<compile_context>
chip_gen: v7x
topology: tpu7x:2x2x1
jax: 0.10.0
libtpu: 0.0.40
codegen_flags: <defaults>
</compile_context>

<pallas_src>
import functools
import math

import jax
import jax.numpy as jnp
from jax import lax
from jax.experimental import pallas as pl
from jax.experimental.pallas import tpu as pltpu


# ----------------------------------------------------------------------------
# Kernel 1: tiled linear  y = x @ W + b  (W pre-transposed to (K, N) in the wrapper)
# Used for the fused QKV projection.  bf16 MXU operands, f32 accumulation.
# ----------------------------------------------------------------------------
def _linear_kernel(x_ref, w_ref, b_ref, o_ref, acc_ref):
    kk = pl.program_id(2)

    @pl.when(kk == 0)
    def _init():
        acc_ref[...] = jnp.zeros_like(acc_ref)

    # Canonical (tm, tk) @ (tk, tn): weight already in (K, N) layout -> no in-kernel transpose.
    acc_ref[...] += jnp.dot(
        x_ref[...].astype(jnp.bfloat16),
        w_ref[...],                                   # already bf16
        preferred_element_type=jnp.float32,
    )

    @pl.when(kk == pl.num_programs(2) - 1)
    def _finalize():
        o_ref[...] = (acc_ref[...] + b_ref[...]).astype(o_ref.dtype)


def _pick_tile(dim, preferred, quantum):
    """Largest multiple of `quantum` that divides `dim` and is <= preferred, else full dim.

    TODO(synk): for shapes with no nice divisor (e.g. ViT N=197) use pl.cdiv grids with
    edge masking / padding instead of falling back to the full dimension.
    """
    t = min(preferred, dim)
    t = (t // quantum) * quantum
    while t >= quantum:
        if dim % t == 0:
            return t
        t -= quantum
    return dim


def pallas_linear(x2d, w_kn, b, out_dtype, *, tm=256, tn=256, tk=256):
    m, kdim = x2d.shape
    kdim2, nout = w_kn.shape
    assert kdim == kdim2
    tm = _pick_tile(m, tm, 8)
    tn = _pick_tile(nout, tn, 128)
    tk = _pick_tile(kdim, tk, 128)
    grid = (m // tm, nout // tn, kdim // tk)
    return pl.pallas_call(
        _linear_kernel,
        out_shape=jax.ShapeDtypeStruct((m, nout), out_dtype),
        grid_spec=pltpu.PrefetchScalarGridSpec(
            num_scalar_prefetch=0,
            grid=grid,
            in_specs=[
                pl.BlockSpec((tm, tk), lambda i, j, kk: (i, kk)),
                pl.BlockSpec((tk, tn), lambda i, j, kk: (kk, j)),
                pl.BlockSpec((1, tn), lambda i, j, kk: (0, j)),
            ],
            out_specs=pl.BlockSpec((tm, tn), lambda i, j, kk: (i, j)),
            scratch_shapes=[pltpu.VMEM((tm, tn), jnp.float32)],
        ),
        compiler_params=pltpu.CompilerParams(
            dimension_semantics=("parallel", "parallel", "arbitrary"),
            vmem_limit_bytes=32 * 1024 * 1024,
        ),
    )(x2d, w_kn, b.reshape(1, nout))


# ----------------------------------------------------------------------------
# Kernel 2: fused attention + head-merge + output projection.
#   grid = (batch, head_group); the head-group axis reduces into an (N, E) accumulator.
#   Per head: streamed softmax (one (N,N) live tile), context packed into a lane-dense
#   (N, G*D) scratch, then ONE (N, G*D) @ (G*D, E) projection matmul per group.
# ----------------------------------------------------------------------------
def _attn_proj_kernel(q_ref, k_ref, v_ref, wp_ref, bp_ref, o_ref, ctx_ref, acc_ref,
                      *, g_block, head_dim):
    hgi = pl.program_id(1)
    gd = g_block * head_dim

    @pl.when(hgi == 0)
    def _init():
        acc_ref[...] = jnp.zeros_like(acc_ref)

    qblk = q_ref[0, 0]          # (N, G*D) bf16; 1/sqrt(d) already folded into Wq/bq
    kblk = k_ref[0, 0]
    vblk = v_ref[0, 0]

    # Streamed per-head softmax: live set is one (N, N) f32 score tile at a time.
    for g in range(g_block):                       # small static unroll (G <= 8)
        lo = g * head_dim
        q = qblk[:, lo:lo + head_dim]              # (N, D) bf16, static lane slice
        k = kblk[:, lo:lo + head_dim]
        v = vblk[:, lo:lo + head_dim]
        s = lax.dot_general(q, k, (((1,), (1,)), ((), ())),
                            preferred_element_type=jnp.float32)   # (N, N) f32
        mx = jnp.max(s, axis=-1, keepdims=True)
        p = jnp.exp(s - mx)                                        # f32 (v5e: no bf16 EUP)
        denom = jnp.sum(p, axis=-1, keepdims=True)
        ctx = jnp.dot(p.astype(jnp.bfloat16), v,
                      preferred_element_type=jnp.float32)          # (N, D) f32
        # Normalize the (N, D) context (not the (N, N) scores); EUP reciprocal is ~free.
        ctx_ref[:, lo:lo + head_dim] = ctx * pl.reciprocal(denom, approx=True)

    # Fused head-merge + projection: one full-depth (N, G*D) @ (G*D, E) matmul.
    start = pl.multiple_of(hgi * gd, gd)
    wp_blk = wp_ref[pl.ds(start, gd), :]           # (G*D, E), weight resident in VMEM
    acc_ref[...] += jnp.dot(ctx_ref[...].astype(jnp.bfloat16), wp_blk,
                            preferred_element_type=jnp.float32)

    @pl.when(hgi == pl.num_programs(1) - 1)
    def _finalize():
        o_ref[0] = (acc_ref[...] + bp_ref[...]).astype(o_ref.dtype)


def pallas_attention_projection(qh, kh, vh, wp_t, bp, *, g_block, head_dim, out_dtype):
    b, n_groups, n, gd = qh.shape
    e = wp_t.shape[-1]
    qkv_spec = pl.BlockSpec((1, 1, n, gd), lambda bi, hgi: (bi, hgi, 0, 0))
    return pl.pallas_call(
        functools.partial(_attn_proj_kernel, g_block=g_block, head_dim=head_dim),
        out_shape=jax.ShapeDtypeStruct((b, n, e), out_dtype),
        grid_spec=pltpu.PrefetchScalarGridSpec(
            num_scalar_prefetch=0,
            grid=(b, n_groups),
            in_specs=[
                qkv_spec,
                qkv_spec,
                qkv_spec,
                pl.BlockSpec((e, e), lambda bi, hgi: (0, 0)),    # Wp^T resident (one DMA)
                pl.BlockSpec((1, e), lambda bi, hgi: (0, 0)),    # bias resident
            ],
            out_specs=pl.BlockSpec((1, n, e), lambda bi, hgi: (bi, 0, 0)),
            scratch_shapes=[pltpu.VMEM((n, gd), jnp.float32),    # packed per-head contexts
                            pltpu.VMEM((n, e), jnp.float32)],    # output accumulator
        ),
        compiler_params=pltpu.CompilerParams(
            dimension_semantics=("parallel", "arbitrary"),
            vmem_limit_bytes=32 * 1024 * 1024,
        ),
    )(qh, kh, vh, wp_t, bp)


# ----------------------------------------------------------------------------
# Parameter pre-packing (done ONCE, outside the jitted forward)
# ----------------------------------------------------------------------------
def prepare_params(params, num_heads):
    e = params["wq"].shape[0]
    d = e // num_heads
    scale = 1.0 / math.sqrt(d)
    # Fold the softmax scale into the Q projection (weights + bias).
    wq = params["wq"] * scale
    bq = params["bq"] * scale
    # Fused QKV weight, pre-transposed to canonical (K, N) layout, bf16 once.
    w_qkv = jnp.concatenate([wq, params["wk"], params["wv"]], axis=0).T.astype(jnp.bfloat16)
    b_qkv = jnp.concatenate([bq, params["bk"], params["bv"]], axis=0).astype(jnp.float32)
    # Output projection: Wp^T so ctx (head-major features) @ Wp^T; bf16 once.
    wp_t = params["wp"].T.astype(jnp.bfloat16)
    bp = params["bp"].astype(jnp.float32).reshape(1, e)
    return {"w_qkv": w_qkv, "b_qkv": b_qkv, "wp_t": wp_t, "bp": bp}


# ----------------------------------------------------------------------------
# Full forward pass
# ----------------------------------------------------------------------------
@functools.partial(jax.jit, static_argnames=("num_heads",))
def mha_forward(x, prepped, num_heads):
    b, n, e = x.shape
    d = e // num_heads
    m = b * n

    # Fused QKV projection (x read from HBM once, bf16 intermediate).
    qkv = pallas_linear(x.reshape(m, e), prepped["w_qkv"], prepped["b_qkv"],
                        out_dtype=jnp.bfloat16)                          # (M, 3E)

    # Head-group size: target G*D = 256 (MXU contraction depth on v6e/v7x).
    g_block = max(1, min(num_heads, max(1, 256 // d)))
    while num_heads % g_block:
        g_block -= 1
    n_groups = num_heads // g_block

    def regroup(z2d):
        # Exact PyTorch semantics: reshape (b*n, e) -> (b, h, n, d) WITHOUT head transpose,
        # then pack each group of G heads onto the lane axis: (b, h/G, n, G*d) lane-dense.
        z = z2d.reshape(b, num_heads, n, d)
        z = z.reshape(b, n_groups, g_block, n, d)
        z = jnp.transpose(z, (0, 1, 3, 2, 4))
        return z.reshape(b, n_groups, n, g_block * d)

    qh = regroup(qkv[:, :e])
    kh = regroup(qkv[:, e:2 * e])
    vh = regroup(qkv[:, 2 * e:])

    # Fused attention + transpose(1,2) + flatten + projection (no extra HBM round trip).
    return pallas_attention_projection(qh, kh, vh, prepped["wp_t"], prepped["bp"],
                                       g_block=g_block, head_dim=d, out_dtype=x.dtype)


# ----------------------------------------------------------------------------
# Pure-JAX reference (mirrors the PyTorch forward, f32) for correctness checking
# ----------------------------------------------------------------------------
def reference_mha(x, params, num_heads):
    b, n, e = x.shape
    d = e // num_heads
    lin = lambda xx, w, bb: xx @ w.T + bb
    Q = lin(x, params["wq"], params["bq"]).reshape(b, num_heads, n, d)
    K = lin(x, params["wk"], params["bk"]).reshape(b, num_heads, n, d)
    V = lin(x, params["wv"], params["bv"]).reshape(b, num_heads, n, d)
    att = jnp.einsum("bhqd,bhkd->bhqk", Q, K) / jnp.sqrt(jnp.float32(d))
    att = jax.nn.softmax(att, axis=3)
    out = jnp.einsum("bhal,bhlv->bhav", att, V)
    out = jnp.transpose(out, (0, 2, 1, 3)).reshape(b, n, e)
    return lin(out, params["wp"], params["bp"])


if __name__ == "__main__":
    # Small but TPU-friendly shapes consistent with the module (E = H * D).
    B, N, EMB, HEADS = 2, 128, 256, 8

    key = jax.random.PRNGKey(0)
    ks = jax.random.split(key, 9)
    init = lambda kk, shape: (0.02 * jax.random.normal(kk, shape)).astype(jnp.float32)

    params = {
        "wq": init(ks[0], (EMB, EMB)), "bq": init(ks[1], (EMB,)),
        "wk": init(ks[2], (EMB, EMB)), "bk": init(ks[3], (EMB,)),
        "wv": init(ks[4], (EMB, EMB)), "bv": init(ks[5], (EMB,)),
        "wp": init(ks[6], (EMB, EMB)), "bp": init(ks[7], (EMB,)),
    }
    x = jax.random.normal(ks[8], (B, N, EMB), dtype=jnp.float32)

    # Pre-pack parameters once (weight concat/transpose/bf16 cast hoisted out of the forward).
    prepped = jax.block_until_ready(prepare_params(params, HEADS))

    out = jax.block_until_ready(mha_forward(x, prepped, HEADS))
    ref = reference_mha(x, params, HEADS)

    assert out.shape == (B, N, EMB)
    # Tolerance accounts for bf16 MXU operands (f32 accumulation) and the approximate
    # EUP reciprocal in the softmax normalization; estimated error is ~1e-3 absolute.
    assert jnp.allclose(out, ref, atol=1e-2, rtol=1e-2), "mismatch vs reference"

    print("KERNEL_OK")
</pallas_src>

<mosaic_0001>
module attributes {stable_mosaic.version = 11 : i64} {
  func.func @_linear_kernel(%arg0: i32, %arg1: i32, %arg2: i32, %arg3: memref<256x256xf32, #tpu.memory_space<vmem>>, %arg4: memref<256x256xbf16, #tpu.memory_space<vmem>>, %arg5: memref<1x256xf32, #tpu.memory_space<vmem>>, %arg6: memref<256x256xbf16, #tpu.memory_space<vmem>>, %arg7: memref<256x256xf32, #tpu.memory_space<vmem>>) attributes {dimension_semantics = [#tpu.dimension_semantics<parallel>, #tpu.dimension_semantics<parallel>, #tpu.dimension_semantics<arbitrary>], iteration_bounds = array<i64: 1, 3, 1>, scalar_prefetch = 0 : i64, scratch_operands = 1 : i64, tpu.core_type = #tpu.core_type<tc>, window_params = [{transform_indices = @transform_0, window_bounds = array<i64: 256, 256>}, {transform_indices = @transform_1, window_bounds = array<i64: 256, 256>}, {transform_indices = @transform_2, window_bounds = array<i64: 1, 256>}, {transform_indices = @transform_3, window_bounds = array<i64: 256, 256>}]} {
    %c0_i32 = arith.constant 0 : i32
    %0 = arith.cmpi eq, %arg2, %c0_i32 : i32
    %1 = arith.extui %0 : i1 to i32
    %c0_i32_0 = arith.constant 0 : i32
    %2 = arith.cmpi ne, %1, %c0_i32_0 : i32
    scf.if %2 {
      %cst_10 = arith.constant 0.000000e+00 : f32
      %13 = vector.broadcast %cst_10 : f32 to vector<256x256xf32>
      %c0_11 = arith.constant 0 : index
      %c0_12 = arith.constant 0 : index
      %14 = vector.load %arg7[%c0_11, %c0_12] : memref<256x256xf32, #tpu.memory_space<vmem>>, vector<256x256xf32>
      tpu.vector_store %arg7[%c0_11, %c0_12], %13 {strides = array<i32>} : memref<256x256xf32, #tpu.memory_space<vmem>>, vector<256x256xf32>,
    } else {
    }
    %c0 = arith.constant 0 : index
    %c0_1 = arith.constant 0 : index
    %3 = vector.load %arg7[%c0, %c0_1] : memref<256x256xf32, #tpu.memory_space<vmem>>, vector<256x256xf32>
    %c0_2 = arith.constant 0 : index
    %c0_3 = arith.constant 0 : index
    %4 = vector.load %arg3[%c0_2, %c0_3] : memref<256x256xf32, #tpu.memory_space<vmem>>, vector<256x256xf32>
    %5 = arith.truncf %4 : vector<256x256xf32> to vector<256x256xbf16>
    %c0_4 = arith.constant 0 : index
    %c0_5 = arith.constant 0 : index
    %6 = vector.load %arg4[%c0_4, %c0_5] : memref<256x256xbf16, #tpu.memory_space<vmem>>, vector<256x256xbf16>
    %cst = arith.constant dense<0.000000e+00> : vector<256x256xf32>
    %7 = tpu.matmul %5, %6, %cst {dimension_numbers = #tpu.dot_dimension_numbers<[1], [0], [0], [1], [0, 0, 1, 1], [], []>} : vector<256x256xbf16>, vector<256x256xbf16>, vector<256x256xf32> -> vector<256x256xf32>
    %8 = arith.addf %3, %7 : vector<256x256xf32>
    %c0_6 = arith.constant 0 : index
    %c0_7 = arith.constant 0 : index
    %9 = vector.load %arg7[%c0_6, %c0_7] : memref<256x256xf32, #tpu.memory_space<vmem>>, vector<256x256xf32>
    tpu.vector_store %arg7[%c0_6, %c0_7], %8 {strides = array<i32>} : memref<256x256xf32, #tpu.memory_space<vmem>>, vector<256x256xf32>,
    %c0_i32_8 = arith.constant 0 : i32
    %10 = arith.cmpi eq, %arg2, %c0_i32_8 : i32
    %11 = arith.extui %10 : i1 to i32
    %c0_i32_9 = arith.constant 0 : i32
    %12 = arith.cmpi ne, %11, %c0_i32_9 : i32
    scf.if %12 {
      %c0_10 = arith.constant 0 : index
      %c0_11 = arith.constant 0 : index
      %13 = vector.load %arg7[%c0_10, %c0_11] : memref<256x256xf32, #tpu.memory_space<vmem>>, vector<256x256xf32>
      %c0_12 = arith.constant 0 : index
      %c0_13 = arith.constant 0 : index
      %14 = vector.load %arg5[%c0_12, %c0_13] : memref<1x256xf32, #tpu.memory_space<vmem>>, vector<1x256xf32>
      %15 = vector.broadcast %14 : vector<1x256xf32> to vector<256x256xf32>
      %16 = arith.addf %13, %15 : vector<256x256xf32>
      %17 = arith.truncf %16 : vector<256x256xf32> to vector<256x256xbf16>
      %c0_14 = arith.constant 0 : index
      %c0_15 = arith.constant 0 : index
      %18 = vector.load %arg6[%c0_14, %c0_15] : memref<256x256xbf16, #tpu.memory_space<vmem>>, vector<256x256xbf16>
      tpu.vector_store %arg6[%c0_14, %c0_15], %17 {strides = array<i32>} : memref<256x256xbf16, #tpu.memory_space<vmem>>, vector<256x256xbf16>,
    } else {
    }
    return
  }
  func.func @transform_0(%arg0: i32, %arg1: i32, %arg2: i32) -> (i32, i32) {
    %c0_i32 = arith.constant 0 : i32
    return %arg0, %arg2 : i32, i32
  }
  func.func @transform_1(%arg0: i32, %arg1: i32, %arg2: i32) -> (i32, i32) {
    %c0_i32 = arith.constant 0 : i32
    return %arg2, %arg1 : i32, i32
  }
  func.func @transform_2(%arg0: i32, %arg1: i32, %arg2: i32) -> (i32, i32) {
    %c0_i32 = arith.constant 0 : i32
    %c0_i32_0 = arith.constant 0 : i32
    return %c0_i32, %arg1 : i32, i32
  }
  func.func @transform_3(%arg0: i32, %arg1: i32, %arg2: i32) -> (i32, i32) {
    %c0_i32 = arith.constant 0 : i32
    return %arg0, %arg1 : i32, i32
  }
}

module attributes {stable_mosaic.version = 11 : i64} {
  func.func @_attn_proj_kernel(%arg0: i32, %arg1: i32, %arg2: memref<1x1x128x256xbf16, #tpu.memory_space<vmem>>, %arg3: memref<1x1x128x256xbf16, #tpu.memory_space<vmem>>, %arg4: memref<1x1x128x256xbf16, #tpu.memory_space<vmem>>, %arg5: memref<256x256xbf16, #tpu.memory_space<vmem>>, %arg6: memref<1x256xf32, #tpu.memory_space<vmem>>, %arg7: memref<1x128x256xf32, #tpu.memory_space<vmem>>, %arg8: memref<128x256xf32, #tpu.memory_space<vmem>>, %arg9: memref<128x256xf32, #tpu.memory_space<vmem>>) attributes {dimension_semantics = [#tpu.dimension_semantics<parallel>, #tpu.dimension_semantics<arbitrary>], iteration_bounds = array<i64: 2, 1>, scalar_prefetch = 0 : i64, scratch_operands = 2 : i64, tpu.core_type = #tpu.core_type<tc>, window_params = [{transform_indices = @transform_0, window_bounds = array<i64: 1, 1, 128, 256>}, {transform_indices = @transform_1, window_bounds = array<i64: 1, 1, 128, 256>}, {transform_indices = @transform_2, window_bounds = array<i64: 1, 1, 128, 256>}, {pipeline_mode = #tpu.pipeline_mode<synchronous>, transform_indices = @transform_3, window_bounds = array<i64: 256, 256>}, {pipeline_mode = #tpu.pipeline_mode<synchronous>, transform_indices = @transform_4, window_bounds = array<i64: 1, 256>}, {transform_indices = @transform_5, window_bounds = array<i64: 1, 128, 256>}]} {
    %c0_i32 = arith.constant 0 : i32
    %0 = arith.cmpi eq, %arg1, %c0_i32 : i32
    %1 = arith.extui %0 : i1 to i32
    %c0_i32_0 = arith.constant 0 : i32
    %2 = arith.cmpi ne, %1, %c0_i32_0 : i32
    scf.if %2 {
      %cst_62 = arith.constant 0.000000e+00 : f32
      %158 = vector.broadcast %cst_62 : f32 to vector<128x256xf32>
      %c0_63 = arith.constant 0 : index
      %c0_64 = arith.constant 0 : index
      %159 = vector.load %arg9[%c0_63, %c0_64] : memref<128x256xf32, #tpu.memory_space<vmem>>, vector<128x256xf32>
      tpu.vector_store %arg9[%c0_63, %c0_64], %158 {strides = array<i32>} : memref<128x256xf32, #tpu.memory_space<vmem>>, vector<128x256xf32>,
    } else {
    }
    %c0 = arith.constant 0 : index
    %c0_1 = arith.constant 0 : index
    %c0_2 = arith.constant 0 : index
    %c0_3 = arith.constant 0 : index
    %3 = vector.load %arg2[%c0, %c0_1, %c0_2, %c0_3] : memref<1x1x128x256xbf16, #tpu.memory_space<vmem>>, vector<1x1x128x256xbf16>
    %4 = vector.shape_cast %3 : vector<1x1x128x256xbf16> to vector<128x256xbf16>
    %c0_4 = arith.constant 0 : index
    %c0_5 = arith.constant 0 : index
    %c0_6 = arith.constant 0 : index
    %c0_7 = arith.constant 0 : index
    %5 = vector.load %arg3[%c0_4, %c0_5, %c0_6, %c0_7] : memref<1x1x128x256xbf16, #tpu.memory_space<vmem>>, vector<1x1x128x256xbf16>
    %6 = vector.shape_cast %5 : vector<1x1x128x256xbf16> to vector<128x256xbf16>
    %c0_8 = arith.constant 0 : index
    %c0_9 = arith.constant 0 : index
    %c0_10 = arith.constant 0 : index
    %c0_11 = arith.constant 0 : index
    %7 = vector.load %arg4[%c0_8, %c0_9, %c0_10, %c0_11] : memref<1x1x128x256xbf16, #tpu.memory_space<vmem>>, vector<1x1x128x256xbf16>
    %8 = vector.shape_cast %7 : vector<1x1x128x256xbf16> to vector<128x256xbf16>
    %9 = vector.extract_strided_slice %4 {offsets = [0, 0], sizes = [128, 32], strides = [1, 1]} : vector<128x256xbf16> to vector<128x32xbf16>
    %10 = vector.extract_strided_slice %6 {offsets = [0, 0], sizes = [128, 32], strides = [1, 1]} : vector<128x256xbf16> to vector<128x32xbf16>
    %11 = vector.extract_strided_slice %8 {offsets = [0, 0], sizes = [128, 32], strides = [1, 1]} : vector<128x256xbf16> to vector<128x32xbf16>
    %cst = arith.constant dense<0.000000e+00> : vector<128x128xf32>
    %12 = tpu.matmul %9, %10, %cst {dimension_numbers = #tpu.dot_dimension_numbers<[1], [1], [0], [0], [0, 0, 1, 0], [], []>} : vector<128x32xbf16>, vector<128x32xbf16>, vector<128x128xf32> -> vector<128x128xf32>
    %cst_12 = arith.constant dense<0xFF800000> : vector<128xf32>
    %13 = vector.multi_reduction <maximumf>, %12, %cst_12 [1] : vector<128x128xf32> to vector<128xf32>
    %14 = vector.shape_cast %13 : vector<128xf32> to vector<128x1xf32>
    %15 = vector.broadcast %14 : vector<128x1xf32> to vector<128x128xf32>
    %16 = arith.subf %12, %15 : vector<128x128xf32>
    %17 = math.exp %16 : vector<128x128xf32>
    %cst_13 = arith.constant dense<0.000000e+00> : vector<128xf32>
    %18 = vector.multi_reduction <add>, %17, %cst_13 [1] : vector<128x128xf32> to vector<128xf32>
    %19 = vector.shape_cast %18 : vector<128xf32> to vector<128x1xf32>
    %20 = arith.truncf %17 : vector<128x128xf32> to vector<128x128xbf16>
    %cst_14 = arith.constant dense<0.000000e+00> : vector<128x32xf32>
    %21 = tpu.matmul %20, %11, %cst_14 {dimension_numbers = #tpu.dot_dimension_numbers<[1], [0], [0], [1], [0, 0, 1, 1], [], []>} : vector<128x128xbf16>, vector<128x32xbf16>, vector<128x32xf32> -> vector<128x32xf32>
    %22 = tpu.reciprocal %19 {approx = true} : vector<128x1xf32> -> vector<128x1xf32>
    %23 = vector.broadcast %22 : vector<128x1xf32> to vector<128x32xf32>
    %24 = arith.mulf %21, %23 : vector<128x32xf32>
    %c0_15 = arith.constant 0 : index
    %c0_16 = arith.constant 0 : index
    %25 = vector.load %arg8[%c0_15, %c0_16] : memref<128x256xf32, #tpu.memory_space<vmem>>, vector<128x32xf32>
    tpu.vector_store %arg8[%c0_15, %c0_16], %24 {strides = array<i32>} : memref<128x256xf32, #tpu.memory_space<vmem>>, vector<128x32xf32>,
    %26 = vector.extract_strided_slice %4 {offsets = [0, 32], sizes = [128, 32], strides = [1, 1]} : vector<128x256xbf16> to vector<128x32xbf16>
    %27 = vector.extract_strided_slice %6 {offsets = [0, 32], sizes = [128, 32], strides = [1, 1]} : vector<128x256xbf16> to vector<128x32xbf16>
    %28 = vector.extract_strided_slice %8 {offsets = [0, 32], sizes = [128, 32], strides = [1, 1]} : vector<128x256xbf16> to vector<128x32xbf16>
    %cst_17 = arith.constant dense<0.000000e+00> : vector<128x128xf32>
    %29 = tpu.matmul %26, %27, %cst_17 {dimension_numbers = #tpu.dot_dimension_numbers<[1], [1], [0], [0], [0, 0, 1, 0], [], []>} : vector<128x32xbf16>, vector<128x32xbf16>, vector<128x128xf32> -> vector<128x128xf32>
    %cst_18 = arith.constant dense<0xFF800000> : vector<128xf32>
    %30 = vector.multi_reduction <maximumf>, %29, %cst_18 [1] : vector<128x128xf32> to vector<128xf32>
    %31 = vector.shape_cast %30 : vector<128xf32> to vector<128x1xf32>
    %32 = vector.broadcast %31 : vector<128x1xf32> to vector<128x128xf32>
    %33 = arith.subf %29, %32 : vector<128x128xf32>
    %34 = math.exp %33 : vector<128x128xf32>
    %cst_19 = arith.constant dense<0.000000e+00> : vector<128xf32>
    %35 = vector.multi_reduction <add>, %34, %cst_19 [1] : vector<128x128xf32> to vector<128xf32>
    %36 = vector.shape_cast %35 : vector<128xf32> to vector<128x1xf32>
    %37 = arith.truncf %34 : vector<128x128xf32> to vector<128x128xbf16>
    %cst_20 = arith.constant dense<0.000000e+00> : vector<128x32xf32>
    %38 = tpu.matmul %37, %28, %cst_20 {dimension_numbers = #tpu.dot_dimension_numbers<[1], [0], [0], [1], [0, 0, 1, 1], [], []>} : vector<128x128xbf16>, vector<128x32xbf16>, vector<128x32xf32> -> vector<128x32xf32>
    %39 = tpu.reciprocal %36 {approx = true} : vector<128x1xf32> -> vector<128x1xf32>
    %40 = vector.broadcast %39 : vector<128x1xf32> to vector<128x32xf32>
    %41 = arith.mulf %38, %40 : vector<128x32xf32>
    %c0_21 = arith.constant 0 : index
    %c32 = arith.constant 32 : index
    %42 = vector.load %arg8[%c0_21, %c32] : memref<128x256xf32, #tpu.memory_space<vmem>>, vector<128x32xf32>
    tpu.vector_store %arg8[%c0_21, %c32], %41 {strides = array<i32>} : memref<128x256xf32, #tpu.memory_space<vmem>>, vector<128x32xf32>,
    %43 = vector.extract_strided_slice %4 {offsets = [0, 64], sizes = [128, 32], strides = [1, 1]} : vector<128x256xbf16> to vector<128x32xbf16>
    %44 = vector.extract_strided_slice %6 {offsets = [0, 64], sizes = [128, 32], strides = [1, 1]} : vector<128x256xbf16> to vector<128x32xbf16>
    %45 = vector.extract_strided_slice %8 {offsets = [0, 64], sizes = [128, 32], strides = [1, 1]} : vector<128x256xbf16> to vector<128x32xbf16>
    %cst_22 = arith.constant dense<0.000000e+00> : vector<128x128xf32>
    %46 = tpu.matmul %43, %44, %cst_22 {dimension_numbers = #tpu.dot_dimension_numbers<[1], [1], [0], [0], [0, 0, 1, 0], [], []>} : vector<128x32xbf16>, vector<128x32xbf16>, vector<128x128xf32> -> vector<128x128xf32>
    %cst_23 = arith.constant dense<0xFF800000> : vector<128xf32>
    %47 = vector.multi_reduction <maximumf>, %46, %cst_23 [1] : vector<128x128xf32> to vector<128xf32>
    %48 = vector.shape_cast %47 : vector<128xf32> to vector<128x1xf32>
    %49 = vector.broadcast %48 : vector<128x1xf32> to vector<128x128xf32>
    %50 = arith.subf %46, %49 : vector<128x128xf32>
    %51 = math.exp %50 : vector<128x128xf32>
    %cst_24 = arith.constant dense<0.000000e+00> : vector<128xf32>
    %52 = vector.multi_reduction <add>, %51, %cst_24 [1] : vector<128x128xf32> to vector<128xf32>
    %53 = vector.shape_cast %52 : vector<128xf32> to vector<128x1xf32>
    %54 = arith.truncf %51 : vector<128x128xf32> to vector<128x128xbf16>
    %cst_25 = arith.constant dense<0.000000e+00> : vector<128x32xf32>
    %55 = tpu.matmul %54, %45, %cst_25 {dimension_numbers = #tpu.dot_dimension_numbers<[1], [0], [0], [1], [0, 0, 1, 1], [], []>} : vector<128x128xbf16>, vector<128x32xbf16>, vector<128x32xf32> -> vector<128x32xf32>
    %56 = tpu.reciprocal %53 {approx = true} : vector<128x1xf32> -> vector<128x1xf32>
    %57 = vector.broadcast %56 : vector<128x1xf32> to vector<128x32xf32>
    %58 = arith.mulf %55, %57 : vector<128x32xf32>
    %c0_26 = arith.constant 0 : index
    %c64 = arith.constant 64 : index
    %59 = vector.load %arg8[%c0_26, %c64] : memref<128x256xf32, #tpu.memory_space<vmem>>, vector<128x32xf32>
    tpu.vector_store %arg8[%c0_26, %c64], %58 {strides = array<i32>} : memref<128x256xf32, #tpu.memory_space<vmem>>, vector<128x32xf32>,
    %60 = vector.extract_strided_slice %4 {offsets = [0, 96], sizes = [128, 32], strides = [1, 1]} : vector<128x256xbf16> to vector<128x32xbf16>
    %61 = vector.extract_strided_slice %6 {offsets = [0, 96], sizes = [128, 32], strides = [1, 1]} : vector<128x256xbf16> to vector<128x32xbf16>
    %62 = vector.extract_strided_slice %8 {offsets = [0, 96], sizes = [128, 32], strides = [1, 1]} : vector<128x256xbf16> to vector<128x32xbf16>
    %cst_27 = arith.constant dense<0.000000e+00> : vector<128x128xf32>
    %63 = tpu.matmul %60, %61, %cst_27 {dimension_numbers = #tpu.dot_dimension_numbers<[1], [1], [0], [0], [0, 0, 1, 0], [], []>} : vector<128x32xbf16>, vector<128x32xbf16>, vector<128x128xf32> -> vector<128x128xf32>
    %cst_28 = arith.constant dense<0xFF800000> : vector<128xf32>
    %64 = vector.multi_reduction <maximumf>, %63, %cst_28 [1] : vector<128x128xf32> to vector<128xf32>
    %65 = vector.shape_cast %64 : vector<128xf32> to vector<128x1xf32>
    %66 = vector.broadcast %65 : vector<128x1xf32> to vector<128x128xf32>
    %67 = arith.subf %63, %66 : vector<128x128xf32>
    %68 = math.exp %67 : vector<128x128xf32>
    %cst_29 = arith.constant dense<0.000000e+00> : vector<128xf32>
    %69 = vector.multi_reduction <add>, %68, %cst_29 [1] : vector<128x128xf32> to vector<128xf32>
    %70 = vector.shape_cast %69 : vector<128xf32> to vector<128x1xf32>
    %71 = arith.truncf %68 : vector<128x128xf32> to vector<128x128xbf16>
    %cst_30 = arith.constant dense<0.000000e+00> : vector<128x32xf32>
    %72 = tpu.matmul %71, %62, %cst_30 {dimension_numbers = #tpu.dot_dimension_numbers<[1], [0], [0], [1], [0, 0, 1, 1], [], []>} : vector<128x128xbf16>, vector<128x32xbf16>, vector<128x32xf32> -> vector<128x32xf32>
    %73 = tpu.reciprocal %70 {approx = true} : vector<128x1xf32> -> vector<128x1xf32>
    %74 = vector.broadcast %73 : vector<128x1xf32> to vector<128x32xf32>
    %75 = arith.mulf %72, %74 : vector<128x32xf32>
    %c0_31 = arith.constant 0 : index
    %c96 = arith.constant 96 : index
    %76 = vector.load %arg8[%c0_31, %c96] : memref<128x256xf32, #tpu.memory_space<vmem>>, vector<128x32xf32>
    tpu.vector_store %arg8[%c0_31, %c96], %75 {strides = array<i32>} : memref<128x256xf32, #tpu.memory_space<vmem>>, vector<128x32xf32>,
    %77 = vector.extract_strided_slice %4 {offsets = [0, 128], sizes = [128, 32], strides = [1, 1]} : vector<128x256xbf16> to vector<128x32xbf16>
    %78 = vector.extract_strided_slice %6 {offsets = [0, 128], sizes = [128, 32], strides = [1, 1]} : vector<128x256xbf16> to vector<128x32xbf16>
    %79 = vector.extract_strided_slice %8 {offsets = [0, 128], sizes = [128, 32], strides = [1, 1]} : vector<128x256xbf16> to vector<128x32xbf16>
    %cst_32 = arith.constant dense<0.000000e+00> : vector<128x128xf32>
    %80 = tpu.matmul %77, %78, %cst_32 {dimension_numbers = #tpu.dot_dimension_numbers<[1], [1], [0], [0], [0, 0, 1, 0], [], []>} : vector<128x32xbf16>, vector<128x32xbf16>, vector<128x128xf32> -> vector<128x128xf32>
    %cst_33 = arith.constant dense<0xFF800000> : vector<128xf32>
    %81 = vector.multi_reduction <maximumf>, %80, %cst_33 [1] : vector<128x128xf32> to vector<128xf32>
    %82 = vector.shape_cast %81 : vector<128xf32> to vector<128x1xf32>
    %83 = vector.broadcast %82 : vector<128x1xf32> to vector<128x128xf32>
    %84 = arith.subf %80, %83 : vector<128x128xf32>
    %85 = math.exp %84 : vector<128x128xf32>
    %cst_34 = arith.constant dense<0.000000e+00> : vector<128xf32>
    %86 = vector.multi_reduction <add>, %85, %cst_34 [1] : vector<128x128xf32> to vector<128xf32>
    %87 = vector.shape_cast %86 : vector<128xf32> to vector<128x1xf32>
    %88 = arith.truncf %85 : vector<128x128xf32> to vector<128x128xbf16>
    %cst_35 = arith.constant dense<0.000000e+00> : vector<128x32xf32>
    %89 = tpu.matmul %88, %79, %cst_35 {dimension_numbers = #tpu.dot_dimension_numbers<[1], [0], [0], [1], [0, 0, 1, 1], [], []>} : vector<128x128xbf16>, vector<128x32xbf16>, vector<128x32xf32> -> vector<128x32xf32>
    %90 = tpu.reciprocal %87 {approx = true} : vector<128x1xf32> -> vector<128x1xf32>
    %91 = vector.broadcast %90 : vector<128x1xf32> to vector<128x32xf32>
    %92 = arith.mulf %89, %91 : vector<128x32xf32>
    %c0_36 = arith.constant 0 : index
    %c128 = arith.constant 128 : index
    %93 = vector.load %arg8[%c0_36, %c128] : memref<128x256xf32, #tpu.memory_space<vmem>>, vector<128x32xf32>
    tpu.vector_store %arg8[%c0_36, %c128], %92 {strides = array<i32>} : memref<128x256xf32, #tpu.memory_space<vmem>>, vector<128x32xf32>,
    %94 = vector.extract_strided_slice %4 {offsets = [0, 160], sizes = [128, 32], strides = [1, 1]} : vector<128x256xbf16> to vector<128x32xbf16>
    %95 = vector.extract_strided_slice %6 {offsets = [0, 160], sizes = [128, 32], strides = [1, 1]} : vector<128x256xbf16> to vector<128x32xbf16>
    %96 = vector.extract_strided_slice %8 {offsets = [0, 160], sizes = [128, 32], strides = [1, 1]} : vector<128x256xbf16> to vector<128x32xbf16>
    %cst_37 = arith.constant dense<0.000000e+00> : vector<128x128xf32>
    %97 = tpu.matmul %94, %95, %cst_37 {dimension_numbers = #tpu.dot_dimension_numbers<[1], [1], [0], [0], [0, 0, 1, 0], [], []>} : vector<128x32xbf16>, vector<128x32xbf16>, vector<128x128xf32> -> vector<128x128xf32>
    %cst_38 = arith.constant dense<0xFF800000> : vector<128xf32>
    %98 = vector.multi_reduction <maximumf>, %97, %cst_38 [1] : vector<128x128xf32> to vector<128xf32>
    %99 = vector.shape_cast %98 : vector<128xf32> to vector<128x1xf32>
    %100 = vector.broadcast %99 : vector<128x1xf32> to vector<128x128xf32>
    %101 = arith.subf %97, %100 : vector<128x128xf32>
    %102 = math.exp %101 : vector<128x128xf32>
    %cst_39 = arith.constant dense<0.000000e+00> : vector<128xf32>
    %103 = vector.multi_reduction <add>, %102, %cst_39 [1] : vector<128x128xf32> to vector<128xf32>
    %104 = vector.shape_cast %103 : vector<128xf32> to vector<128x1xf32>
    %105 = arith.truncf %102 : vector<128x128xf32> to vector<128x128xbf16>
    %cst_40 = arith.constant dense<0.000000e+00> : vector<128x32xf32>
    %106 = tpu.matmul %105, %96, %cst_40 {dimension_numbers = #tpu.dot_dimension_numbers<[1], [0], [0], [1], [0, 0, 1, 1], [], []>} : vector<128x128xbf16>, vector<128x32xbf16>, vector<128x32xf32> -> vector<128x32xf32>
    %107 = tpu.reciprocal %104 {approx = true} : vector<128x1xf32> -> vector<128x1xf32>
    %108 = vector.broadcast %107 : vector<128x1xf32> to vector<128x32xf32>
    %109 = arith.mulf %106, %108 : vector<128x32xf32>
    %c0_41 = arith.constant 0 : index
    %c160 = arith.constant 160 : index
    %110 = vector.load %arg8[%c0_41, %c160] : memref<128x256xf32, #tpu.memory_space<vmem>>, vector<128x32xf32>
    tpu.vector_store %arg8[%c0_41, %c160], %109 {strides = array<i32>} : memref<128x256xf32, #tpu.memory_space<vmem>>, vector<128x32xf32>,
    %111 = vector.extract_strided_slice %4 {offsets = [0, 192], sizes = [128, 32], strides = [1, 1]} : vector<128x256xbf16> to vector<128x32xbf16>
    %112 = vector.extract_strided_slice %6 {offsets = [0, 192], sizes = [128, 32], strides = [1, 1]} : vector<128x256xbf16> to vector<128x32xbf16>
    %113 = vector.extract_strided_slice %8 {offsets = [0, 192], sizes = [128, 32], strides = [1, 1]} : vector<128x256xbf16> to vector<128x32xbf16>
    %cst_42 = arith.constant dense<0.000000e+00> : vector<128x128xf32>
    %114 = tpu.matmul %111, %112, %cst_42 {dimension_numbers = #tpu.dot_dimension_numbers<[1], [1], [0], [0], [0, 0, 1, 0], [], []>} : vector<128x32xbf16>, vector<128x32xbf16>, vector<128x128xf32> -> vector<128x128xf32>
    %cst_43 = arith.constant dense<0xFF800000> : vector<128xf32>
    %115 = vector.multi_reduction <maximumf>, %114, %cst_43 [1] : vector<128x128xf32> to vector<128xf32>
    %116 = vector.shape_cast %115 : vector<128xf32> to vector<128x1xf32>
    %117 = vector.broadcast %116 : vector<128x1xf32> to vector<128x128xf32>
    %118 = arith.subf %114, %117 : vector<128x128xf32>
    %119 = math.exp %118 : vector<128x128xf32>
    %cst_44 = arith.constant dense<0.000000e+00> : vector<128xf32>
    %120 = vector.multi_reduction <add>, %119, %cst_44 [1] : vector<128x128xf32> to vector<128xf32>
    %121 = vector.shape_cast %120 : vector<128xf32> to vector<128x1xf32>
    %122 = arith.truncf %119 : vector<128x128xf32> to vector<128x128xbf16>
    %cst_45 = arith.constant dense<0.000000e+00> : vector<128x32xf32>
    %123 = tpu.matmul %122, %113, %cst_45 {dimension_numbers = #tpu.dot_dimension_numbers<[1], [0], [0], [1], [0, 0, 1, 1], [], []>} : vector<128x128xbf16>, vector<128x32xbf16>, vector<128x32xf32> -> vector<128x32xf32>
    %124 = tpu.reciprocal %121 {approx = true} : vector<128x1xf32> -> vector<128x1xf32>
    %125 = vector.broadcast %124 : vector<128x1xf32> to vector<128x32xf32>
    %126 = arith.mulf %123, %125 : vector<128x32xf32>
    %c0_46 = arith.constant 0 : index
    %c192 = arith.constant 192 : index
    %127 = vector.load %arg8[%c0_46, %c192] : memref<128x256xf32, #tpu.memory_space<vmem>>, vector<128x32xf32>
    tpu.vector_store %arg8[%c0_46, %c192], %126 {strides = array<i32>} : memref<128x256xf32, #tpu.memory_space<vmem>>, vector<128x32xf32>,
    %128 = vector.extract_strided_slice %4 {offsets = [0, 224], sizes = [128, 32], strides = [1, 1]} : vector<128x256xbf16> to vector<128x32xbf16>
    %129 = vector.extract_strided_slice %6 {offsets = [0, 224], sizes = [128, 32], strides = [1, 1]} : vector<128x256xbf16> to vector<128x32xbf16>
    %130 = vector.extract_strided_slice %8 {offsets = [0, 224], sizes = [128, 32], strides = [1, 1]} : vector<128x256xbf16> to vector<128x32xbf16>
    %cst_47 = arith.constant dense<0.000000e+00> : vector<128x128xf32>
    %131 = tpu.matmul %128, %129, %cst_47 {dimension_numbers = #tpu.dot_dimension_numbers<[1], [1], [0], [0], [0, 0, 1, 0], [], []>} : vector<128x32xbf16>, vector<128x32xbf16>, vector<128x128xf32> -> vector<128x128xf32>
    %cst_48 = arith.constant dense<0xFF800000> : vector<128xf32>
    %132 = vector.multi_reduction <maximumf>, %131, %cst_48 [1] : vector<128x128xf32> to vector<128xf32>
    %133 = vector.shape_cast %132 : vector<128xf32> to vector<128x1xf32>
    %134 = vector.broadcast %133 : vector<128x1xf32> to vector<128x128xf32>
    %135 = arith.subf %131, %134 : vector<128x128xf32>
    %136 = math.exp %135 : vector<128x128xf32>
    %cst_49 = arith.constant dense<0.000000e+00> : vector<128xf32>
    %137 = vector.multi_reduction <add>, %136, %cst_49 [1] : vector<128x128xf32> to vector<128xf32>
    %138 = vector.shape_cast %137 : vector<128xf32> to vector<128x1xf32>
    %139 = arith.truncf %136 : vector<128x128xf32> to vector<128x128xbf16>
    %cst_50 = arith.constant dense<0.000000e+00> : vector<128x32xf32>
    %140 = tpu.matmul %139, %130, %cst_50 {dimension_numbers = #tpu.dot_dimension_numbers<[1], [0], [0], [1], [0, 0, 1, 1], [], []>} : vector<128x128xbf16>, vector<128x32xbf16>, vector<128x32xf32> -> vector<128x32xf32>
    %141 = tpu.reciprocal %138 {approx = true} : vector<128x1xf32> -> vector<128x1xf32>
    %142 = vector.broadcast %141 : vector<128x1xf32> to vector<128x32xf32>
    %143 = arith.mulf %140, %142 : vector<128x32xf32>
    %c0_51 = arith.constant 0 : index
    %c224 = arith.constant 224 : index
    %144 = vector.load %arg8[%c0_51, %c224] : memref<128x256xf32, #tpu.memory_space<vmem>>, vector<128x32xf32>
    tpu.vector_store %arg8[%c0_51, %c224], %143 {strides = array<i32>} : memref<128x256xf32, #tpu.memory_space<vmem>>, vector<128x32xf32>,
    %c256_i32 = arith.constant 256 : i32
    %145 = arith.muli %arg1, %c256_i32 : i32
    %146 = tpu.assume_multiple %145, 256 : i32
    %147 = arith.index_cast %146 : i32 to index
    %c0_52 = arith.constant 0 : index
    %148 = vector.load %arg5[%147, %c0_52] : memref<256x256xbf16, #tpu.memory_space<vmem>>, vector<256x256xbf16>
    %c0_53 = arith.constant 0 : index
    %c0_54 = arith.constant 0 : index
    %149 = vector.load %arg9[%c0_53, %c0_54] : memref<128x256xf32, #tpu.memory_space<vmem>>, vector<128x256xf32>
    %c0_55 = arith.constant 0 : index
    %c0_56 = arith.constant 0 : index
    %150 = vector.load %arg8[%c0_55, %c0_56] : memref<128x256xf32, #tpu.memory_space<vmem>>, vector<128x256xf32>
    %151 = arith.truncf %150 : vector<128x256xf32> to vector<128x256xbf16>
    %cst_57 = arith.constant dense<0.000000e+00> : vector<128x256xf32>
    %152 = tpu.matmul %151, %148, %cst_57 {dimension_numbers = #tpu.dot_dimension_numbers<[1], [0], [0], [1], [0, 0, 1, 1], [], []>} : vector<128x256xbf16>, vector<256x256xbf16>, vector<128x256xf32> -> vector<128x256xf32>
    %153 = arith.addf %149, %152 : vector<128x256xf32>
    %c0_58 = arith.constant 0 : index
    %c0_59 = arith.constant 0 : index
    %154 = vector.load %arg9[%c0_58, %c0_59] : memref<128x256xf32, #tpu.memory_space<vmem>>, vector<128x256xf32>
    tpu.vector_store %arg9[%c0_58, %c0_59], %153 {strides = array<i32>} : memref<128x256xf32, #tpu.memory_space<vmem>>, vector<128x256xf32>,
    %c0_i32_60 = arith.constant 0 : i32
    %155 = arith.cmpi eq, %arg1, %c0_i32_60 : i32
    %156 = arith.extui %155 : i1 to i32
    %c0_i32_61 = arith.constant 0 : i32
    %157 = arith.cmpi ne, %156, %c0_i32_61 : i32
    scf.if %157 {
      %c0_62 = arith.constant 0 : index
      %c0_63 = arith.constant 0 : index
      %158 = vector.load %arg9[%c0_62, %c0_63] : memref<128x256xf32, #tpu.memory_space<vmem>>, vector<128x256xf32>
      %c0_64 = arith.constant 0 : index
      %c0_65 = arith.constant 0 : index
      %159 = vector.load %arg6[%c0_64, %c0_65] : memref<1x256xf32, #tpu.memory_space<vmem>>, vector<1x256xf32>
      %160 = vector.broadcast %159 : vector<1x256xf32> to vector<128x256xf32>
      %161 = arith.addf %158, %160 : vector<128x256xf32>
      %c0_66 = arith.constant 0 : index
      %c0_67 = arith.constant 0 : index
      %c0_68 = arith.constant 0 : index
      %162 = vector.load %arg7[%c0_66, %c0_67, %c0_68] : memref<1x128x256xf32, #tpu.memory_space<vmem>>, vector<1x128x256xf32>
      %163 = vector.shape_cast %162 : vector<1x128x256xf32> to vector<128x256xf32>
      %164 = vector.shape_cast %161 : vector<128x256xf32> to vector<1x128x256xf32>
      tpu.vector_store %arg7[%c0_66, %c0_67, %c0_68], %164 {strides = array<i32>} : memref<1x128x256xf32, #tpu.memory_space<vmem>>, vector<1x128x256xf32>,
    } else {
    }
    return
  }
  func.func @transform_0(%arg0: i32, %arg1: i32) -> (i32, i32, i32, i32) {
    %c0_i32 = arith.constant 0 : i32
    %c0_i32_0 = arith.constant 0 : i32
    %c0_i32_1 = arith.constant 0 : i32
    return %arg0, %arg1, %c0_i32, %c0_i32_0 : i32, i32, i32, i32
  }
  func.func @transform_1(%arg0: i32, %arg1: i32) -> (i32, i32, i32, i32) {
    %c0_i32 = arith.constant 0 : i32
    %c0_i32_0 = arith.constant 0 : i32
    %c0_i32_1 = arith.constant 0 : i32
    return %arg0, %arg1, %c0_i32, %c0_i32_0 : i32, i32, i32, i32
  }
  func.func @transform_2(%arg0: i32, %arg1: i32) -> (i32, i32, i32, i32) {
    %c0_i32 = arith.constant 0 : i32
    %c0_i32_0 = arith.constant 0 : i32
    %c0_i32_1 = arith.constant 0 : i32
    return %arg0, %arg1, %c0_i32, %c0_i32_0 : i32, i32, i32, i32
  }
  func.func @transform_3(%arg0: i32, %arg1: i32) -> (i32, i32) {
    %c0_i32 = arith.constant 0 : i32
    %c0_i32_0 = arith.constant 0 : i32
    %c0_i32_1 = arith.constant 0 : i32
    return %c0_i32, %c0_i32_0 : i32, i32
  }
  func.func @transform_4(%arg0: i32, %arg1: i32) -> (i32, i32) {
    %c0_i32 = arith.constant 0 : i32
    %c0_i32_0 = arith.constant 0 : i32
    %c0_i32_1 = arith.constant 0 : i32
    return %c0_i32, %c0_i32_0 : i32, i32
  }
  func.func @transform_5(%arg0: i32, %arg1: i32) -> (i32, i32, i32) {
    %c0_i32 = arith.constant 0 : i32
    %c0_i32_0 = arith.constant 0 : i32
    %c0_i32_1 = arith.constant 0 : i32
    return %arg0, %c0_i32, %c0_i32_0 : i32, i32, i32
  }
}

</mosaic_0001>

<bundles_post_ra>
// kernel: mha_forward.2
= control target key start
LH: loop header
LB: loop body
LE: loop exit
PB: predicated region body
PF: predicated region fallthrough
CT: control target
= control target key end

     0   :  { %8 = vsyncpa [#allocation4], 0  ;;  %s2440_s0 = inlined_call_operand.hbm [shape: f32[256,256], index: 0, kind: input, shape index: {}]   ;;  %s2441_s1 = inlined_call_operand.hbm [shape: bf16[256,768], index: 1, kind: input, shape index: {}]   ;;  %s2442_s2 = inlined_call_operand.vmem [shape: f32[1,768], index: 2, kind: input, shape index: {}]   ;;  %s2443_s3 = inlined_call_operand.vmem [shape: bf16[256,768], index: 3, kind: output, shape index: {}]  }
   0x1   :  { %9 = vsyncpa [#allocation6], 0 }
   0x2   :  { %11 = vsyncpa [#allocation6 + $0x1], 0  ;;  %s2054_s12 = smov 0   ;;  %s2056_s13 = smov 0  }
   0x3   :  { %s2058_s14 = smov 0   ;;  %s2060_s15 = smov 0  }
   0x4   :  { %s2062_s16 = smov 0   ;;  %s2064_s17 = smov 0  }
   0x5 LB: > { %s1646_s18 = sadd.s32 4294967295, %s2025_s17   ;;  %p80_p0 = scmp.ne.s32.totalorder %s2013_s14, %s2009_s13  ;;  %s2025_s17 = sphi %s2064_s17, %s17_s17   ;;  %s2021_s16 = sphi %s2062_s16, %s2466_s16   ;;  %s2017_s15 = sphi %s2060_s15, %s2465_s15   ;;  %s2013_s14 = sphi %s2058_s14, %s2464_s14   ;;  %s2009_s13 = sphi %s2056_s13, %s2463_s13   ;;  %s2005_s12 = sphi %s2054_s12, %s2462_s12  }
   0x6   : > { %p81_p1 = scmp.eq.s32.totalorder %s2025_s17, 0  ;;  %p86_p2 = scmp.ne.s32.totalorder %s2009_s13, %s2005_s12 }
   0x7   : > { %p2087_p3 = scmp.eq.s32.totalorder %s1646_s18, 0  ;;  %p138_p4 = scmp.eq.s32.totalorder %s1646_s18, 2 }
   0x8   : > { %p82_p5 = por %p81_p1, %p80_p0  ;;  %p1648_p6 = scmp.ge.s32.totalorder %s2025_s17, 1 }
   0x9   : > { %s2449_s19 = scalar_select %p2087_p3, 1, 0 }
   0xa   : > { %p2094_p7 = por %p2087_p3, %p86_p2  ;;  %p2098_p8 = por %p138_p4, %p80_p0 }
   0xb   : > { %p151_p9 = scmp.lt.s32.totalorder %s2025_s17, 4  ;;  %s2027_s23 = smov [#allocation3]  }
   0xc   : > { %s2450_s20 = scalar_select %p2094_p7, 1, 0 }
   0xd   : > { %s2451_s21 = scalar_select %p2098_p8, 1, 0 }
   0xe   : > { %p2103_p10 = pnand %p1648_p6, %p151_p9  ;;  %s169_s24 = sshll.u32 %s2027_s23, 4  ;;  %s2107_s24 = int_to_ptr.vmem [resolvable:$true] %s169_s24 }
   0xf   : > { %p1809_p12 = scmp.lt.s32.totalorder %s2025_s17, 3  ;;  %s32_s27 = sadd.s32 1, %s2021_s16 }
  0x10   : > { %s2452_s22 = scalar_select %p2103_p10, 1, 0 }
  0x11   : > { %p1800_p11 = pneg %p2103_p10  ;;  %p2118_p0 = pnand %p1809_p12, %p82_p5 }
  0x12   : > { %p2123_p1 = scmp.ge.s32.totalorder %s32_s27, 3  ;;  %s1913_s4 = scalar_lea.hbm %s2440_s0, 8192 }
  0x13   : > { %p2114_p13 = pnand %p1800_p11, %p2087_p3  ;;  %p1914_p2 = scmp.ne.s32.totalorder %s2440_s0, %s1913_s4 }
  0x14   : > { %s2454_s26 = scalar_select %p2118_p0, 1, 0 }
  0x15   : > { %s2455_s28 = scalar_select %p2123_p1, 1, 0 }
  0x16   : > { %p1915_p4 = pneg %p2114_p13  ;;  %p1920_p9 = scmp.lt.u32.totalorder %s1913_s4, %s2440_s0 }
  0x18   : > { %p1916_p6 = pnand %p1915_p4, %p1914_p2 }
  0x1a   : > { %p1917_p5 = pneg %p1916_p6 }
  0x1c   : > { %p1922_p11 = pnand %p1920_p9, %p1917_p5 }
  0x1e   : > { %1925 = shalt.err (!%p1922_p11)
}
  0x1f   : > { %s1926_s9 = scalar_lea.vmem %s2107_s24, 8192  ;;  %p1934_p3 = scmp.lt.s32.totalorder %s2107_s24, %s2107_s24 }
  0x20   : > { %p1927_p12 = scmp.ne.s32.totalorder %s2107_s24, %s1926_s9  ;;  %p1935_p10 = scmp.lt.s32.totalorder %s1926_s9, %s1926_s9 }
  0x22   : > { %p1929_p8 = pnand %p1927_p12, %p1915_p4  ;;  %p1936_p0 = por %p1935_p10, %p1934_p3 }
  0x24   : > { %p1930_p7 = pneg %p1929_p8 }
  0x26   : > { %p1937_p1 = pnand %p1936_p0, %p1930_p7 }
  0x28   : > { %1940 = shalt.err (!%p1937_p1)
}
  0x29   : > { %s2028_s10 = smov 256   ;;  %s2029_s11 = smov 16  }
  0x2a   : > { %1803 = dma.hbm_to_vmem [thread:$0]  (!%p2114_p13), %s2440_s0, 8192, %s2107_s24, [#allocation4], %s2028_s10, %s2028_s10, %s2029_s11  }
  0x2b   : > { %s73_s23 = sadd.s32 1, %s2013_s14  ;;  %p2456_p3 = scmp.ne.s32.totalorder %s2455_s28, 0 }
  0x2c   : > { %s183_s29 = sand.u32 1, %s2013_s14   ;;  %s1728_s30 = sshll.u32 %s2021_s16, 7 }
  0x2d   : > { %s2468_s27 = smov (%p2456_p3, %s32_s27), 0  ;;  %s1651_s5 = sshll.u32 %s183_s29, 8 }
  0x2e   : > { %s69_s4 = ssub.s32 %s2021_s16, %s2468_s27  ;;  %s2160_s25 = scalar_lea.hbm %s2441_s1, %s1728_s30 }
  0x2f   : > { %p71_p7 = scmp.eq.s32.totalorder %s69_s4, 0  ;;  %s187_s28 = scalar_lea.vmem [#allocation5], %s1651_s5 }
  0x30   : > { %s197_s8 = sshll.u32 %s187_s28, 4  ;;  %s2167_s9 = scalar_lea.sflag [#allocation6], %s183_s29  ;;  %s2165_s8 = int_to_ptr.vmem [resolvable:$true] %s197_s8 }
  0x31   : > { %s2163_s24 = scalar_select %p71_p7, %s2013_s14, %s73_s23  }
  0x32   : > { %s1941_s10 = scalar_lea.hbm %s2160_s25, 4096  ;;  %p2457_p10 = scmp.ne.s32.totalorder %s2454_s26, 0 }
  0x33   : > { %p1942_p8 = scmp.ne.s32.totalorder %s2160_s25, %s1941_s10  ;;  %s1946_s18 = scalar_lea.hbm %s2441_s1, 12288 }
  0x34   : > { %p1943_p13 = pneg %p2457_p10  ;;  %p1947_p2 = scmp.lt.u32.totalorder %s2160_s25, %s2441_s1 }
  0x35   : > { %p1948_p4 = scmp.lt.u32.totalorder %s1946_s18, %s1941_s10  ;;  %p1950_p5 = scmp.lt.u32.totalorder %s1941_s10, %s2160_s25 }
  0x36   : > { %p1944_p0 = pnand %p1943_p13, %p1942_p8 }
  0x37   : > { %p1949_p6 = por %p1948_p4, %p1947_p2 }
  0x38   : > { %p1945_p1 = pneg %p1944_p0 }
  0x39   : > { %p1951_p9 = por %p1950_p5, %p1949_p6 }
  0x3b   : > { %p1952_p11 = pnand %p1951_p9, %p1945_p1 }
  0x3d   : > { %1955 = shalt.err (!%p1952_p11)
}
  0x3e   : > { %s1956_s29 = scalar_lea.vmem %s2165_s8, 4096  ;;  %s2030_s4 = smov [#allocation5]  }
  0x3f   : > { %p1957_p12 = scmp.ne.s32.totalorder %s2165_s8, %s1956_s29  ;;  %s1961_s5 = sshll.u32 %s2030_s4, 4  ;;  %s1962_s5 = int_to_ptr.vmem [resolvable:$false] %s1961_s5 }
  0x40   : > { %s1963_s6 = scalar_lea.vmem %s1962_s5, 8192  ;;  %p1964_p8 = scmp.lt.s32.totalorder %s2165_s8, %s1962_s5 }
  0x41   : > { %p1959_p3 = pnand %p1957_p12, %p1943_p13  ;;  %p1965_p0 = scmp.lt.s32.totalorder %s1963_s6, %s1956_s29 }
  0x43   : > { %p1960_p7 = pneg %p1959_p3  ;;  %p1966_p2 = por %p1965_p0, %p1964_p8 }
  0x45   : > { %p1967_p4 = pnand %p1966_p2, %p1960_p7 }
  0x47   : > { %1970 = shalt.err (!%p1967_p4)
}
  0x48   : > { %s2031_s7 = smov 384   ;;  %s2032_s28 = smov 128  }
  0x49   : > { %s2033_s10 = smov 8   ;;  %p2458_p13 = scmp.ne.s32.totalorder %s2452_s22, 0 }
  0x4a   : > { %1807 = dma.hbm_to_vmem [thread:$0]  (!%p2457_p10), %s2160_s25, 4096, %s2165_s8, %s2167_s9, %s2031_s7, %s2032_s28, %s2033_s10  }
  0x4b   : > { %217 = sbr.rel (%p2458_p13) target bundleno = 437 (0x1b5), region = 32  ;;  %p2459_p1 = scmp.ne.s32.totalorder (!%p2458_p13), %s2449_s19, 0 }
  0x52   : > { %1996 = dma.done.wait (%p2459_p1), [#allocation4], 8192  }
  0x53   : > { %1998 = vsyncadd (%p2459_p1), [#allocation4], 4294959104  ;;  %s223_s11 = sand.u32 1, %s2009_s13   ;;  %p2460_p6 = scmp.ne.s32.totalorder %s2450_s20, 0 }
  0x54   : > { %s2202_s12 = sshll.u32 %s223_s11, 8  ;;  %s224_s18 = scalar_lea.sflag [#allocation6], %s223_s11 }
  0x55   : > { %s2205_s23 = scalar_lea.vmem [#allocation5], %s2202_s12 }
  0x56   : > { %2000 = dma.done.wait (%p2460_p6), %s224_s18, 4096  }
  0x57   : > { %2002 = vsyncadd (%p2460_p6), %s224_s18, 4294963200  ;;  %v1865_v0 = vld [vmem:[%s2205_s23 + $0x4] ss:$8 sps:$4 sm:$0xff]   ;;  %v1867_v1 = vld [vmem:[%s2205_s23] ss:$8 sps:$4 sm:$0xff]   ;;  %s1658_s19 = sshll.u32 %s2017_s15, 1 }
  0x58   : > { %684 = vmatprep.subr.bf16.mxu0 %v1865_v0  ;;  %1762 = vmatprep.subr.bf16.mxu1 %v1865_v0  ;;  %v1868_v2 = vld [vmem:[%s2205_s23 + $0x14] ss:$8 sps:$4 sm:$0xff]   ;;  %v1870_v3 = vld [vmem:[%s2205_s23 + $0x10] ss:$8 sps:$4 sm:$0xff]   ;;  %v1871_v4 = vld [vmem:[%s2205_s23 + $0x24] ss:$8 sps:$4 sm:$0xff]  }
  0x59   : > { %685 = vmatpush1.bf16.msra.mxu0 %v1867_v1  ;;  %1778 = vmatpush1.bf16.msra.mxu1 %v1867_v1  ;;  %v1873_v5 = vld [vmem:[%s2205_s23 + $0x20] ss:$8 sps:$4 sm:$0xff]   ;;  %v1874_v6 = vld [vmem:[%s2205_s23 + $0x34] ss:$8 sps:$4 sm:$0xff]   ;;  %v1876_v7 = vld [vmem:[%s2205_s23 + $0x30] ss:$8 sps:$4 sm:$0xff]  }
  0x5a   : > { %686 = vmatprep.subr.bf16.mxu0 %v1868_v2  ;;  %1763 = vmatprep.subr.bf16.mxu1 %v1868_v2  ;;  %v1877_v8 = vld [vmem:[%s2205_s23 + $0x44] ss:$8 sps:$4 sm:$0xff]   ;;  %v1879_v9 = vld [vmem:[%s2205_s23 + $0x40] ss:$8 sps:$4 sm:$0xff]   ;;  %v1880_v10 = vld [vmem:[%s2205_s23 + $0x54] ss:$8 sps:$4 sm:$0xff]  }
  0x5b   : > { %v1882_v11 = vld [vmem:[%s2205_s23 + $0x50] ss:$8 sps:$4 sm:$0xff]   ;;  %v1883_v12 = vld [vmem:[%s2205_s23 + $0x64] ss:$8 sps:$4 sm:$0xff]   ;;  %v1885_v18 = vld [vmem:[%s2205_s23 + $0x60] ss:$8 sps:$4 sm:$0xff]  }
  0x5c   : > { %v397_v13 = vld [vmem:[#allocation3 + $0x8] sm:$0xff]  ;;  %v399_v14 = vld [vmem:[#allocation3 + $0x18] sm:$0xff]  ;;  %v396_v38 = vld [vmem:[#allocation3] sm:$0xff]  ;;  %p258_p10 = scmp.lt.s32.totalorder %s1658_s19, 5  ;;  %s2260_s25 = scalar_lea.vmem [#allocation7], %s2202_s12 }
  0x5d   : > { %687 = vmatpush1.bf16.msra.mxu0 %v1870_v3  ;;  %1779 = vmatpush1.bf16.msra.mxu1 %v1870_v3  ;;  %v461_v15 = vpack.c.bf16 %v399_v14, %v397_v13  ;;  %v429_v16 = vld [vmem:[#allocation3 + $0x108] sm:$0xff]  ;;  %v431_v17 = vld [vmem:[#allocation3 + $0x118] sm:$0xff]  ;;  %v398_v39 = vld [vmem:[#allocation3 + $0x10] sm:$0xff]  ;;  %p2461_p5 = scmp.ne.s32.totalorder %s2451_s21, 0 }
  0x5e   : > { %688 = vmatprep.subr.bf16.mxu0 %v1871_v4  ;;  %1764 = vmatprep.subr.bf16.mxu1 %v1871_v4  ;;  %v477_v19 = vpack.c.bf16 %v431_v17, %v429_v16  ;;  %v1886_v20 = vld [vmem:[%s2205_s23 + $0x74] ss:$8 sps:$4 sm:$0xff]   ;;  %v1888_v21 = vld [vmem:[%s2205_s23 + $0x70] ss:$8 sps:$4 sm:$0xff]   ;;  %v1889_v22 = vld [vmem:[%s2205_s23 + $0x84] ss:$8 sps:$4 sm:$0xff]   ;;  %v460_v46 = vpack.c.bf16 %v398_v39, %v396_v38 }
  0x5f   : > { %716 = vmatprep.mubr.bf16.mxu0 %v461_v15  ;;  %v1891_v23 = vld [vmem:[%s2205_s23 + $0x80] ss:$8 sps:$4 sm:$0xff]   ;;  %v1892_v24 = vld [vmem:[%s2205_s23 + $0x94] ss:$8 sps:$4 sm:$0xff]   ;;  %v1894_v25 = vld [vmem:[%s2205_s23 + $0x90] ss:$8 sps:$4 sm:$0xff]  }
  0x60   : > { %796 = vmatprep.mubr.bf16.mxu1 %v477_v19  ;;  %v1895_v26 = vld [vmem:[%s2205_s23 + $0xa4] ss:$8 sps:$4 sm:$0xff]   ;;  %v1897_v27 = vld [vmem:[%s2205_s23 + $0xa0] ss:$8 sps:$4 sm:$0xff]   ;;  %v1898_v28 = vld [vmem:[%s2205_s23 + $0xb4] ss:$8 sps:$4 sm:$0xff]  }
  0x61   : > { %689 = vmatpush1.bf16.msra.mxu0 %v1873_v5  ;;  %1780 = vmatpush1.bf16.msra.mxu1 %v1873_v5  ;;  %v1900_v29 = vld [vmem:[%s2205_s23 + $0xb0] ss:$8 sps:$4 sm:$0xff]   ;;  %v1901_v30 = vld [vmem:[%s2205_s23 + $0xc4] ss:$8 sps:$4 sm:$0xff]   ;;  %v1903_v31 = vld [vmem:[%s2205_s23 + $0xc0] ss:$8 sps:$4 sm:$0xff]  }
  0x62   : > { %690 = vmatprep.subr.bf16.mxu0 %v1874_v6  ;;  %1765 = vmatprep.subr.bf16.mxu1 %v1874_v6  ;;  %v1904_v32 = vld [vmem:[%s2205_s23 + $0xd4] ss:$8 sps:$4 sm:$0xff]   ;;  %v1906_v33 = vld [vmem:[%s2205_s23 + $0xd0] ss:$8 sps:$4 sm:$0xff]   ;;  %v1907_v34 = vld [vmem:[%s2205_s23 + $0xe4] ss:$8 sps:$4 sm:$0xff]  }
  0x63   : > { %v1909_v35 = vld [vmem:[%s2205_s23 + $0xe0] ss:$8 sps:$4 sm:$0xff]   ;;  %v1910_v36 = vld [vmem:[%s2205_s23 + $0xf4] ss:$8 sps:$4 sm:$0xff]   ;;  %v1912_v37 = vld [vmem:[%s2205_s23 + $0xf0] ss:$8 sps:$4 sm:$0xff]  }
  0x64   : > { %v428_v40 = vld [vmem:[#allocation3 + $0x100] sm:$0xff]  ;;  %v430_v41 = vld [vmem:[#allocation3 + $0x110] sm:$0xff]  ;;  %v401_v42 = vld [vmem:[#allocation3 + $0x28] sm:$0xff]  ;;  %s2470_s19 = smov (!%p258_p10, %s1658_s19), 5  ;;  %s1761_s8 = sshll.u32 (%p2461_p5), %s2017_s15, 3 }
  0x65   : > { %691 = vmatpush1.bf16.msra.mxu0 %v1876_v7  ;;  %1781 = vmatpush1.bf16.msra.mxu1 %v1876_v7  ;;  %v403_v43 = vld [vmem:[#allocation3 + $0x38] sm:$0xff]  ;;  %v433_v44 = vld [vmem:[#allocation3 + $0x128] sm:$0xff]  ;;  %v476_v47 = vpack.c.bf16 %v430_v41, %v428_v40  ;;  %v400_v50 = vld [vmem:[#allocation3 + $0x20] sm:$0xff]  ;;  %s260_s26 = scalar_lea.vmem %s2442_s2, %s2470_s19  ;;  %s2359_s29 = scalar_lea.vmem (%p2461_p5), %s2443_s3, %s1761_s8 }
  0x66   : > { %692 = vmatprep.subr.bf16.mxu0 %v1877_v8  ;;  %1766 = vmatprep.subr.bf16.mxu1 %v1877_v8  ;;  %v435_v45 = vld [vmem:[#allocation3 + $0x138] sm:$0xff]  ;;  %v463_v48 = vpack.c.bf16 %v403_v43, %v401_v42  ;;  %v402_v51 = vld [vmem:[#allocation3 + $0x30] sm:$0xff]  ;;  %v432_v52 = vld [vmem:[#allocation3 + $0x120] sm:$0xff] }
  0x67   : > { %v479_v49 = vpack.c.bf16 %v435_v45, %v433_v44  ;;  %v434_v53 = vld [vmem:[#allocation3 + $0x130] sm:$0xff]  ;;  %v405_v54 = vld [vmem:[#allocation3 + $0x48] sm:$0xff]  ;;  %v407_v55 = vld [vmem:[#allocation3 + $0x58] sm:$0xff]  ;;  %v462_v58 = vpack.c.bf16 %v402_v51, %v400_v50 }
  0x68   : > { %v437_v56 = vld [vmem:[#allocation3 + $0x148] sm:$0xff]  ;;  %v439_v57 = vld [vmem:[#allocation3 + $0x158] sm:$0xff]  ;;  %v478_v59 = vpack.c.bf16 %v434_v53, %v432_v52  ;;  %v465_v60 = vpack.c.bf16 %v407_v55, %v405_v54  ;;  %v404_v62 = vld [vmem:[#allocation3 + $0x40] sm:$0xff] }
  0x69   : > { %693 = vmatpush1.bf16.msra.mxu0 %v1879_v9  ;;  %1782 = vmatpush1.bf16.msra.mxu1 %v1879_v9  ;;  %v481_v61 = vpack.c.bf16 %v439_v57, %v437_v56  ;;  %v406_v63 = vld [vmem:[#allocation3 + $0x50] sm:$0xff]  ;;  %v436_v0 = vld [vmem:[#allocation3 + $0x140] sm:$0xff]  ;;  %v409_v2 = vld [vmem:[#allocation3 + $0x68] sm:$0xff] }
  0x6a   : > { %694 = vmatprep.subr.bf16.mxu0 %v1880_v10  ;;  %1767 = vmatprep.subr.bf16.mxu1 %v1880_v10  ;;  %v438_v1 = vld [vmem:[#allocation3 + $0x150] sm:$0xff]  ;;  %v411_v3 = vld [vmem:[#allocation3 + $0x78] sm:$0xff]  ;;  %v441_v4 = vld [vmem:[#allocation3 + $0x168] sm:$0xff]  ;;  %v464_v6 = vpack.c.bf16 %v406_v63, %v404_v62 }
  0x6b   : > { %v443_v5 = vld [vmem:[#allocation3 + $0x178] sm:$0xff]  ;;  %v480_v7 = vpack.c.bf16 %v438_v1, %v436_v0  ;;  %v467_v8 = vpack.c.bf16 %v411_v3, %v409_v2  ;;  %v408_v10 = vld [vmem:[#allocation3 + $0x60] sm:$0xff]  ;;  %v442_v13 = vld [vmem:[#allocation3 + $0x170] sm:$0xff]  ;;  %v1074_v0 = vlaneseq }
  0x6c   : > { %v483_v9 = vpack.c.bf16 %v443_v5, %v441_v4  ;;  %v413_v14 = vld [vmem:[#allocation3 + $0x88] sm:$0xff]  ;;  %v415_v15 = vld [vmem:[#allocation3 + $0x98] sm:$0xff]  ;;  %v1072_v3 = vld [vmem:[%s260_s26] sm:$0x3] }
  0x6d   : > { %695 = vmatpush1.bf16.msra.mxu0 %v1882_v11  ;;  %1783 = vmatpush1.bf16.msra.mxu1 %v1882_v11  ;;  %v410_v11 = vld [vmem:[#allocation3 + $0x70] sm:$0xff]  ;;  %v445_v16 = vld [vmem:[#allocation3 + $0x188] sm:$0xff]  ;;  %v447_v17 = vld [vmem:[#allocation3 + $0x198] sm:$0xff]  ;;  %v1075_v1 = vshrl.u32 %v1074_v0, 7 }
  0x6e   : > { %696 = vmatprep.subr.bf16.mxu0 %v1883_v12  ;;  %1768 = vmatprep.subr.bf16.mxu1 %v1883_v12  ;;  %v440_v12 = vld [vmem:[#allocation3 + $0x160] sm:$0xff]  ;;  %v421_v38 = vld [vmem:[#allocation3 + $0xc8] sm:$0xff]  ;;  %v423_v39 = vld [vmem:[#allocation3 + $0xd8] sm:$0xff] }
  0x6f   : > { %v482_v19 = vpack.c.bf16 %v442_v13, %v440_v12  ;;  %v453_v40 = vld [vmem:[#allocation3 + $0x1c8] sm:$0xff]  ;;  %v455_v41 = vld [vmem:[#allocation3 + $0x1d8] sm:$0xff]  ;;  %v473_v44 = vpack.c.bf16 %v423_v39, %v421_v38  ;;  %v1076_v2 = vsub.s32 0, %v1075_v1  ;;  %v1080_v4 = vsub.s32 1, %v1075_v1 }
  0x70   : > { %v489_v45 = vpack.c.bf16 %v455_v41, %v453_v40  ;;  %v425_v50 = vld [vmem:[#allocation3 + $0xe8] sm:$0xff]  ;;  %v427_v51 = vld [vmem:[#allocation3 + $0xf8] sm:$0xff] }
  0x71   : > { %697 = vmatpush1.bf16.msra.mxu0 %v1885_v18  ;;  %1784 = vmatpush1.bf16.msra.mxu1 %v1885_v18  ;;  %v466_v18 = vpack.c.bf16 %v410_v11, %v408_v10  ;;  %v457_v52 = vld [vmem:[#allocation3 + $0x1e8] sm:$0xff]  ;;  %v459_v53 = vld [vmem:[#allocation3 + $0x1f8] sm:$0xff]  ;;  %v475_v56 = vpack.c.bf16 %v427_v51, %v425_v50  ;;  %v2247_v5 = vrot.slane %v1072_v3, %v1076_v2 }
  0x72   : > { %698 = vmatprep.subr.bf16.mxu0 %v1886_v20  ;;  %1769 = vmatprep.subr.bf16.mxu1 %v1886_v20  ;;  %v469_v20 = vpack.c.bf16 %v415_v15, %v413_v14  ;;  %v491_v57 = vpack.c.bf16 %v459_v53, %v457_v52 }
  0x75   : > { %699 = vmatpush1.bf16.msra.mxu0 %v1888_v21  ;;  %1785 = vmatpush1.bf16.msra.mxu1 %v1888_v21  ;;  %v485_v21 = vpack.c.bf16 %v447_v17, %v445_v16 }
  0x76   : > { %700 = vmatprep.subr.bf16.mxu0 %v1889_v22  ;;  %1770 = vmatprep.subr.bf16.mxu1 %v1889_v22  ;;  %v412_v22 = vld [vmem:[#allocation3 + $0x80] sm:$0xff] }
  0x79   : > { %701 = vmatpush1.bf16.msra.mxu0 %v1891_v23  ;;  %1786 = vmatpush1.bf16.msra.mxu1 %v1891_v23  ;;  %v414_v23 = vld [vmem:[#allocation3 + $0x90] sm:$0xff] }
  0x7a   : > { %702 = vmatprep.subr.bf16.mxu0 %v1892_v24  ;;  %1771 = vmatprep.subr.bf16.mxu1 %v1892_v24  ;;  %v444_v24 = vld [vmem:[#allocation3 + $0x180] sm:$0xff] }
  0x7d   : > { %703 = vmatpush1.bf16.msra.mxu0 %v1894_v25  ;;  %1787 = vmatpush1.bf16.msra.mxu1 %v1894_v25  ;;  %v446_v25 = vld [vmem:[#allocation3 + $0x190] sm:$0xff] }
  0x7e   : > { %704 = vmatprep.subr.bf16.mxu0 %v1895_v26  ;;  %1772 = vmatprep.subr.bf16.mxu1 %v1895_v26  ;;  %v417_v26 = vld [vmem:[#allocation3 + $0xa8] sm:$0xff] }
  0x81   : > { %705 = vmatpush1.bf16.msra.mxu0 %v1897_v27  ;;  %1788 = vmatpush1.bf16.msra.mxu1 %v1897_v27  ;;  %v419_v27 = vld [vmem:[#allocation3 + $0xb8] sm:$0xff] }
  0x82   : > { %706 = vmatprep.subr.bf16.mxu0 %v1898_v28  ;;  %1773 = vmatprep.subr.bf16.mxu1 %v1898_v28  ;;  %v449_v28 = vld [vmem:[#allocation3 + $0x1a8] sm:$0xff] }
  0x85   : > { %707 = vmatpush1.bf16.msra.mxu0 %v1900_v29  ;;  %1789 = vmatpush1.bf16.msra.mxu1 %v1900_v29  ;;  %v451_v29 = vld [vmem:[#allocation3 + $0x1b8] sm:$0xff] }
  0x86   : > { %708 = vmatprep.subr.bf16.mxu0 %v1901_v30  ;;  %1774 = vmatprep.subr.bf16.mxu1 %v1901_v30  ;;  %v468_v30 = vpack.c.bf16 %v414_v23, %v412_v22 }
  0x89   : > { %709 = vmatpush1.bf16.msra.mxu0 %v1903_v31  ;;  %1790 = vmatpush1.bf16.msra.mxu1 %v1903_v31  ;;  %v484_v31 = vpack.c.bf16 %v446_v25, %v444_v24 }
  0x8a   : > { %710 = vmatprep.subr.bf16.mxu0 %v1904_v32  ;;  %1775 = vmatprep.subr.bf16.mxu1 %v1904_v32  ;;  %v471_v32 = vpack.c.bf16 %v419_v27, %v417_v26 }
  0x8d   : > { %711 = vmatpush1.bf16.msra.mxu0 %v1906_v33  ;;  %1791 = vmatpush1.bf16.msra.mxu1 %v1906_v33  ;;  %v487_v33 = vpack.c.bf16 %v451_v29, %v449_v28 }
  0x8e   : > { %712 = vmatprep.subr.bf16.mxu0 %v1907_v34  ;;  %1776 = vmatprep.subr.bf16.mxu1 %v1907_v34  ;;  %v416_v34 = vld [vmem:[#allocation3 + $0xa0] sm:$0xff] }
  0x91   : > { %713 = vmatpush1.bf16.msra.mxu0 %v1909_v35  ;;  %1792 = vmatpush1.bf16.msra.mxu1 %v1909_v35  ;;  %v418_v35 = vld [vmem:[#allocation3 + $0xb0] sm:$0xff] }
  0x92   : > { %714 = vmatprep.subr.bf16.mxu0 %v1910_v36  ;;  %1777 = vmatprep.subr.bf16.mxu1 %v1910_v36  ;;  %v448_v36 = vld [vmem:[#allocation3 + $0x1a0] sm:$0xff]  ;;  %v470_v42 = vpack.c.bf16 %v418_v35, %v416_v34 }
  0x95   : > { %715 = vmatpush1.bf16.msra.mxu0 %v1912_v37  ;;  %1793 = vmatpush1.bf16.msra.mxu1 %v1912_v37  ;;  %v450_v37 = vld [vmem:[#allocation3 + $0x1b0] sm:$0xff] }
  0x96   : > { %v486_v43 = vpack.c.bf16 %v450_v37, %v448_v36 }
  0x98   : > { %717 = vmatmul.mubr.bf16.vlgmr.msra.gmra.mrb[0].mxu0 %v460_v46  ;;  %797 = vmatmul.mubr.bf16.vlgmr.msra.gmra.mrb[0].mxu1 %v476_v47  ;;  %v420_v46 = vld [vmem:[#allocation3 + $0xc0] sm:$0xff]  ;;  %v422_v47 = vld [vmem:[#allocation3 + $0xd0] sm:$0xff] }
  0x99   : > { %726 = vmatprep.mubr.bf16.mxu0 %v463_v48  ;;  %806 = vmatprep.mubr.bf16.mxu1 %v479_v49  ;;  %v452_v48 = vld [vmem:[#allocation3 + $0x1c0] sm:$0xff]  ;;  %v454_v49 = vld [vmem:[#allocation3 + $0x1d0] sm:$0xff]  ;;  %v472_v54 = vpack.c.bf16 %v422_v47, %v420_v46 }
  0x9a   : > { %v488_v55 = vpack.c.bf16 %v454_v49, %v452_v48 }
  0xa0   : > { %727 = vmatmul.mubr.bf16.gmra.mrb[4].mxu0 %v462_v58  ;;  %807 = vmatmul.mubr.bf16.gmra.mrb[4].mxu1 %v478_v59  ;;  %v424_v58 = vld [vmem:[#allocation3 + $0xe0] sm:$0xff]  ;;  %v426_v59 = vld [vmem:[#allocation3 + $0xf0] sm:$0xff] }
  0xa1   : > { %736 = vmatprep.mubr.bf16.mxu0 %v465_v60  ;;  %816 = vmatprep.mubr.bf16.mxu1 %v481_v61  ;;  %v456_v60 = vld [vmem:[#allocation3 + $0x1e0] sm:$0xff]  ;;  %v458_v61 = vld [vmem:[#allocation3 + $0x1f0] sm:$0xff]  ;;  %v474_v62 = vpack.c.bf16 %v426_v59, %v424_v58 }
  0xa2   : > { %v490_v63 = vpack.c.bf16 %v458_v61, %v456_v60 }
  0xa8   : > { %737 = vmatmul.mubr.bf16.gmra.mrb[8].mxu0 %v464_v6  ;;  %817 = vmatmul.mubr.bf16.gmra.mrb[8].mxu1 %v480_v7  ;;  %v2249_v6 = vrot.slane %v1072_v3, %v1080_v4 }
  0xa9   : > { %746 = vmatprep.mubr.bf16.mxu0 %v467_v8  ;;  %826 = vmatprep.mubr.bf16.mxu1 %v483_v9 }
  0xb0   : > { %747 = vmatmul.mubr.bf16.gmra.mrb[12].mxu0 %v466_v18  ;;  %827 = vmatmul.mubr.bf16.gmra.mrb[12].mxu1 %v482_v19 }
  0xb1   : > { %756 = vmatprep.mubr.bf16.mxu0 %v469_v20  ;;  %836 = vmatprep.mubr.bf16.mxu1 %v485_v21 }
  0xb8   : > { %757 = vmatmul.mubr.bf16.gmra.mrb[16].mxu0 %v468_v30  ;;  %837 = vmatmul.mubr.bf16.gmra.mrb[16].mxu1 %v484_v31 }
  0xb9   : > { %766 = vmatprep.mubr.bf16.mxu0 %v471_v32  ;;  %846 = vmatprep.mubr.bf16.mxu1 %v487_v33 }
  0xc0   : > { %767 = vmatmul.mubr.bf16.gmra.mrb[20].mxu0 %v470_v42  ;;  %847 = vmatmul.mubr.bf16.gmra.mrb[20].mxu1 %v486_v43 }
  0xc1   : > { %776 = vmatprep.mubr.bf16.mxu0 %v473_v44  ;;  %856 = vmatprep.mubr.bf16.mxu1 %v489_v45 }
  0xc8   : > { %777 = vmatmul.mubr.bf16.gmra.mrb[24].mxu0 %v472_v54  ;;  %857 = vmatmul.mubr.bf16.gmra.mrb[24].mxu1 %v488_v55 }
  0xc9   : > { %786 = vmatprep.mubr.bf16.mxu0 %v475_v56  ;;  %866 = vmatprep.mubr.bf16.mxu1 %v491_v57 }
  0xd0   : > { %787 = vmatmul.mubr.bf16.gmra.mrb[28].mxu0 %v474_v62  ;;  %867 = vmatmul.mubr.bf16.gmra.mrb[28].mxu1 %v490_v63 }
 0x16b   : > { %v718_v7 = vpop.f32.mrb[0].mxu0  ;;  %v798_v8 = vpop.f32.mrb[0].mxu1 }
 0x16c   : > { %v1084_v9 = vadd.f32 %v2247_v5, %v718_v7  ;;  %v1116_v10 = vadd.f32 %v2247_v5, %v798_v8  ;;  %v720_v11 = vpop.f32.mrb[1].mxu0  ;;  %v800_v12 = vpop.f32.mrb[1].mxu1 }
 0x16d   : > { %v1085_v13 = vadd.f32 %v2249_v6, %v720_v11  ;;  %v1117_v14 = vadd.f32 %v2249_v6, %v800_v12  ;;  %v722_v15 = vpop.f32.mrb[2].mxu0  ;;  %v802_v16 = vpop.f32.mrb[2].mxu1 }
 0x16e   : > { %v1086_v17 = vadd.f32 %v2247_v5, %v722_v15  ;;  %v1118_v18 = vadd.f32 %v2247_v5, %v802_v16  ;;  %v724_v19 = vpop.f32.mrb[3].mxu0  ;;  %v804_v20 = vpop.f32.mrb[3].mxu1 }
 0x16f   : > { %v1729_v21 = vpack.c.bf16 %v1085_v13, %v1084_v9  ;;  %v1745_v22 = vpack.c.bf16 %v1117_v14, %v1116_v10  ;;  %v1087_v23 = vadd.f32 %v2249_v6, %v724_v19  ;;  %v1119_v24 = vadd.f32 %v2249_v6, %v804_v20 }
 0x171   : > { %1340 = vst [vmem:[%s2260_s25] sm:$0xff] %v1729_v21  ;;  %1356 = vst [vmem:[%s2260_s25 + $0x80] sm:$0xff] %v1745_v22  ;;  %v1730_v25 = vpack.c.bf16 %v1087_v23, %v1086_v17  ;;  %v1746_v26 = vpack.c.bf16 %v1119_v24, %v1118_v18 }
 0x173   : > { %1341 = vst [vmem:[%s2260_s25 + $0x8] sm:$0xff] %v1730_v25  ;;  %1357 = vst [vmem:[%s2260_s25 + $0x88] sm:$0xff] %v1746_v26  ;;  %v728_v27 = vpop.f32.mrb[4].mxu0  ;;  %v808_v28 = vpop.f32.mrb[4].mxu1 }
 0x174   : > { %v1088_v29 = vadd.f32 %v2247_v5, %v728_v27  ;;  %v1120_v30 = vadd.f32 %v2247_v5, %v808_v28  ;;  %v730_v31 = vpop.f32.mrb[5].mxu0  ;;  %v810_v32 = vpop.f32.mrb[5].mxu1 }
 0x175   : > { %v1089_v33 = vadd.f32 %v2249_v6, %v730_v31  ;;  %v1121_v34 = vadd.f32 %v2249_v6, %v810_v32  ;;  %v732_v35 = vpop.f32.mrb[6].mxu0  ;;  %v812_v36 = vpop.f32.mrb[6].mxu1 }
 0x176   : > { %v1090_v37 = vadd.f32 %v2247_v5, %v732_v35  ;;  %v1122_v38 = vadd.f32 %v2247_v5, %v812_v36  ;;  %v734_v39 = vpop.f32.mrb[7].mxu0  ;;  %v814_v40 = vpop.f32.mrb[7].mxu1 }
 0x177   : > { %v1731_v41 = vpack.c.bf16 %v1089_v33, %v1088_v29  ;;  %v1747_v42 = vpack.c.bf16 %v1121_v34, %v1120_v30  ;;  %v1091_v43 = vadd.f32 %v2249_v6, %v734_v39  ;;  %v1123_v44 = vadd.f32 %v2249_v6, %v814_v40 }
 0x179   : > { %1342 = vst [vmem:[%s2260_s25 + $0x10] sm:$0xff] %v1731_v41  ;;  %1358 = vst [vmem:[%s2260_s25 + $0x90] sm:$0xff] %v1747_v42  ;;  %v1732_v45 = vpack.c.bf16 %v1091_v43, %v1090_v37  ;;  %v1748_v46 = vpack.c.bf16 %v1123_v44, %v1122_v38 }
 0x17b   : > { %1343 = vst [vmem:[%s2260_s25 + $0x18] sm:$0xff] %v1732_v45  ;;  %1359 = vst [vmem:[%s2260_s25 + $0x98] sm:$0xff] %v1748_v46  ;;  %v738_v47 = vpop.f32.mrb[8].mxu0  ;;  %v818_v48 = vpop.f32.mrb[8].mxu1 }
 0x17c   : > { %v1092_v49 = vadd.f32 %v2247_v5, %v738_v47  ;;  %v1124_v50 = vadd.f32 %v2247_v5, %v818_v48  ;;  %v740_v51 = vpop.f32.mrb[9].mxu0  ;;  %v820_v52 = vpop.f32.mrb[9].mxu1 }
 0x17d   : > { %v1093_v53 = vadd.f32 %v2249_v6, %v740_v51  ;;  %v1125_v54 = vadd.f32 %v2249_v6, %v820_v52  ;;  %v742_v55 = vpop.f32.mrb[10].mxu0  ;;  %v822_v56 = vpop.f32.mrb[10].mxu1 }
 0x17e   : > { %v1094_v57 = vadd.f32 %v2247_v5, %v742_v55  ;;  %v1126_v58 = vadd.f32 %v2247_v5, %v822_v56  ;;  %v744_v59 = vpop.f32.mrb[11].mxu0  ;;  %v824_v60 = vpop.f32.mrb[11].mxu1 }
 0x17f   : > { %v1733_v61 = vpack.c.bf16 %v1093_v53, %v1092_v49  ;;  %v1749_v62 = vpack.c.bf16 %v1125_v54, %v1124_v50  ;;  %v1095_v63 = vadd.f32 %v2249_v6, %v744_v59  ;;  %v1127_v0 = vadd.f32 %v2249_v6, %v824_v60 }
 0x181   : > { %1344 = vst [vmem:[%s2260_s25 + $0x20] sm:$0xff] %v1733_v61  ;;  %1360 = vst [vmem:[%s2260_s25 + $0xa0] sm:$0xff] %v1749_v62  ;;  %v1734_v1 = vpack.c.bf16 %v1095_v63, %v1094_v57  ;;  %v1750_v2 = vpack.c.bf16 %v1127_v0, %v1126_v58 }
 0x183   : > { %1345 = vst [vmem:[%s2260_s25 + $0x28] sm:$0xff] %v1734_v1  ;;  %1361 = vst [vmem:[%s2260_s25 + $0xa8] sm:$0xff] %v1750_v2  ;;  %v748_v3 = vpop.f32.mrb[12].mxu0  ;;  %v828_v4 = vpop.f32.mrb[12].mxu1 }
 0x184   : > { %v1096_v7 = vadd.f32 %v2247_v5, %v748_v3  ;;  %v1128_v8 = vadd.f32 %v2247_v5, %v828_v4  ;;  %v750_v9 = vpop.f32.mrb[13].mxu0  ;;  %v830_v10 = vpop.f32.mrb[13].mxu1 }
 0x185   : > { %v1097_v11 = vadd.f32 %v2249_v6, %v750_v9  ;;  %v1129_v12 = vadd.f32 %v2249_v6, %v830_v10  ;;  %v752_v13 = vpop.f32.mrb[14].mxu0  ;;  %v832_v14 = vpop.f32.mrb[14].mxu1 }
 0x186   : > { %v1098_v15 = vadd.f32 %v2247_v5, %v752_v13  ;;  %v1130_v16 = vadd.f32 %v2247_v5, %v832_v14  ;;  %v754_v17 = vpop.f32.mrb[15].mxu0  ;;  %v834_v18 = vpop.f32.mrb[15].mxu1 }
 0x187   : > { %v1735_v19 = vpack.c.bf16 %v1097_v11, %v1096_v7  ;;  %v1751_v20 = vpack.c.bf16 %v1129_v12, %v1128_v8  ;;  %v1099_v21 = vadd.f32 %v2249_v6, %v754_v17  ;;  %v1131_v22 = vadd.f32 %v2249_v6, %v834_v18 }
 0x189   : > { %1346 = vst [vmem:[%s2260_s25 + $0x30] sm:$0xff] %v1735_v19  ;;  %1362 = vst [vmem:[%s2260_s25 + $0xb0] sm:$0xff] %v1751_v20  ;;  %v1736_v23 = vpack.c.bf16 %v1099_v21, %v1098_v15  ;;  %v1752_v24 = vpack.c.bf16 %v1131_v22, %v1130_v16 }
 0x18b   : > { %1347 = vst [vmem:[%s2260_s25 + $0x38] sm:$0xff] %v1736_v23  ;;  %1363 = vst [vmem:[%s2260_s25 + $0xb8] sm:$0xff] %v1752_v24  ;;  %v758_v25 = vpop.f32.mrb[16].mxu0  ;;  %v838_v26 = vpop.f32.mrb[16].mxu1 }
 0x18c   : > { %v1100_v27 = vadd.f32 %v2247_v5, %v758_v25  ;;  %v1132_v28 = vadd.f32 %v2247_v5, %v838_v26  ;;  %v760_v29 = vpop.f32.mrb[17].mxu0  ;;  %v840_v30 = vpop.f32.mrb[17].mxu1 }
 0x18d   : > { %v1101_v31 = vadd.f32 %v2249_v6, %v760_v29  ;;  %v1133_v32 = vadd.f32 %v2249_v6, %v840_v30  ;;  %v762_v33 = vpop.f32.mrb[18].mxu0  ;;  %v842_v34 = vpop.f32.mrb[18].mxu1 }
 0x18e   : > { %v1102_v35 = vadd.f32 %v2247_v5, %v762_v33  ;;  %v1134_v36 = vadd.f32 %v2247_v5, %v842_v34  ;;  %v764_v37 = vpop.f32.mrb[19].mxu0  ;;  %v844_v38 = vpop.f32.mrb[19].mxu1 }
 0x18f   : > { %v1737_v39 = vpack.c.bf16 %v1101_v31, %v1100_v27  ;;  %v1753_v40 = vpack.c.bf16 %v1133_v32, %v1132_v28  ;;  %v1103_v41 = vadd.f32 %v2249_v6, %v764_v37  ;;  %v1135_v42 = vadd.f32 %v2249_v6, %v844_v38 }
 0x191   : > { %1348 = vst [vmem:[%s2260_s25 + $0x40] sm:$0xff] %v1737_v39  ;;  %1364 = vst [vmem:[%s2260_s25 + $0xc0] sm:$0xff] %v1753_v40  ;;  %v1738_v43 = vpack.c.bf16 %v1103_v41, %v1102_v35  ;;  %v1754_v44 = vpack.c.bf16 %v1135_v42, %v1134_v36 }
 0x193   : > { %1349 = vst [vmem:[%s2260_s25 + $0x48] sm:$0xff] %v1738_v43  ;;  %1365 = vst [vmem:[%s2260_s25 + $0xc8] sm:$0xff] %v1754_v44  ;;  %v768_v45 = vpop.f32.mrb[20].mxu0  ;;  %v848_v46 = vpop.f32.mrb[20].mxu1  ;;  %v1478_v43 = vld [vmem:[%s2260_s25 + $0x10] sm:$0xff] (%p2461_p5)  ;;  %v1480_v44 = vld [vmem:[%s2260_s25 + $0x18] sm:$0xff] (%p2461_p5) }
 0x194   : > { %v1104_v47 = vadd.f32 %v2247_v5, %v768_v45  ;;  %v1136_v48 = vadd.f32 %v2247_v5, %v848_v46  ;;  %v770_v49 = vpop.f32.mrb[21].mxu0  ;;  %v850_v50 = vpop.f32.mrb[21].mxu1  ;;  %v1482_v45 = vld [vmem:[%s2260_s25 + $0x20] sm:$0xff] (%p2461_p5)  ;;  %v1484_v46 = vld [vmem:[%s2260_s25 + $0x28] sm:$0xff] (%p2461_p5)  ;;  %1479 = vst [vmem:[%s2359_s29 + $0x30] sm:$0xff] (%p2461_p5), %v1478_v43  ;;  %1481 = vst [vmem:[%s2359_s29 + $0x48] sm:$0xff] (%p2461_p5), %v1480_v44 }
 0x195   : > { %v1105_v51 = vadd.f32 %v2249_v6, %v770_v49  ;;  %v1137_v52 = vadd.f32 %v2249_v6, %v850_v50  ;;  %v772_v53 = vpop.f32.mrb[22].mxu0  ;;  %v852_v54 = vpop.f32.mrb[22].mxu1  ;;  %1483 = vst [vmem:[%s2359_s29 + $0x60] sm:$0xff] (%p2461_p5), %v1482_v45  ;;  %1485 = vst [vmem:[%s2359_s29 + $0x78] sm:$0xff] (%p2461_p5), %v1484_v46 }
 0x196   : > { %v1106_v55 = vadd.f32 %v2247_v5, %v772_v53  ;;  %v1138_v56 = vadd.f32 %v2247_v5, %v852_v54  ;;  %v774_v57 = vpop.f32.mrb[23].mxu0  ;;  %v854_v58 = vpop.f32.mrb[23].mxu1 }
 0x197   : > { %v1739_v59 = vpack.c.bf16 %v1105_v51, %v1104_v47  ;;  %v1755_v60 = vpack.c.bf16 %v1137_v52, %v1136_v48  ;;  %v1107_v61 = vadd.f32 %v2249_v6, %v774_v57  ;;  %v1139_v62 = vadd.f32 %v2249_v6, %v854_v58  ;;  %v1486_v47 = vld [vmem:[%s2260_s25 + $0x30] sm:$0xff] (%p2461_p5)  ;;  %v1488_v48 = vld [vmem:[%s2260_s25 + $0x38] sm:$0xff] (%p2461_p5)  ;;  %v1506_v57 = vld [vmem:[%s2260_s25 + $0x80] sm:$0xff] (%p2461_p5) }
 0x198   : > { %v1490_v49 = vld [vmem:[%s2260_s25 + $0x40] sm:$0xff] (%p2461_p5)  ;;  %1487 = vst [vmem:[%s2359_s29 + $0x90] sm:$0xff] (%p2461_p5), %v1486_v47  ;;  %1489 = vst [vmem:[%s2359_s29 + $0xa8] sm:$0xff] (%p2461_p5), %v1488_v48  ;;  %v1508_v58 = vld [vmem:[%s2260_s25 + $0x88] sm:$0xff] (%p2461_p5) }
 0x199   : > { %1350 = vst [vmem:[%s2260_s25 + $0x50] sm:$0xff] %v1739_v59  ;;  %1366 = vst [vmem:[%s2260_s25 + $0xd0] sm:$0xff] %v1755_v60  ;;  %v1740_v63 = vpack.c.bf16 %v1107_v61, %v1106_v55  ;;  %v1756_v0 = vpack.c.bf16 %v1139_v62, %v1138_v56  ;;  %v1510_v59 = vld [vmem:[%s2260_s25 + $0x90] sm:$0xff] (%p2461_p5)  ;;  %v1512_v60 = vld [vmem:[%s2260_s25 + $0x98] sm:$0xff] (%p2461_p5) }
 0x19a   : > { %1491 = vst [vmem:[%s2359_s29 + $0xc0] sm:$0xff] (%p2461_p5), %v1490_v49  ;;  %v1492_v50 = vld [vmem:[%s2260_s25 + $0x48] sm:$0xff] (%p2461_p5)  ;;  %1507 = vst [vmem:[%s2359_s29 + $0x180] sm:$0xff] (%p2461_p5), %v1506_v57  ;;  %v1514_v61 = vld [vmem:[%s2260_s25 + $0xa0] sm:$0xff] (%p2461_p5) }
 0x19b   : > { %1351 = vst [vmem:[%s2260_s25 + $0x58] sm:$0xff] %v1740_v63  ;;  %1367 = vst [vmem:[%s2260_s25 + $0xd8] sm:$0xff] %v1756_v0  ;;  %v778_v1 = vpop.f32.mrb[24].mxu0  ;;  %v858_v2 = vpop.f32.mrb[24].mxu1  ;;  %v1516_v62 = vld [vmem:[%s2260_s25 + $0xa8] sm:$0xff] (%p2461_p5)  ;;  %v1518_v63 = vld [vmem:[%s2260_s25 + $0xb0] sm:$0xff] (%p2461_p5) }
 0x19c   : > { %v1108_v3 = vadd.f32 %v2247_v5, %v778_v1  ;;  %v1140_v4 = vadd.f32 %v2247_v5, %v858_v2  ;;  %v780_v7 = vpop.f32.mrb[25].mxu0  ;;  %v860_v8 = vpop.f32.mrb[25].mxu1  ;;  %1493 = vst [vmem:[%s2359_s29 + $0xd8] sm:$0xff] (%p2461_p5), %v1492_v50  ;;  %1509 = vst [vmem:[%s2359_s29 + $0x198] sm:$0xff] (%p2461_p5), %v1508_v58  ;;  %v1520_v0 = vld [vmem:[%s2260_s25 + $0xb8] sm:$0xff] (%p2461_p5)  ;;  %v1522_v1 = vld [vmem:[%s2260_s25 + $0xc0] sm:$0xff] (%p2461_p5) }
 0x19d   : > { %v1109_v9 = vadd.f32 %v2249_v6, %v780_v7  ;;  %v1141_v10 = vadd.f32 %v2249_v6, %v860_v8  ;;  %v782_v11 = vpop.f32.mrb[26].mxu0  ;;  %v862_v12 = vpop.f32.mrb[26].mxu1  ;;  %1511 = vst [vmem:[%s2359_s29 + $0x1b0] sm:$0xff] (%p2461_p5), %v1510_v59  ;;  %1513 = vst [vmem:[%s2359_s29 + $0x1c8] sm:$0xff] (%p2461_p5), %v1512_v60  ;;  %v1524_v2 = vld [vmem:[%s2260_s25 + $0xc8] sm:$0xff] (%p2461_p5) }
 0x19e   : > { %v1110_v13 = vadd.f32 %v2247_v5, %v782_v11  ;;  %v1142_v14 = vadd.f32 %v2247_v5, %v862_v12  ;;  %v784_v15 = vpop.f32.mrb[27].mxu0  ;;  %v864_v16 = vpop.f32.mrb[27].mxu1  ;;  %1515 = vst [vmem:[%s2359_s29 + $0x1e0] sm:$0xff] (%p2461_p5), %v1514_v61  ;;  %1517 = vst [vmem:[%s2359_s29 + $0x1f8] sm:$0xff] (%p2461_p5), %v1516_v62 }
 0x19f   : > { %v1741_v17 = vpack.c.bf16 %v1109_v9, %v1108_v3  ;;  %v1757_v18 = vpack.c.bf16 %v1141_v10, %v1140_v4  ;;  %v1111_v19 = vadd.f32 %v2249_v6, %v784_v15  ;;  %v1143_v20 = vadd.f32 %v2249_v6, %v864_v16  ;;  %1519 = vst [vmem:[%s2359_s29 + $0x210] sm:$0xff] (%p2461_p5), %v1518_v63 }
 0x1a0   : > { %v1494_v51 = vld [vmem:[%s2260_s25 + $0x50] sm:$0xff] (%p2461_p5)  ;;  %1521 = vst [vmem:[%s2359_s29 + $0x228] sm:$0xff] (%p2461_p5), %v1520_v0  ;;  %1523 = vst [vmem:[%s2359_s29 + $0x240] sm:$0xff] (%p2461_p5), %v1522_v1 }
 0x1a1   : > { %1352 = vst [vmem:[%s2260_s25 + $0x60] sm:$0xff] %v1741_v17  ;;  %1368 = vst [vmem:[%s2260_s25 + $0xe0] sm:$0xff] %v1757_v18  ;;  %v1742_v21 = vpack.c.bf16 %v1111_v19, %v1110_v13  ;;  %v1758_v22 = vpack.c.bf16 %v1143_v20, %v1142_v14  ;;  %v1526_v3 = vld [vmem:[%s2260_s25 + $0xd0] sm:$0xff] (%p2461_p5) }
 0x1a2   : > { %v1496_v52 = vld [vmem:[%s2260_s25 + $0x58] sm:$0xff] (%p2461_p5)  ;;  %1495 = vst [vmem:[%s2359_s29 + $0xf0] sm:$0xff] (%p2461_p5), %v1494_v51  ;;  %1525 = vst [vmem:[%s2359_s29 + $0x258] sm:$0xff] (%p2461_p5), %v1524_v2 }
 0x1a3   : > { %1353 = vst [vmem:[%s2260_s25 + $0x68] sm:$0xff] %v1742_v21  ;;  %1369 = vst [vmem:[%s2260_s25 + $0xe8] sm:$0xff] %v1758_v22  ;;  %v788_v23 = vpop.f32.mrb[28].mxu0  ;;  %v868_v24 = vpop.f32.mrb[28].mxu1  ;;  %v1528_v4 = vld [vmem:[%s2260_s25 + $0xd8] sm:$0xff] (%p2461_p5) }
 0x1a4   : > { %v1112_v25 = vadd.f32 %v2247_v5, %v788_v23  ;;  %v1144_v26 = vadd.f32 %v2247_v5, %v868_v24  ;;  %v790_v27 = vpop.f32.mrb[29].mxu0  ;;  %v870_v28 = vpop.f32.mrb[29].mxu1  ;;  %1497 = vst [vmem:[%s2359_s29 + $0x108] sm:$0xff] (%p2461_p5), %v1496_v52  ;;  %1527 = vst [vmem:[%s2359_s29 + $0x270] sm:$0xff] (%p2461_p5), %v1526_v3 }
 0x1a5   : > { %v1113_v29 = vadd.f32 %v2249_v6, %v790_v27  ;;  %v1145_v30 = vadd.f32 %v2249_v6, %v870_v28  ;;  %v792_v31 = vpop.f32.mrb[30].mxu0  ;;  %v872_v32 = vpop.f32.mrb[30].mxu1  ;;  %1378 = sbr.rel (!%p2461_p5) target bundleno = 437 (0x1b5), region = 52  ;;  %1529 = vst [vmem:[%s2359_s29 + $0x288] sm:$0xff] (%p2461_p5), %v1528_v4 }
 0x1a6   : > { %v1114_v33 = vadd.f32 %v2247_v5, %v792_v31  ;;  %v1146_v34 = vadd.f32 %v2247_v5, %v872_v32  ;;  %v794_v35 = vpop.f32.mrb[31].mxu0  ;;  %v874_v36 = vpop.f32.mrb[31].mxu1  ;;  %v1474_v5 = vld [vmem:[%s2260_s25] sm:$0xff] (%p2461_p5) }
 0x1a7   : > { %v1743_v37 = vpack.c.bf16 %v1113_v29, %v1112_v25  ;;  %v1759_v38 = vpack.c.bf16 %v1145_v30, %v1144_v26  ;;  %v1115_v39 = vadd.f32 %v2249_v6, %v794_v35  ;;  %v1147_v40 = vadd.f32 %v2249_v6, %v874_v36  ;;  %v1476_v6 = vld [vmem:[%s2260_s25 + $0x8] sm:$0xff] (%p2461_p5)  ;;  %1475 = vst [vmem:[%s2359_s29] sm:$0xff] (%p2461_p5), %v1474_v5 }
 0x1a8   : > { %1477 = vst [vmem:[%s2359_s29 + $0x18] sm:$0xff] (%p2461_p5), %v1476_v6  ;;  %v1498_v53 = vld [vmem:[%s2260_s25 + $0x60] sm:$0xff] (%p2461_p5) }
 0x1a9   : > { %1354 = vst [vmem:[%s2260_s25 + $0x70] sm:$0xff] %v1743_v37  ;;  %1370 = vst [vmem:[%s2260_s25 + $0xf0] sm:$0xff] %v1759_v38  ;;  %v1744_v41 = vpack.c.bf16 %v1115_v39, %v1114_v33  ;;  %v1760_v42 = vpack.c.bf16 %v1147_v40, %v1146_v34  ;;  %v1530_v7 = vld [vmem:[%s2260_s25 + $0xe0] sm:$0xff] (%p2461_p5) }
 0x1aa   : > { %v1500_v54 = vld [vmem:[%s2260_s25 + $0x68] sm:$0xff] (%p2461_p5)  ;;  %1499 = vst [vmem:[%s2359_s29 + $0x120] sm:$0xff] (%p2461_p5), %v1498_v53  ;;  %1531 = vst [vmem:[%s2359_s29 + $0x2a0] sm:$0xff] (%p2461_p5), %v1530_v7 }
 0x1ab   : > { %1355 = vst [vmem:[%s2260_s25 + $0x78] sm:$0xff] %v1744_v41  ;;  %1371 = vst [vmem:[%s2260_s25 + $0xf8] sm:$0xff] %v1760_v42  ;;  %v1532_v8 = vld [vmem:[%s2260_s25 + $0xe8] sm:$0xff] (%p2461_p5) }
 0x1ac   : > { %1501 = vst [vmem:[%s2359_s29 + $0x138] sm:$0xff] %v1500_v54  ;;  %1533 = vst [vmem:[%s2359_s29 + $0x2b8] sm:$0xff] %v1532_v8 }
 0x1b0   : > { %v1502_v55 = vld [vmem:[%s2260_s25 + $0x70] sm:$0xff] }
 0x1b1   : > { %1503 = vst [vmem:[%s2359_s29 + $0x150] sm:$0xff] %v1502_v55  ;;  %v1534_v9 = vld [vmem:[%s2260_s25 + $0xf0] sm:$0xff] }
 0x1b2   : > { %v1504_v56 = vld [vmem:[%s2260_s25 + $0x78] sm:$0xff]  ;;  %1535 = vst [vmem:[%s2359_s29 + $0x2d0] sm:$0xff] %v1534_v9 }
 0x1b3   : > { %1505 = vst [vmem:[%s2359_s29 + $0x168] sm:$0xff] %v1504_v56  ;;  %v1536_v10 = vld [vmem:[%s2260_s25 + $0xf8] sm:$0xff] }
 0x1b4   : > { %1537 = vst [vmem:[%s2359_s29 + $0x2e8] sm:$0xff] %v1536_v10 }
 0x1b5 PF: > { %s17_s17 = sadd.s32 1, %s2025_s17   ;;  %s2462_s12 = smov %s2009_s13 }
 0x1b6   : > { %p14_p9 = scmp.ge.s32.totalorder %s17_s17, 5   ;;  %s2463_s13 = smov %s2013_s14 }
 0x1b7   : > { %s2464_s14 = smov %s2163_s24  ;;  %s2465_s15 = smov %s2021_s16 }
 0x1b8   : > { %s2466_s16 = smov %s2468_s27  ;;  %16 = sbr.rel (!%p14_p9) target bundleno = 5 (0x5), region = 127 }
 0x1bf   :  { %1553 = vsyncpa [#allocation4], 1 }
 0x1c0   :  { %1555 = vsyncpa [#allocation4 + $0x1], 1 }
 0x1c1   :  { %1556 = vsyncpa [#allocation6], 1 }
 0x1c2   :  { %1558 = vsyncpa [#allocation6 + $0x1], 1 }

// kernel: mha_forward.3
= control target key start
LH: loop header
LB: loop body
LE: loop exit
PB: predicated region body
PF: predicated region fallthrough
CT: control target
= control target key end

     0   :  { %10 = vsyncpa [#allocation5], 0  ;;  %s10017_s0 = inlined_call_operand.vmem [shape: bf16[2,1,128,256], index: 0, kind: input, shape index: {}]   ;;  %s10018_s1 = inlined_call_operand.vmem [shape: bf16[2,1,128,256], index: 1, kind: input, shape index: {}]   ;;  %s10019_s2 = inlined_call_operand.vmem [shape: bf16[2,1,128,256], index: 2, kind: input, shape index: {}]   ;;  %s10020_s3 = inlined_call_operand.vmem [shape: bf16[256,256], index: 3, kind: input, shape index: {}]   ;;  %s10021_s4 = inlined_call_operand.vmem [shape: f32[1,256], index: 4, kind: input, shape index: {}]   ;;  %s10022_s5 = inlined_call_operand.hbm [shape: f32[2,128,256], index: 5, kind: output, shape index: {}]  }
   0x1   :  { %12 = vsyncpa [#allocation5 + $0x1], 0  ;;  %s7146_s18 = smov 0   ;;  %s7148_s19 = smov 0  }
   0x2   :  { %s7150_s20 = smov 0   ;;  %s7152_s21 = smov 0  }
   0x3   :  { %s7154_s22 = smov 0   ;;  %s7156_s23 = smov 0  }
   0x4 LB: > { %s5317_s24 = sadd.s32 4294967295, %s7108_s23   ;;  %s5318_s25 = sadd.s32 4294967294, %s7108_s23   ;;  %s7108_s23 = sphi %s7156_s23, %s18_s23   ;;  %s7104_s22 = sphi %s7154_s22, %s10460_s22   ;;  %s7100_s21 = sphi %s7152_s21, %s10459_s21   ;;  %s7096_s20 = sphi %s7150_s20, %s10458_s20   ;;  %s7092_s19 = sphi %s7148_s19, %s10457_s19   ;;  %s7088_s18 = sphi %s7146_s18, %s10456_s18  }
   0x5   : > { %s30_s26 = sadd.s32 1, %s7104_s22  ;;  %s163_s27 = sadd.s32 1, %s7096_s20 }
   0x6   : > { %p32_p0 = scmp.ge.s32.totalorder %s30_s26, 2  ;;  %p173_p1 = scmp.ne.s32.totalorder %s7096_s20, %s7092_s19 }
   0x7   : > { %p174_p2 = scmp.eq.s32.totalorder %s5317_s24, 1  ;;  %p179_p3 = scmp.ne.s32.totalorder %s7092_s19, %s7088_s18 }
   0x8   : > { %s10462_s26 = smov (%p32_p0, %s30_s26), 0  ;;  %p180_p5 = scmp.eq.s32.totalorder %s5318_s25, 1 }
   0x9   : > { %p7186_p4 = por %p174_p2, %p173_p1  ;;  %s160_s29 = ssub.s32 %s7104_s22, %s10462_s26 }
   0xa   : > { %p5321_p6 = scmp.ge.s32.totalorder %s7108_s23, 1  ;;  %p161_p7 = scmp.eq.s32.totalorder %s160_s29, 0 }
   0xb   : > { %p7193_p8 = por %p180_p5, %p179_p3  ;;  %p240_p9 = scmp.lt.s32.totalorder %s7108_s23, 3 }
   0xc   : > { %s7199_s6 = scalar_select %p161_p7, %s7096_s20, %s163_s27  }
   0xd   : > { %p241_p10 = pnand %p5321_p6, %p240_p9 }
   0xf   : > { %244 = sbr.rel (%p241_p10) target bundleno = 4493 (0x118d), region = 40 }
  0x16   : > { %p290_p11 = scmp.lt.s32.totalorder %s7100_s21, 1  ;;  %vm482_vm0 = vcmask 261120   ;;  %s7110_s12 = smov 96   ;;  %vm1455_vm1 = vcmask 523520   ;;  %vm1986_vm2 = vcmask 785920   ;;  %vm2517_vm3 = vcmask 1048320  }
  0x17   : > { %s7111_s25 = smov 64   ;;  %s7112_s27 = smov 32  }
  0x18   : > { %s291_s7 = scalar_select %p290_p11, %s7100_s21, 1 }
  0x19   : > { %s5481_s13 = sshll.u32 %s7100_s21, 12  ;;  %s7113_s29 = smov [#allocation4]  }
  0x1a   : > { %s7203_s8 = sshll.u32 %s291_s7, 7  ;;  %s9961_s17 = scalar_lea.hbm %s10022_s5, %s5481_s13 }
  0x1b   : > { %s7209_s11 = scalar_lea.vmem %s10018_s1, %s7203_s8  ;;  %s7234_s15 = scalar_lea.vmem %s10017_s0, %s7203_s8 }
  0x1c   : > { %v7212_v0 = vld [vmem:[%s7209_s11] ss:$8 sps:$4 sm:$0xff]   ;;  %v7215_v1 = vld [vmem:[%s7209_s11 + $0x10] ss:$8 sps:$4 sm:$0xff]   ;;  %s7323_s24 = scalar_lea.vmem %s10019_s2, %s7203_s8  ;;  %s7034_s7 = sshll.u32 %s7113_s29, 4  ;;  %s7035_s7 = int_to_ptr.vmem [resolvable:$false] %s7034_s7 }
  0x1d   : > { %6250 = vmatprep.subr.msk.bf16.mxu1 %vm482_vm0, %v7212_v0  ;;  %v508_v2 = vsel %vm482_vm0, %v7212_v0, 0  ;;  %957 = vrot.lane.b32.xlu0 %v7212_v0, %s7110_s12  ;;  %v7228_v3 = vld [vmem:[%s7209_s11 + $0x20] ss:$8 sps:$4 sm:$0xff]   ;;  %v511_v4 = vsel %vm482_vm0, %v7215_v1, 0  ;;  %v7250_v7 = vld [vmem:[%s7209_s11 + $0x30] ss:$8 sps:$4 sm:$0xff]  }
  0x1e   : > { %5739 = vmatpush3.bf16.xpose.msra.mxu1 %v508_v2  ;;  %959 = vrot.lane.b32.xlu1 %v7215_v1, %s7110_s12  ;;  %v7241_v5 = vld [vmem:[%s7234_s15] ss:$8 sps:$4 sm:$0xff]   ;;  %v514_v6 = vsel %vm482_vm0, %v7228_v3, 0  ;;  %v517_v8 = vsel %vm482_vm0, %v7250_v7, 0  ;;  %v7264_v11 = vld [vmem:[%s7209_s11 + $0x50] ss:$8 sps:$4 sm:$0xff]  }
  0x1f   : > { %6251 = vmatprep.subr.msk.bf16.mxu1 %vm482_vm0, %v7215_v1  ;;  %5754 = vmatprep.mubr.msk.bf16.mxu1 %vm482_vm0, %v7241_v5  ;;  %v7257_v9 = vld [vmem:[%s7209_s11 + $0x40] ss:$8 sps:$4 sm:$0xff]   ;;  %v523_v12 = vsel %vm482_vm0, %v7264_v11, 0  ;;  %v7278_v15 = vld [vmem:[%s7209_s11 + $0x70] ss:$8 sps:$4 sm:$0xff]   ;;  %s7036_s8 = scalar_lea.vmem %s7035_s7, 8192 }
  0x20   : > { %v520_v10 = vsel %vm482_vm0, %v7257_v9, 0  ;;  %v7271_v13 = vld [vmem:[%s7209_s11 + $0x60] ss:$8 sps:$4 sm:$0xff]   ;;  %v529_v16 = vsel %vm482_vm0, %v7278_v15, 0  ;;  %v7285_v17 = vld [vmem:[%s7234_s15 + $0x10] ss:$8 sps:$4 sm:$0xff]  }
  0x21   : > { %961 = vrot.lane.b32.xlu0 %v7228_v3, %s7110_s12  ;;  %v526_v14 = vsel %vm482_vm0, %v7271_v13, 0  ;;  %v7288_v18 = vld [vmem:[%s7234_s15 + $0x20] ss:$8 sps:$4 sm:$0xff]   ;;  %v7295_v19 = vld [vmem:[%s7234_s15 + $0x30] ss:$8 sps:$4 sm:$0xff]  }
  0x22   : > { %v7298_v20 = vld [vmem:[%s7234_s15 + $0x40] ss:$8 sps:$4 sm:$0xff]   ;;  %v7305_v21 = vld [vmem:[%s7234_s15 + $0x50] ss:$8 sps:$4 sm:$0xff]  }
  0x23   : > { %v7308_v22 = vld [vmem:[%s7234_s15 + $0x60] ss:$8 sps:$4 sm:$0xff]   ;;  %v7315_v23 = vld [vmem:[%s7234_s15 + $0x70] ss:$8 sps:$4 sm:$0xff]  }
  0x24   : > { %v7326_v24 = vld [vmem:[%s7323_s24] ss:$8 sps:$4 sm:$0xff]   ;;  %v7331_v25 = vld [vmem:[%s7323_s24 + $0x10] ss:$8 sps:$4 sm:$0xff]  }
  0x25   : > { %v7336_v26 = vld [vmem:[%s7323_s24 + $0x20] ss:$8 sps:$4 sm:$0xff]   ;;  %v7341_v27 = vld [vmem:[%s7323_s24 + $0x30] ss:$8 sps:$4 sm:$0xff]  }
  0x26   : > { %5741 = vmatpush3.bf16.xpose.msra.mxu1 %v511_v4  ;;  %v7346_v28 = vld [vmem:[%s7323_s24 + $0x40] ss:$8 sps:$4 sm:$0xff]   ;;  %v7351_v29 = vld [vmem:[%s7323_s24 + $0x50] ss:$8 sps:$4 sm:$0xff]  }
  0x27   : > { %6252 = vmatprep.subr.msk.bf16.mxu1 %vm482_vm0, %v7228_v3  ;;  %v7356_v30 = vld [vmem:[%s7323_s24 + $0x60] ss:$8 sps:$4 sm:$0xff]   ;;  %v7359_v31 = vld [vmem:[%s7323_s24 + $0x70] ss:$8 sps:$4 sm:$0xff]  }
  0x2e   : > { %5743 = vmatpush3.bf16.xpose.msra.mxu1 %v514_v6 }
  0x2f   : > { %6253 = vmatprep.subr.msk.bf16.mxu1 %vm482_vm0, %v7250_v7 }
  0x36   : > { %5745 = vmatpush3.bf16.xpose.msra.mxu1 %v517_v8 }
  0x37   : > { %6254 = vmatprep.subr.msk.bf16.mxu1 %vm482_vm0, %v7257_v9 }
  0x3e   : > { %5747 = vmatpush3.bf16.xpose.msra.mxu1 %v520_v10 }
  0x3f   : > { %6255 = vmatprep.subr.msk.bf16.mxu1 %vm482_vm0, %v7264_v11 }
  0x46   : > { %5749 = vmatpush3.bf16.xpose.msra.mxu1 %v523_v12 }
  0x47   : > { %6256 = vmatprep.subr.msk.bf16.mxu1 %vm482_vm0, %v7271_v13 }
  0x4e   : > { %5751 = vmatpush3.bf16.xpose.msra.mxu1 %v526_v14 }
  0x4f   : > { %6257 = vmatprep.subr.msk.bf16.mxu1 %vm482_vm0, %v7278_v15 }
  0x56   : > { %5753 = vmatpush3.bf16.xpose.msra.mxu1 %v529_v16 }
  0x57   : > { %5770 = vmatprep.subr.bf16.mxu1 %v7326_v24 }
  0x5d   : > { %5755 = vmatmul.mubr.msk.bf16.vlgmr.msra.gmra.mrb[0].mxu1 %vm482_vm0, %v7285_v17 }
  0x5e   : > { %5758 = vmatprep.mubr.msk.bf16.mxu1 %vm482_vm0, %v7288_v18  ;;  %5771 = vmatpush3.bf16.msra.mxu1 %v7326_v24 }
  0x5f   : > { %5772 = vmatprep.subr.bf16.mxu1 %v7331_v25 }
  0x62   : > { %5773 = vmatpush3.bf16.msra.mxu1 %v7331_v25 }
  0x63   : > { %5774 = vmatprep.subr.bf16.mxu1 %v7336_v26 }
  0x65   : > { %5759 = vmatmul.mubr.msk.bf16.gmra.mrb[4].mxu1 %vm482_vm0, %v7295_v19 }
  0x66   : > { %5762 = vmatprep.mubr.msk.bf16.mxu1 %vm482_vm0, %v7298_v20  ;;  %5775 = vmatpush3.bf16.msra.mxu1 %v7336_v26 }
  0x67   : > { %5776 = vmatprep.subr.bf16.mxu1 %v7341_v27 }
  0x6a   : > { %5777 = vmatpush3.bf16.msra.mxu1 %v7341_v27 }
  0x6b   : > { %5778 = vmatprep.subr.bf16.mxu1 %v7346_v28 }
  0x6d   : > { %5763 = vmatmul.mubr.msk.bf16.gmra.mrb[8].mxu1 %vm482_vm0, %v7305_v21 }
  0x6e   : > { %5766 = vmatprep.mubr.msk.bf16.mxu1 %vm482_vm0, %v7308_v22  ;;  %5779 = vmatpush3.bf16.msra.mxu1 %v7346_v28 }
  0x6f   : > { %5780 = vmatprep.subr.bf16.mxu1 %v7351_v29 }
  0x72   : > { %5781 = vmatpush3.bf16.msra.mxu1 %v7351_v29 }
  0x73   : > { %5782 = vmatprep.subr.bf16.mxu1 %v7356_v30 }
  0x75   : > { %5767 = vmatmul.mubr.msk.bf16.gmra.mrb[12].mxu1 %vm482_vm0, %v7315_v23 }
  0x76   : > { %5783 = vmatpush3.bf16.msra.mxu1 %v7356_v30 }
  0x77   : > { %5784 = vmatprep.subr.bf16.mxu1 %v7359_v31 }
  0x7a   : > { %5785 = vmatpush3.bf16.msra.mxu1 %v7359_v31 }
  0x8f   : > { %v7364_v32 = vpop.permute.xlu0 %957 }
  0x90   : > { %6258 = vmatprep.subr.msk.bf16.mxu1 %vm482_vm0, %v7364_v32  ;;  %v960_v49 = vpop.permute.xlu1 %959  ;;  %v998_v12 = vsel %vm482_vm0, %v7364_v32, 0 }
  0x91   : > { %v1001_v14 = vsel %vm482_vm0, %v960_v49, 0 }
  0x93   : > { %v962_v50 = vpop.permute.xlu0 %961 }
  0x94   : > { %v1004_v16 = vsel %vm482_vm0, %v962_v50, 0 }
 0x130   : > { %v7369_v33 = vpop.f32.mrb[0].mxu1 }
 0x131   : > { %632 = vmax.xlane.f32.xlu1 %v7369_v33  ;;  %v565_v34 = vpop.f32.mrb[1].mxu1 }
 0x132   : > { %628 = vmax.xlane.f32.xlu0 %v565_v34  ;;  %v5757_v35 = vpop.f32.mrb[2].mxu1 }
 0x133   : > { %v568_v36 = vpop.f32.mrb[3].mxu1 }
 0x135   : > { %634 = vmax.xlane.f32.xlu1 %v5757_v35 }
 0x136   : > { %630 = vmax.xlane.f32.xlu0 %v568_v36 }
 0x138   : > { %v7372_v37 = vpop.f32.mrb[4].mxu1 }
 0x139   : > { %v7374_v38 = vpop.f32.mrb[5].mxu1 }
 0x13a   : > { %v7376_v39 = vpop.f32.mrb[6].mxu1 }
 0x13b   : > { %v7378_v40 = vpop.f32.mrb[7].mxu1 }
 0x140   : > { %v7380_v41 = vpop.f32.mrb[8].mxu1 }
 0x141   : > { %v7382_v42 = vpop.f32.mrb[9].mxu1 }
 0x142   : > { %v7384_v43 = vpop.f32.mrb[10].mxu1 }
 0x143   : > { %v7386_v44 = vpop.f32.mrb[11].mxu1 }
 0x146   : > { %963 = vrot.lane.b32.xlu1 %v7250_v7, %s7110_s12 }
 0x148   : > { %v7390_v45 = vpop.f32.mrb[12].mxu1 }
 0x149   : > { %v7392_v46 = vpop.f32.mrb[13].mxu1 }
 0x14a   : > { %v7394_v47 = vpop.f32.mrb[14].mxu1 }
 0x14b   : > { %v7396_v48 = vpop.f32.mrb[15].mxu1 }
 0x14c   : > { %965 = vrot.lane.b32.xlu0 %v7257_v9, %s7110_s12 }
 0x16a   : > { %636 = vmax.xlane.f32.xlu1 %v7374_v38 }
 0x16b   : > { %640 = vmax.xlane.f32.xlu0 %v7372_v37 }
 0x16e   : > { %642 = vmax.xlane.f32.xlu1 %v7376_v39 }
 0x16f   : > { %644 = vmax.xlane.f32.xlu0 %v7382_v42 }
 0x172   : > { %638 = vmax.xlane.f32.xlu1 %v7378_v40 }
 0x173   : > { %646 = vmax.xlane.f32.xlu0 %v7386_v44 }
 0x176   : > { %648 = vmax.xlane.f32.xlu1 %v7380_v41 }
 0x177   : > { %656 = vmax.xlane.f32.xlu0 %v7390_v45 }
 0x17a   : > { %650 = vmax.xlane.f32.xlu1 %v7384_v43 }
 0x17e   : > { %652 = vmax.xlane.f32.xlu1 %v7392_v46 }
 0x182   : > { %658 = vmax.xlane.f32.xlu1 %v7394_v47 }
 0x186   : > { %654 = vmax.xlane.f32.xlu1 %v7396_v48 }
 0x18d   : > { %969 = vrot.lane.b32.xlu0 %v7271_v13, %s7110_s12 }
 0x191   : > { %971 = vrot.lane.b32.xlu0 %v7278_v15, %s7110_s12 }
 0x195   : > { %941 = vrot.lane.b32.xlu0 %v7241_v5, %s7110_s12 }
 0x197   : > { %967 = vrot.lane.b32.xlu1 %v7264_v11, %s7110_s12 }
 0x199   : > { %945 = vrot.lane.b32.xlu0 %v7288_v18, %s7110_s12 }
 0x19b   : > { %943 = vrot.lane.b32.xlu1 %v7285_v17, %s7110_s12 }
 0x19d   : > { %949 = vrot.lane.b32.xlu0 %v7298_v20, %s7110_s12 }
 0x19f   : > { %947 = vrot.lane.b32.xlu1 %v7295_v19, %s7110_s12 }
 0x1a1   : > { %953 = vrot.lane.b32.xlu0 %v7308_v22, %s7110_s12 }
 0x1a3   : > { %951 = vrot.lane.b32.xlu1 %v7305_v21, %s7110_s12 }
 0x1a5   : > { %1238 = vrot.lane.b32.xlu0 %v7326_v24, %s7110_s12 }
 0x1a7   : > { %955 = vrot.lane.b32.xlu1 %v7315_v23, %s7110_s12 }
 0x1a9   : > { %1242 = vrot.lane.b32.xlu0 %v7336_v26, %s7110_s12 }
 0x1ab   : > { %1240 = vrot.lane.b32.xlu1 %v7331_v25, %s7110_s12 }
 0x1ad   : > { %1250 = vrot.lane.b32.xlu0 %v7356_v30, %s7110_s12 }
 0x1af   : > { %1244 = vrot.lane.b32.xlu1 %v7341_v27, %s7110_s12 }
 0x1b1   : > { %1488 = vrot.lane.b32.xlu0 %v7212_v0, %s7111_s25 }
 0x1b3   : > { %1246 = vrot.lane.b32.xlu1 %v7346_v28, %s7110_s12 }
 0x1b5   : > { %1490 = vrot.lane.b32.xlu0 %v7215_v1, %s7111_s25 }
 0x1b7   : > { %1248 = vrot.lane.b32.xlu1 %v7351_v29, %s7110_s12 }
 0x1b9   : > { %1494 = vrot.lane.b32.xlu0 %v7250_v7, %s7111_s25 }
 0x1bb   : > { %1252 = vrot.lane.b32.xlu1 %v7359_v31, %s7110_s12 }
 0x1be   : > { %v633_v51 = vpop.xlane.xlu1 %632 }
 0x1bf   : > { %v629_v52 = vpop.xlane.xlu0 %628  ;;  %v662_v54 = vsub.f32 %v7369_v33, %v633_v51  ;;  %1492 = vrot.lane.b32.xlu1 %v7228_v3, %s7111_s25 }
 0x1c0   : > { %v660_v53 = vsub.f32 %v565_v34, %v629_v52 }
 0x1c1   : > { %v680_v60 = vmul.f32 1.442695, %v662_v54 }
 0x1c2   : > { %v676_v55 = vmul.f32 1.442695, %v660_v53  ;;  %v635_v56 = vpop.xlane.xlu1 %634 }
 0x1c3   : > { %v663_v57 = vsub.f32 %v5757_v35, %v635_v56  ;;  %v631_v58 = vpop.xlane.xlu0 %630 }
 0x1c4   : > { %v661_v59 = vsub.f32 %v568_v36, %v631_v58  ;;  %6494 = vpow2.f32 %v676_v55 }
 0x1c5   : > { %v682_v61 = vmul.f32 1.442695, %v663_v57 }
 0x1c6   : > { %v678_v62 = vmul.f32 1.442695, %v661_v59  ;;  %v964_v33 = vpop.permute.xlu1 %963 }
 0x1c7   : > { %6496 = vpow2.f32 %v682_v61  ;;  %v1007_v34 = vsel %vm482_vm0, %v964_v33, 0  ;;  %v966_v35 = vpop.permute.xlu0 %965 }
 0x1c8   : > { %6498 = vpow2.f32 %v678_v62  ;;  %v1010_v32 = vsel %vm482_vm0, %v966_v35, 0 }
 0x1c9   : > { %6500 = vpow2.f32 %v680_v60 }
 0x1ce   : > { %v7451_v63 = vpop.eup %6494 }
 0x1cf   : > { %10094 = vst [vmem:[#allocation7_spill] sm:$0xff] %v7451_v63 }
 0x1d1   : > { %v7453_v2 = vpop.eup %6496 }
 0x1d2   : > { %10095 = vst [vmem:[#allocation8_spill] sm:$0xff] %v7453_v2  ;;  %v7455_v4 = vpop.eup %6498 }
 0x1d3   : > { %10096 = vst [vmem:[#allocation9_spill] sm:$0xff] %v7455_v4  ;;  %v7457_v6 = vpop.eup %6500  ;;  %v740_v8 = vpack.c.bf16 %v7455_v4, %v7451_v63 }
 0x1d4   : > { %10097 = vst [vmem:[#allocation10_spill] sm:$0xff] %v7457_v6  ;;  %v741_v10 = vpack.c.bf16 %v7453_v2, %v7457_v6  ;;  %v8259_v2 = vld [vmem:[%s7323_s24 + $0x64] ss:$8 sps:$4 sm:$0xff]  }
 0x1d5   : > { %5786 = vmatprep.mubr.bf16.mxu1 %v740_v8 }
 0x1d6   : > { %5787 = vmatmul.mubr.bf16.vlgmr.msra.gmra.mrb[16].mxu1 %v741_v10 }
 0x1d7   : > { %5803 = vmatpush3.bf16.xpose.msra.mxu1 %v998_v12 }
 0x1d8   : > { %6259 = vmatprep.subr.msk.bf16.mxu1 %vm482_vm0, %v960_v49 }
 0x1df   : > { %5805 = vmatpush3.bf16.xpose.msra.mxu1 %v1001_v14 }
 0x1e0   : > { %6260 = vmatprep.subr.msk.bf16.mxu1 %vm482_vm0, %v962_v50 }
 0x1e7   : > { %5807 = vmatpush3.bf16.xpose.msra.mxu1 %v1004_v16 }
 0x1e8   : > { %6261 = vmatprep.subr.msk.bf16.mxu1 %vm482_vm0, %v964_v33 }
 0x1ef   : > { %5809 = vmatpush3.bf16.xpose.msra.mxu1 %v1007_v34 }
 0x1f0   : > { %6262 = vmatprep.subr.msk.bf16.mxu1 %vm482_vm0, %v966_v35 }
 0x1f7   : > { %5811 = vmatpush3.bf16.xpose.msra.mxu1 %v1010_v32  ;;  %v637_v36 = vpop.xlane.xlu1 %636 }
 0x1f8   : > { %v664_v49 = vsub.f32 %v7374_v38, %v637_v36  ;;  %v641_v51 = vpop.xlane.xlu0 %640 }
 0x1f9   : > { %v666_v52 = vsub.f32 %v7372_v37, %v641_v51 }
 0x1fa   : > { %v684_v53 = vmul.f32 1.442695, %v664_v49 }
 0x1fb   : > { %v643_v50 = vpop.xlane.xlu1 %642  ;;  %v688_v56 = vmul.f32 1.442695, %v666_v52 }
 0x1fc   : > { %v667_v54 = vsub.f32 %v7376_v39, %v643_v50  ;;  %v645_v55 = vpop.xlane.xlu0 %644  ;;  %6502 = vpow2.f32 %v684_v53 }
 0x1fd   : > { %v668_v57 = vsub.f32 %v7382_v42, %v645_v55  ;;  %6504 = vpow2.f32 %v688_v56 }
 0x1fe   : > { %v690_v58 = vmul.f32 1.442695, %v667_v54 }
 0x1ff   : > { %v692_v59 = vmul.f32 1.442695, %v668_v57  ;;  %v639_v60 = vpop.xlane.xlu1 %638 }
 0x200   : > { %v665_v61 = vsub.f32 %v7378_v40, %v639_v60  ;;  %v647_v62 = vpop.xlane.xlu0 %646  ;;  %6506 = vpow2.f32 %v690_v58 }
 0x201   : > { %v669_v38 = vsub.f32 %v7386_v44, %v647_v62  ;;  %6508 = vpow2.f32 %v692_v59 }
 0x202   : > { %v686_v37 = vmul.f32 1.442695, %v665_v61 }
 0x203   : > { %v694_v8 = vmul.f32 1.442695, %v669_v38  ;;  %v649_v10 = vpop.xlane.xlu1 %648 }
 0x204   : > { %6510 = vpow2.f32 %v686_v37  ;;  %v670_v39 = vsub.f32 %v7380_v41, %v649_v10  ;;  %v657_v41 = vpop.xlane.xlu0 %656 }
 0x205   : > { %6512 = vpow2.f32 %v694_v8  ;;  %v674_v54 = vsub.f32 %v7390_v45, %v657_v41 }
 0x206   : > { %v696_v42 = vmul.f32 1.442695, %v670_v39  ;;  %v7481_v16 = vpop.eup %6502 }
 0x207   : > { %v651_v12 = vpop.xlane.xlu1 %650  ;;  %10098 = vst [vmem:[#allocation11_spill] sm:$0xff] %v7481_v16  ;;  %v7483_v33 = vpop.eup %6504  ;;  %v704_v59 = vmul.f32 1.442695, %v674_v54 }
 0x208   : > { %v671_v14 = vsub.f32 %v7384_v43, %v651_v12  ;;  %10099 = vst [vmem:[#allocation12_spill] sm:$0xff] %v7483_v33  ;;  %6514 = vpow2.f32 %v696_v42  ;;  %v970_v62 = vpop.permute.xlu0 %969 }
 0x20a   : > { %v698_v40 = vmul.f32 1.442695, %v671_v14  ;;  %v7485_v34 = vpop.eup %6506 }
 0x20b   : > { %v653_v44 = vpop.xlane.xlu1 %652  ;;  %10100 = vst [vmem:[#allocation13_spill] sm:$0xff] %v7485_v34  ;;  %v7487_v35 = vpop.eup %6508  ;;  %v743_v50 = vpack.c.bf16 %v7485_v34, %v7483_v33 }
 0x20c   : > { %6516 = vpow2.f32 %v698_v40  ;;  %10101 = vst [vmem:[#allocation14_spill] sm:$0xff] %v7487_v35  ;;  %v672_v36 = vsub.f32 %v7392_v46, %v653_v44  ;;  %v972_v37 = vpop.permute.xlu0 %971 }
 0x20d   : > { %v1019_v44 = vsel %vm482_vm0, %v972_v37, 0 }
 0x20e   : > { %v7489_v32 = vpop.eup %6510  ;;  %v700_v55 = vmul.f32 1.442695, %v672_v36 }
 0x20f   : > { %10102 = vst [vmem:[#allocation15_spill] sm:$0xff] %v7489_v32  ;;  %v7492_v49 = vpop.eup %6512  ;;  %v659_v43 = vpop.xlane.xlu1 %658  ;;  %v742_v51 = vpack.c.bf16 %v7489_v32, %v7481_v16 }
 0x210   : > { %10103 = vst [vmem:[#allocation16_spill] sm:$0xff] %v7492_v49  ;;  %v675_v52 = vsub.f32 %v7394_v47, %v659_v43  ;;  %v744_v53 = vpack.c.bf16 %v7492_v49, %v7487_v35  ;;  %6518 = vpow2.f32 %v700_v55  ;;  %v942_v40 = vpop.permute.xlu0 %941 }
 0x211   : > { %5790 = vmatprep.mubr.bf16.mxu1 %v742_v51 }
 0x212   : > { %5791 = vmatmul.mubr.bf16.gmra.mrb[20].mxu1 %v743_v50  ;;  %v706_v46 = vmul.f32 1.442695, %v675_v52  ;;  %v7503_v58 = vpop.eup %6514 }
 0x213   : > { %5794 = vmatprep.mubr.bf16.mxu1 %v744_v53  ;;  %v655_v56 = vpop.xlane.xlu1 %654  ;;  %10104 = vst [vmem:[#allocation17_spill] sm:$0xff] %v7503_v58 }
 0x214   : > { %v673_v57 = vsub.f32 %v7396_v48, %v655_v56  ;;  %6520 = vpow2.f32 %v706_v46  ;;  %v1016_v48 = vsel %vm482_vm0, %v970_v62, 0  ;;  %v946_v36 = vpop.permute.xlu0 %945 }
 0x216   : > { %v7505_v47 = vpop.eup %6516  ;;  %v702_v60 = vmul.f32 1.442695, %v673_v57 }
 0x217   : > { %10105 = vst [vmem:[#allocation18_spill] sm:$0xff] %v7505_v47  ;;  %v968_v61 = vpop.permute.xlu1 %967  ;;  %v745_v45 = vpack.c.bf16 %v7505_v47, %v7503_v58  ;;  %v7015_v47 = vld [vmem:[%s7234_s15 + $0x70] ss:$8 sps:$4 sm:$0xff]   ;;  %v7024_v58 = vld [vmem:[%s7234_s15 + $0x40] ss:$8 sps:$4 sm:$0xff]  }
 0x218   : > { %6522 = vpow2.f32 %v702_v60  ;;  %6263 = vmatprep.subr.msk.bf16.mxu1 %vm482_vm0, %v968_v61  ;;  %v1013_v38 = vsel %vm482_vm0, %v968_v61, 0  ;;  %v950_v51 = vpop.permute.xlu0 %949 }
 0x219   : > { %6524 = vpow2.f32 %v704_v59  ;;  %5813 = vmatpush3.bf16.xpose.msra.mxu1 %v1013_v38 }
 0x21a   : > { %5795 = vmatmul.mubr.bf16.gmra.mrb[24].mxu1 %v745_v45  ;;  %6264 = vmatprep.subr.msk.bf16.mxu1 %vm482_vm0, %v970_v62  ;;  %v7513_v8 = vpop.eup %6518 }
 0x21b   : > { %10106 = vst [vmem:[#allocation19_spill] sm:$0xff] %v7513_v8  ;;  %v944_v41 = vpop.permute.xlu1 %943 }
 0x21c   : > { %v954_v52 = vpop.permute.xlu0 %953 }
 0x21e   : > { %v7515_v10 = vpop.eup %6520 }
 0x21f   : > { %10107 = vst [vmem:[#allocation20_spill] sm:$0xff] %v7515_v10  ;;  %v948_v43 = vpop.permute.xlu1 %947 }
 0x220   : > { %v1239_v54 = vpop.permute.xlu0 %1238 }
 0x221   : > { %5815 = vmatpush3.bf16.xpose.msra.mxu1 %v1016_v48  ;;  %5834 = vmatprep.subr.bf16.mxu0 %v1239_v54 }
 0x222   : > { %v7517_v39 = vpop.eup %6522  ;;  %6265 = vmatprep.subr.msk.bf16.mxu1 %vm482_vm0, %v972_v37  ;;  %5835 = vmatpush3.bf16.msra.mxu0 %v1239_v54 }
 0x223   : > { %10108 = vst [vmem:[#allocation21_spill] sm:$0xff] %v7517_v39  ;;  %v7520_v42 = vpop.eup %6524  ;;  %v746_v12 = vpack.c.bf16 %v7517_v39, %v7513_v8  ;;  %v952_v0 = vpop.permute.xlu1 %951  ;;  %v7011_v39 = vld [vmem:[%s7209_s11 + $0x40] ss:$8 sps:$4 sm:$0xff]   ;;  %v7012_v8 = vld [vmem:[%s7234_s15 + $0x10] ss:$8 sps:$4 sm:$0xff]  }
 0x224   : > { %10109 = vst [vmem:[#allocation22_spill] sm:$0xff] %v7520_v42  ;;  %v747_v14 = vpack.c.bf16 %v7515_v10, %v7520_v42  ;;  %v1243_v46 = vpop.permute.xlu0 %1242 }
 0x225   : > { %5798 = vmatprep.mubr.bf16.mxu1 %v746_v12 }
 0x226   : > { %5799 = vmatmul.mubr.bf16.gmra.mrb[28].mxu1 %v747_v14 }
 0x227   : > { %5818 = vmatprep.mubr.msk.bf16.mxu1 %vm482_vm0, %v942_v40  ;;  %v956_v3 = vpop.permute.xlu1 %955 }
 0x228   : > { %v1251_v60 = vpop.permute.xlu0 %1250 }
 0x229   : > { %5817 = vmatpush3.bf16.xpose.msra.mxu1 %v1019_v44 }
 0x22b   : > { %v1241_v55 = vpop.permute.xlu1 %1240 }
 0x22c   : > { %5836 = vmatprep.subr.bf16.mxu0 %v1241_v55  ;;  %v7551_v45 = vpop.permute.xlu0 %1488 }
 0x22d   : > { %5837 = vmatpush3.bf16.msra.mxu0 %v1241_v55 }
 0x22e   : > { %5838 = vmatprep.subr.bf16.mxu0 %v1243_v46 }
 0x22f   : > { %v1245_v56 = vpop.permute.xlu1 %1244 }
 0x230   : > { %5819 = vmatmul.mubr.msk.bf16.vlgmr.msra.gmra.mrb[32].mxu1 %vm482_vm0, %v944_v41 }
 0x231   : > { %5822 = vmatprep.mubr.msk.bf16.mxu1 %vm482_vm0, %v946_v36  ;;  %5839 = vmatpush3.bf16.msra.mxu0 %v1243_v46 }
 0x232   : > { %5840 = vmatprep.subr.bf16.mxu0 %v1245_v56 }
 0x233   : > { %v1247_v57 = vpop.permute.xlu1 %1246 }
 0x235   : > { %5841 = vmatpush3.bf16.msra.mxu0 %v1245_v56 }
 0x236   : > { %5842 = vmatprep.subr.bf16.mxu0 %v1247_v57 }
 0x237   : > { %v1249_v59 = vpop.permute.xlu1 %1248 }
 0x238   : > { %5823 = vmatmul.mubr.msk.bf16.gmra.mrb[36].mxu1 %vm482_vm0, %v948_v43 }
 0x239   : > { %5826 = vmatprep.mubr.msk.bf16.mxu1 %vm482_vm0, %v950_v51  ;;  %5843 = vmatpush3.bf16.msra.mxu0 %v1247_v57 }
 0x23a   : > { %5844 = vmatprep.subr.bf16.mxu0 %v1249_v59 }
 0x23b   : > { %v1253_v61 = vpop.permute.xlu1 %1252 }
 0x23d   : > { %5845 = vmatpush3.bf16.msra.mxu0 %v1249_v59 }
 0x23e   : > { %5846 = vmatprep.subr.bf16.mxu0 %v1251_v60 }
 0x240   : > { %5827 = vmatmul.mubr.msk.bf16.gmra.mrb[40].mxu1 %vm482_vm0, %v952_v0 }
 0x241   : > { %5830 = vmatprep.mubr.msk.bf16.mxu1 %vm482_vm0, %v954_v52  ;;  %5847 = vmatpush3.bf16.msra.mxu0 %v1251_v60 }
 0x242   : > { %5848 = vmatprep.subr.bf16.mxu0 %v1253_v61 }
 0x245   : > { %5849 = vmatpush3.bf16.msra.mxu0 %v1253_v61 }
 0x246   : > { %6266 = vmatprep.subr.msk.bf16.mxu0 %vm482_vm0, %v7551_v45 }
 0x248   : > { %5831 = vmatmul.mubr.msk.bf16.gmra.mrb[44].mxu1 %vm482_vm0, %v956_v3 }
 0x2a9   : > { %v7543_v50 = vpop.f32.mrb[16].mxu1 }
 0x2aa   : > { %10110 = vst [vmem:[#allocation23_spill] sm:$0xff] %v7543_v50  ;;  %v7545_v1 = vpop.f32.mrb[17].mxu1 }
 0x2ab   : > { %10111 = vst [vmem:[#allocation24_spill] sm:$0xff] %v7545_v1  ;;  %v7547_v53 = vpop.f32.mrb[18].mxu1 }
 0x2ac   : > { %10112 = vst [vmem:[#allocation25_spill] sm:$0xff] %v7547_v53  ;;  %v7549_v7 = vpop.f32.mrb[19].mxu1  ;;  %v8070_v53 = vld [vmem:[%s7209_s11 + $0x24] ss:$8 sps:$4 sm:$0xff]  }
 0x2ad   : > { %10113 = vst [vmem:[#allocation26_spill] sm:$0xff] %v7549_v7 }
 0x2e5   : > { %v7555_v62 = vpop.f32.mrb[20].mxu1 }
 0x2e6   : > { %10114 = vst [vmem:[#allocation27_spill] sm:$0xff] %v7555_v62  ;;  %v7557_v38 = vpop.f32.mrb[21].mxu1 }
 0x2e7   : > { %10115 = vst [vmem:[#allocation28_spill] sm:$0xff] %v7557_v38  ;;  %v7559_v48 = vpop.f32.mrb[22].mxu1 }
 0x2e8   : > { %10116 = vst [vmem:[#allocation29_spill] sm:$0xff] %v7559_v48  ;;  %v7561_v37 = vpop.f32.mrb[23].mxu1 }
 0x2e9   : > { %10117 = vst [vmem:[#allocation30_spill] sm:$0xff] %v7561_v37 }
 0x2ed   : > { %v7563_v12 = vpop.f32.mrb[24].mxu1 }
 0x2ee   : > { %10118 = vst [vmem:[#allocation31_spill] sm:$0xff] %v7563_v12  ;;  %v7565_v14 = vpop.f32.mrb[25].mxu1 }
 0x2ef   : > { %10119 = vst [vmem:[#allocation32_spill] sm:$0xff] %v7565_v14  ;;  %v7567_v40 = vpop.f32.mrb[26].mxu1  ;;  %v7010_v14 = vld [vmem:[%s7209_s11 + $0x50] ss:$8 sps:$4 sm:$0xff]  }
 0x2f0   : > { %10120 = vst [vmem:[#allocation33_spill] sm:$0xff] %v7567_v40  ;;  %v7569_v44 = vpop.f32.mrb[27].mxu1 }
 0x2f1   : > { %10121 = vst [vmem:[#allocation34_spill] sm:$0xff] %v7569_v44 }
 0x2f9   : > { %v7571_v41 = vpop.f32.mrb[28].mxu1 }
 0x2fa   : > { %10122 = vst [vmem:[#allocation35_spill] sm:$0xff] %v7571_v41  ;;  %v7573_v36 = vpop.f32.mrb[29].mxu1 }
 0x2fb   : > { %10123 = vst [vmem:[#allocation36_spill] sm:$0xff] %v7573_v36  ;;  %v7575_v43 = vpop.f32.mrb[30].mxu1 }
 0x2fc   : > { %10124 = vst [vmem:[#allocation37_spill] sm:$0xff] %v7575_v43  ;;  %v7577_v51 = vpop.f32.mrb[31].mxu1 }
 0x2fd   : > { %10125 = vst [vmem:[#allocation38_spill] sm:$0xff] %v7577_v51 }
 0x303   : > { %v7579_v0 = vpop.f32.mrb[32].mxu1 }
 0x304   : > { %1122 = vmax.xlane.f32.xlu0 %v7579_v0  ;;  %v1055_v52 = vpop.f32.mrb[33].mxu1 }
 0x305   : > { %v7582_v3 = vpop.f32.mrb[34].mxu1 }
 0x306   : > { %v1058_v54 = vpop.f32.mrb[35].mxu1 }
 0x307   : > { %1120 = vmax.xlane.f32.xlu1 %v1058_v54 }
 0x308   : > { %1118 = vmax.xlane.f32.xlu0 %v1055_v52 }
 0x30b   : > { %v7584_v55 = vpop.f32.mrb[36].mxu1 }
 0x30c   : > { %1124 = vmax.xlane.f32.xlu0 %v7582_v3  ;;  %1130 = vmax.xlane.f32.xlu1 %v7584_v55  ;;  %v7588_v46 = vpop.f32.mrb[37].mxu1 }
 0x30d   : > { %v7590_v56 = vpop.f32.mrb[38].mxu1 }
 0x30e   : > { %v7592_v57 = vpop.f32.mrb[39].mxu1 }
 0x310   : > { %1126 = vmax.xlane.f32.xlu1 %v7588_v46  ;;  %1128 = vmax.xlane.f32.xlu0 %v7592_v57 }
 0x313   : > { %v7596_v59 = vpop.f32.mrb[40].mxu1 }
 0x314   : > { %1132 = vmax.xlane.f32.xlu1 %v7590_v56  ;;  %1138 = vmax.xlane.f32.xlu0 %v7596_v59  ;;  %v7600_v60 = vpop.f32.mrb[41].mxu1 }
 0x315   : > { %v7602_v61 = vpop.f32.mrb[42].mxu1 }
 0x316   : > { %v7604_v43 = vpop.f32.mrb[43].mxu1 }
 0x318   : > { %1134 = vmax.xlane.f32.xlu1 %v7600_v60 }
 0x31b   : > { %v7607_v41 = vpop.f32.mrb[44].mxu1 }
 0x31c   : > { %1140 = vmax.xlane.f32.xlu1 %v7602_v61  ;;  %v7610_v10 = vpop.f32.mrb[45].mxu1 }
 0x31d   : > { %1142 = vmax.xlane.f32.xlu0 %v7610_v10  ;;  %v7613_v42 = vpop.f32.mrb[46].mxu1 }
 0x31e   : > { %v7615_v51 = vpop.f32.mrb[47].mxu1 }
 0x320   : > { %1136 = vmax.xlane.f32.xlu1 %v7604_v43 }
 0x324   : > { %1146 = vmax.xlane.f32.xlu1 %v7607_v41 }
 0x328   : > { %1148 = vmax.xlane.f32.xlu1 %v7613_v42 }
 0x333   : > { %1498 = vrot.lane.b32.xlu0 %v7264_v11, %s7111_s25  ;;  %v7665_v11 = vpop.permute.xlu1 %1492 }
 0x339   : > { %1496 = vrot.lane.b32.xlu1 %v7257_v9, %s7111_s25  ;;  %v7659_v9 = vpop.permute.xlu0 %1490 }
 0x33d   : > { %1474 = vrot.lane.b32.xlu1 %v7285_v17, %s7111_s25 }
 0x341   : > { %1478 = vrot.lane.b32.xlu1 %v7295_v19, %s7111_s25 }
 0x345   : > { %1482 = vrot.lane.b32.xlu1 %v7305_v21, %s7111_s25 }
 0x349   : > { %1486 = vrot.lane.b32.xlu1 %v7315_v23, %s7111_s25 }
 0x34d   : > { %1771 = vrot.lane.b32.xlu1 %v7331_v25, %s7111_s25 }
 0x351   : > { %1775 = vrot.lane.b32.xlu1 %v7341_v27, %s7111_s25 }
 0x352   : > { %1144 = vmax.xlane.f32.xlu0 %v7615_v51 }
 0x355   : > { %1777 = vrot.lane.b32.xlu1 %v7346_v28, %s7111_s25 }
 0x359   : > { %1779 = vrot.lane.b32.xlu1 %v7351_v29, %s7111_s25 }
 0x35d   : > { %1783 = vrot.lane.b32.xlu1 %v7359_v31, %s7111_s25 }
 0x368   : > { %1500 = vrot.lane.b32.xlu0 %v7271_v13, %s7111_s25 }
 0x36c   : > { %1502 = vrot.lane.b32.xlu0 %v7278_v15, %s7111_s25 }
 0x370   : > { %1472 = vrot.lane.b32.xlu0 %v7241_v5, %s7111_s25  ;;  %v7663_v5 = vpop.permute.xlu0 %1494 }
 0x374   : > { %1476 = vrot.lane.b32.xlu0 %v7288_v18, %s7111_s25 }
 0x378   : > { %1480 = vrot.lane.b32.xlu0 %v7298_v20, %s7111_s25 }
 0x37c   : > { %1484 = vrot.lane.b32.xlu0 %v7308_v22, %s7111_s25 }
 0x380   : > { %1769 = vrot.lane.b32.xlu0 %v7326_v24, %s7111_s25 }
 0x384   : > { %1773 = vrot.lane.b32.xlu0 %v7336_v26, %s7111_s25 }
 0x388   : > { %1781 = vrot.lane.b32.xlu0 %v7356_v30, %s7111_s25 }
 0x391   : > { %v1123_v13 = vpop.xlane.xlu0 %1122 }
 0x392   : > { %v1152_v17 = vsub.f32 %v7579_v0, %v1123_v13 }
 0x394   : > { %v1121_v15 = vpop.xlane.xlu1 %1120  ;;  %v1170_v23 = vmul.f32 1.442695, %v1152_v17 }
 0x395   : > { %v1151_v18 = vsub.f32 %v1058_v54, %v1121_v15  ;;  %v1119_v19 = vpop.xlane.xlu0 %1118 }
 0x396   : > { %v1150_v20 = vsub.f32 %v1055_v52, %v1119_v19 }
 0x397   : > { %v1168_v21 = vmul.f32 1.442695, %v1151_v18 }
 0x398   : > { %v1166_v22 = vmul.f32 1.442695, %v1150_v20 }
 0x399   : > { %6526 = vpow2.f32 %v1168_v21  ;;  %v1125_v24 = vpop.xlane.xlu0 %1124  ;;  %v1131_v25 = vpop.xlane.xlu1 %1130 }
 0x39a   : > { %6528 = vpow2.f32 %v1166_v22  ;;  %v1153_v26 = vsub.f32 %v7582_v3, %v1125_v24  ;;  %v1156_v28 = vsub.f32 %v7584_v55, %v1131_v25 }
 0x39b   : > { %6530 = vpow2.f32 %v1170_v23 }
 0x39c   : > { %v1172_v27 = vmul.f32 1.442695, %v1153_v26  ;;  %v1178_v13 = vmul.f32 1.442695, %v1156_v28  ;;  %v1529_v26 = vsel %vm482_vm0, %v7551_v45, 0 }
 0x39d   : > { %v1127_v29 = vpop.xlane.xlu1 %1126  ;;  %v1129_v30 = vpop.xlane.xlu0 %1128 }
 0x39e   : > { %6532 = vpow2.f32 %v1172_v27  ;;  %v1154_v31 = vsub.f32 %v7588_v46, %v1127_v29  ;;  %v1155_v0 = vsub.f32 %v7592_v57, %v1129_v30 }
 0x3a0   : > { %v1174_v52 = vmul.f32 1.442695, %v1154_v31  ;;  %v1176_v54 = vmul.f32 1.442695, %v1155_v0 }
 0x3a1   : > { %v1133_v15 = vpop.xlane.xlu1 %1132  ;;  %v1139_v21 = vpop.xlane.xlu0 %1138 }
 0x3a2   : > { %6534 = vpow2.f32 %v1174_v52  ;;  %v1157_v17 = vsub.f32 %v7590_v56, %v1133_v15  ;;  %v1160_v25 = vsub.f32 %v7596_v59, %v1139_v21 }
 0x3a3   : > { %v7673_v18 = vpop.eup %6526  ;;  %6536 = vpow2.f32 %v1176_v54 }
 0x3a4   : > { %v7675_v3 = vpop.eup %6528  ;;  %v1180_v55 = vmul.f32 1.442695, %v1157_v17  ;;  %6538 = vpow2.f32 %v1178_v13  ;;  %v1186_v0 = vmul.f32 1.442695, %v1160_v25 }
 0x3a5   : > { %10126 = vst [vmem:[#allocation39_spill] sm:$0xff] %v7675_v3  ;;  %v1135_v19 = vpop.xlane.xlu1 %1134  ;;  %v1230_v46 = vpack.c.bf16 %v7673_v18, %v7675_v3  ;;  %v7679_v57 = vpop.eup %6530 }
 0x3a6   : > { %6540 = vpow2.f32 %v1180_v55  ;;  %10127 = vst [vmem:[#allocation40_spill] sm:$0xff] %v7679_v57  ;;  %v1158_v56 = vsub.f32 %v7600_v60, %v1135_v19  ;;  %v1535_v55 = vsel %vm482_vm0, %v7665_v11, 0 }
 0x3a7   : > { %5850 = vmatprep.mubr.bf16.mxu0 %v1230_v46 }
 0x3a8   : > { %v7681_v20 = vpop.eup %6532  ;;  %v1182_v28 = vmul.f32 1.442695, %v1158_v56 }
 0x3a9   : > { %v1141_v22 = vpop.xlane.xlu1 %1140  ;;  %v1231_v23 = vpack.c.bf16 %v7681_v20, %v7679_v57 }
 0x3aa   : > { %v1161_v24 = vsub.f32 %v7602_v61, %v1141_v22  ;;  %6542 = vpow2.f32 %v1182_v28 }
 0x3ab   : > { %5851 = vmatmul.mubr.bf16.vlgmr.msra.gmra.mrb[0].mxu0 %v1231_v23  ;;  %v1143_v23 = vpop.xlane.xlu0 %1142 }
 0x3ac   : > { %v7690_v27 = vpop.eup %6534  ;;  %5867 = vmatpush3.bf16.xpose.msra.mxu0 %v1529_v26  ;;  %v1188_v30 = vmul.f32 1.442695, %v1161_v24  ;;  %v1162_v28 = vsub.f32 %v7610_v10, %v1143_v23 }
 0x3ad   : > { %10128 = vst [vmem:[#allocation41_spill] sm:$0xff] %v7690_v27  ;;  %v7692_v29 = vpop.eup %6536  ;;  %6267 = vmatprep.subr.msk.bf16.mxu0 %vm482_vm0, %v7659_v9  ;;  %v1137_v60 = vpop.xlane.xlu1 %1136 }
 0x3ae   : > { %v1159_v31 = vsub.f32 %v7604_v43, %v1137_v60  ;;  %v1232_v59 = vpack.c.bf16 %v7692_v29, %v7690_v27  ;;  %v7699_v61 = vpop.eup %6538  ;;  %6544 = vpow2.f32 %v1188_v30  ;;  %v1532_v43 = vsel %vm482_vm0, %v7659_v9, 0 }
 0x3af   : > { %10129 = vst [vmem:[#allocation42_spill] sm:$0xff] %v7699_v61  ;;  %v1499_v25 = vpop.permute.xlu0 %1498 }
 0x3b0   : > { %v7701_v45 = vpop.eup %6540  ;;  %v1184_v52 = vmul.f32 1.442695, %v1159_v31  ;;  %5854 = vmatprep.mubr.bf16.mxu0 %v1232_v59  ;;  %v1544_v26 = vsel %vm482_vm0, %v1499_v25, 0 }
 0x3b1   : > { %v1233_v54 = vpack.c.bf16 %v7701_v45, %v7699_v61  ;;  %v1147_v13 = vpop.xlane.xlu1 %1146 }
 0x3b2   : > { %6546 = vpow2.f32 %v1184_v52  ;;  %v1164_v60 = vsub.f32 %v7607_v41, %v1147_v13 }
 0x3b3   : > { %6548 = vpow2.f32 %v1186_v0  ;;  %5855 = vmatmul.mubr.bf16.gmra.mrb[4].mxu0 %v1233_v54 }
 0x3b4   : > { %5869 = vmatpush3.bf16.xpose.msra.mxu0 %v1532_v43  ;;  %v7709_v15 = vpop.eup %6542  ;;  %v1194_v52 = vmul.f32 1.442695, %v1164_v60  ;;  %v7006_v60 = vld [vmem:[%s7209_s11] ss:$8 sps:$4 sm:$0xff]  }
 0x3b5   : > { %6268 = vmatprep.subr.msk.bf16.mxu0 %vm482_vm0, %v7665_v11  ;;  %10130 = vst [vmem:[#allocation43_spill] sm:$0xff] %v7709_v15  ;;  %v1149_v21 = vpop.xlane.xlu1 %1148  ;;  %v1538_v11 = vsel %vm482_vm0, %v7663_v5, 0  ;;  %2019 = vrot.lane.b32.xlu0 %v7006_v60, %s7112_s27 }
 0x3b6   : > { %v1165_v30 = vsub.f32 %v7613_v42, %v1149_v21 }
 0x3b8   : > { %v7711_v17 = vpop.eup %6544  ;;  %v1196_v31 = vmul.f32 1.442695, %v1165_v30 }
 0x3b9   : > { %10131 = vst [vmem:[#allocation44_spill] sm:$0xff] %v7711_v17  ;;  %v1497_v22 = vpop.permute.xlu1 %1496 }
 0x3ba   : > { %v1541_v24 = vsel %vm482_vm0, %v1497_v22, 0 }
 0x3bc   : > { %v7715_v19 = vpop.eup %6546  ;;  %5871 = vmatpush3.bf16.xpose.msra.mxu0 %v1535_v55 }
 0x3bd   : > { %10132 = vst [vmem:[#allocation45_spill] sm:$0xff] %v7715_v19  ;;  %v7717_v46 = vpop.eup %6548  ;;  %6269 = vmatprep.subr.msk.bf16.mxu0 %vm482_vm0, %v7663_v5  ;;  %v1234_v9 = vpack.c.bf16 %v7715_v19, %v7709_v15  ;;  %v1190_v5 = vmul.f32 1.442695, %v1162_v28 }
 0x3be   : > { %10133 = vst [vmem:[#allocation46_spill] sm:$0xff] %v7717_v46  ;;  %v1235_v56 = vpack.c.bf16 %v7711_v17, %v7717_v46  ;;  %v8264_v46 = vld [vmem:[%s7323_s24 + $0x74] ss:$8 sps:$4 sm:$0xff]  }
 0x3bf   : > { %5858 = vmatprep.mubr.bf16.mxu0 %v1234_v9  ;;  %6550 = vpow2.f32 %v1190_v5  ;;  %v7007_v5 = vld [vmem:[%s7209_s11 + $0x20] ss:$8 sps:$4 sm:$0xff]  }
 0x3c0   : > { %5859 = vmatmul.mubr.bf16.gmra.mrb[8].mxu0 %v1235_v56  ;;  %6552 = vpow2.f32 %v1196_v31  ;;  %2023 = vrot.lane.b32.xlu1 %v7007_v5, %s7112_s27  ;;  %v7008_v31 = vld [vmem:[%s7209_s11 + $0x10] ss:$8 sps:$4 sm:$0xff]  }
 0x3c1   : > { %2021 = vrot.lane.b32.xlu0 %v7008_v31, %s7112_s27 }
 0x3c4   : > { %5873 = vmatpush3.bf16.xpose.msra.mxu0 %v1538_v11  ;;  %v1475_v11 = vpop.permute.xlu1 %1474 }
 0x3c5   : > { %6270 = vmatprep.subr.msk.bf16.mxu0 %vm482_vm0, %v1497_v22 }
 0x3c9   : > { %v7739_v41 = vpop.eup %6550 }
 0x3ca   : > { %10134 = vst [vmem:[#allocation47_spill] sm:$0xff] %v7739_v41 }
 0x3cc   : > { %5875 = vmatpush3.bf16.xpose.msra.mxu0 %v1541_v24  ;;  %v1479_v24 = vpop.permute.xlu1 %1478 }
 0x3cd   : > { %6271 = vmatprep.subr.msk.bf16.mxu0 %vm482_vm0, %v1499_v25 }
 0x3d4   : > { %5877 = vmatpush3.bf16.xpose.msra.mxu0 %v1544_v26  ;;  %v1483_v26 = vpop.permute.xlu1 %1482 }
 0x3d8   : > { %v1487_v30 = vpop.permute.xlu1 %1486 }
 0x3df   : > { %v1145_v59 = vpop.xlane.xlu0 %1144 }
 0x3e0   : > { %v1163_v0 = vsub.f32 %v7615_v51, %v1145_v59  ;;  %v7741_v51 = vpop.eup %6552  ;;  %v7009_v59 = vld [vmem:[%s7209_s11 + $0x30] ss:$8 sps:$4 sm:$0xff]  }
 0x3e1   : > { %10135 = vst [vmem:[#allocation48_spill] sm:$0xff] %v7741_v51  ;;  %2025 = vrot.lane.b32.xlu0 %v7009_v59, %s7112_s27 }
 0x3e2   : > { %v1192_v54 = vmul.f32 1.442695, %v1163_v0 }
 0x3e3   : > { %v1501_v43 = vpop.permute.xlu0 %1500 }
 0x3e4   : > { %6554 = vpow2.f32 %v1192_v54  ;;  %6272 = vmatprep.subr.msk.bf16.mxu0 %vm482_vm0, %v1501_v43  ;;  %v1547_v55 = vsel %vm482_vm0, %v1501_v43, 0 }
 0x3e5   : > { %6556 = vpow2.f32 %v1194_v52  ;;  %5879 = vmatpush3.bf16.xpose.msra.mxu0 %v1547_v55  ;;  %v1772_v52 = vpop.permute.xlu1 %1771 }
 0x3e7   : > { %v1503_v10 = vpop.permute.xlu0 %1502 }
 0x3e8   : > { %6273 = vmatprep.subr.msk.bf16.mxu0 %vm482_vm0, %v1503_v10  ;;  %v1550_v42 = vsel %vm482_vm0, %v1503_v10, 0 }
 0x3eb   : > { %v1473_v22 = vpop.permute.xlu0 %1472 }
 0x3ed   : > { %5881 = vmatpush3.bf16.xpose.msra.mxu0 %v1550_v42 }
 0x3ee   : > { %v7743_v13 = vpop.eup %6554 }
 0x3ef   : > { %10136 = vst [vmem:[#allocation49_spill] sm:$0xff] %v7743_v13  ;;  %v7745_v9 = vpop.eup %6556  ;;  %v1236_v21 = vpack.c.bf16 %v7743_v13, %v7739_v41  ;;  %v1477_v23 = vpop.permute.xlu0 %1476 }
 0x3f0   : > { %10137 = vst [vmem:[#allocation50_spill] sm:$0xff] %v7745_v9  ;;  %v1237_v56 = vpack.c.bf16 %v7741_v51, %v7745_v9 }
 0x3f1   : > { %5862 = vmatprep.mubr.bf16.mxu0 %v1236_v21  ;;  %v1776_v21 = vpop.permute.xlu1 %1775 }
 0x3f2   : > { %5863 = vmatmul.mubr.bf16.gmra.mrb[12].mxu0 %v1237_v56 }
 0x3f3   : > { %5882 = vmatprep.mubr.msk.bf16.mxu0 %vm482_vm0, %v1473_v22  ;;  %v1481_v25 = vpop.permute.xlu0 %1480 }
 0x3f7   : > { %v1485_v28 = vpop.permute.xlu0 %1484 }
 0x3fa   : > { %5883 = vmatmul.mubr.msk.bf16.vlgmr.msra.gmra.mrb[16].mxu0 %vm482_vm0, %v1475_v11  ;;  %v1778_v11 = vpop.permute.xlu1 %1777 }
 0x3fb   : > { %5886 = vmatprep.mubr.msk.bf16.mxu0 %vm482_vm0, %v1477_v23  ;;  %v1770_v0 = vpop.permute.xlu0 %1769 }
 0x3fc   : > { %5898 = vmatprep.subr.bf16.mxu1 %v1770_v0 }
 0x3fd   : > { %5899 = vmatpush3.bf16.msra.mxu1 %v1770_v0 }
 0x3fe   : > { %5900 = vmatprep.subr.bf16.mxu1 %v1772_v52 }
 0x3ff   : > { %v1774_v42 = vpop.permute.xlu0 %1773 }
 0x401   : > { %5901 = vmatpush3.bf16.msra.mxu1 %v1772_v52 }
 0x402   : > { %5887 = vmatmul.mubr.msk.bf16.gmra.mrb[20].mxu0 %vm482_vm0, %v1479_v24  ;;  %5902 = vmatprep.subr.bf16.mxu1 %v1774_v42 }
 0x403   : > { %5890 = vmatprep.mubr.msk.bf16.mxu0 %vm482_vm0, %v1481_v25  ;;  %v1780_v25 = vpop.permute.xlu1 %1779 }
 0x405   : > { %5903 = vmatpush3.bf16.msra.mxu1 %v1774_v42 }
 0x406   : > { %5904 = vmatprep.subr.bf16.mxu1 %v1776_v21 }
 0x407   : > { %v1784_v5 = vpop.permute.xlu1 %1783 }
 0x409   : > { %5905 = vmatpush3.bf16.msra.mxu1 %v1776_v21 }
 0x40a   : > { %5891 = vmatmul.mubr.msk.bf16.gmra.mrb[24].mxu0 %vm482_vm0, %v1483_v26  ;;  %5906 = vmatprep.subr.bf16.mxu1 %v1778_v11  ;;  %v1782_v26 = vpop.permute.xlu0 %1781 }
 0x40b   : > { %5894 = vmatprep.mubr.msk.bf16.mxu0 %vm482_vm0, %v1485_v28 }
 0x40d   : > { %5907 = vmatpush3.bf16.msra.mxu1 %v1778_v11 }
 0x40e   : > { %5908 = vmatprep.subr.bf16.mxu1 %v1780_v25 }
 0x411   : > { %5909 = vmatpush3.bf16.msra.mxu1 %v1780_v25 }
 0x412   : > { %5895 = vmatmul.mubr.msk.bf16.gmra.mrb[28].mxu0 %vm482_vm0, %v1487_v30  ;;  %5910 = vmatprep.subr.bf16.mxu1 %v1782_v26 }
 0x415   : > { %5911 = vmatpush3.bf16.msra.mxu1 %v1782_v26 }
 0x416   : > { %5912 = vmatprep.subr.bf16.mxu1 %v1784_v5 }
 0x419   : > { %5913 = vmatpush3.bf16.msra.mxu1 %v1784_v5 }
 0x427   : > { %v7791_v59 = vpop.permute.xlu0 %2019 }
 0x428   : > { %6274 = vmatprep.subr.msk.bf16.mxu1 %vm482_vm0, %v7791_v59 }
 0x47e   : > { %v7767_v54 = vpop.f32.mrb[0].mxu0 }
 0x47f   : > { %10138 = vst [vmem:[#allocation51_spill] sm:$0xff] %v7767_v54  ;;  %v7769_v43 = vpop.f32.mrb[1].mxu0 }
 0x480   : > { %10139 = vst [vmem:[#allocation52_spill] sm:$0xff] %v7769_v43  ;;  %v7771_v55 = vpop.f32.mrb[2].mxu0 }
 0x481   : > { %10140 = vst [vmem:[#allocation53_spill] sm:$0xff] %v7771_v55  ;;  %v7773_v10 = vpop.f32.mrb[3].mxu0 }
 0x482   : > { %10141 = vst [vmem:[#allocation54_spill] sm:$0xff] %v7773_v10 }
 0x486   : > { %v7775_v56 = vpop.f32.mrb[4].mxu0 }
 0x487   : > { %10142 = vst [vmem:[#allocation55_spill] sm:$0xff] %v7775_v56  ;;  %v7777_v22 = vpop.f32.mrb[5].mxu0  ;;  %v7014_v56 = vld [vmem:[%s7234_s15 + $0x50] ss:$8 sps:$4 sm:$0xff]  }
 0x488   : > { %10143 = vst [vmem:[#allocation56_spill] sm:$0xff] %v7777_v22  ;;  %v7779_v23 = vpop.f32.mrb[6].mxu0 }
 0x489   : > { %10144 = vst [vmem:[#allocation57_spill] sm:$0xff] %v7779_v23  ;;  %v7781_v24 = vpop.f32.mrb[7].mxu0  ;;  %v7013_v23 = vld [vmem:[%s7234_s15 + $0x30] ss:$8 sps:$4 sm:$0xff]  }
 0x48a   : > { %10145 = vst [vmem:[#allocation58_spill] sm:$0xff] %v7781_v24  ;;  %v7026_v24 = vld [vmem:[%s7323_s24] ss:$8 sps:$4 sm:$0xff]  }
 0x493   : > { %v7783_v28 = vpop.f32.mrb[8].mxu0 }
 0x494   : > { %10146 = vst [vmem:[#allocation59_spill] sm:$0xff] %v7783_v28  ;;  %v7785_v30 = vpop.f32.mrb[9].mxu0 }
 0x495   : > { %10147 = vst [vmem:[#allocation60_spill] sm:$0xff] %v7785_v30  ;;  %v7787_v60 = vpop.f32.mrb[10].mxu0 }
 0x496   : > { %10148 = vst [vmem:[#allocation61_spill] sm:$0xff] %v7787_v60  ;;  %v7789_v31 = vpop.f32.mrb[11].mxu0 }
 0x497   : > { %10149 = vst [vmem:[#allocation62_spill] sm:$0xff] %v7789_v31 }
 0x4c5   : > { %v7795_v0 = vpop.f32.mrb[12].mxu0 }
 0x4c6   : > { %10150 = vst [vmem:[#allocation63_spill] sm:$0xff] %v7795_v0  ;;  %v7797_v52 = vpop.f32.mrb[13].mxu0 }
 0x4c7   : > { %10151 = vst [vmem:[#allocation64_spill] sm:$0xff] %v7797_v52  ;;  %v7799_v42 = vpop.f32.mrb[14].mxu0 }
 0x4c8   : > { %10152 = vst [vmem:[#allocation65_spill] sm:$0xff] %v7799_v42  ;;  %v7801_v21 = vpop.f32.mrb[15].mxu0 }
 0x4c9   : > { %10153 = vst [vmem:[#allocation66_spill] sm:$0xff] %v7801_v21 }
 0x4cd   : > { %v7803_v11 = vpop.f32.mrb[16].mxu0 }
 0x4ce   : > { %1653 = vmax.xlane.f32.xlu0 %v7803_v11  ;;  %v7806_v25 = vpop.f32.mrb[17].mxu0 }
 0x4cf   : > { %v7808_v26 = vpop.f32.mrb[18].mxu0 }
 0x4d0   : > { %v7810_v5 = vpop.f32.mrb[19].mxu0 }
 0x4d1   : > { %1651 = vmax.xlane.f32.xlu1 %v7810_v5 }
 0x4d2   : > { %1649 = vmax.xlane.f32.xlu0 %v7806_v25 }
 0x4d5   : > { %v7814_v0 = vpop.f32.mrb[20].mxu0 }
 0x4d6   : > { %1655 = vmax.xlane.f32.xlu0 %v7808_v26  ;;  %1661 = vmax.xlane.f32.xlu1 %v7814_v0  ;;  %v7818_v42 = vpop.f32.mrb[21].mxu0 }
 0x4d7   : > { %v7820_v21 = vpop.f32.mrb[22].mxu0 }
 0x4d8   : > { %v7822_v52 = vpop.f32.mrb[23].mxu0 }
 0x4da   : > { %1657 = vmax.xlane.f32.xlu1 %v7818_v42  ;;  %1659 = vmax.xlane.f32.xlu0 %v7822_v52 }
 0x4dd   : > { %v7826_v60 = vpop.f32.mrb[24].mxu0 }
 0x4de   : > { %1663 = vmax.xlane.f32.xlu1 %v7820_v21  ;;  %1669 = vmax.xlane.f32.xlu0 %v7826_v60  ;;  %v7830_v28 = vpop.f32.mrb[25].mxu0 }
 0x4df   : > { %v7832_v31 = vpop.f32.mrb[26].mxu0 }
 0x4e0   : > { %v7834_v30 = vpop.f32.mrb[27].mxu0 }
 0x4e2   : > { %1665 = vmax.xlane.f32.xlu1 %v7830_v28 }
 0x4e5   : > { %v7837_v36 = vpop.f32.mrb[28].mxu0 }
 0x4e6   : > { %1671 = vmax.xlane.f32.xlu1 %v7832_v31  ;;  %v7840_v40 = vpop.f32.mrb[29].mxu0 }
 0x4e7   : > { %1673 = vmax.xlane.f32.xlu0 %v7840_v40  ;;  %v7843_v12 = vpop.f32.mrb[30].mxu0 }
 0x4e8   : > { %v7845_v44 = vpop.f32.mrb[31].mxu0 }
 0x4ea   : > { %1667 = vmax.xlane.f32.xlu1 %v7834_v30 }
 0x4ee   : > { %1677 = vmax.xlane.f32.xlu1 %v7837_v36 }
 0x4f2   : > { %1679 = vmax.xlane.f32.xlu1 %v7843_v12 }
 0x4fd   : > { %2029 = vrot.lane.b32.xlu0 %v7010_v14, %s7112_s27  ;;  %v7016_v14 = vld [vmem:[%s7323_s24 + $0x10] ss:$8 sps:$4 sm:$0xff]  }
 0x503   : > { %2027 = vrot.lane.b32.xlu1 %v7011_v39, %s7112_s27  ;;  %v7017_v39 = vld [vmem:[%s7323_s24 + $0x30] ss:$8 sps:$4 sm:$0xff]  }
 0x507   : > { %2005 = vrot.lane.b32.xlu1 %v7012_v8, %s7112_s27  ;;  %v7018_v8 = vld [vmem:[%s7323_s24 + $0x40] ss:$8 sps:$4 sm:$0xff]  }
 0x50b   : > { %2009 = vrot.lane.b32.xlu1 %v7013_v23, %s7112_s27  ;;  %v7021_v23 = vld [vmem:[%s7209_s11 + $0x70] ss:$8 sps:$4 sm:$0xff]  }
 0x50f   : > { %2013 = vrot.lane.b32.xlu1 %v7014_v56, %s7112_s27  ;;  %v7019_v56 = vld [vmem:[%s7323_s24 + $0x50] ss:$8 sps:$4 sm:$0xff]  }
 0x513   : > { %2017 = vrot.lane.b32.xlu1 %v7015_v47, %s7112_s27  ;;  %v7020_v47 = vld [vmem:[%s7209_s11 + $0x60] ss:$8 sps:$4 sm:$0xff]  }
 0x517   : > { %2302 = vrot.lane.b32.xlu1 %v7016_v14, %s7112_s27  ;;  %v7022_v14 = vld [vmem:[%s7234_s15] ss:$8 sps:$4 sm:$0xff]  }
 0x51b   : > { %2306 = vrot.lane.b32.xlu1 %v7017_v39, %s7112_s27  ;;  %v7023_v39 = vld [vmem:[%s7234_s15 + $0x20] ss:$8 sps:$4 sm:$0xff]  }
 0x51c   : > { %1675 = vmax.xlane.f32.xlu0 %v7845_v44 }
 0x51f   : > { %2308 = vrot.lane.b32.xlu1 %v7018_v8, %s7112_s27  ;;  %v7025_v8 = vld [vmem:[%s7234_s15 + $0x60] ss:$8 sps:$4 sm:$0xff]  }
 0x523   : > { %2310 = vrot.lane.b32.xlu1 %v7019_v56, %s7112_s27  ;;  %v7027_v56 = vld [vmem:[%s7323_s24 + $0x20] ss:$8 sps:$4 sm:$0xff]  }
 0x532   : > { %2031 = vrot.lane.b32.xlu0 %v7020_v47, %s7112_s27  ;;  %v7887_v47 = vpop.permute.xlu0 %2021 }
 0x536   : > { %2033 = vrot.lane.b32.xlu0 %v7021_v23, %s7112_s27  ;;  %v7889_v23 = vpop.permute.xlu0 %2025 }
 0x53a   : > { %2003 = vrot.lane.b32.xlu0 %v7022_v14, %s7112_s27  ;;  %v7891_v14 = vpop.permute.xlu1 %2023 }
 0x53e   : > { %2007 = vrot.lane.b32.xlu0 %v7023_v39, %s7112_s27 }
 0x542   : > { %2011 = vrot.lane.b32.xlu0 %v7024_v58, %s7112_s27 }
 0x546   : > { %2015 = vrot.lane.b32.xlu0 %v7025_v8, %s7112_s27 }
 0x54a   : > { %2300 = vrot.lane.b32.xlu0 %v7026_v24, %s7112_s27 }
 0x54e   : > { %2304 = vrot.lane.b32.xlu0 %v7027_v56, %s7112_s27 }
 0x55b   : > { %v1654_v22 = vpop.xlane.xlu0 %1653 }
 0x55c   : > { %v1683_v55 = vsub.f32 %v7803_v11, %v1654_v22 }
 0x55e   : > { %v1652_v39 = vpop.xlane.xlu1 %1651  ;;  %v1701_v62 = vmul.f32 1.442695, %v1683_v55 }
 0x55f   : > { %v1682_v49 = vsub.f32 %v7810_v5, %v1652_v39  ;;  %v1650_v58 = vpop.xlane.xlu0 %1649 }
 0x560   : > { %v1681_v8 = vsub.f32 %v7806_v25, %v1650_v58 }
 0x561   : > { %v1699_v54 = vmul.f32 1.442695, %v1682_v49 }
 0x562   : > { %v1697_v24 = vmul.f32 1.442695, %v1681_v8 }
 0x563   : > { %6558 = vpow2.f32 %v1699_v54  ;;  %v1662_v35 = vpop.xlane.xlu1 %1661  ;;  %v1656_v56 = vpop.xlane.xlu0 %1655 }
 0x564   : > { %6560 = vpow2.f32 %v1697_v24  ;;  %v1684_v38 = vsub.f32 %v7808_v26, %v1656_v56  ;;  %v1687_v1 = vsub.f32 %v7814_v0, %v1662_v35  ;;  %v2060_v24 = vsel %vm482_vm0, %v7791_v59, 0 }
 0x565   : > { %6562 = vpow2.f32 %v1701_v62 }
 0x566   : > { %v1703_v50 = vmul.f32 1.442695, %v1684_v38  ;;  %v1709_v54 = vmul.f32 1.442695, %v1687_v1 }
 0x567   : > { %v1658_v48 = vpop.xlane.xlu1 %1657  ;;  %v1660_v37 = vpop.xlane.xlu0 %1659 }
 0x568   : > { %v1685_v5 = vsub.f32 %v7818_v42, %v1658_v48  ;;  %v1686_v22 = vsub.f32 %v7822_v52, %v1660_v37  ;;  %6564 = vpow2.f32 %v1703_v50 }
 0x56a   : > { %v1705_v49 = vmul.f32 1.442695, %v1685_v5  ;;  %v1707_v11 = vmul.f32 1.442695, %v1686_v22 }
 0x56b   : > { %v1664_v25 = vpop.xlane.xlu1 %1663  ;;  %v1670_v1 = vpop.xlane.xlu0 %1669 }
 0x56c   : > { %6566 = vpow2.f32 %v1705_v49  ;;  %v1688_v55 = vsub.f32 %v7820_v21, %v1664_v25  ;;  %v1691_v26 = vsub.f32 %v7826_v60, %v1670_v1 }
 0x56d   : > { %v7901_v39 = vpop.eup %6558  ;;  %6568 = vpow2.f32 %v1707_v11 }
 0x56e   : > { %v7903_v38 = vpop.eup %6560  ;;  %v1711_v35 = vmul.f32 1.442695, %v1688_v55  ;;  %6570 = vpow2.f32 %v1709_v54  ;;  %v1717_v49 = vmul.f32 1.442695, %v1691_v26 }
 0x56f   : > { %10154 = vst [vmem:[#allocation67_spill] sm:$0xff] %v7903_v38  ;;  %v1666_v62 = vpop.xlane.xlu1 %1665  ;;  %v1761_v48 = vpack.c.bf16 %v7901_v39, %v7903_v38  ;;  %v7907_v50 = vpop.eup %6562 }
 0x570   : > { %6572 = vpow2.f32 %v1711_v35  ;;  %10155 = vst [vmem:[#allocation68_spill] sm:$0xff] %v7907_v50  ;;  %v1689_v37 = vsub.f32 %v7830_v28, %v1666_v62 }
 0x571   : > { %5914 = vmatprep.mubr.bf16.mxu1 %v1761_v48  ;;  %v2066_v48 = vsel %vm482_vm0, %v7891_v14, 0 }
 0x572   : > { %v7910_v0 = vpop.eup %6564  ;;  %v1713_v8 = vmul.f32 1.442695, %v1689_v37 }
 0x573   : > { %v1672_v52 = vpop.xlane.xlu1 %1671  ;;  %v1762_v21 = vpack.c.bf16 %v7910_v0, %v7907_v50 }
 0x574   : > { %v1692_v42 = vsub.f32 %v7832_v31, %v1672_v52  ;;  %6574 = vpow2.f32 %v1713_v8 }
 0x575   : > { %5915 = vmatmul.mubr.bf16.vlgmr.msra.gmra.mrb[48].mxu1 %v1762_v21  ;;  %v2069_v21 = vsel %vm482_vm0, %v7889_v23, 0 }
 0x576   : > { %v7916_v58 = vpop.eup %6566  ;;  %v1719_v28 = vmul.f32 1.442695, %v1692_v42  ;;  %5931 = vmatpush3.bf16.xpose.msra.mxu1 %v2060_v24 }
 0x577   : > { %10156 = vst [vmem:[#allocation69_spill] sm:$0xff] %v7916_v58  ;;  %v7920_v56 = vpop.eup %6568  ;;  %v1668_v5 = vpop.xlane.xlu1 %1667  ;;  %6275 = vmatprep.subr.msk.bf16.mxu1 %vm482_vm0, %v7887_v47 }
 0x578   : > { %v1690_v31 = vsub.f32 %v7834_v30, %v1668_v5  ;;  %v1763_v60 = vpack.c.bf16 %v7920_v56, %v7916_v58  ;;  %v7927_v22 = vpop.eup %6570  ;;  %6576 = vpow2.f32 %v1719_v28  ;;  %v2063_v30 = vsel %vm482_vm0, %v7887_v47, 0 }
 0x579   : > { %10157 = vst [vmem:[#allocation70_spill] sm:$0xff] %v7927_v22 }
 0x57a   : > { %v7929_v11 = vpop.eup %6572  ;;  %v1715_v59 = vmul.f32 1.442695, %v1690_v31  ;;  %5918 = vmatprep.mubr.bf16.mxu1 %v1763_v60 }
 0x57b   : > { %v1764_v54 = vpack.c.bf16 %v7929_v11, %v7927_v22  ;;  %v1678_v25 = vpop.xlane.xlu1 %1677 }
 0x57c   : > { %6578 = vpow2.f32 %v1715_v59  ;;  %v1695_v31 = vsub.f32 %v7837_v36, %v1678_v25 }
 0x57d   : > { %6580 = vpow2.f32 %v1717_v49  ;;  %5919 = vmatmul.mubr.bf16.gmra.mrb[52].mxu1 %v1764_v54 }
 0x57e   : > { %5933 = vmatpush3.bf16.xpose.msra.mxu1 %v2063_v30  ;;  %v7937_v55 = vpop.eup %6574  ;;  %v1725_v54 = vmul.f32 1.442695, %v1695_v31 }
 0x57f   : > { %6276 = vmatprep.subr.msk.bf16.mxu1 %vm482_vm0, %v7891_v14  ;;  %10158 = vst [vmem:[#allocation71_spill] sm:$0xff] %v7937_v55  ;;  %v1680_v52 = vpop.xlane.xlu1 %1679  ;;  %v1674_v14 = vpop.xlane.xlu0 %1673 }
 0x580   : > { %v1693_v28 = vsub.f32 %v7840_v40, %v1674_v14  ;;  %v1696_v5 = vsub.f32 %v7843_v12, %v1680_v52 }
 0x582   : > { %v7939_v35 = vpop.eup %6576  ;;  %v1727_v60 = vmul.f32 1.442695, %v1696_v5 }
 0x583   : > { %10159 = vst [vmem:[#allocation72_spill] sm:$0xff] %v7939_v35  ;;  %v2028_v42 = vpop.permute.xlu1 %2027  ;;  %v2030_v8 = vpop.permute.xlu0 %2029 }
 0x584   : > { %v2072_v26 = vsel %vm482_vm0, %v2028_v42, 0  ;;  %v2075_v24 = vsel %vm482_vm0, %v2030_v8, 0 }
 0x586   : > { %v7941_v62 = vpop.eup %6578  ;;  %5935 = vmatpush3.bf16.xpose.msra.mxu1 %v2066_v48 }
 0x587   : > { %10160 = vst [vmem:[#allocation73_spill] sm:$0xff] %v7941_v62  ;;  %v7945_v1 = vpop.eup %6580  ;;  %v1765_v47 = vpack.c.bf16 %v7941_v62, %v7937_v55  ;;  %6277 = vmatprep.subr.msk.bf16.mxu1 %vm482_vm0, %v7889_v23  ;;  %v1721_v23 = vmul.f32 1.442695, %v1693_v28  ;;  %v2006_v14 = vpop.permute.xlu1 %2005 }
 0x588   : > { %10161 = vst [vmem:[#allocation74_spill] sm:$0xff] %v7945_v1  ;;  %v1766_v37 = vpack.c.bf16 %v7939_v35, %v7945_v1  ;;  %v8132_v1 = vld [vmem:[%s7209_s11 + $0x74] ss:$8 sps:$4 sm:$0xff]  }
 0x589   : > { %5922 = vmatprep.mubr.bf16.mxu1 %v1765_v47  ;;  %6582 = vpow2.f32 %v1721_v23 }
 0x58a   : > { %5923 = vmatmul.mubr.bf16.gmra.mrb[56].mxu1 %v1766_v37  ;;  %6584 = vpow2.f32 %v1727_v60 }
 0x58e   : > { %5937 = vmatpush3.bf16.xpose.msra.mxu1 %v2069_v21 }
 0x58f   : > { %6278 = vmatprep.subr.msk.bf16.mxu1 %vm482_vm0, %v2028_v42 }
 0x593   : > { %v7967_v36 = vpop.eup %6582 }
 0x594   : > { %10162 = vst [vmem:[#allocation75_spill] sm:$0xff] %v7967_v36 }
 0x596   : > { %5939 = vmatpush3.bf16.xpose.msra.mxu1 %v2072_v26 }
 0x597   : > { %6279 = vmatprep.subr.msk.bf16.mxu1 %vm482_vm0, %v2030_v8  ;;  %v2010_v8 = vpop.permute.xlu1 %2009 }
 0x59b   : > { %v2014_v28 = vpop.permute.xlu1 %2013 }
 0x59e   : > { %5941 = vmatpush3.bf16.xpose.msra.mxu1 %v2075_v24 }
 0x59f   : > { %v2018_v31 = vpop.permute.xlu1 %2017 }
 0x5a9   : > { %v1676_v49 = vpop.xlane.xlu0 %1675 }
 0x5aa   : > { %v1694_v59 = vsub.f32 %v7845_v44, %v1676_v49  ;;  %v7969_v44 = vpop.eup %6584 }
 0x5ab   : > { %10163 = vst [vmem:[#allocation76_spill] sm:$0xff] %v7969_v44 }
 0x5ac   : > { %v1723_v30 = vmul.f32 1.442695, %v1694_v59 }
 0x5ad   : > { %v2032_v48 = vpop.permute.xlu0 %2031 }
 0x5ae   : > { %6586 = vpow2.f32 %v1723_v30  ;;  %6280 = vmatprep.subr.msk.bf16.mxu1 %vm482_vm0, %v2032_v48  ;;  %v2078_v47 = vsel %vm482_vm0, %v2032_v48, 0 }
 0x5af   : > { %6588 = vpow2.f32 %v1725_v54  ;;  %5943 = vmatpush3.bf16.xpose.msra.mxu1 %v2078_v47 }
 0x5b1   : > { %v2034_v12 = vpop.permute.xlu0 %2033 }
 0x5b2   : > { %6281 = vmatprep.subr.msk.bf16.mxu1 %vm482_vm0, %v2034_v12  ;;  %v2081_v40 = vsel %vm482_vm0, %v2034_v12, 0 }
 0x5b5   : > { %v2004_v21 = vpop.permute.xlu0 %2003 }
 0x5b7   : > { %5945 = vmatpush3.bf16.xpose.msra.mxu1 %v2081_v40 }
 0x5b8   : > { %v7971_v25 = vpop.eup %6586 }
 0x5b9   : > { %10164 = vst [vmem:[#allocation77_spill] sm:$0xff] %v7971_v25  ;;  %v7973_v37 = vpop.eup %6588  ;;  %v1767_v52 = vpack.c.bf16 %v7971_v25, %v7967_v36  ;;  %v2008_v26 = vpop.permute.xlu0 %2007 }
 0x5ba   : > { %10165 = vst [vmem:[#allocation78_spill] sm:$0xff] %v7973_v37  ;;  %v1768_v42 = vpack.c.bf16 %v7969_v44, %v7973_v37 }
 0x5bb   : > { %5926 = vmatprep.mubr.bf16.mxu1 %v1767_v52 }
 0x5bc   : > { %5927 = vmatmul.mubr.bf16.gmra.mrb[60].mxu1 %v1768_v42 }
 0x5bd   : > { %5946 = vmatprep.mubr.msk.bf16.mxu1 %vm482_vm0, %v2004_v21  ;;  %v2012_v24 = vpop.permute.xlu0 %2011 }
 0x5c1   : > { %v2016_v5 = vpop.permute.xlu0 %2015 }
 0x5c4   : > { %5947 = vmatmul.mubr.msk.bf16.vlgmr.msra.gmra.mrb[64].mxu1 %vm482_vm0, %v2006_v14  ;;  %v2303_v14 = vpop.permute.xlu1 %2302 }
 0x5c5   : > { %5950 = vmatprep.mubr.msk.bf16.mxu1 %vm482_vm0, %v2008_v26  ;;  %v2301_v21 = vpop.permute.xlu0 %2300 }
 0x5c6   : > { %5962 = vmatprep.subr.bf16.mxu0 %v2301_v21 }
 0x5c7   : > { %5963 = vmatpush3.bf16.msra.mxu0 %v2301_v21 }
 0x5c8   : > { %5964 = vmatprep.subr.bf16.mxu0 %v2303_v14 }
 0x5c9   : > { %v2305_v26 = vpop.permute.xlu0 %2304 }
 0x5cb   : > { %5965 = vmatpush3.bf16.msra.mxu0 %v2303_v14 }
 0x5cc   : > { %5951 = vmatmul.mubr.msk.bf16.gmra.mrb[68].mxu1 %vm482_vm0, %v2010_v8  ;;  %5966 = vmatprep.subr.bf16.mxu0 %v2305_v26  ;;  %v2307_v8 = vpop.permute.xlu1 %2306 }
 0x5cd   : > { %5954 = vmatprep.mubr.msk.bf16.mxu1 %vm482_vm0, %v2012_v24 }
 0x5cf   : > { %5967 = vmatpush3.bf16.msra.mxu0 %v2305_v26 }
 0x5d0   : > { %5968 = vmatprep.subr.bf16.mxu0 %v2307_v8  ;;  %v2309_v24 = vpop.permute.xlu1 %2308 }
 0x5d3   : > { %5969 = vmatpush3.bf16.msra.mxu0 %v2307_v8 }
 0x5d4   : > { %5955 = vmatmul.mubr.msk.bf16.gmra.mrb[72].mxu1 %vm482_vm0, %v2014_v28  ;;  %5970 = vmatprep.subr.bf16.mxu0 %v2309_v24  ;;  %v2311_v28 = vpop.permute.xlu1 %2310 }
 0x5d5   : > { %5958 = vmatprep.mubr.msk.bf16.mxu1 %vm482_vm0, %v2016_v5 }
 0x5d7   : > { %5971 = vmatpush3.bf16.msra.mxu0 %v2309_v24 }
 0x5d8   : > { %5972 = vmatprep.subr.bf16.mxu0 %v2311_v28 }
 0x5db   : > { %5973 = vmatpush3.bf16.msra.mxu0 %v2311_v28 }
 0x5dc   : > { %5959 = vmatmul.mubr.msk.bf16.gmra.mrb[76].mxu1 %vm482_vm0, %v2018_v31 }
 0x648   : > { %v7987_v23 = vpop.f32.mrb[48].mxu1 }
 0x649   : > { %10166 = vst [vmem:[#allocation79_spill] sm:$0xff] %v7987_v23  ;;  %v7989_v60 = vpop.f32.mrb[49].mxu1 }
 0x64a   : > { %10167 = vst [vmem:[#allocation80_spill] sm:$0xff] %v7989_v60  ;;  %v7991_v49 = vpop.f32.mrb[50].mxu1 }
 0x64b   : > { %10168 = vst [vmem:[#allocation81_spill] sm:$0xff] %v7991_v49  ;;  %v7993_v59 = vpop.f32.mrb[51].mxu1  ;;  %v7029_v49 = vld [vmem:[%s7323_s24 + $0x60] ss:$8 sps:$4 sm:$0xff]  }
 0x64c   : > { %10169 = vst [vmem:[#allocation82_spill] sm:$0xff] %v7993_v59 }
 0x650   : > { %v7995_v54 = vpop.f32.mrb[52].mxu1 }
 0x651   : > { %10170 = vst [vmem:[#allocation83_spill] sm:$0xff] %v7995_v54  ;;  %v7997_v30 = vpop.f32.mrb[53].mxu1 }
 0x652   : > { %10171 = vst [vmem:[#allocation84_spill] sm:$0xff] %v7997_v30  ;;  %v7999_v48 = vpop.f32.mrb[54].mxu1 }
 0x653   : > { %10172 = vst [vmem:[#allocation85_spill] sm:$0xff] %v7999_v48  ;;  %v8001_v47 = vpop.f32.mrb[55].mxu1  ;;  %v7028_v48 = vld [vmem:[%s7323_s24 + $0x70] ss:$8 sps:$4 sm:$0xff]  }
 0x654   : > { %10173 = vst [vmem:[#allocation86_spill] sm:$0xff] %v8001_v47 }
 0x65d   : > { %v8003_v12 = vpop.f32.mrb[56].mxu1 }
 0x65e   : > { %10174 = vst [vmem:[#allocation87_spill] sm:$0xff] %v8003_v12  ;;  %v8005_v40 = vpop.f32.mrb[57].mxu1 }
 0x65f   : > { %10175 = vst [vmem:[#allocation88_spill] sm:$0xff] %v8005_v40  ;;  %v8007_v52 = vpop.f32.mrb[58].mxu1 }
 0x660   : > { %10176 = vst [vmem:[#allocation89_spill] sm:$0xff] %v8007_v52  ;;  %v8009_v42 = vpop.f32.mrb[59].mxu1 }
 0x661   : > { %10177 = vst [vmem:[#allocation90_spill] sm:$0xff] %v8009_v42 }
 0x68f   : > { %v8011_v5 = vpop.f32.mrb[60].mxu1 }
 0x690   : > { %10178 = vst [vmem:[#allocation91_spill] sm:$0xff] %v8011_v5  ;;  %v8013_v31 = vpop.f32.mrb[61].mxu1 }
 0x691   : > { %10179 = vst [vmem:[#allocation92_spill] sm:$0xff] %v8013_v31  ;;  %v8015_v52 = vpop.f32.mrb[62].mxu1 }
 0x692   : > { %10180 = vst [vmem:[#allocation93_spill] sm:$0xff] %v8015_v52  ;;  %v8017_v21 = vpop.f32.mrb[63].mxu1 }
 0x693   : > { %10181 = vst [vmem:[#allocation94_spill] sm:$0xff] %v8017_v21 }
 0x697   : > { %v5948_v14 = vpop.f32.mrb[64].mxu1 }
 0x698   : > { %2184 = vmax.xlane.f32.xlu0 %v5948_v14  ;;  %v2117_v26 = vpop.f32.mrb[65].mxu1 }
 0x699   : > { %v5949_v12 = vpop.f32.mrb[66].mxu1 }
 0x69a   : > { %v2120_v42 = vpop.f32.mrb[67].mxu1 }
 0x69b   : > { %2182 = vmax.xlane.f32.xlu1 %v2120_v42 }
 0x69c   : > { %2180 = vmax.xlane.f32.xlu0 %v2117_v26 }
 0x69f   : > { %v8019_v8 = vpop.f32.mrb[68].mxu1 }
 0x6a0   : > { %2186 = vmax.xlane.f32.xlu0 %v5949_v12  ;;  %v8021_v24 = vpop.f32.mrb[69].mxu1 }
 0x6a1   : > { %v8023_v28 = vpop.f32.mrb[70].mxu1 }
 0x6a2   : > { %v8025_v5 = vpop.f32.mrb[71].mxu1 }
 0x6a7   : > { %v8027_v52 = vpop.f32.mrb[72].mxu1 }
 0x6a8   : > { %v8029_v21 = vpop.f32.mrb[73].mxu1 }
 0x6a9   : > { %v8031_v31 = vpop.f32.mrb[74].mxu1 }
 0x6aa   : > { %v8033_v40 = vpop.f32.mrb[75].mxu1 }
 0x6ac   : > { %2314 = vrot.lane.b32.xlu1 %v7028_v48, %s7112_s27  ;;  %v8065_v48 = vld [vmem:[%s7209_s11 + $0x4] ss:$8 sps:$4 sm:$0xff]  }
 0x6af   : > { %v8037_v54 = vpop.f32.mrb[76].mxu1 }
 0x6b0   : > { %v8039_v30 = vpop.f32.mrb[77].mxu1 }
 0x6b1   : > { %v8041_v47 = vpop.f32.mrb[78].mxu1 }
 0x6b2   : > { %v8043_v23 = vpop.f32.mrb[79].mxu1 }
 0x6b6   : > { %2312 = vrot.lane.b32.xlu0 %v7029_v49, %s7112_s27  ;;  %v8060_v49 = vld [vmem:[%s7209_s11 + $0x14] ss:$8 sps:$4 sm:$0xff]  }
 0x6d0   : > { %2190 = vmax.xlane.f32.xlu1 %v8025_v5 }
 0x6d4   : > { %2198 = vmax.xlane.f32.xlu1 %v8033_v40 }
 0x6d5   : > { %2188 = vmax.xlane.f32.xlu0 %v8021_v24 }
 0x6d8   : > { %2202 = vmax.xlane.f32.xlu1 %v8031_v31 }
 0x6d9   : > { %2192 = vmax.xlane.f32.xlu0 %v8019_v8 }
 0x6dc   : > { %2206 = vmax.xlane.f32.xlu1 %v8043_v23 }
 0x6dd   : > { %2194 = vmax.xlane.f32.xlu0 %v8023_v28 }
 0x6e0   : > { %2210 = vmax.xlane.f32.xlu1 %v8041_v47 }
 0x6e1   : > { %2196 = vmax.xlane.f32.xlu0 %v8029_v21 }
 0x6e5   : > { %2200 = vmax.xlane.f32.xlu0 %v8027_v52 }
 0x6e9   : > { %2204 = vmax.xlane.f32.xlu0 %v8039_v30 }
 0x6ed   : > { %2208 = vmax.xlane.f32.xlu0 %v8037_v54 }
 0x6f1   : > { %3042 = vrot.lane.b32.xlu1 %v8060_v49, %s7110_s12 }
 0x703   : > { %3040 = vrot.lane.b32.xlu0 %v8065_v48, %s7110_s12 }
 0x707   : > { %3044 = vrot.lane.b32.xlu0 %v8070_v53, %s7110_s12 }
 0x725   : > { %v2185_v7 = vpop.xlane.xlu0 %2184 }
 0x726   : > { %v2214_v60 = vsub.f32 %v5948_v14, %v2185_v7 }
 0x728   : > { %v2183_v59 = vpop.xlane.xlu1 %2182  ;;  %v2232_v37 = vmul.f32 1.442695, %v2214_v60 }
 0x729   : > { %v2213_v10 = vsub.f32 %v2120_v42, %v2183_v59  ;;  %v2181_v43 = vpop.xlane.xlu0 %2180  ;;  %v8113_v59 = vld [vmem:[%s7209_s11 + $0x54] ss:$8 sps:$4 sm:$0xff]  }
 0x72a   : > { %v2212_v33 = vsub.f32 %v2117_v26, %v2181_v43  ;;  %v8099_v43 = vld [vmem:[%s7209_s11 + $0x34] ss:$8 sps:$4 sm:$0xff]  }
 0x72b   : > { %v2230_v16 = vmul.f32 1.442695, %v2213_v10  ;;  %v2616_v10 = vsel %vm482_vm0, %v8099_v43, 0 }
 0x72c   : > { %v2228_v6 = vmul.f32 1.442695, %v2212_v33  ;;  %v2315_v41 = vpop.permute.xlu1 %2314 }
 0x72d   : > { %6590 = vpow2.f32 %v2230_v16  ;;  %v2187_v63 = vpop.xlane.xlu0 %2186 }
 0x72e   : > { %6592 = vpow2.f32 %v2228_v6  ;;  %v2215_v9 = vsub.f32 %v5949_v12, %v2187_v63 }
 0x72f   : > { %6594 = vpow2.f32 %v2232_v37 }
 0x730   : > { %v2234_v34 = vmul.f32 1.442695, %v2215_v9  ;;  %v2613_v9 = vsel %vm482_vm0, %v8070_v53, 0 }
 0x731   : > { %v2313_v36 = vpop.permute.xlu0 %2312 }
 0x732   : > { %6596 = vpow2.f32 %v2234_v34  ;;  %5974 = vmatprep.subr.bf16.mxu0 %v2313_v36  ;;  %v2607_v34 = vsel %vm482_vm0, %v8065_v48, 0 }
 0x733   : > { %5975 = vmatpush3.bf16.msra.mxu0 %v2313_v36  ;;  %v8106_v36 = vld [vmem:[%s7209_s11 + $0x44] ss:$8 sps:$4 sm:$0xff]  }
 0x734   : > { %5976 = vmatprep.subr.bf16.mxu0 %v2315_v41  ;;  %v2619_v60 = vsel %vm482_vm0, %v8106_v36, 0 }
 0x737   : > { %v8074_v32 = vpop.eup %6590  ;;  %5977 = vmatpush3.bf16.msra.mxu0 %v2315_v41  ;;  %v2610_v41 = vsel %vm482_vm0, %v8060_v49, 0 }
 0x738   : > { %v8076_v7 = vpop.eup %6592  ;;  %6282 = vmatprep.subr.msk.bf16.mxu0 %vm482_vm0, %v8065_v48 }
 0x739   : > { %10182 = vst [vmem:[#allocation95_spill] sm:$0xff] %v8076_v7  ;;  %v2292_v63 = vpack.c.bf16 %v8074_v32, %v8076_v7  ;;  %v8082_v6 = vpop.eup %6594 }
 0x73a   : > { %10183 = vst [vmem:[#allocation96_spill] sm:$0xff] %v8082_v6 }
 0x73b   : > { %5978 = vmatprep.mubr.bf16.mxu0 %v2292_v63 }
 0x73c   : > { %v8084_v16 = vpop.eup %6596 }
 0x73d   : > { %v2293_v33 = vpack.c.bf16 %v8084_v16, %v8082_v6 }
 0x73f   : > { %5979 = vmatmul.mubr.bf16.vlgmr.msra.gmra.mrb[32].mxu0 %v2293_v33 }
 0x740   : > { %5995 = vmatpush3.bf16.xpose.msra.mxu0 %v2607_v34  ;;  %v2622_v34 = vsel %vm482_vm0, %v8113_v59, 0 }
 0x741   : > { %6283 = vmatprep.subr.msk.bf16.mxu0 %vm482_vm0, %v8060_v49 }
 0x748   : > { %5997 = vmatpush3.bf16.xpose.msra.mxu0 %v2610_v41  ;;  %v8122_v41 = vld [vmem:[%s7209_s11 + $0x64] ss:$8 sps:$4 sm:$0xff]  }
 0x749   : > { %6284 = vmatprep.subr.msk.bf16.mxu0 %vm482_vm0, %v8070_v53 }
 0x750   : > { %5999 = vmatpush3.bf16.xpose.msra.mxu0 %v2613_v9 }
 0x751   : > { %6285 = vmatprep.subr.msk.bf16.mxu0 %vm482_vm0, %v8099_v43 }
 0x758   : > { %6001 = vmatpush3.bf16.xpose.msra.mxu0 %v2616_v10 }
 0x759   : > { %6286 = vmatprep.subr.msk.bf16.mxu0 %vm482_vm0, %v8106_v36 }
 0x75d   : > { %v2191_v37 = vpop.xlane.xlu1 %2190 }
 0x75e   : > { %v2217_v12 = vsub.f32 %v8025_v5, %v2191_v37 }
 0x760   : > { %6003 = vmatpush3.bf16.xpose.msra.mxu0 %v2619_v60  ;;  %v2238_v14 = vmul.f32 1.442695, %v2217_v12 }
 0x761   : > { %v2199_v42 = vpop.xlane.xlu1 %2198  ;;  %6287 = vmatprep.subr.msk.bf16.mxu0 %vm482_vm0, %v8113_v59 }
 0x762   : > { %v2189_v26 = vpop.xlane.xlu0 %2188  ;;  %6598 = vpow2.f32 %v2238_v14  ;;  %v2221_v37 = vsub.f32 %v8033_v40, %v2199_v42  ;;  %v2625_v14 = vsel %vm482_vm0, %v8122_v41, 0 }
 0x763   : > { %v2216_v63 = vsub.f32 %v8021_v24, %v2189_v26 }
 0x765   : > { %v2236_v33 = vmul.f32 1.442695, %v2216_v63  ;;  %v2203_v5 = vpop.xlane.xlu1 %2202 }
 0x766   : > { %v2193_v9 = vpop.xlane.xlu0 %2192 }
 0x767   : > { %6600 = vpow2.f32 %v2236_v33  ;;  %v2218_v10 = vsub.f32 %v8019_v8, %v2193_v9  ;;  %v2246_v33 = vmul.f32 1.442695, %v2221_v37  ;;  %v2223_v8 = vsub.f32 %v8031_v31, %v2203_v5 }
 0x768   : > { %6005 = vmatpush3.bf16.xpose.msra.mxu0 %v2622_v34 }
 0x769   : > { %6288 = vmatprep.subr.msk.bf16.mxu0 %vm482_vm0, %v8122_v41  ;;  %v2240_v24 = vmul.f32 1.442695, %v2218_v10  ;;  %v2207_v26 = vpop.xlane.xlu1 %2206  ;;  %v2250_v10 = vmul.f32 1.442695, %v2223_v8 }
 0x76a   : > { %v2195_v60 = vpop.xlane.xlu0 %2194  ;;  %v2225_v37 = vsub.f32 %v8043_v23, %v2207_v26 }
 0x76b   : > { %v2219_v12 = vsub.f32 %v8023_v28, %v2195_v60  ;;  %6602 = vpow2.f32 %v2240_v24 }
 0x76c   : > { %v8136_v40 = vpop.eup %6598 }
 0x76d   : > { %v2242_v63 = vmul.f32 1.442695, %v2219_v12  ;;  %v2211_v5 = vpop.xlane.xlu1 %2210  ;;  %v2628_v12 = vsel %vm482_vm0, %v8132_v1, 0 }
 0x76e   : > { %v2197_v34 = vpop.xlane.xlu0 %2196 }
 0x76f   : > { %6604 = vpow2.f32 %v2242_v63  ;;  %v2220_v9 = vsub.f32 %v8029_v21, %v2197_v34  ;;  %v2254_v63 = vmul.f32 1.442695, %v2225_v37 }
 0x770   : > { %6007 = vmatpush3.bf16.xpose.msra.mxu0 %v2625_v14  ;;  %6606 = vpow2.f32 %v2246_v33  ;;  %v2227_v14 = vsub.f32 %v8041_v47, %v2211_v5 }
 0x771   : > { %v8138_v42 = vpop.eup %6600  ;;  %v2244_v28 = vmul.f32 1.442695, %v2220_v9  ;;  %6289 = vmatprep.subr.msk.bf16.mxu0 %vm482_vm0, %v8132_v1  ;;  %v3043_v35 = vpop.permute.xlu1 %3042 }
 0x772   : > { %10184 = vst [vmem:[#allocation97_spill] sm:$0xff] %v8138_v42  ;;  %v2201_v60 = vpop.xlane.xlu0 %2200  ;;  %v2294_v31 = vpack.c.bf16 %v8136_v40, %v8138_v42 }
 0x773   : > { %6608 = vpow2.f32 %v2244_v28  ;;  %v2222_v21 = vsub.f32 %v8027_v52, %v2201_v60  ;;  %v2258_v52 = vmul.f32 1.442695, %v2227_v14 }
 0x774   : > { %5982 = vmatprep.mubr.bf16.mxu0 %v2294_v31  ;;  %6610 = vpow2.f32 %v2250_v10 }
 0x775   : > { %v2248_v24 = vmul.f32 1.442695, %v2222_v21  ;;  %v8150_v26 = vpop.eup %6602 }
 0x776   : > { %v2205_v33 = vpop.xlane.xlu0 %2204  ;;  %10185 = vst [vmem:[#allocation98_spill] sm:$0xff] %v8150_v26 }
 0x777   : > { %6612 = vpow2.f32 %v2248_v24  ;;  %v2224_v23 = vsub.f32 %v8039_v30, %v2205_v33  ;;  %v8180_v33 = vld [vmem:[%s7234_s15 + $0x4] ss:$8 sps:$4 sm:$0xff]  }
 0x778   : > { %6009 = vmatpush3.bf16.xpose.msra.mxu0 %v2628_v12  ;;  %6614 = vpow2.f32 %v2254_v63 }
 0x779   : > { %v8152_v8 = vpop.eup %6604  ;;  %v2252_v34 = vmul.f32 1.442695, %v2224_v23 }
 0x77a   : > { %10186 = vst [vmem:[#allocation99_spill] sm:$0xff] %v8152_v8  ;;  %v2209_v9 = vpop.xlane.xlu0 %2208  ;;  %v2295_v28 = vpack.c.bf16 %v8152_v8, %v8150_v26  ;;  %v8157_v47 = vpop.eup %6606 }
 0x77b   : > { %6616 = vpow2.f32 %v2252_v34  ;;  %v2226_v10 = vsub.f32 %v8037_v54, %v2209_v9  ;;  %10187 = vst [vmem:[#allocation100_spill] sm:$0xff] %v8157_v47  ;;  %v8187_v34 = vld [vmem:[%s7234_s15 + $0x14] ss:$8 sps:$4 sm:$0xff]  }
 0x77c   : > { %5983 = vmatmul.mubr.bf16.gmra.mrb[36].mxu0 %v2295_v28  ;;  %6618 = vpow2.f32 %v2258_v52  ;;  %v8190_v52 = vld [vmem:[%s7234_s15 + $0x24] ss:$8 sps:$4 sm:$0xff]   ;;  %v8197_v9 = vld [vmem:[%s7234_s15 + $0x34] ss:$8 sps:$4 sm:$0xff]  }
 0x77d   : > { %v8159_v37 = vpop.eup %6608  ;;  %v2256_v30 = vmul.f32 1.442695, %v2226_v10  ;;  %v8200_v28 = vld [vmem:[%s7234_s15 + $0x44] ss:$8 sps:$4 sm:$0xff]   ;;  %v8207_v10 = vld [vmem:[%s7234_s15 + $0x54] ss:$8 sps:$4 sm:$0xff]  }
 0x77e   : > { %10188 = vst [vmem:[#allocation101_spill] sm:$0xff] %v8159_v37  ;;  %v2296_v60 = vpack.c.bf16 %v8157_v47, %v8159_v37  ;;  %v8163_v31 = vpop.eup %6610  ;;  %v8268_v37 = vpop.permute.xlu0 %3040 }
 0x77f   : > { %6620 = vpow2.f32 %v2256_v30  ;;  %10189 = vst [vmem:[#allocation102_spill] sm:$0xff] %v8163_v31  ;;  %v8210_v30 = vld [vmem:[%s7234_s15 + $0x64] ss:$8 sps:$4 sm:$0xff]  }
 0x780   : > { %5986 = vmatprep.mubr.bf16.mxu0 %v2296_v60  ;;  %v8217_v60 = vld [vmem:[%s7234_s15 + $0x74] ss:$8 sps:$4 sm:$0xff]  }
 0x781   : > { %v8165_v5 = vpop.eup %6612 }
 0x782   : > { %10190 = vst [vmem:[#allocation103_spill] sm:$0xff] %v8165_v5  ;;  %v2297_v54 = vpack.c.bf16 %v8163_v31, %v8165_v5  ;;  %v8169_v21 = vpop.eup %6614  ;;  %v8235_v5 = vld [vmem:[%s7323_s24 + $0x14] ss:$8 sps:$4 sm:$0xff]   ;;  %v3045_v6 = vpop.permute.xlu0 %3044 }
 0x783   : > { %10191 = vst [vmem:[#allocation104_spill] sm:$0xff] %v8169_v21 }
 0x784   : > { %5987 = vmatmul.mubr.bf16.gmra.mrb[40].mxu0 %v2297_v54 }
 0x785   : > { %v8171_v24 = vpop.eup %6616 }
 0x786   : > { %10192 = vst [vmem:[#allocation105_spill] sm:$0xff] %v8171_v24  ;;  %v2298_v12 = vpack.c.bf16 %v8169_v21, %v8171_v24  ;;  %v8175_v63 = vpop.eup %6618  ;;  %v8230_v24 = vld [vmem:[%s7323_s24 + $0x4] ss:$8 sps:$4 sm:$0xff]  }
 0x787   : > { %10193 = vst [vmem:[#allocation106_spill] sm:$0xff] %v8175_v63  ;;  %6026 = vmatprep.subr.bf16.mxu1 %v8230_v24 }
 0x788   : > { %5990 = vmatprep.mubr.bf16.mxu0 %v2298_v12  ;;  %6027 = vmatpush3.bf16.msra.mxu1 %v8230_v24 }
 0x789   : > { %v8177_v14 = vpop.eup %6620  ;;  %6028 = vmatprep.subr.bf16.mxu1 %v8235_v5 }
 0x78a   : > { %10194 = vst [vmem:[#allocation107_spill] sm:$0xff] %v8177_v14  ;;  %v2299_v23 = vpack.c.bf16 %v8175_v63, %v8177_v14 }
 0x78c   : > { %5991 = vmatmul.mubr.bf16.gmra.mrb[44].mxu0 %v2299_v23  ;;  %6029 = vmatpush3.bf16.msra.mxu1 %v8235_v5 }
 0x78d   : > { %6010 = vmatprep.mubr.msk.bf16.mxu0 %vm482_vm0, %v8180_v33 }
 0x794   : > { %6011 = vmatmul.mubr.msk.bf16.vlgmr.msra.gmra.mrb[48].mxu0 %vm482_vm0, %v8187_v34 }
 0x795   : > { %6014 = vmatprep.mubr.msk.bf16.mxu0 %vm482_vm0, %v8190_v52 }
 0x79c   : > { %6015 = vmatmul.mubr.msk.bf16.gmra.mrb[52].mxu0 %vm482_vm0, %v8197_v9 }
 0x79d   : > { %6018 = vmatprep.mubr.msk.bf16.mxu0 %vm482_vm0, %v8200_v28 }
 0x7a4   : > { %6019 = vmatmul.mubr.msk.bf16.gmra.mrb[56].mxu0 %vm482_vm0, %v8207_v10 }
 0x7a5   : > { %6022 = vmatprep.mubr.msk.bf16.mxu0 %vm482_vm0, %v8210_v30 }
 0x7ac   : > { %6023 = vmatmul.mubr.msk.bf16.gmra.mrb[60].mxu0 %vm482_vm0, %v8217_v60 }
 0x812   : > { %v8221_v54 = vpop.f32.mrb[32].mxu0 }
 0x813   : > { %10195 = vst [vmem:[#allocation108_spill] sm:$0xff] %v8221_v54  ;;  %v8223_v12 = vpop.f32.mrb[33].mxu0  ;;  %v8239_v54 = vld [vmem:[%s7323_s24 + $0x24] ss:$8 sps:$4 sm:$0xff]  }
 0x814   : > { %10196 = vst [vmem:[#allocation109_spill] sm:$0xff] %v8223_v12  ;;  %v8225_v23 = vpop.f32.mrb[34].mxu0  ;;  %6030 = vmatprep.subr.bf16.mxu1 %v8239_v54  ;;  %v8249_v12 = vld [vmem:[%s7323_s24 + $0x44] ss:$8 sps:$4 sm:$0xff]  }
 0x815   : > { %10197 = vst [vmem:[#allocation110_spill] sm:$0xff] %v8225_v23  ;;  %v8227_v14 = vpop.f32.mrb[35].mxu0  ;;  %v8244_v23 = vld [vmem:[%s7323_s24 + $0x34] ss:$8 sps:$4 sm:$0xff]   ;;  %6031 = vmatpush3.bf16.msra.mxu1 %v8239_v54 }
 0x816   : > { %10198 = vst [vmem:[#allocation111_spill] sm:$0xff] %v8227_v14  ;;  %6032 = vmatprep.subr.bf16.mxu1 %v8244_v23  ;;  %v8254_v14 = vld [vmem:[%s7323_s24 + $0x54] ss:$8 sps:$4 sm:$0xff]  }
 0x819   : > { %6033 = vmatpush3.bf16.msra.mxu1 %v8244_v23 }
 0x81a   : > { %6034 = vmatprep.subr.bf16.mxu1 %v8249_v12 }
 0x81d   : > { %6035 = vmatpush3.bf16.msra.mxu1 %v8249_v12 }
 0x81e   : > { %6036 = vmatprep.subr.bf16.mxu1 %v8254_v14 }
 0x821   : > { %6037 = vmatpush3.bf16.msra.mxu1 %v8254_v14 }
 0x822   : > { %6038 = vmatprep.subr.bf16.mxu1 %v8259_v2 }
 0x825   : > { %6039 = vmatpush3.bf16.msra.mxu1 %v8259_v2 }
 0x826   : > { %6040 = vmatprep.subr.bf16.mxu1 %v8264_v46 }
 0x829   : > { %6041 = vmatpush3.bf16.msra.mxu1 %v8264_v46 }
 0x82a   : > { %6290 = vmatprep.subr.msk.bf16.mxu1 %vm482_vm0, %v8268_v37 }
 0x84f   : > { %v8273_v63 = vpop.f32.mrb[36].mxu0 }
 0x850   : > { %10199 = vst [vmem:[#allocation112_spill] sm:$0xff] %v8273_v63  ;;  %v8275_v55 = vpop.f32.mrb[37].mxu0 }
 0x851   : > { %10200 = vst [vmem:[#allocation113_spill] sm:$0xff] %v8275_v55  ;;  %v8277_v44 = vpop.f32.mrb[38].mxu0 }
 0x852   : > { %10201 = vst [vmem:[#allocation114_spill] sm:$0xff] %v8277_v44  ;;  %v8279_v15 = vpop.f32.mrb[39].mxu0 }
 0x853   : > { %10202 = vst [vmem:[#allocation115_spill] sm:$0xff] %v8279_v15 }
 0x857   : > { %v8281_v4 = vpop.f32.mrb[40].mxu0 }
 0x858   : > { %10203 = vst [vmem:[#allocation116_spill] sm:$0xff] %v8281_v4  ;;  %v8283_v26 = vpop.f32.mrb[41].mxu0 }
 0x859   : > { %10204 = vst [vmem:[#allocation117_spill] sm:$0xff] %v8283_v26  ;;  %v8285_v22 = vpop.f32.mrb[42].mxu0 }
 0x85a   : > { %10205 = vst [vmem:[#allocation118_spill] sm:$0xff] %v8285_v22  ;;  %v8287_v51 = vpop.f32.mrb[43].mxu0 }
 0x85b   : > { %10206 = vst [vmem:[#allocation119_spill] sm:$0xff] %v8287_v51 }
 0x85f   : > { %v8289_v61 = vpop.f32.mrb[44].mxu0 }
 0x860   : > { %10207 = vst [vmem:[#allocation120_spill] sm:$0xff] %v8289_v61  ;;  %v8291_v21 = vpop.f32.mrb[45].mxu0 }
 0x861   : > { %10208 = vst [vmem:[#allocation121_spill] sm:$0xff] %v8291_v21  ;;  %v8293_v42 = vpop.f32.mrb[46].mxu0 }
 0x862   : > { %10209 = vst [vmem:[#allocation122_spill] sm:$0xff] %v8293_v42  ;;  %v8295_v63 = vpop.f32.mrb[47].mxu0 }
 0x863   : > { %10210 = vst [vmem:[#allocation123_spill] sm:$0xff] %v8295_v63 }
 0x867   : > { %v8297_v55 = vpop.f32.mrb[48].mxu0 }
 0x868   : > { %2731 = vmax.xlane.f32.xlu0 %v8297_v55  ;;  %v8300_v44 = vpop.f32.mrb[49].mxu0 }
 0x869   : > { %v8302_v4 = vpop.f32.mrb[50].mxu0 }
 0x86a   : > { %2733 = vmax.xlane.f32.xlu1 %v8302_v4  ;;  %v8305_v22 = vpop.f32.mrb[51].mxu0 }
 0x86c   : > { %2727 = vmax.xlane.f32.xlu0 %v8300_v44 }
 0x86e   : > { %2729 = vmax.xlane.f32.xlu1 %v8305_v22 }
 0x86f   : > { %v8309_v61 = vpop.f32.mrb[52].mxu0 }
 0x870   : > { %v8311_v42 = vpop.f32.mrb[53].mxu0 }
 0x871   : > { %v8313_v63 = vpop.f32.mrb[54].mxu0 }
 0x872   : > { %v8315_v21 = vpop.f32.mrb[55].mxu0 }
 0x877   : > { %v8317_v51 = vpop.f32.mrb[56].mxu0 }
 0x878   : > { %v8319_v26 = vpop.f32.mrb[57].mxu0 }
 0x879   : > { %v8321_v15 = vpop.f32.mrb[58].mxu0 }
 0x87a   : > { %v8323_v25 = vpop.f32.mrb[59].mxu0 }
 0x87f   : > { %3046 = vrot.lane.b32.xlu1 %v8099_v43, %s7110_s12  ;;  %v8327_v58 = vpop.f32.mrb[60].mxu0 }
 0x880   : > { %v8329_v13 = vpop.f32.mrb[61].mxu0 }
 0x881   : > { %v8331_v27 = vpop.f32.mrb[62].mxu0 }
 0x882   : > { %3048 = vrot.lane.b32.xlu0 %v8106_v36, %s7110_s12  ;;  %v8335_v31 = vpop.f32.mrb[63].mxu0 }
 0x8a1   : > { %2739 = vmax.xlane.f32.xlu0 %v8309_v61 }
 0x8a3   : > { %2735 = vmax.xlane.f32.xlu1 %v8311_v42 }
 0x8a5   : > { %2743 = vmax.xlane.f32.xlu0 %v8319_v26 }
 0x8a7   : > { %2741 = vmax.xlane.f32.xlu1 %v8313_v63 }
 0x8a9   : > { %2745 = vmax.xlane.f32.xlu0 %v8323_v25 }
 0x8ab   : > { %2737 = vmax.xlane.f32.xlu1 %v8315_v21 }
 0x8ad   : > { %2755 = vmax.xlane.f32.xlu0 %v8327_v58 }
 0x8af   : > { %2747 = vmax.xlane.f32.xlu1 %v8317_v51 }
 0x8b3   : > { %2749 = vmax.xlane.f32.xlu1 %v8321_v15 }
 0x8b7   : > { %2751 = vmax.xlane.f32.xlu1 %v8329_v13 }
 0x8bb   : > { %2757 = vmax.xlane.f32.xlu1 %v8331_v27 }
 0x8bf   : > { %2753 = vmax.xlane.f32.xlu1 %v8335_v31 }
 0x8c3   : > { %3052 = vrot.lane.b32.xlu0 %v8122_v41, %s7110_s12 }
 0x8c7   : > { %3054 = vrot.lane.b32.xlu0 %v8132_v1, %s7110_s12 }
 0x8cb   : > { %3024 = vrot.lane.b32.xlu0 %v8180_v33, %s7110_s12 }
 0x8cf   : > { %3028 = vrot.lane.b32.xlu0 %v8190_v52, %s7110_s12 }
 0x8d0   : > { %3050 = vrot.lane.b32.xlu1 %v8113_v59, %s7110_s12 }
 0x8d3   : > { %3032 = vrot.lane.b32.xlu0 %v8200_v28, %s7110_s12 }
 0x8d4   : > { %3026 = vrot.lane.b32.xlu1 %v8187_v34, %s7110_s12 }
 0x8d7   : > { %3036 = vrot.lane.b32.xlu0 %v8210_v30, %s7110_s12 }
 0x8d8   : > { %3030 = vrot.lane.b32.xlu1 %v8197_v9, %s7110_s12 }
 0x8db   : > { %3321 = vrot.lane.b32.xlu0 %v8230_v24, %s7110_s12 }
 0x8dc   : > { %3034 = vrot.lane.b32.xlu1 %v8207_v10, %s7110_s12 }
 0x8df   : > { %3325 = vrot.lane.b32.xlu0 %v8239_v54, %s7110_s12 }
 0x8e0   : > { %3038 = vrot.lane.b32.xlu1 %v8217_v60, %s7110_s12 }
 0x8e3   : > { %3333 = vrot.lane.b32.xlu0 %v8259_v2, %s7110_s12 }
 0x8e4   : > { %3323 = vrot.lane.b32.xlu1 %v8235_v5, %s7110_s12 }
 0x8e7   : > { %3570 = vrot.lane.b32.xlu0 %v8065_v48, %s7111_s25 }
 0x8e8   : > { %3327 = vrot.lane.b32.xlu1 %v8244_v23, %s7110_s12 }
 0x8eb   : > { %3572 = vrot.lane.b32.xlu0 %v8060_v49, %s7111_s25 }
 0x8ec   : > { %3329 = vrot.lane.b32.xlu1 %v8249_v12, %s7110_s12 }
 0x8ef   : > { %3576 = vrot.lane.b32.xlu0 %v8099_v43, %s7111_s25 }
 0x8f0   : > { %3331 = vrot.lane.b32.xlu1 %v8254_v14, %s7110_s12 }
 0x8f3   : > { %3580 = vrot.lane.b32.xlu0 %v8113_v59, %s7111_s25 }
 0x8f4   : > { %3335 = vrot.lane.b32.xlu1 %v8264_v46, %s7110_s12 }
 0x8f5   : > { %v2732_v50 = vpop.xlane.xlu0 %2731 }
 0x8f6   : > { %v2761_v47 = vsub.f32 %v8297_v55, %v2732_v50  ;;  %v3081_v55 = vsel %vm482_vm0, %v8268_v37, 0 }
 0x8f7   : > { %v2734_v17 = vpop.xlane.xlu1 %2733  ;;  %3582 = vrot.lane.b32.xlu0 %v8122_v41, %s7111_s25 }
 0x8f8   : > { %v2762_v57 = vsub.f32 %v8302_v4, %v2734_v17  ;;  %3574 = vrot.lane.b32.xlu1 %v8070_v53, %s7111_s25  ;;  %v2779_v4 = vmul.f32 1.442695, %v2761_v47 }
 0x8f9   : > { %v2728_v7 = vpop.xlane.xlu0 %2727 }
 0x8fa   : > { %v2781_v62 = vmul.f32 1.442695, %v2762_v57  ;;  %v2759_v38 = vsub.f32 %v8300_v44, %v2728_v7  ;;  %v3087_v44 = vsel %vm482_vm0, %v3045_v6, 0 }
 0x8fb   : > { %v2730_v19 = vpop.xlane.xlu1 %2729  ;;  %3584 = vrot.lane.b32.xlu0 %v8132_v1, %s7111_s25 }
 0x8fc   : > { %v2775_v3 = vmul.f32 1.442695, %v2759_v38  ;;  %v2760_v8 = vsub.f32 %v8305_v22, %v2730_v19  ;;  %3578 = vrot.lane.b32.xlu1 %v8106_v36, %s7111_s25  ;;  %6622 = vpow2.f32 %v2781_v62  ;;  %v3084_v62 = vsel %vm482_vm0, %v3043_v35, 0 }
 0x8fe   : > { %v2777_v17 = vmul.f32 1.442695, %v2760_v8  ;;  %6624 = vpow2.f32 %v2775_v3 }
 0x8ff   : > { %3554 = vrot.lane.b32.xlu0 %v8180_v33, %s7111_s25  ;;  %v3047_v7 = vpop.permute.xlu1 %3046 }
 0x900   : > { %6626 = vpow2.f32 %v2777_v17  ;;  %3556 = vrot.lane.b32.xlu1 %v8187_v34, %s7111_s25 }
 0x901   : > { %6628 = vpow2.f32 %v2779_v4 }
 0x903   : > { %3558 = vrot.lane.b32.xlu0 %v8190_v52, %s7111_s25 }
 0x904   : > { %3560 = vrot.lane.b32.xlu1 %v8197_v9, %s7111_s25 }
 0x906   : > { %v8417_v57 = vpop.eup %6622 }
 0x907   : > { %3562 = vrot.lane.b32.xlu0 %v8200_v28, %s7111_s25 }
 0x908   : > { %3564 = vrot.lane.b32.xlu1 %v8207_v10, %s7111_s25  ;;  %v8421_v3 = vpop.eup %6624 }
 0x90a   : > { %v8423_v19 = vpop.eup %6626 }
 0x90b   : > { %v8425_v38 = vpop.eup %6628  ;;  %v2839_v50 = vpack.c.bf16 %v8423_v19, %v8421_v3  ;;  %3566 = vrot.lane.b32.xlu0 %v8210_v30, %s7111_s25 }
 0x90c   : > { %v2840_v22 = vpack.c.bf16 %v8417_v57, %v8425_v38  ;;  %3568 = vrot.lane.b32.xlu1 %v8217_v60, %s7111_s25 }
 0x90d   : > { %6042 = vmatprep.mubr.bf16.mxu1 %v2839_v50 }
 0x90e   : > { %6043 = vmatmul.mubr.bf16.vlgmr.msra.gmra.mrb[80].mxu1 %v2840_v22 }
 0x90f   : > { %6059 = vmatpush3.bf16.xpose.msra.mxu1 %v3081_v55  ;;  %3851 = vrot.lane.b32.xlu0 %v8230_v24, %s7111_s25 }
 0x910   : > { %6291 = vmatprep.subr.msk.bf16.mxu1 %vm482_vm0, %v3043_v35  ;;  %3853 = vrot.lane.b32.xlu1 %v8235_v5, %s7111_s25  ;;  %v3090_v35 = vsel %vm482_vm0, %v3047_v7, 0 }
 0x913   : > { %3855 = vrot.lane.b32.xlu0 %v8239_v54, %s7111_s25 }
 0x914   : > { %3857 = vrot.lane.b32.xlu1 %v8244_v23, %s7111_s25 }
 0x917   : > { %6061 = vmatpush3.bf16.xpose.msra.mxu1 %v3084_v62  ;;  %3863 = vrot.lane.b32.xlu0 %v8259_v2, %s7111_s25 }
 0x918   : > { %6292 = vmatprep.subr.msk.bf16.mxu1 %vm482_vm0, %v3045_v6  ;;  %3859 = vrot.lane.b32.xlu1 %v8249_v12, %s7111_s25 }
 0x91b   : > { %4100 = vrot.lane.b32.xlu0 %v8065_v48, %s7112_s27  ;;  %v3049_v48 = vpop.permute.xlu0 %3048 }
 0x91c   : > { %3861 = vrot.lane.b32.xlu1 %v8254_v14, %s7111_s25 }
 0x91f   : > { %6063 = vmatpush3.bf16.xpose.msra.mxu1 %v3087_v44  ;;  %4102 = vrot.lane.b32.xlu0 %v8060_v49, %s7112_s27 }
 0x920   : > { %6293 = vmatprep.subr.msk.bf16.mxu1 %vm482_vm0, %v3047_v7  ;;  %3865 = vrot.lane.b32.xlu1 %v8264_v46, %s7111_s25 }
 0x923   : > { %4106 = vrot.lane.b32.xlu0 %v8099_v43, %s7112_s27 }
 0x924   : > { %4104 = vrot.lane.b32.xlu1 %v8070_v53, %s7112_s27  ;;  %v3093_v53 = vsel %vm482_vm0, %v3049_v48, 0 }
 0x927   : > { %6065 = vmatpush3.bf16.xpose.msra.mxu1 %v3090_v35  ;;  %4110 = vrot.lane.b32.xlu0 %v8113_v59, %s7112_s27 }
 0x928   : > { %6294 = vmatprep.subr.msk.bf16.mxu1 %vm482_vm0, %v3049_v48  ;;  %4108 = vrot.lane.b32.xlu1 %v8106_v36, %s7112_s27 }
 0x92b   : > { %4112 = vrot.lane.b32.xlu0 %v8122_v41, %s7112_s27 }
 0x92c   : > { %4086 = vrot.lane.b32.xlu1 %v8187_v34, %s7112_s27 }
 0x92e   : > { %v2740_v49 = vpop.xlane.xlu0 %2739 }
 0x92f   : > { %6067 = vmatpush3.bf16.xpose.msra.mxu1 %v3093_v53  ;;  %4114 = vrot.lane.b32.xlu0 %v8132_v1, %s7112_s27  ;;  %v2765_v8 = vsub.f32 %v8309_v61, %v2740_v49 }
 0x930   : > { %v2736_v6 = vpop.xlane.xlu1 %2735  ;;  %4090 = vrot.lane.b32.xlu1 %v8197_v9, %s7112_s27 }
 0x931   : > { %v2763_v43 = vsub.f32 %v8311_v42, %v2736_v6 }
 0x932   : > { %v2744_v36 = vpop.xlane.xlu0 %2743 }
 0x933   : > { %4084 = vrot.lane.b32.xlu0 %v8180_v33, %s7112_s27  ;;  %v2783_v47 = vmul.f32 1.442695, %v2763_v43  ;;  %v2767_v37 = vsub.f32 %v8319_v26, %v2744_v36 }
 0x934   : > { %v2742_v59 = vpop.xlane.xlu1 %2741  ;;  %4094 = vrot.lane.b32.xlu1 %v8207_v10, %s7112_s27 }
 0x935   : > { %v2766_v41 = vsub.f32 %v8313_v63, %v2742_v59  ;;  %v2787_v63 = vmul.f32 1.442695, %v2765_v8  ;;  %6630 = vpow2.f32 %v2783_v47  ;;  %v2791_v61 = vmul.f32 1.442695, %v2767_v37 }
 0x936   : > { %v2746_v1 = vpop.xlane.xlu0 %2745 }
 0x937   : > { %v2789_v34 = vmul.f32 1.442695, %v2766_v41  ;;  %v2768_v9 = vsub.f32 %v8323_v25, %v2746_v1  ;;  %4088 = vrot.lane.b32.xlu0 %v8190_v52, %s7112_s27 }
 0x938   : > { %v2738_v42 = vpop.xlane.xlu1 %2737  ;;  %4098 = vrot.lane.b32.xlu1 %v8217_v60, %s7112_s27 }
 0x939   : > { %v2793_v33 = vmul.f32 1.442695, %v2768_v9  ;;  %v2764_v10 = vsub.f32 %v8315_v21, %v2738_v42  ;;  %6632 = vpow2.f32 %v2789_v34 }
 0x93b   : > { %v2785_v4 = vmul.f32 1.442695, %v2764_v10  ;;  %4092 = vrot.lane.b32.xlu0 %v8200_v28, %s7112_s27  ;;  %6634 = vpow2.f32 %v2793_v33 }
 0x93c   : > { %v2748_v25 = vpop.xlane.xlu1 %2747 }
 0x93d   : > { %6636 = vpow2.f32 %v2785_v4  ;;  %v2769_v26 = vsub.f32 %v8317_v51, %v2748_v25 }
 0x93e   : > { %6638 = vpow2.f32 %v2787_v63 }
 0x93f   : > { %6640 = vpow2.f32 %v2791_v61  ;;  %4096 = vrot.lane.b32.xlu0 %v8210_v30, %s7112_s27  ;;  %v2795_v52 = vmul.f32 1.442695, %v2769_v26  ;;  %v8503_v50 = vpop.eup %6630  ;;  %v2756_v30 = vpop.xlane.xlu0 %2755 }
 0x940   : > { %v2750_v21 = vpop.xlane.xlu1 %2749  ;;  %v2773_v53 = vsub.f32 %v8327_v58, %v2756_v30 }
 0x941   : > { %v2770_v60 = vsub.f32 %v8321_v15, %v2750_v21  ;;  %6642 = vpow2.f32 %v2795_v52 }
 0x943   : > { %v2797_v17 = vmul.f32 1.442695, %v2770_v60  ;;  %4381 = vrot.lane.b32.xlu0 %v8230_v24, %s7112_s27  ;;  %v8505_v22 = vpop.eup %6632  ;;  %v3053_v36 = vpop.permute.xlu0 %3052 }
 0x944   : > { %v2752_v28 = vpop.xlane.xlu1 %2751  ;;  %v3099_v42 = vsel %vm482_vm0, %v3053_v36, 0 }
 0x945   : > { %6644 = vpow2.f32 %v2797_v17  ;;  %v8507_v51 = vpop.eup %6634  ;;  %v2771_v62 = vsub.f32 %v8329_v13, %v2752_v28 }
 0x946   : > { %10211 = vst [vmem:[#allocation124_spill] sm:$0xff] %v8507_v51 }
 0x947   : > { %v8509_v55 = vpop.eup %6636  ;;  %v2799_v13 = vmul.f32 1.442695, %v2771_v62  ;;  %v3055_v37 = vpop.permute.xlu0 %3054 }
 0x948   : > { %v8512_v44 = vpop.eup %6638  ;;  %v2758_v15 = vpop.xlane.xlu1 %2757  ;;  %v2841_v24 = vpack.c.bf16 %v8509_v55, %v8503_v50  ;;  %v3102_v17 = vsel %vm482_vm0, %v3055_v37, 0 }
 0x949   : > { %v8516_v7 = vpop.eup %6640  ;;  %v2774_v35 = vsub.f32 %v8331_v27, %v2758_v15  ;;  %v2842_v48 = vpack.c.bf16 %v8505_v22, %v8512_v44  ;;  %v2803_v27 = vmul.f32 1.442695, %v2773_v53  ;;  %6646 = vpow2.f32 %v2799_v13 }
 0x94a   : > { %10212 = vst [vmem:[#allocation125_spill] sm:$0xff] %v8516_v7  ;;  %6046 = vmatprep.mubr.bf16.mxu1 %v2841_v24  ;;  %v2843_v49 = vpack.c.bf16 %v8507_v51, %v8516_v7 }
 0x94b   : > { %6047 = vmatmul.mubr.bf16.gmra.mrb[84].mxu1 %v2842_v48  ;;  %v2805_v6 = vmul.f32 1.442695, %v2774_v35  ;;  %v8525_v41 = vpop.eup %6642 }
 0x94c   : > { %v2754_v43 = vpop.xlane.xlu1 %2753  ;;  %6050 = vmatprep.mubr.bf16.mxu1 %v2843_v49  ;;  %10213 = vst [vmem:[#allocation126_spill] sm:$0xff] %v8525_v41 }
 0x94d   : > { %v2772_v59 = vsub.f32 %v8335_v31, %v2754_v43  ;;  %6648 = vpow2.f32 %v2805_v6  ;;  %v3025_v31 = vpop.permute.xlu0 %3024 }
 0x94f   : > { %v8527_v8 = vpop.eup %6644  ;;  %v2801_v47 = vmul.f32 1.442695, %v2772_v59 }
 0x950   : > { %10214 = vst [vmem:[#allocation127_spill] sm:$0xff] %v8527_v8  ;;  %v3051_v58 = vpop.permute.xlu1 %3050  ;;  %v2844_v1 = vpack.c.bf16 %v8527_v8, %v8525_v41 }
 0x951   : > { %6650 = vpow2.f32 %v2801_v47  ;;  %6295 = vmatprep.subr.msk.bf16.mxu1 %vm482_vm0, %v3051_v58  ;;  %v3096_v34 = vsel %vm482_vm0, %v3051_v58, 0  ;;  %v3029_v33 = vpop.permute.xlu0 %3028 }
 0x952   : > { %6652 = vpow2.f32 %v2803_v27  ;;  %6069 = vmatpush3.bf16.xpose.msra.mxu1 %v3096_v34 }
 0x953   : > { %6051 = vmatmul.mubr.bf16.gmra.mrb[88].mxu1 %v2844_v1  ;;  %6296 = vmatprep.subr.msk.bf16.mxu1 %vm482_vm0, %v3053_v36  ;;  %v8535_v63 = vpop.eup %6646 }
 0x954   : > { %v3027_v9 = vpop.permute.xlu1 %3026  ;;  %10215 = vst [vmem:[#allocation128_spill] sm:$0xff] %v8535_v63 }
 0x955   : > { %v3033_v52 = vpop.permute.xlu0 %3032 }
 0x957   : > { %v8537_v61 = vpop.eup %6648 }
 0x958   : > { %v3031_v10 = vpop.permute.xlu1 %3030  ;;  %10216 = vst [vmem:[#allocation129_spill] sm:$0xff] %v8537_v61 }
 0x959   : > { %v3037_v28 = vpop.permute.xlu0 %3036 }
 0x95a   : > { %6071 = vmatpush3.bf16.xpose.msra.mxu1 %v3099_v42 }
 0x95b   : > { %v8539_v4 = vpop.eup %6650  ;;  %6297 = vmatprep.subr.msk.bf16.mxu1 %vm482_vm0, %v3055_v37 }
 0x95c   : > { %10217 = vst [vmem:[#allocation130_spill] sm:$0xff] %v8539_v4  ;;  %v8542_v25 = vpop.eup %6652  ;;  %v2845_v26 = vpack.c.bf16 %v8539_v4, %v8535_v63  ;;  %v3035_v21 = vpop.permute.xlu1 %3034 }
 0x95d   : > { %10218 = vst [vmem:[#allocation131_spill] sm:$0xff] %v8542_v25  ;;  %v2846_v60 = vpack.c.bf16 %v8537_v61, %v8542_v25  ;;  %v3322_v62 = vpop.permute.xlu0 %3321 }
 0x95e   : > { %6054 = vmatprep.mubr.bf16.mxu1 %v2845_v26  ;;  %6090 = vmatprep.subr.bf16.mxu0 %v3322_v62 }
 0x95f   : > { %6055 = vmatmul.mubr.bf16.gmra.mrb[92].mxu1 %v2846_v60  ;;  %6091 = vmatpush3.bf16.msra.mxu0 %v3322_v62 }
 0x960   : > { %6074 = vmatprep.mubr.msk.bf16.mxu1 %vm482_vm0, %v3025_v31  ;;  %v3039_v30 = vpop.permute.xlu1 %3038 }
 0x961   : > { %v3326_v24 = vpop.permute.xlu0 %3325 }
 0x962   : > { %6073 = vmatpush3.bf16.xpose.msra.mxu1 %v3102_v17 }
 0x964   : > { %v3324_v15 = vpop.permute.xlu1 %3323 }
 0x965   : > { %6092 = vmatprep.subr.bf16.mxu0 %v3324_v15  ;;  %v3334_v35 = vpop.permute.xlu0 %3333 }
 0x966   : > { %6093 = vmatpush3.bf16.msra.mxu0 %v3324_v15 }
 0x967   : > { %6094 = vmatprep.subr.bf16.mxu0 %v3326_v24 }
 0x968   : > { %v3328_v48 = vpop.permute.xlu1 %3327 }
 0x969   : > { %6075 = vmatmul.mubr.msk.bf16.vlgmr.msra.gmra.mrb[96].mxu1 %vm482_vm0, %v3027_v9  ;;  %v8557_v53 = vpop.permute.xlu0 %3570 }
 0x96a   : > { %6078 = vmatprep.mubr.msk.bf16.mxu1 %vm482_vm0, %v3029_v33  ;;  %6095 = vmatpush3.bf16.msra.mxu0 %v3326_v24 }
 0x96b   : > { %6096 = vmatprep.subr.bf16.mxu0 %v3328_v48 }
 0x96c   : > { %v3330_v49 = vpop.permute.xlu1 %3329 }
 0x96d   : > { %v8559_v13 = vpop.permute.xlu0 %3572 }
 0x96e   : > { %6097 = vmatpush3.bf16.msra.mxu0 %v3328_v48 }
 0x96f   : > { %6098 = vmatprep.subr.bf16.mxu0 %v3330_v49 }
 0x970   : > { %v3332_v6 = vpop.permute.xlu1 %3331 }
 0x971   : > { %6079 = vmatmul.mubr.msk.bf16.gmra.mrb[100].mxu1 %vm482_vm0, %v3031_v10  ;;  %v8561_v43 = vpop.permute.xlu0 %3576 }
 0x972   : > { %6082 = vmatprep.mubr.msk.bf16.mxu1 %vm482_vm0, %v3033_v52  ;;  %6099 = vmatpush3.bf16.msra.mxu0 %v3330_v49 }
 0x973   : > { %6100 = vmatprep.subr.bf16.mxu0 %v3332_v6 }
 0x974   : > { %v3336_v36 = vpop.permute.xlu1 %3335 }
 0x975   : > { %v8563_v59 = vpop.permute.xlu0 %3580 }
 0x976   : > { %6101 = vmatpush3.bf16.msra.mxu0 %v3332_v6 }
 0x977   : > { %6102 = vmatprep.subr.bf16.mxu0 %v3334_v35 }
 0x978   : > { %v8569_v47 = vpop.permute.xlu1 %3574 }
 0x979   : > { %6083 = vmatmul.mubr.msk.bf16.gmra.mrb[104].mxu1 %vm482_vm0, %v3035_v21  ;;  %v8565_v27 = vpop.permute.xlu0 %3582 }
 0x97a   : > { %6086 = vmatprep.mubr.msk.bf16.mxu1 %vm482_vm0, %v3037_v28  ;;  %6103 = vmatpush3.bf16.msra.mxu0 %v3334_v35 }
 0x97b   : > { %6104 = vmatprep.subr.bf16.mxu0 %v3336_v36 }
 0x97c   : > { %v8573_v1 = vpop.permute.xlu1 %3578 }
 0x97d   : > { %v8571_v58 = vpop.permute.xlu0 %3584 }
 0x97e   : > { %6105 = vmatpush3.bf16.msra.mxu0 %v3336_v36 }
 0x97f   : > { %6298 = vmatprep.subr.msk.bf16.mxu0 %vm482_vm0, %v8557_v53 }
 0x980   : > { %v8577_v34 = vpop.permute.xlu1 %3556 }
 0x981   : > { %6087 = vmatmul.mubr.msk.bf16.gmra.mrb[108].mxu1 %vm482_vm0, %v3039_v30  ;;  %v8575_v37 = vpop.permute.xlu0 %3554 }
 0x984   : > { %v8581_v9 = vpop.permute.xlu1 %3560 }
 0x985   : > { %v8579_v31 = vpop.permute.xlu0 %3558 }
 0x988   : > { %v8585_v33 = vpop.permute.xlu1 %3564 }
 0x989   : > { %v8583_v42 = vpop.permute.xlu0 %3562 }
 0x98c   : > { %v8589_v26 = vpop.permute.xlu1 %3568 }
 0x98d   : > { %v8587_v10 = vpop.permute.xlu0 %3566 }
 0x990   : > { %v3854_v21 = vpop.permute.xlu1 %3853 }
 0x991   : > { %v3852_v52 = vpop.permute.xlu0 %3851 }
 0x992   : > { %6154 = vmatprep.subr.bf16.mxu1 %v3852_v52 }
 0x993   : > { %6155 = vmatpush3.bf16.msra.mxu1 %v3852_v52 }
 0x994   : > { %6156 = vmatprep.subr.bf16.mxu1 %v3854_v21  ;;  %v3858_v17 = vpop.permute.xlu1 %3857 }
 0x995   : > { %v3856_v60 = vpop.permute.xlu0 %3855 }
 0x997   : > { %6157 = vmatpush3.bf16.msra.mxu1 %v3854_v21 }
 0x998   : > { %6158 = vmatprep.subr.bf16.mxu1 %v3856_v60  ;;  %v3860_v28 = vpop.permute.xlu1 %3859 }
 0x999   : > { %v3864_v62 = vpop.permute.xlu0 %3863 }
 0x99b   : > { %6159 = vmatpush3.bf16.msra.mxu1 %v3856_v60 }
 0x99c   : > { %6160 = vmatprep.subr.bf16.mxu1 %v3858_v17  ;;  %v3862_v30 = vpop.permute.xlu1 %3861 }
 0x99d   : > { %v8599_v6 = vpop.permute.xlu0 %4100 }
 0x99e   : > { %10222 = vst [vmem:[#allocation135_spill] sm:$0xff] %v8599_v6 }
 0x99f   : > { %6161 = vmatpush3.bf16.msra.mxu1 %v3858_v17 }
 0x9a0   : > { %6162 = vmatprep.subr.bf16.mxu1 %v3860_v28  ;;  %v3866_v48 = vpop.permute.xlu1 %3865 }
 0x9a3   : > { %6163 = vmatpush3.bf16.msra.mxu1 %v3860_v28 }
 0x9a4   : > { %6164 = vmatprep.subr.bf16.mxu1 %v3862_v30 }
 0x9a7   : > { %6165 = vmatpush3.bf16.msra.mxu1 %v3862_v30 }
 0x9a8   : > { %6166 = vmatprep.subr.bf16.mxu1 %v3864_v62 }
 0x9ab   : > { %6167 = vmatpush3.bf16.msra.mxu1 %v3864_v62 }
 0x9ac   : > { %6168 = vmatprep.subr.bf16.mxu1 %v3866_v48 }
 0x9af   : > { %6169 = vmatpush3.bf16.msra.mxu1 %v3866_v48 }
 0x9b0   : > { %6306 = vmatprep.subr.msk.bf16.mxu1 %vm482_vm0, %v8599_v6 }
 0x9e1   : > { %v8591_v15 = vpop.f32.mrb[80].mxu1 }
 0x9e2   : > { %10219 = vst [vmem:[#allocation132_spill] sm:$0xff] %v8591_v15  ;;  %v8593_v24 = vpop.f32.mrb[81].mxu1 }
 0x9e3   : > { %10220 = vst [vmem:[#allocation133_spill] sm:$0xff] %v8593_v24  ;;  %v8595_v35 = vpop.f32.mrb[82].mxu1  ;;  %v8690_v24 = vpop.permute.xlu1 %4104 }
 0x9e4   : > { %10221 = vst [vmem:[#allocation134_spill] sm:$0xff] %v8595_v35  ;;  %v8597_v49 = vpop.f32.mrb[83].mxu1  ;;  %10240 = vst [vmem:[#allocation153_spill] sm:$0xff] %v8690_v24 }
 0xa1e   : > { %v8603_v36 = vpop.f32.mrb[84].mxu1 }
 0xa1f   : > { %10223 = vst [vmem:[#allocation136_spill] sm:$0xff] %v8603_v36  ;;  %v8605_v52 = vpop.f32.mrb[85].mxu1 }
 0xa20   : > { %10224 = vst [vmem:[#allocation137_spill] sm:$0xff] %v8605_v52  ;;  %v8607_v21 = vpop.f32.mrb[86].mxu1 }
 0xa21   : > { %10225 = vst [vmem:[#allocation138_spill] sm:$0xff] %v8607_v21  ;;  %v8609_v60 = vpop.f32.mrb[87].mxu1 }
 0xa22   : > { %10226 = vst [vmem:[#allocation139_spill] sm:$0xff] %v8609_v60 }
 0xa26   : > { %v8611_v17 = vpop.f32.mrb[88].mxu1 }
 0xa27   : > { %10227 = vst [vmem:[#allocation140_spill] sm:$0xff] %v8611_v17  ;;  %v8613_v28 = vpop.f32.mrb[89].mxu1 }
 0xa28   : > { %10228 = vst [vmem:[#allocation141_spill] sm:$0xff] %v8613_v28  ;;  %v8615_v30 = vpop.f32.mrb[90].mxu1 }
 0xa29   : > { %10229 = vst [vmem:[#allocation142_spill] sm:$0xff] %v8615_v30  ;;  %v8617_v62 = vpop.f32.mrb[91].mxu1 }
 0xa2a   : > { %10230 = vst [vmem:[#allocation143_spill] sm:$0xff] %v8617_v62 }
 0xa32   : > { %v8619_v48 = vpop.f32.mrb[92].mxu1 }
 0xa33   : > { %10231 = vst [vmem:[#allocation144_spill] sm:$0xff] %v8619_v48  ;;  %v8621_v61 = vpop.f32.mrb[93].mxu1 }
 0xa34   : > { %10232 = vst [vmem:[#allocation145_spill] sm:$0xff] %v8621_v61  ;;  %v8623_v25 = vpop.f32.mrb[94].mxu1 }
 0xa35   : > { %10233 = vst [vmem:[#allocation146_spill] sm:$0xff] %v8623_v25  ;;  %v8625_v63 = vpop.f32.mrb[95].mxu1 }
 0xa36   : > { %10234 = vst [vmem:[#allocation147_spill] sm:$0xff] %v8625_v63 }
 0xa3c   : > { %v8627_v4 = vpop.f32.mrb[96].mxu1 }
 0xa3d   : > { %3205 = vmax.xlane.f32.xlu0 %v8627_v4  ;;  %v3138_v6 = vpop.f32.mrb[97].mxu1 }
 0xa3e   : > { %v8630_v17 = vpop.f32.mrb[98].mxu1 }
 0xa3f   : > { %v3141_v28 = vpop.f32.mrb[99].mxu1 }
 0xa40   : > { %3203 = vmax.xlane.f32.xlu1 %v3141_v28 }
 0xa41   : > { %3201 = vmax.xlane.f32.xlu0 %v3138_v6 }
 0xa44   : > { %v8632_v30 = vpop.f32.mrb[100].mxu1 }
 0xa45   : > { %3207 = vmax.xlane.f32.xlu0 %v8630_v17  ;;  %v8635_v48 = vpop.f32.mrb[101].mxu1 }
 0xa46   : > { %v8637_v61 = vpop.f32.mrb[102].mxu1 }
 0xa47   : > { %v8639_v25 = vpop.f32.mrb[103].mxu1 }
 0xa4c   : > { %v8641_v63 = vpop.f32.mrb[104].mxu1 }
 0xa4d   : > { %v8643_v62 = vpop.f32.mrb[105].mxu1 }
 0xa4e   : > { %v8645_v41 = vpop.f32.mrb[106].mxu1 }
 0xa4f   : > { %v8647_v8 = vpop.f32.mrb[107].mxu1 }
 0xa51   : > { %4383 = vrot.lane.b32.xlu1 %v8235_v5, %s7112_s27  ;;  %v8675_v5 = vpop.permute.xlu0 %4102 }
 0xa52   : > { %10235 = vst [vmem:[#allocation148_spill] sm:$0xff] %v8675_v5  ;;  %v8694_v5 = vpop.permute.xlu1 %4108 }
 0xa53   : > { %10242 = vst [vmem:[#allocation155_spill] sm:$0xff] %v8694_v5 }
 0xa54   : > { %v8651_v7 = vpop.f32.mrb[108].mxu1 }
 0xa55   : > { %v8653_v51 = vpop.f32.mrb[109].mxu1 }
 0xa56   : > { %v8655_v36 = vpop.f32.mrb[110].mxu1 }
 0xa57   : > { %v8657_v52 = vpop.f32.mrb[111].mxu1 }
 0xa5b   : > { %4385 = vrot.lane.b32.xlu0 %v8239_v54, %s7112_s27  ;;  %v8678_v54 = vpop.permute.xlu0 %4106 }
 0xa5c   : > { %10236 = vst [vmem:[#allocation149_spill] sm:$0xff] %v8678_v54  ;;  %v8698_v54 = vpop.permute.xlu1 %4086 }
 0xa5d   : > { %10244 = vst [vmem:[#allocation157_spill] sm:$0xff] %v8698_v54 }
 0xa5f   : > { %4387 = vrot.lane.b32.xlu0 %v8244_v23, %s7112_s27 }
 0xa63   : > { %4389 = vrot.lane.b32.xlu0 %v8249_v12, %s7112_s27  ;;  %v8680_v12 = vpop.permute.xlu0 %4110 }
 0xa64   : > { %10237 = vst [vmem:[#allocation150_spill] sm:$0xff] %v8680_v12 }
 0xa67   : > { %v8684_v23 = vpop.permute.xlu0 %4112 }
 0xa68   : > { %10238 = vst [vmem:[#allocation151_spill] sm:$0xff] %v8684_v23 }
 0xa6b   : > { %v8688_v15 = vpop.permute.xlu0 %4114 }
 0xa6c   : > { %10239 = vst [vmem:[#allocation152_spill] sm:$0xff] %v8688_v15 }
 0xa6f   : > { %v8692_v21 = vpop.permute.xlu0 %4084 }
 0xa70   : > { %10241 = vst [vmem:[#allocation154_spill] sm:$0xff] %v8692_v21 }
 0xa73   : > { %v8696_v60 = vpop.permute.xlu0 %4088 }
 0xa74   : > { %10243 = vst [vmem:[#allocation156_spill] sm:$0xff] %v8696_v60 }
 0xa75   : > { %3213 = vmax.xlane.f32.xlu1 %v8632_v30 }
 0xa77   : > { %v8700_v12 = vpop.permute.xlu0 %4092 }
 0xa78   : > { %10245 = vst [vmem:[#allocation158_spill] sm:$0xff] %v8700_v12 }
 0xa79   : > { %3209 = vmax.xlane.f32.xlu1 %v8635_v48 }
 0xa7b   : > { %v8705_v23 = vpop.permute.xlu0 %4096 }
 0xa7c   : > { %10247 = vst [vmem:[#allocation160_spill] sm:$0xff] %v8705_v23 }
 0xa7d   : > { %3215 = vmax.xlane.f32.xlu1 %v8637_v61 }
 0xa7f   : > { %v8709_v15 = vpop.permute.xlu0 %4381 }
 0xa81   : > { %3217 = vmax.xlane.f32.xlu1 %v8643_v62 }
 0xa82   : > { %3211 = vmax.xlane.f32.xlu0 %v8639_v25 }
 0xa85   : > { %3223 = vmax.xlane.f32.xlu1 %v8645_v41 }
 0xa86   : > { %3221 = vmax.xlane.f32.xlu0 %v8641_v63 }
 0xa89   : > { %3219 = vmax.xlane.f32.xlu1 %v8647_v8 }
 0xa8a   : > { %3225 = vmax.xlane.f32.xlu0 %v8653_v51 }
 0xa8d   : > { %3229 = vmax.xlane.f32.xlu1 %v8651_v7 }
 0xa91   : > { %3231 = vmax.xlane.f32.xlu1 %v8655_v36 }
 0xaa0   : > { %4393 = vrot.lane.b32.xlu0 %v8259_v2, %s7112_s27  ;;  %v8702_v2 = vpop.permute.xlu1 %4090 }
 0xaa1   : > { %10246 = vst [vmem:[#allocation159_spill] sm:$0xff] %v8702_v2 }
 0xaa2   : > { %4391 = vrot.lane.b32.xlu1 %v8254_v14, %s7112_s27 }
 0xaa4   : > { %v8707_v14 = vpop.permute.xlu1 %4094 }
 0xaa5   : > { %10248 = vst [vmem:[#allocation161_spill] sm:$0xff] %v8707_v14 }
 0xaa8   : > { %v8712_v21 = vpop.permute.xlu1 %4098 }
 0xaa9   : > { %10249 = vst [vmem:[#allocation162_spill] sm:$0xff] %v8712_v21 }
 0xabf   : > { %3227 = vmax.xlane.f32.xlu0 %v8657_v52 }
 0xac6   : > { %1200 = vadd.xlane.f32.xlu1 %v7673_v18 }
 0xaca   : > { %1731 = vadd.xlane.f32.xlu1 %v7901_v39  ;;  %v3206_v60 = vpop.xlane.xlu0 %3205 }
 0xacb   : > { %v3235_v12 = vsub.f32 %v8627_v4, %v3206_v60 }
 0xacd   : > { %v3204_v54 = vpop.xlane.xlu1 %3203  ;;  %v3253_v14 = vmul.f32 1.442695, %v3235_v12 }
 0xace   : > { %v3234_v5 = vsub.f32 %v3141_v28, %v3204_v54  ;;  %2262 = vadd.xlane.f32.xlu1 %v8074_v32  ;;  %v3202_v2 = vpop.xlane.xlu0 %3201  ;;  %v10259_v54 = vld [vmem:[#allocation68_spill] sm:$0xff] }
 0xacf   : > { %v3233_v24 = vsub.f32 %v3138_v6, %v3202_v2  ;;  %v10255_v6 = vld [vmem:[#allocation95_spill] sm:$0xff]  ;;  %v10260_v2 = vld [vmem:[#allocation72_spill] sm:$0xff] }
 0xad0   : > { %v3251_v23 = vmul.f32 1.442695, %v3234_v5  ;;  %v10258_v5 = vld [vmem:[#allocation44_spill] sm:$0xff] }
 0xad1   : > { %v3249_v35 = vmul.f32 1.442695, %v3233_v24 }
 0xad2   : > { %6654 = vpow2.f32 %v3251_v23  ;;  %1204 = vadd.xlane.f32.xlu1 %v7681_v20  ;;  %v3208_v18 = vpop.xlane.xlu0 %3207 }
 0xad3   : > { %6656 = vpow2.f32 %v3249_v35  ;;  %v3236_v21 = vsub.f32 %v8630_v17, %v3208_v18  ;;  %v10257_v17 = vld [vmem:[#allocation40_spill] sm:$0xff] }
 0xad4   : > { %6658 = vpow2.f32 %v3253_v14  ;;  %v10261_v14 = vld [vmem:[#allocation96_spill] sm:$0xff] }
 0xad5   : > { %v3255_v39 = vmul.f32 1.442695, %v3236_v21  ;;  %4395 = vrot.lane.b32.xlu0 %v8264_v46, %s7112_s27  ;;  %v8760_v21 = vpop.permute.xlu1 %4383 }
 0xad6   : > { %1735 = vadd.xlane.f32.xlu1 %v7910_v0  ;;  %v3611_v0 = vsel %vm482_vm0, %v8557_v53, 0  ;;  %v3617_v53 = vsel %vm482_vm0, %v8569_v47, 0  ;;  %v8765_v60 = vpop.permute.xlu0 %4385 }
 0xad7   : > { %6660 = vpow2.f32 %v3255_v39 }
 0xada   : > { %2266 = vadd.xlane.f32.xlu1 %v8084_v16  ;;  %v10251_v16 = vld [vmem:[#allocation39_spill] sm:$0xff]  ;;  %v8772_v12 = vpop.permute.xlu0 %4387 }
 0xadc   : > { %v8723_v32 = vpop.eup %6654 }
 0xadd   : > { %v8725_v4 = vpop.eup %6656 }
 0xade   : > { %1208 = vadd.xlane.f32.xlu1 %v7692_v29  ;;  %v3313_v20 = vpack.c.bf16 %v8723_v32, %v8725_v4  ;;  %v8730_v24 = vpop.eup %6658  ;;  %v3614_v29 = vsel %vm482_vm0, %v8559_v13, 0 }
 0xae0   : > { %6106 = vmatprep.mubr.bf16.mxu0 %v3313_v20  ;;  %v10262_v20 = vld [vmem:[#allocation102_spill] sm:$0xff] }
 0xae1   : > { %v8732_v35 = vpop.eup %6660 }
 0xae2   : > { %1739 = vadd.xlane.f32.xlu1 %v7920_v56  ;;  %v3314_v46 = vpack.c.bf16 %v8732_v35, %v8730_v24  ;;  %v10250_v56 = vld [vmem:[#allocation99_spill] sm:$0xff] }
 0xae4   : > { %6107 = vmatmul.mubr.bf16.vlgmr.msra.gmra.mrb[64].mxu0 %v3314_v46  ;;  %v8780_v46 = vpop.permute.xlu0 %4389 }
 0xae5   : > { %6123 = vmatpush3.bf16.xpose.msra.mxu0 %v3611_v0  ;;  %v10263_v0 = vld [vmem:[#allocation41_spill] sm:$0xff] }
 0xae6   : > { %6299 = vmatprep.subr.msk.bf16.mxu0 %vm482_vm0, %v8559_v13  ;;  %2270 = vadd.xlane.f32.xlu1 %v8136_v40  ;;  %v10253_v40 = vld [vmem:[#allocation67_spill] sm:$0xff]  ;;  %v10254_v13 = vld [vmem:[#allocation73_spill] sm:$0xff] }
 0xaea   : > { %1212 = vadd.xlane.f32.xlu1 %v7701_v45  ;;  %v10252_v45 = vld [vmem:[#allocation45_spill] sm:$0xff] }
 0xaed   : > { %6125 = vmatpush3.bf16.xpose.msra.mxu0 %v3614_v29  ;;  %v3626_v29 = vsel %vm482_vm0, %v8563_v59, 0 }
 0xaee   : > { %6300 = vmatprep.subr.msk.bf16.mxu0 %vm482_vm0, %v8569_v47  ;;  %1743 = vadd.xlane.f32.xlu1 %v7929_v11  ;;  %v3620_v11 = vsel %vm482_vm0, %v8561_v43, 0  ;;  %v10256_v47 = vld [vmem:[#allocation100_spill] sm:$0xff] }
 0xaf2   : > { %2274 = vadd.xlane.f32.xlu1 %v10250_v56 }
 0xaf4   : > { %1198 = vadd.xlane.f32.xlu0 %v10251_v16 }
 0xaf5   : > { %6127 = vmatpush3.bf16.xpose.msra.mxu0 %v3617_v53  ;;  %v10264_v53 = vld [vmem:[#allocation49_spill] sm:$0xff] }
 0xaf6   : > { %6301 = vmatprep.subr.msk.bf16.mxu0 %vm482_vm0, %v8561_v43  ;;  %1216 = vadd.xlane.f32.xlu1 %v10252_v45  ;;  %v3623_v43 = vsel %vm482_vm0, %v8573_v1, 0 }
 0xaf8   : > { %1729 = vadd.xlane.f32.xlu0 %v10253_v40 }
 0xafa   : > { %1747 = vadd.xlane.f32.xlu1 %v10254_v13 }
 0xafc   : > { %2260 = vadd.xlane.f32.xlu0 %v10255_v6  ;;  %v10265_v6 = vld [vmem:[#allocation69_spill] sm:$0xff] }
 0xafd   : > { %6129 = vmatpush3.bf16.xpose.msra.mxu0 %v3620_v11 }
 0xafe   : > { %6302 = vmatprep.subr.msk.bf16.mxu0 %vm482_vm0, %v8573_v1  ;;  %2278 = vadd.xlane.f32.xlu1 %v10256_v47  ;;  %v10266_v47 = vld [vmem:[#allocation77_spill] sm:$0xff] }
 0xb00   : > { %1202 = vadd.xlane.f32.xlu0 %v10257_v17 }
 0xb02   : > { %v3214_v28 = vpop.xlane.xlu1 %3213  ;;  %1220 = vadd.xlane.f32.xlu1 %v10258_v5 }
 0xb03   : > { %v3239_v56 = vsub.f32 %v8632_v30, %v3214_v28 }
 0xb04   : > { %1733 = vadd.xlane.f32.xlu0 %v10259_v54 }
 0xb05   : > { %6131 = vmatpush3.bf16.xpose.msra.mxu0 %v3623_v43  ;;  %v3261_v11 = vmul.f32 1.442695, %v3239_v56  ;;  %v10267_v43 = vld [vmem:[#allocation97_spill] sm:$0xff] }
 0xb06   : > { %6303 = vmatprep.subr.msk.bf16.mxu0 %vm482_vm0, %v8563_v59  ;;  %v3210_v23 = vpop.xlane.xlu1 %3209  ;;  %1751 = vadd.xlane.f32.xlu1 %v10260_v2 }
 0xb07   : > { %v3237_v18 = vsub.f32 %v8635_v48, %v3210_v23 }
 0xb08   : > { %2264 = vadd.xlane.f32.xlu0 %v10261_v14  ;;  %v10268_v14 = vld [vmem:[#allocation104_spill] sm:$0xff] }
 0xb09   : > { %v3257_v16 = vmul.f32 1.442695, %v3237_v18  ;;  %v10269_v18 = vld [vmem:[#allocation42_spill] sm:$0xff] }
 0xb0a   : > { %v3216_v39 = vpop.xlane.xlu1 %3215  ;;  %2282 = vadd.xlane.f32.xlu1 %v10262_v20  ;;  %v10271_v20 = vld [vmem:[#allocation70_spill] sm:$0xff] }
 0xb0b   : > { %v3240_v1 = vsub.f32 %v8637_v61, %v3216_v39  ;;  %6662 = vpow2.f32 %v3257_v16  ;;  %v10270_v39 = vld [vmem:[#allocation48_spill] sm:$0xff]  ;;  %v10272_v16 = vld [vmem:[#allocation98_spill] sm:$0xff] }
 0xb0c   : > { %1206 = vadd.xlane.f32.xlu0 %v10263_v0 }
 0xb0d   : > { %6133 = vmatpush3.bf16.xpose.msra.mxu0 %v3626_v29  ;;  %v3263_v45 = vmul.f32 1.442695, %v3240_v1  ;;  %v3632_v1 = vsel %vm482_vm0, %v8571_v58, 0 }
 0xb0e   : > { %6304 = vmatprep.subr.msk.bf16.mxu0 %vm482_vm0, %v8565_v27  ;;  %v3218_v48 = vpop.xlane.xlu1 %3217  ;;  %1224 = vadd.xlane.f32.xlu1 %v10264_v53  ;;  %v10273_v53 = vld [vmem:[#allocation9_spill] sm:$0xff] }
 0xb0f   : > { %v3212_v40 = vpop.xlane.xlu0 %3211  ;;  %v3241_v13 = vsub.f32 %v8643_v62, %v3218_v48  ;;  %6664 = vpow2.f32 %v3263_v45 }
 0xb10   : > { %v3238_v61 = vsub.f32 %v8639_v25, %v3212_v40  ;;  %1737 = vadd.xlane.f32.xlu0 %v10265_v6  ;;  %v3629_v25 = vsel %vm482_vm0, %v8565_v27, 0 }
 0xb11   : > { %v3265_v5 = vmul.f32 1.442695, %v3241_v13 }
 0xb12   : > { %v3259_v59 = vmul.f32 1.442695, %v3238_v61  ;;  %v3224_v30 = vpop.xlane.xlu1 %3223  ;;  %1755 = vadd.xlane.f32.xlu1 %v10266_v47  ;;  %v10275_v61 = vld [vmem:[#allocation76_spill] sm:$0xff]  ;;  %v10278_v47 = vld [vmem:[#allocation101_spill] sm:$0xff] }
 0xb13   : > { %v3244_v17 = vsub.f32 %v8645_v41, %v3224_v30  ;;  %v3222_v28 = vpop.xlane.xlu0 %3221  ;;  %v10277_v30 = vld [vmem:[#allocation106_spill] sm:$0xff] }
 0xb14   : > { %6666 = vpow2.f32 %v3259_v59  ;;  %v3243_v54 = vsub.f32 %v8641_v63, %v3222_v28  ;;  %2268 = vadd.xlane.f32.xlu0 %v10267_v43  ;;  %v10280_v28 = vld [vmem:[#allocation8_spill] sm:$0xff]  ;;  %v10283_v43 = vld [vmem:[#allocation15_spill] sm:$0xff] }
 0xb15   : > { %6668 = vpow2.f32 %v3261_v11  ;;  %v3271_v62 = vmul.f32 1.442695, %v3244_v17  ;;  %6135 = vmatpush3.bf16.xpose.msra.mxu0 %v3629_v25  ;;  %v8805_v27 = vpop.eup %6662  ;;  %v10276_v11 = vld [vmem:[#allocation71_spill] sm:$0xff]  ;;  %v10279_v17 = vld [vmem:[#allocation46_spill] sm:$0xff] }
 0xb16   : > { %v3269_v23 = vmul.f32 1.442695, %v3243_v54  ;;  %6305 = vmatprep.subr.msk.bf16.mxu0 %vm482_vm0, %v8571_v58  ;;  %v3220_v2 = vpop.xlane.xlu1 %3219  ;;  %2286 = vadd.xlane.f32.xlu1 %v10268_v14  ;;  %6670 = vpow2.f32 %v3265_v5  ;;  %v10281_v5 = vld [vmem:[#allocation74_spill] sm:$0xff]  ;;  %v10282_v54 = vld [vmem:[#allocation103_spill] sm:$0xff]  ;;  %v10287_v14 = vld [vmem:[#allocation105_spill] sm:$0xff] }
 0xb17   : > { %v3242_v41 = vsub.f32 %v8647_v8, %v3220_v2  ;;  %6672 = vpow2.f32 %v3271_v62  ;;  %v10284_v25 = vld [vmem:[#allocation47_spill] sm:$0xff]  ;;  %v10286_v2 = vld [vmem:[#allocation13_spill] sm:$0xff] }
 0xb18   : > { %1210 = vadd.xlane.f32.xlu0 %v10269_v18  ;;  %6674 = vpow2.f32 %v3269_v23  ;;  %v10285_v23 = vld [vmem:[#allocation75_spill] sm:$0xff] }
 0xb19   : > { %v3267_v63 = vmul.f32 1.442695, %v3242_v41  ;;  %v8810_v0 = vpop.eup %6664 }
 0xb1a   : > { %1228 = vadd.xlane.f32.xlu1 %v10270_v39  ;;  %v3230_v62 = vpop.xlane.xlu1 %3229  ;;  %v10288_v39 = vld [vmem:[#allocation50_spill] sm:$0xff] }
 0xb1b   : > { %6676 = vpow2.f32 %v3267_v63 }
 0xb1c   : > { %1741 = vadd.xlane.f32.xlu0 %v10271_v20  ;;  %v3247_v20 = vsub.f32 %v8651_v7, %v3230_v62  ;;  %v10295_v62 = vld [vmem:[#allocation52_spill] sm:$0xff] }
 0xb1d   : > { %6137 = vmatpush3.bf16.xpose.msra.mxu0 %v3632_v1 }
 0xb1e   : > { %v8812_v8 = vpop.eup %6666  ;;  %6218 = vmatprep.subr.bf16.mxu0 %v8709_v15  ;;  %2809 = vadd.xlane.f32.xlu1 %v8423_v19  ;;  %v10274_v19 = vld [vmem:[#allocation43_spill] sm:$0xff]  ;;  %v3232_v41 = vpop.xlane.xlu1 %3231 }
 0xb1f   : > { %v8816_v29 = vpop.eup %6668  ;;  %v3315_v56 = vpack.c.bf16 %v8812_v8, %v8805_v27  ;;  %v3248_v63 = vsub.f32 %v8655_v36, %v3232_v41 }
 0xb20   : > { %2272 = vadd.xlane.f32.xlu0 %v10272_v16  ;;  %v3316_v48 = vpack.c.bf16 %v8810_v0, %v8816_v29  ;;  %v8823_v58 = vpop.eup %6670 }
 0xb21   : > { %6110 = vmatprep.mubr.bf16.mxu0 %v3315_v56  ;;  %v8826_v45 = vpop.eup %6672  ;;  %v3279_v1 = vmul.f32 1.442695, %v3248_v63  ;;  %v10298_v63 = vld [vmem:[#allocation80_spill] sm:$0xff] }
 0xb22   : > { %710 = vadd.xlane.f32.xlu1 %v10273_v53  ;;  %6111 = vmatmul.mubr.bf16.gmra.mrb[68].mxu0 %v3316_v48  ;;  %v8828_v40 = vpop.eup %6674  ;;  %v4392_v48 = vpop.permute.xlu1 %4391  ;;  %v3277_v53 = vmul.f32 1.442695, %v3247_v20 }
 0xb23   : > { %v3318_v59 = vpack.c.bf16 %v8826_v45, %v8828_v40 }
 0xb24   : > { %1214 = vadd.xlane.f32.xlu0 %v10274_v19 }
 0xb25   : > { %v8831_v13 = vpop.eup %6676 }
 0xb26   : > { %1759 = vadd.xlane.f32.xlu1 %v10275_v61  ;;  %v3317_v6 = vpack.c.bf16 %v8831_v13, %v8823_v58  ;;  %v10290_v61 = vld [vmem:[#allocation78_spill] sm:$0xff] }
 0xb28   : > { %1745 = vadd.xlane.f32.xlu0 %v10276_v11  ;;  %6114 = vmatprep.mubr.bf16.mxu0 %v3317_v6  ;;  %v10291_v6 = vld [vmem:[#allocation107_spill] sm:$0xff] }
 0xb2a   : > { %2290 = vadd.xlane.f32.xlu1 %v10277_v30  ;;  %6115 = vmatmul.mubr.bf16.gmra.mrb[72].mxu0 %v3318_v59 }
 0xb2c   : > { %2276 = vadd.xlane.f32.xlu0 %v10278_v47 }
 0xb2e   : > { %2813 = vadd.xlane.f32.xlu1 %v8417_v57  ;;  %v3226_v57 = vpop.xlane.xlu0 %3225 }
 0xb2f   : > { %v3245_v18 = vsub.f32 %v8653_v51, %v3226_v57  ;;  %v10289_v51 = vld [vmem:[#allocation7_spill] sm:$0xff] }
 0xb30   : > { %1218 = vadd.xlane.f32.xlu0 %v10279_v17 }
 0xb32   : > { %714 = vadd.xlane.f32.xlu1 %v10280_v28 }
 0xb34   : > { %1749 = vadd.xlane.f32.xlu0 %v10281_v5  ;;  %v10292_v5 = vld [vmem:[#allocation10_spill] sm:$0xff] }
 0xb36   : > { %2817 = vadd.xlane.f32.xlu1 %v8509_v55  ;;  %v8854_v55 = vpop.permute.xlu0 %4393 }
 0xb38   : > { %2280 = vadd.xlane.f32.xlu0 %v10282_v54 }
 0xb3a   : > { %718 = vadd.xlane.f32.xlu1 %v10283_v43  ;;  %v10293_v43 = vld [vmem:[#allocation11_spill] sm:$0xff] }
 0xb3c   : > { %1222 = vadd.xlane.f32.xlu0 %v10284_v25 }
 0xb3e   : > { %2821 = vadd.xlane.f32.xlu1 %v8505_v22  ;;  %v3273_v22 = vmul.f32 1.442695, %v3245_v18  ;;  %v10297_v18 = vld [vmem:[#allocation54_spill] sm:$0xff] }
 0xb40   : > { %1753 = vadd.xlane.f32.xlu0 %v10285_v23  ;;  %6678 = vpow2.f32 %v3273_v22 }
 0xb41   : > { %6680 = vpow2.f32 %v3279_v1 }
 0xb42   : > { %722 = vadd.xlane.f32.xlu1 %v10286_v2 }
 0xb44   : > { %2284 = vadd.xlane.f32.xlu0 %v10287_v14 }
 0xb48   : > { %1226 = vadd.xlane.f32.xlu0 %v10288_v39 }
 0xb4a   : > { %v8864_v11 = vpop.eup %6678 }
 0xb4c   : > { %2807 = vadd.xlane.f32.xlu0 %v8421_v3  ;;  %v3228_v56 = vpop.xlane.xlu0 %3227  ;;  %v8866_v3 = vpop.eup %6680 }
 0xb4d   : > { %v3246_v16 = vsub.f32 %v8657_v52, %v3228_v56  ;;  %v10300_v56 = vld [vmem:[#allocation82_spill] sm:$0xff] }
 0xb4f   : > { %v3275_v19 = vmul.f32 1.442695, %v3246_v16 }
 0xb50   : > { %708 = vadd.xlane.f32.xlu0 %v10289_v51 }
 0xb51   : > { %6682 = vpow2.f32 %v3275_v19 }
 0xb52   : > { %6684 = vpow2.f32 %v3277_v53 }
 0xb53   : > { %v1201_v36 = vpop.xlane.xlu1 %1200 }
 0xb54   : > { %1757 = vadd.xlane.f32.xlu0 %v10290_v61 }
 0xb57   : > { %v1732_v7 = vpop.xlane.xlu1 %1731 }
 0xb58   : > { %2288 = vadd.xlane.f32.xlu0 %v10291_v6 }
 0xb5b   : > { %v8868_v52 = vpop.eup %6682  ;;  %v8870_v59 = vpop.xlane.xlu1 %2262 }
 0xb5c   : > { %v8872_v30 = vpop.eup %6684  ;;  %2811 = vadd.xlane.f32.xlu0 %v8425_v38  ;;  %v3319_v47 = vpack.c.bf16 %v8868_v52, %v8864_v11 }
 0xb5d   : > { %v3320_v17 = vpack.c.bf16 %v8866_v3, %v8872_v30 }
 0xb5e   : > { %6118 = vmatprep.mubr.bf16.mxu0 %v3319_v47 }
 0xb5f   : > { %v8879_v28 = vpop.xlane.xlu1 %1204  ;;  %6119 = vmatmul.mubr.bf16.gmra.mrb[76].mxu0 %v3320_v17 }
 0xb60   : > { %712 = vadd.xlane.f32.xlu0 %v10292_v5  ;;  %6138 = vmatprep.mubr.msk.bf16.mxu0 %vm482_vm0, %v8575_v37  ;;  %v10294_v37 = vld [vmem:[#allocation12_spill] sm:$0xff] }
 0xb63   : > { %v8884_v54 = vpop.xlane.xlu1 %1735 }
 0xb64   : > { %2815 = vadd.xlane.f32.xlu0 %v8503_v50 }
 0xb67   : > { %v8887_v38 = vpop.xlane.xlu1 %2266  ;;  %6139 = vmatmul.mubr.msk.bf16.vlgmr.msra.gmra.mrb[80].mxu0 %vm482_vm0, %v8577_v34 }
 0xb68   : > { %6219 = vmatpush3.bf16.msra.mxu0 %v8709_v15  ;;  %716 = vadd.xlane.f32.xlu0 %v10293_v43 }
 0xb69   : > { %6142 = vmatprep.mubr.msk.bf16.mxu0 %vm482_vm0, %v8579_v31  ;;  %6220 = vmatprep.subr.bf16.mxu0 %v8760_v21 }
 0xb6b   : > { %v8896_v25 = vpop.xlane.xlu1 %1208 }
 0xb6c   : > { %6221 = vmatpush3.bf16.msra.mxu0 %v8760_v21  ;;  %2819 = vadd.xlane.f32.xlu0 %v8512_v44 }
 0xb6d   : > { %6222 = vmatprep.subr.bf16.mxu0 %v8765_v60 }
 0xb6f   : > { %v8901_v50 = vpop.xlane.xlu1 %1739  ;;  %6143 = vmatmul.mubr.msk.bf16.gmra.mrb[84].mxu0 %vm482_vm0, %v8581_v9  ;;  %v4396_v9 = vpop.permute.xlu0 %4395 }
 0xb70   : > { %6223 = vmatpush3.bf16.msra.mxu0 %v8765_v60  ;;  %720 = vadd.xlane.f32.xlu0 %v10294_v37 }
 0xb71   : > { %6146 = vmatprep.mubr.msk.bf16.mxu0 %vm482_vm0, %v8583_v42  ;;  %6224 = vmatprep.subr.bf16.mxu0 %v8772_v12 }
 0xb73   : > { %v8910_v34 = vpop.xlane.xlu1 %2270 }
 0xb74   : > { %6225 = vmatpush3.bf16.msra.mxu0 %v8772_v12 }
 0xb75   : > { %6226 = vmatprep.subr.bf16.mxu0 %v8780_v46 }
 0xb77   : > { %v8914_v44 = vpop.xlane.xlu1 %1212  ;;  %6147 = vmatmul.mubr.msk.bf16.gmra.mrb[88].mxu0 %vm482_vm0, %v8585_v33 }
 0xb78   : > { %6227 = vmatpush3.bf16.msra.mxu0 %v8780_v46  ;;  %6150 = vmatprep.mubr.msk.bf16.mxu0 %vm482_vm0, %v8587_v10 }
 0xb79   : > { %6228 = vmatprep.subr.bf16.mxu0 %v4392_v48 }
 0xb7b   : > { %v8921_v31 = vpop.xlane.xlu1 %1743 }
 0xb7c   : > { %6229 = vmatpush3.bf16.msra.mxu0 %v4392_v48 }
 0xb7d   : > { %6230 = vmatprep.subr.bf16.mxu0 %v8854_v55 }
 0xb7f   : > { %v8924_v42 = vpop.xlane.xlu1 %2274  ;;  %6151 = vmatmul.mubr.msk.bf16.gmra.mrb[92].mxu0 %vm482_vm0, %v8589_v26 }
 0xb80   : > { %6231 = vmatpush3.bf16.msra.mxu0 %v8854_v55 }
 0xb81   : > { %6232 = vmatprep.subr.bf16.mxu0 %v4396_v9  ;;  %v1199_v33 = vpop.xlane.xlu0 %1198 }
 0xb82   : > { %6686 = vrcp.f32 %v1199_v33 }
 0xb83   : > { %v8929_v15 = vpop.xlane.xlu1 %1216  ;;  %6688 = vrcp.f32 %v1201_v36 }
 0xb84   : > { %6233 = vmatpush3.bf16.msra.mxu0 %v4396_v9 }
 0xb85   : > { %v1730_v10 = vpop.xlane.xlu0 %1729 }
 0xb86   : > { %6690 = vrcp.f32 %v1730_v10 }
 0xb87   : > { %v8931_v21 = vpop.xlane.xlu1 %1747  ;;  %6692 = vrcp.f32 %v1732_v7 }
 0xb89   : > { %v8933_v60 = vpop.xlane.xlu0 %2260 }
 0xb8b   : > { %v8935_v12 = vpop.xlane.xlu1 %2278 }
 0xb8c   : > { %v6687_v46 = vpop.eup %6686 }
 0xb8d   : > { %v8937_v26 = vpop.xlane.xlu0 %1202  ;;  %v1375_v23 = vmul.f32 %v6687_v46, %v10295_v62  ;;  %v6689_v57 = vpop.eup %6688 }
 0xb8e   : > { %v1376_v55 = vmul.f32 %v6689_v57, %v10297_v18 }
 0xb8f   : > { %v8940_v2 = vpop.xlane.xlu1 %1220  ;;  %1407 = vrot.lane.b32.xlu1 %v1375_v23, %s7112_s27 }
 0xb90   : > { %10296 = vst [vmem:[#allocation99_spill] sm:$0xff] %v8940_v2  ;;  %v6691_v14 = vpop.eup %6690 }
 0xb91   : > { %v8943_v41 = vpop.xlane.xlu0 %1733  ;;  %v1906_v39 = vmul.f32 %v6691_v14, %v10298_v63  ;;  %v6693_v20 = vpop.eup %6692 }
 0xb92   : > { %v1907_v16 = vmul.f32 %v6693_v20, %v10300_v56 }
 0xb93   : > { %v8947_v22 = vpop.xlane.xlu1 %1751  ;;  %1409 = vrot.lane.b32.xlu1 %v1376_v55, %s7112_s27  ;;  %1938 = vrot.lane.b32.xlu0 %v1906_v39, %s7111_s25  ;;  %v10308_v39 = vld [vmem:[#allocation26_spill] sm:$0xff] }
 0xb94   : > { %10299 = vst [vmem:[#allocation39_spill] sm:$0xff] %v8947_v22 }
 0xb95   : > { %v8951_v1 = vpop.xlane.xlu0 %2264 }
 0xb97   : > { %v8954_v48 = vpop.xlane.xlu1 %2282  ;;  %1940 = vrot.lane.b32.xlu1 %v1907_v16, %s7111_s25 }
 0xb98   : > { %10301 = vst [vmem:[#allocation45_spill] sm:$0xff] %v8954_v48 }
 0xb99   : > { %v8957_v53 = vpop.xlane.xlu0 %1206 }
 0xb9b   : > { %v8959_v19 = vpop.xlane.xlu1 %1224 }
 0xb9c   : > { %10302 = vst [vmem:[#allocation67_spill] sm:$0xff] %v8959_v19 }
 0xb9d   : > { %v8961_v51 = vpop.xlane.xlu0 %1737 }
 0xb9f   : > { %v8963_v36 = vpop.xlane.xlu1 %1755 }
 0xba0   : > { %10303 = vst [vmem:[#allocation73_spill] sm:$0xff] %v8963_v36 }
 0xba1   : > { %v8965_v61 = vpop.xlane.xlu0 %2268 }
 0xba3   : > { %v8967_v7 = vpop.xlane.xlu1 %2286 }
 0xba4   : > { %10304 = vst [vmem:[#allocation95_spill] sm:$0xff] %v8967_v7 }
 0xba5   : > { %v8969_v6 = vpop.xlane.xlu0 %1210 }
 0xba7   : > { %v8971_v47 = vpop.xlane.xlu1 %1228 }
 0xba8   : > { %10305 = vst [vmem:[#allocation100_spill] sm:$0xff] %v8971_v47 }
 0xba9   : > { %v8973_v17 = vpop.xlane.xlu0 %1741 }
 0xbab   : > { %v2810_v5 = vpop.xlane.xlu1 %2809 }
 0xbac   : > { %6694 = vrcp.f32 %v2810_v5 }
 0xbad   : > { %v8975_v43 = vpop.xlane.xlu0 %2272 }
 0xbaf   : > { %v711_v37 = vpop.xlane.xlu1 %710 }
 0xbb0   : > { %6696 = vrcp.f32 %v711_v37 }
 0xbb1   : > { %v8977_v9 = vpop.xlane.xlu0 %1214 }
 0xbb2   : > { %3285 = vadd.xlane.f32.xlu0 %v8730_v24 }
 0xbb3   : > { %v8980_v33 = vpop.xlane.xlu1 %1759 }
 0xbb4   : > { %10306 = vst [vmem:[#allocation40_spill] sm:$0xff] %v8980_v33 }
 0xbb5   : > { %v8982_v10 = vpop.xlane.xlu0 %1745 }
 0xbb6   : > { %v6695_v46 = vpop.eup %6694  ;;  %3281 = vadd.xlane.f32.xlu0 %v8725_v4 }
 0xbb7   : > { %v8985_v62 = vpop.xlane.xlu1 %2290  ;;  %v8987_v23 = vpop.f32.mrb[64].mxu0  ;;  %v2993_v57 = vmul.f32 %v6695_v46, %v8597_v49 }
 0xbb8   : > { %10307 = vst [vmem:[#allocation44_spill] sm:$0xff] %v8985_v62  ;;  %v8990_v14 = vpop.f32.mrb[65].mxu0 }
 0xbb9   : > { %v8992_v18 = vpop.f32.mrb[66].mxu0  ;;  %v8994_v55 = vpop.xlane.xlu0 %2276  ;;  %3009 = vst.msk [vmem:[#allocation2 + $0x18] sm:$0xff] %vm482_vm0, %v2993_v57  ;;  %v10312_v57 = vld [vmem:[#allocation25_spill] sm:$0xff] }
 0xbba   : > { %v6697_v24 = vpop.eup %6696  ;;  %v8997_v63 = vpop.f32.mrb[67].mxu0  ;;  %3293 = vadd.xlane.f32.xlu0 %v8816_v29 }
 0xbbb   : > { %v2814_v4 = vpop.xlane.xlu1 %2813  ;;  %3287 = vadd.xlane.f32.xlu1 %v8732_v35  ;;  %v910_v20 = vmul.f32 %v6697_v24, %v10308_v39  ;;  %v10314_v39 = vld [vmem:[#allocation139_spill] sm:$0xff] }
 0xbbc   : > { %6698 = vrcp.f32 %v2814_v4 }
 0xbbd   : > { %v9002_v49 = vpop.xlane.xlu0 %1218  ;;  %926 = vst.msk [vmem:[#allocation2 + $0x10] sm:$0xff] %vm482_vm0, %v910_v20 }
 0xbbe   : > { %3289 = vadd.xlane.f32.xlu0 %v8805_v27  ;;  %v10310_v27 = vld [vmem:[#allocation134_spill] sm:$0xff] }
 0xbbf   : > { %v715_v56 = vpop.xlane.xlu1 %714  ;;  %3283 = vadd.xlane.f32.xlu1 %v8723_v32 }
 0xbc0   : > { %6700 = vrcp.f32 %v715_v56  ;;  %v10316_v56 = vld [vmem:[#allocation30_spill] sm:$0xff] }
 0xbc1   : > { %v9007_v16 = vpop.xlane.xlu0 %1749 }
 0xbc2   : > { %3301 = vadd.xlane.f32.xlu0 %v8828_v40 }
 0xbc3   : > { %v2818_v29 = vpop.xlane.xlu1 %2817  ;;  %3295 = vadd.xlane.f32.xlu1 %v8810_v0 }
 0xbc4   : > { %6702 = vrcp.f32 %v2818_v29 }
 0xbc5   : > { %v9011_v35 = vpop.xlane.xlu0 %2280 }
 0xbc6   : > { %10309 = vst [vmem:[#allocation68_spill] sm:$0xff] %v9011_v35  ;;  %v6699_v5 = vpop.eup %6698  ;;  %3297 = vadd.xlane.f32.xlu0 %v8823_v58  ;;  %v10336_v35 = vld [vmem:[#allocation111_spill] sm:$0xff] }
 0xbc7   : > { %v719_v37 = vpop.xlane.xlu1 %718  ;;  %3291 = vadd.xlane.f32.xlu1 %v8812_v8  ;;  %v2995_v46 = vmul.f32 %v6699_v5, %v10310_v27 }
 0xbc8   : > { %6704 = vrcp.f32 %v719_v37 }
 0xbc9   : > { %v9016_v32 = vpop.xlane.xlu0 %1222  ;;  %3011 = vst.msk [vmem:[#allocation2 + $0x38] sm:$0xff] %vm482_vm0, %v2995_v46 }
 0xbca   : > { %10311 = vst [vmem:[#allocation72_spill] sm:$0xff] %v9016_v32  ;;  %v6701_v40 = vpop.eup %6700  ;;  %3309 = vadd.xlane.f32.xlu0 %v8872_v30 }
 0xbcb   : > { %v2822_v0 = vpop.xlane.xlu1 %2821  ;;  %3303 = vadd.xlane.f32.xlu1 %v8826_v45  ;;  %v912_v24 = vmul.f32 %v6701_v40, %v10312_v57  ;;  %v10319_v40 = vld [vmem:[#allocation29_spill] sm:$0xff] }
 0xbcc   : > { %6706 = vrcp.f32 %v2822_v0 }
 0xbcd   : > { %v9022_v58 = vpop.xlane.xlu0 %1753  ;;  %928 = vst.msk [vmem:[#allocation2 + $0x30] sm:$0xff] %vm482_vm0, %v912_v24 }
 0xbce   : > { %10313 = vst [vmem:[#allocation96_spill] sm:$0xff] %v9022_v58  ;;  %v6703_v8 = vpop.eup %6702  ;;  %3305 = vadd.xlane.f32.xlu0 %v8864_v11 }
 0xbcf   : > { %v723_v4 = vpop.xlane.xlu1 %722  ;;  %3299 = vadd.xlane.f32.xlu1 %v8831_v13  ;;  %v2997_v20 = vmul.f32 %v6703_v8, %v10314_v39  ;;  %v10318_v13 = vld [vmem:[#allocation138_spill] sm:$0xff] }
 0xbd0   : > { %6708 = vrcp.f32 %v723_v4  ;;  %v10322_v4 = vld [vmem:[#allocation133_spill] sm:$0xff] }
 0xbd1   : > { %v9028_v30 = vpop.xlane.xlu0 %2284  ;;  %3013 = vst.msk [vmem:[#allocation2 + $0x58] sm:$0xff] %vm482_vm0, %v2997_v20 }
 0xbd2   : > { %10315 = vst [vmem:[#allocation102_spill] sm:$0xff] %v9028_v30  ;;  %v6705_v45 = vpop.eup %6704 }
 0xbd3   : > { %3311 = vadd.xlane.f32.xlu1 %v8866_v3  ;;  %v914_v29 = vmul.f32 %v6705_v45, %v10316_v56  ;;  %v10323_v45 = vld [vmem:[#allocation24_spill] sm:$0xff] }
 0xbd5   : > { %v9033_v5 = vpop.xlane.xlu0 %1226  ;;  %930 = vst.msk [vmem:[#allocation2 + $0x50] sm:$0xff] %vm482_vm0, %v914_v29 }
 0xbd6   : > { %10317 = vst [vmem:[#allocation41_spill] sm:$0xff] %v9033_v5  ;;  %v6707_v11 = vpop.eup %6706 }
 0xbd7   : > { %3307 = vadd.xlane.f32.xlu1 %v8868_v52  ;;  %v2999_v37 = vmul.f32 %v6707_v11, %v10318_v13 }
 0xbd9   : > { %v2808_v27 = vpop.xlane.xlu0 %2807  ;;  %3015 = vst.msk [vmem:[#allocation2 + $0x78] sm:$0xff] %vm482_vm0, %v2999_v37 }
 0xbda   : > { %v6709_v46 = vpop.eup %6708  ;;  %6710 = vrcp.f32 %v2808_v27 }
 0xbdb   : > { %v916_v0 = vmul.f32 %v6709_v46, %v10319_v40  ;;  %v10324_v46 = vld [vmem:[#allocation132_spill] sm:$0xff] }
 0xbdd   : > { %v709_v57 = vpop.xlane.xlu0 %708  ;;  %932 = vst.msk [vmem:[#allocation2 + $0x70] sm:$0xff] %vm482_vm0, %v916_v0 }
 0xbde   : > { %6712 = vrcp.f32 %v709_v57 }
 0xbe1   : > { %v9041_v3 = vpop.xlane.xlu0 %1757 }
 0xbe2   : > { %10320 = vst [vmem:[#allocation49_spill] sm:$0xff] %v9041_v3  ;;  %v10331_v3 = vld [vmem:[#allocation27_spill] sm:$0xff] }
 0xbe4   : > { %v6711_v24 = vpop.eup %6710 }
 0xbe5   : > { %v9043_v8 = vpop.xlane.xlu0 %2288  ;;  %v2992_v52 = vmul.f32 %v6711_v24, %v10322_v4 }
 0xbe6   : > { %10321 = vst [vmem:[#allocation69_spill] sm:$0xff] %v9043_v8 }
 0xbe7   : > { %3008 = vst.msk [vmem:[#allocation2 + $0x8] sm:$0xff] %vm482_vm0, %v2992_v52 }
 0xbe8   : > { %v6713_v39 = vpop.eup %6712 }
 0xbe9   : > { %v2812_v20 = vpop.xlane.xlu0 %2811  ;;  %v909_v56 = vmul.f32 %v6713_v39, %v10323_v45  ;;  %v10325_v39 = vld [vmem:[#allocation23_spill] sm:$0xff] }
 0xbea   : > { %6714 = vrcp.f32 %v2812_v20 }
 0xbeb   : > { %925 = vst.msk [vmem:[#allocation2] sm:$0xff] %vm482_vm0, %v909_v56 }
 0xbed   : > { %v713_v29 = vpop.xlane.xlu0 %712 }
 0xbee   : > { %6716 = vrcp.f32 %v713_v29 }
 0xbf1   : > { %v2816_v11 = vpop.xlane.xlu0 %2815 }
 0xbf2   : > { %6718 = vrcp.f32 %v2816_v11  ;;  %v10327_v11 = vld [vmem:[#allocation137_spill] sm:$0xff] }
 0xbf4   : > { %v6715_v13 = vpop.eup %6714 }
 0xbf5   : > { %v9049_v37 = vpop.f32.mrb[68].mxu0  ;;  %v717_v27 = vpop.xlane.xlu0 %716  ;;  %v2994_v40 = vmul.f32 %v6715_v13, %v10324_v46 }
 0xbf6   : > { %6720 = vrcp.f32 %v717_v27  ;;  %v9052_v0 = vpop.f32.mrb[69].mxu0 }
 0xbf7   : > { %v9054_v57 = vpop.f32.mrb[70].mxu0  ;;  %3010 = vst.msk [vmem:[#allocation2 + $0x28] sm:$0xff] %vm482_vm0, %v2994_v40 }
 0xbf8   : > { %v6717_v24 = vpop.eup %6716  ;;  %v9057_v4 = vpop.f32.mrb[71].mxu0 }
 0xbf9   : > { %v2820_v52 = vpop.xlane.xlu0 %2819  ;;  %v911_v20 = vmul.f32 %v6717_v24, %v10325_v39 }
 0xbfa   : > { %6722 = vrcp.f32 %v2820_v52  ;;  %v10329_v52 = vld [vmem:[#allocation28_spill] sm:$0xff] }
 0xbfb   : > { %927 = vst.msk [vmem:[#allocation2 + $0x20] sm:$0xff] %vm482_vm0, %v911_v20 }
 0xbfc   : > { %v6719_v45 = vpop.eup %6718 }
 0xbfd   : > { %v9061_v56 = vpop.f32.mrb[72].mxu0  ;;  %v721_v29 = vpop.xlane.xlu0 %720  ;;  %v2996_v13 = vmul.f32 %v6719_v45, %v10327_v11  ;;  %v10330_v11 = vld [vmem:[#allocation136_spill] sm:$0xff] }
 0xbfe   : > { %10326 = vst [vmem:[#allocation77_spill] sm:$0xff] %v9061_v56  ;;  %6724 = vrcp.f32 %v721_v29  ;;  %v9064_v27 = vpop.f32.mrb[73].mxu0 }
 0xbff   : > { %v9066_v46 = vpop.f32.mrb[74].mxu0  ;;  %3012 = vst.msk [vmem:[#allocation2 + $0x48] sm:$0xff] %vm482_vm0, %v2996_v13 }
 0xc00   : > { %10328 = vst [vmem:[#allocation97_spill] sm:$0xff] %v9066_v46  ;;  %v6721_v40 = vpop.eup %6720  ;;  %v9069_v62 = vpop.f32.mrb[75].mxu0 }
 0xc01   : > { %v1408_v24 = vpop.permute.xlu1 %1407  ;;  %v913_v39 = vmul.f32 %v6721_v40, %v10329_v52 }
 0xc02   : > { %1456 = vst.msk [vmem:[#allocation2] sm:$0xff] %vm1455_vm1, %v1408_v24 }
 0xc03   : > { %929 = vst.msk [vmem:[#allocation2 + $0x40] sm:$0xff] %vm482_vm0, %v913_v39 }
 0xc04   : > { %v6723_v20 = vpop.eup %6722 }
 0xc05   : > { %v1410_v45 = vpop.permute.xlu1 %1409  ;;  %v1939_v29 = vpop.permute.xlu0 %1938  ;;  %v2998_v8 = vmul.f32 %v6723_v20, %v10330_v11 }
 0xc06   : > { %1457 = vst.msk [vmem:[#allocation2 + $0x10] sm:$0xff] %vm1455_vm1, %v1410_v45 }
 0xc07   : > { %1987 = vst.msk [vmem:[#allocation2] sm:$0xff] %vm1986_vm2, %v1939_v29 }
 0xc08   : > { %3014 = vst.msk [vmem:[#allocation2 + $0x68] sm:$0xff] %vm482_vm0, %v2998_v8  ;;  %v6725_v13 = vpop.eup %6724 }
 0xc09   : > { %v1941_v33 = vpop.permute.xlu1 %1940  ;;  %v915_v40 = vmul.f32 %v6725_v13, %v10331_v3 }
 0xc0a   : > { %1988 = vst.msk [vmem:[#allocation2 + $0x10] sm:$0xff] %vm1986_vm2, %v1941_v33 }
 0xc0b   : > { %931 = vst.msk [vmem:[#allocation2 + $0x60] sm:$0xff] %vm482_vm0, %v915_v40 }
 0xc32   : > { %v9081_v24 = vpop.f32.mrb[76].mxu0 }
 0xc33   : > { %10332 = vst [vmem:[#allocation104_spill] sm:$0xff] %v9081_v24  ;;  %v9083_v52 = vpop.f32.mrb[77].mxu0 }
 0xc34   : > { %10333 = vst [vmem:[#allocation42_spill] sm:$0xff] %v9083_v52  ;;  %v9085_v39 = vpop.f32.mrb[78].mxu0 }
 0xc35   : > { %10334 = vst [vmem:[#allocation48_spill] sm:$0xff] %v9085_v39  ;;  %v9087_v20 = vpop.f32.mrb[79].mxu0 }
 0xc36   : > { %10335 = vst [vmem:[#allocation70_spill] sm:$0xff] %v9087_v20 }
 0xc3a   : > { %v9089_v45 = vpop.f32.mrb[80].mxu0 }
 0xc3b   : > { %v9091_v29 = vpop.f32.mrb[81].mxu0 }
 0xc3c   : > { %v9093_v8 = vpop.f32.mrb[82].mxu0 }
 0xc3d   : > { %v9095_v11 = vpop.f32.mrb[83].mxu0 }
 0xc3f   : > { %v9097_v3 = vpop.xlane.xlu0 %3285 }
 0xc42   : > { %v9099_v33 = vpop.f32.mrb[84].mxu0 }
 0xc43   : > { %v9101_v13 = vpop.f32.mrb[85].mxu0  ;;  %v3282_v40 = vpop.xlane.xlu0 %3281 }
 0xc44   : > { %6726 = vrcp.f32 %v3282_v40  ;;  %v9103_v24 = vpop.f32.mrb[86].mxu0 }
 0xc45   : > { %v9105_v39 = vpop.f32.mrb[87].mxu0 }
 0xc48   : > { %v3288_v47 = vpop.xlane.xlu1 %3287 }
 0xc4a   : > { %v9107_v5 = vpop.f32.mrb[88].mxu0 }
 0xc4b   : > { %v9109_v7 = vpop.f32.mrb[89].mxu0 }
 0xc4c   : > { %v9111_v30 = vpop.f32.mrb[90].mxu0  ;;  %v3284_v36 = vpop.xlane.xlu1 %3283 }
 0xc4d   : > { %6728 = vrcp.f32 %v3284_v36  ;;  %v9113_v58 = vpop.f32.mrb[91].mxu0 }
 0xc4e   : > { %v6727_v19 = vpop.eup %6726  ;;  %6730 = vrcp.f32 %v8870_v59 }
 0xc4f   : > { %v3458_v40 = vmul.f32 %v6727_v19, %v8990_v14  ;;  %6732 = vrcp.f32 %v8933_v60  ;;  %v10337_v19 = vld [vmem:[#allocation124_spill] sm:$0xff]  ;;  %v9144_v60 = vpop.xlane.xlu0 %3293 }
 0xc50   : > { %6734 = vrcp.f32 %v3288_v47 }
 0xc51   : > { %3490 = vrot.lane.b32.xlu0 %v3458_v40, %s7112_s27  ;;  %6736 = vrcp.f32 %v8937_v26 }
 0xc52   : > { %v9118_v32 = vpop.f32.mrb[92].mxu0  ;;  %6738 = vrcp.f32 %v8879_v28 }
 0xc53   : > { %v9120_v20 = vpop.f32.mrb[93].mxu0  ;;  %6740 = vrcp.f32 %v8884_v54 }
 0xc54   : > { %v9122_v52 = vpop.f32.mrb[94].mxu0  ;;  %6742 = vrcp.f32 %v8887_v38  ;;  %v10346_v38 = vld [vmem:[#allocation81_spill] sm:$0xff] }
 0xc55   : > { %v9124_v48 = vpop.f32.mrb[95].mxu0  ;;  %6744 = vrcp.f32 %v9097_v3 }
 0xc56   : > { %6746 = vrcp.f32 %v8943_v41  ;;  %v10351_v41 = vld [vmem:[#allocation127_spill] sm:$0xff] }
 0xc57   : > { %v6729_v46 = vpop.eup %6728  ;;  %6748 = vrcp.f32 %v8951_v1 }
 0xc58   : > { %v3459_v36 = vmul.f32 %v6729_v46, %v8997_v63  ;;  %v6731_v22 = vpop.eup %6730  ;;  %v10338_v63 = vld [vmem:[#allocation109_spill] sm:$0xff] }
 0xc59   : > { %v2438_v59 = vmul.f32 %v6731_v22, %v10336_v35  ;;  %v6733_v14 = vpop.eup %6732  ;;  %v9148_v22 = vpop.xlane.xlu0 %3289 }
 0xc5a   : > { %3492 = vrot.lane.b32.xlu1 %v3459_v36, %s7112_s27  ;;  %v2437_v46 = vmul.f32 %v6733_v14, %v10338_v63  ;;  %v9150_v35 = vpop.xlane.xlu1 %3295  ;;  %v10339_v36 = vld [vmem:[#allocation125_spill] sm:$0xff]  ;;  %v10340_v63 = vld [vmem:[#allocation14_spill] sm:$0xff] }
 0xc5d   : > { %v9153_v40 = vpop.xlane.xlu0 %3301 }
 0xc5e   : > { %2471 = vrot.lane.b32.xlu1 %v2438_v59, %s7110_s12  ;;  %v3292_v59 = vpop.xlane.xlu1 %3291 }
 0xc5f   : > { %6750 = vrcp.f32 %v3292_v59 }
 0xc60   : > { %6752 = vrcp.f32 %v8957_v53  ;;  %v10353_v53 = vld [vmem:[#allocation126_spill] sm:$0xff] }
 0xc61   : > { %v9158_v14 = vpop.xlane.xlu0 %3297  ;;  %6754 = vrcp.f32 %v8896_v25  ;;  %v10354_v25 = vld [vmem:[#allocation58_spill] sm:$0xff] }
 0xc62   : > { %v9163_v26 = vpop.xlane.xlu1 %3303  ;;  %6756 = vrcp.f32 %v8901_v50 }
 0xc63   : > { %10341 = vst [vmem:[#allocation98_spill] sm:$0xff] %v9163_v26  ;;  %6758 = vrcp.f32 %v8910_v34 }
 0xc64   : > { %6760 = vrcp.f32 %v8961_v51 }
 0xc65   : > { %v9167_v28 = vpop.xlane.xlu0 %3309  ;;  %6762 = vrcp.f32 %v9148_v22 }
 0xc66   : > { %10342 = vst [vmem:[#allocation9_spill] sm:$0xff] %v9167_v28  ;;  %v9172_v54 = vpop.xlane.xlu1 %3299 }
 0xc69   : > { %v9176_v26 = vpop.xlane.xlu0 %3305 }
 0xc6a   : > { %10345 = vst [vmem:[#allocation43_spill] sm:$0xff] %v9176_v26 }
 0xc70   : > { %3735 = vmax.xlane.f32.xlu0 %v9089_v45 }
 0xc74   : > { %3731 = vmax.xlane.f32.xlu0 %v9091_v29 }
 0xc78   : > { %3737 = vmax.xlane.f32.xlu0 %v9093_v8 }
 0xc82   : > { %3733 = vmax.xlane.f32.xlu1 %v9095_v11 }
 0xc86   : > { %2825 = vadd.xlane.f32.xlu1 %v10337_v19  ;;  %v6735_v19 = vpop.eup %6734 }
 0xc87   : > { %v3461_v47 = vmul.f32 %v6735_v19, %v8992_v18  ;;  %v10344_v18 = vld [vmem:[#allocation53_spill] sm:$0xff] }
 0xc8a   : > { %3743 = vmax.xlane.f32.xlu1 %v9099_v33 }
 0xc8e   : > { %3739 = vmax.xlane.f32.xlu1 %v9101_v13  ;;  %2469 = vrot.lane.b32.xlu0 %v2437_v46, %s7110_s12  ;;  %v6737_v46 = vpop.eup %6736 }
 0xc8f   : > { %v6739_v2 = vpop.eup %6738 }
 0xc90   : > { %v1378_v19 = vmul.f32 %v6739_v2, %v10344_v18  ;;  %v10348_v2 = vld [vmem:[#allocation110_spill] sm:$0xff] }
 0xc92   : > { %3745 = vmax.xlane.f32.xlu1 %v9103_v24 }
 0xc96   : > { %3747 = vmax.xlane.f32.xlu1 %v9109_v7 }
 0xc9a   : > { %3753 = vmax.xlane.f32.xlu1 %v9111_v30 }
 0xc9e   : > { %3749 = vmax.xlane.f32.xlu1 %v9113_v58 }
 0xca2   : > { %3759 = vmax.xlane.f32.xlu1 %v9118_v32 }
 0xca6   : > { %3761 = vmax.xlane.f32.xlu1 %v9122_v52 }
 0xcad   : > { %2823 = vadd.xlane.f32.xlu0 %v10339_v36  ;;  %v10343_v36 = vld [vmem:[#allocation51_spill] sm:$0xff] }
 0xcae   : > { %v1377_v56 = vmul.f32 %v6737_v46, %v10343_v36  ;;  %v9181_v46 = vpop.xlane.xlu1 %3311  ;;  %v10347_v36 = vld [vmem:[#allocation16_spill] sm:$0xff] }
 0xcb1   : > { %3741 = vmax.xlane.f32.xlu0 %v9105_v39 }
 0xcb2   : > { %v9188_v26 = vpop.xlane.xlu1 %3307 }
 0xcb5   : > { %724 = vadd.xlane.f32.xlu0 %v10340_v63  ;;  %v6741_v63 = vpop.eup %6740 }
 0xcb6   : > { %v6743_v28 = vpop.eup %6742 }
 0xcb7   : > { %3496 = vrot.lane.b32.xlu1 %v3461_v47, %s7112_s27  ;;  %v1909_v47 = vmul.f32 %v6741_v63, %v10346_v38  ;;  %v2440_v18 = vmul.f32 %v6743_v28, %v10348_v2  ;;  %v6745_v38 = vpop.eup %6744  ;;  %v10350_v2 = vld [vmem:[#allocation108_spill] sm:$0xff] }
 0xcb8   : > { %v3460_v28 = vmul.f32 %v6745_v38, %v8987_v23  ;;  %v10352_v38 = vld [vmem:[#allocation56_spill] sm:$0xff] }
 0xcb9   : > { %3751 = vmax.xlane.f32.xlu0 %v9107_v5 }
 0xcbb   : > { %1411 = vrot.lane.b32.xlu1 %v1377_v56, %s7112_s27 }
 0xcbd   : > { %3755 = vmax.xlane.f32.xlu0 %v9120_v20 }
 0xcbf   : > { %1413 = vrot.lane.b32.xlu1 %v1378_v19, %s7112_s27 }
 0xcc1   : > { %3757 = vmax.xlane.f32.xlu0 %v9124_v48 }
 0xcc3   : > { %1944 = vrot.lane.b32.xlu1 %v1909_v47, %s7111_s25  ;;  %v3491_v56 = vpop.permute.xlu0 %3490  ;;  %v6747_v47 = vpop.eup %6746 }
 0xcc4   : > { %3538 = vst.msk [vmem:[#allocation2 + $0x8] sm:$0xff] %vm1455_vm1, %v3491_v56  ;;  %v10349_v56 = vld [vmem:[#allocation79_spill] sm:$0xff]  ;;  %v6749_v3 = vpop.eup %6748 }
 0xcc5   : > { %726 = vadd.xlane.f32.xlu0 %v10347_v36  ;;  %v1908_v36 = vmul.f32 %v6747_v47, %v10349_v56  ;;  %v6751_v1 = vpop.eup %6750 }
 0xcc6   : > { %v3463_v23 = vmul.f32 %v6751_v1, %v9057_v4  ;;  %v10355_v4 = vld [vmem:[#allocation17_spill] sm:$0xff] }
 0xcc7   : > { %2475 = vrot.lane.b32.xlu1 %v2440_v18, %s7110_s12  ;;  %v2439_v18 = vmul.f32 %v6749_v3, %v10350_v2  ;;  %v10356_v3 = vld [vmem:[#allocation86_spill] sm:$0xff] }
 0xccc   : > { %v3493_v19 = vpop.permute.xlu1 %3492 }
 0xccd   : > { %3539 = vst.msk [vmem:[#allocation2 + $0x18] sm:$0xff] %vm1455_vm1, %v3493_v19  ;;  %v6753_v19 = vpop.eup %6752 }
 0xcce   : > { %v6755_v47 = vpop.eup %6754 }
 0xccf   : > { %v1380_v56 = vmul.f32 %v6755_v47, %v10354_v25 }
 0xcd0   : > { %v2472_v63 = vpop.permute.xlu1 %2471 }
 0xcd1   : > { %2519 = vst.msk [vmem:[#allocation2 + $0x10] sm:$0xff] %vm2517_vm3, %v2472_v63 }
 0xcdb   : > { %3494 = vrot.lane.b32.xlu0 %v3460_v28, %s7112_s27  ;;  %v1379_v28 = vmul.f32 %v6753_v19, %v10352_v38  ;;  %v10358_v19 = vld [vmem:[#allocation115_spill] sm:$0xff] }
 0xcdf   : > { %1942 = vrot.lane.b32.xlu0 %v1908_v36, %s7111_s25  ;;  %v6757_v36 = vpop.eup %6756 }
 0xce0   : > { %v1911_v2 = vmul.f32 %v6757_v36, %v10356_v3  ;;  %v6759_v34 = vpop.eup %6758 }
 0xce1   : > { %v2442_v38 = vmul.f32 %v6759_v34, %v10358_v19 }
 0xce3   : > { %2473 = vrot.lane.b32.xlu0 %v2439_v18, %s7110_s12 }
 0xceb   : > { %2829 = vadd.xlane.f32.xlu1 %v10351_v41 }
 0xcfc   : > { %3500 = vrot.lane.b32.xlu1 %v3463_v23, %s7112_s27  ;;  %v10357_v23 = vld [vmem:[#allocation18_spill] sm:$0xff] }
 0xcfd   : > { %v3736_v63 = vpop.xlane.xlu0 %3735 }
 0xcfe   : > { %v3765_v18 = vsub.f32 %v9089_v45, %v3736_v63 }
 0xd00   : > { %1415 = vrot.lane.b32.xlu1 %v1379_v28, %s7112_s27  ;;  %v3783_v47 = vmul.f32 1.442695, %v3765_v18 }
 0xd01   : > { %v3732_v59 = vpop.xlane.xlu0 %3731 }
 0xd02   : > { %2827 = vadd.xlane.f32.xlu0 %v10353_v53  ;;  %v3763_v1 = vsub.f32 %v9091_v29, %v3732_v59  ;;  %6764 = vpow2.f32 %v3783_v47  ;;  %v6761_v59 = vpop.eup %6760  ;;  %v10361_v47 = vld [vmem:[#allocation84_spill] sm:$0xff] }
 0xd03   : > { %v6763_v36 = vpop.eup %6762 }
 0xd04   : > { %1417 = vrot.lane.b32.xlu1 %v1380_v56, %s7112_s27  ;;  %v3779_v53 = vmul.f32 1.442695, %v3763_v1 }
 0xd05   : > { %v3738_v50 = vpop.xlane.xlu0 %3737 }
 0xd06   : > { %728 = vadd.xlane.f32.xlu0 %v10355_v4  ;;  %v3766_v28 = vsub.f32 %v9093_v8, %v3738_v50  ;;  %6766 = vpow2.f32 %v3779_v53  ;;  %v1910_v53 = vmul.f32 %v6761_v59, %v10361_v47 }
 0xd08   : > { %1948 = vrot.lane.b32.xlu1 %v1911_v2, %s7111_s25  ;;  %v3785_v25 = vmul.f32 1.442695, %v3766_v28  ;;  %v3462_v2 = vmul.f32 %v6763_v36, %v9052_v0  ;;  %v10360_v28 = vld [vmem:[#allocation135_spill] sm:$0xff]  ;;  %v10364_v36 = vld [vmem:[#allocation153_spill] sm:$0xff] }
 0xd09   : > { %v2470_v41 = vpop.permute.xlu0 %2469  ;;  %v4141_v0 = vsel %vm482_vm0, %v10360_v28, 0 }
 0xd0a   : > { %2518 = vst.msk [vmem:[#allocation2] sm:$0xff] %vm2517_vm3, %v2470_v41  ;;  %730 = vadd.xlane.f32.xlu0 %v10357_v23  ;;  %6768 = vpow2.f32 %v3785_v25  ;;  %v10359_v23 = vld [vmem:[#allocation143_spill] sm:$0xff] }
 0xd0c   : > { %2479 = vrot.lane.b32.xlu1 %v2442_v38, %s7110_s12  ;;  %v9227_v50 = vpop.eup %6764 }
 0xd0f   : > { %v3734_v56 = vpop.xlane.xlu1 %3733 }
 0xd10   : > { %v3764_v45 = vsub.f32 %v9095_v11, %v3734_v56  ;;  %v9232_v22 = vpop.eup %6766  ;;  %v10362_v56 = vld [vmem:[#allocation148_spill] sm:$0xff] }
 0xd12   : > { %v3781_v29 = vmul.f32 1.442695, %v3764_v45  ;;  %v10363_v45 = vld [vmem:[#allocation113_spill] sm:$0xff] }
 0xd13   : > { %v2826_v63 = vpop.xlane.xlu1 %2825 }
 0xd14   : > { %6770 = vpow2.f32 %v3781_v29  ;;  %v9234_v11 = vpop.eup %6768 }
 0xd15   : > { %6772 = vrcp.f32 %v2826_v63 }
 0xd16   : > { %6774 = vrcp.f32 %v8965_v61 }
 0xd17   : > { %v3744_v8 = vpop.xlane.xlu1 %3743 }
 0xd18   : > { %v3769_v51 = vsub.f32 %v9099_v33, %v3744_v8  ;;  %v3844_v33 = vpack.c.bf16 %v9234_v11, %v9227_v50  ;;  %v4144_v8 = vsel %vm482_vm0, %v10362_v56, 0 }
 0xd1a   : > { %v3791_v18 = vmul.f32 1.442695, %v3769_v51 }
 0xd1b   : > { %v9230_v4 = vpop.xlane.xlu1 %3739 }
 0xd1c   : > { %6776 = vpow2.f32 %v3791_v18 }
 0xd1e   : > { %v9236_v3 = vpop.eup %6770 }
 0xd1f   : > { %v6773_v34 = vpop.eup %6772  ;;  %v3746_v41 = vpop.xlane.xlu1 %3745  ;;  %v3843_v61 = vpack.c.bf16 %v9236_v3, %v9232_v22 }
 0xd20   : > { %v3770_v1 = vsub.f32 %v9103_v24, %v3746_v41  ;;  %3498 = vrot.lane.b32.xlu0 %v3462_v2, %s7112_s27  ;;  %v3001_v19 = vmul.f32 %v6773_v34, %v10359_v23  ;;  %v6775_v25 = vpop.eup %6774 }
 0xd21   : > { %6170 = vmatprep.mubr.bf16.mxu1 %v3843_v61  ;;  %v2441_v29 = vmul.f32 %v6775_v25, %v10363_v45  ;;  %v10365_v61 = vld [vmem:[#allocation130_spill] sm:$0xff]  ;;  %v10367_v25 = vld [vmem:[#allocation155_spill] sm:$0xff] }
 0xd22   : > { %v3793_v38 = vmul.f32 1.442695, %v3770_v1  ;;  %6171 = vmatmul.mubr.bf16.vlgmr.msra.gmra.mrb[112].mxu1 %v3844_v33  ;;  %3017 = vst.msk [vmem:[#allocation2 + $0x98] sm:$0xff] %vm482_vm0, %v3001_v19  ;;  %v4147_v1 = vsel %vm482_vm0, %v10364_v36, 0 }
 0xd23   : > { %6187 = vmatpush3.bf16.xpose.msra.mxu1 %v4141_v0  ;;  %v3748_v24 = vpop.xlane.xlu1 %3747 }
 0xd24   : > { %6778 = vpow2.f32 %v3793_v38  ;;  %6307 = vmatprep.subr.msk.bf16.mxu1 %vm482_vm0, %v10362_v56  ;;  %1946 = vrot.lane.b32.xlu0 %v1910_v53, %s7111_s25  ;;  %v10366_v38 = vld [vmem:[#allocation149_spill] sm:$0xff] }
 0xd25   : > { %6780 = vrcp.f32 %v9150_v35  ;;  %v3767_v35 = vsub.f32 %v9101_v13, %v9230_v4  ;;  %v3771_v13 = vsub.f32 %v9109_v7, %v3748_v24 }
 0xd26   : > { %v9261_v51 = vpop.eup %6776  ;;  %6782 = vrcp.f32 %v8969_v6 }
 0xd27   : > { %v9254_v63 = vpop.xlane.xlu1 %3753  ;;  %v3787_v56 = vmul.f32 1.442695, %v3767_v35 }
 0xd28   : > { %2477 = vrot.lane.b32.xlu0 %v2441_v29, %s7110_s12  ;;  %v3774_v7 = vsub.f32 %v9111_v30, %v9254_v63 }
 0xd2a   : > { %v3801_v63 = vmul.f32 1.442695, %v3774_v7 }
 0xd2b   : > { %6189 = vmatpush3.bf16.xpose.msra.mxu1 %v4144_v8  ;;  %v3750_v59 = vpop.xlane.xlu1 %3749 }
 0xd2c   : > { %6308 = vmatprep.subr.msk.bf16.mxu1 %vm482_vm0, %v10364_v36  ;;  %v3772_v0 = vsub.f32 %v9113_v58, %v3750_v59  ;;  %v3795_v36 = vmul.f32 1.442695, %v3771_v13 }
 0xd2e   : > { %v9263_v2 = vpop.eup %6778  ;;  %v3797_v4 = vmul.f32 1.442695, %v3772_v0 }
 0xd2f   : > { %v3760_v34 = vpop.xlane.xlu1 %3759  ;;  %v3846_v18 = vpack.c.bf16 %v9263_v2, %v9261_v51  ;;  %v6781_v53 = vpop.eup %6780 }
 0xd30   : > { %v3777_v41 = vsub.f32 %v9118_v32, %v3760_v34  ;;  %2833 = vadd.xlane.f32.xlu1 %v10365_v61  ;;  %v3465_v29 = vmul.f32 %v6781_v53, %v9054_v57  ;;  %v6783_v8 = vpop.eup %6782  ;;  %v10368_v61 = vld [vmem:[#allocation55_spill] sm:$0xff] }
 0xd32   : > { %v3807_v33 = vmul.f32 1.442695, %v3777_v41 }
 0xd33   : > { %6191 = vmatpush3.bf16.xpose.msra.mxu1 %v4147_v1  ;;  %v3762_v23 = vpop.xlane.xlu1 %3761  ;;  %v1381_v1 = vmul.f32 %v6783_v8, %v10368_v61 }
 0xd34   : > { %v3778_v19 = vsub.f32 %v9122_v52, %v3762_v23  ;;  %6309 = vmatprep.subr.msk.bf16.mxu1 %vm482_vm0, %v10366_v38  ;;  %6784 = vpow2.f32 %v3807_v33  ;;  %v4150_v52 = vsel %vm482_vm0, %v10366_v38, 0 }
 0xd36   : > { %v3809_v28 = vmul.f32 1.442695, %v3778_v19  ;;  %v10369_v19 = vld [vmem:[#allocation150_spill] sm:$0xff] }
 0xd37   : > { %v3497_v32 = vpop.permute.xlu1 %3496 }
 0xd38   : > { %6786 = vpow2.f32 %v3809_v28  ;;  %3541 = vst.msk [vmem:[#allocation2 + $0x38] sm:$0xff] %vm1455_vm1, %v3497_v32  ;;  %v10370_v28 = vld [vmem:[#allocation141_spill] sm:$0xff] }
 0xd39   : > { %6788 = vrcp.f32 %v8914_v44 }
 0xd3a   : > { %v2824_v47 = vpop.xlane.xlu0 %2823 }
 0xd3b   : > { %6193 = vmatpush3.bf16.xpose.msra.mxu1 %v4150_v52  ;;  %6790 = vrcp.f32 %v2824_v47  ;;  %v1412_v6 = vpop.permute.xlu1 %1411  ;;  %v10371_v52 = vld [vmem:[#allocation128_spill] sm:$0xff]  ;;  %v10372_v47 = vld [vmem:[#allocation57_spill] sm:$0xff] }
 0xd3c   : > { %1458 = vst.msk [vmem:[#allocation2 + $0x20] sm:$0xff] %vm1455_vm1, %v1412_v6  ;;  %6310 = vmatprep.subr.msk.bf16.mxu1 %vm482_vm0, %v10367_v25  ;;  %6792 = vpow2.f32 %v3787_v56 }
 0xd3d   : > { %6794 = vpow2.f32 %v3797_v4  ;;  %v10373_v4 = vld [vmem:[#allocation19_spill] sm:$0xff] }
 0xd3e   : > { %v3742_v44 = vpop.xlane.xlu0 %3741  ;;  %v9290_v59 = vpop.eup %6784 }
 0xd3f   : > { %v3768_v58 = vsub.f32 %v9105_v39, %v3742_v44  ;;  %v1414_v45 = vpop.permute.xlu1 %1413  ;;  %v4153_v39 = vsel %vm482_vm0, %v10367_v25, 0  ;;  %v4156_v25 = vsel %vm482_vm0, %v10369_v19, 0 }
 0xd40   : > { %1459 = vst.msk [vmem:[#allocation2 + $0x30] sm:$0xff] %vm1455_vm1, %v1414_v45 }
 0xd41   : > { %v3789_v34 = vmul.f32 1.442695, %v3768_v58  ;;  %3504 = vrot.lane.b32.xlu1 %v3465_v29, %s7112_s27  ;;  %v10374_v58 = vld [vmem:[#allocation151_spill] sm:$0xff] }
 0xd42   : > { %v9293_v41 = vpop.eup %6786  ;;  %v725_v57 = vpop.xlane.xlu0 %724 }
 0xd43   : > { %6796 = vpow2.f32 %v3789_v34  ;;  %6195 = vmatpush3.bf16.xpose.msra.mxu1 %v4153_v39  ;;  %v1945_v24 = vpop.permute.xlu1 %1944  ;;  %v3850_v33 = vpack.c.bf16 %v9293_v41, %v9290_v59  ;;  %v6789_v23 = vpop.eup %6788 }
 0xd44   : > { %6798 = vrcp.f32 %v725_v57  ;;  %1990 = vst.msk [vmem:[#allocation2 + $0x30] sm:$0xff] %vm1986_vm2, %v1945_v24  ;;  %6311 = vmatprep.subr.msk.bf16.mxu1 %vm482_vm0, %v10369_v19  ;;  %v1382_v6 = vmul.f32 %v6789_v23, %v10372_v47  ;;  %v10375_v57 = vld [vmem:[#allocation21_spill] sm:$0xff] }
 0xd45   : > { %v6791_v30 = vpop.eup %6790  ;;  %6800 = vpow2.f32 %v3795_v36  ;;  %1419 = vrot.lane.b32.xlu1 %v1381_v1, %s7112_s27 }
 0xd46   : > { %v3752_v38 = vpop.xlane.xlu0 %3751  ;;  %v3000_v32 = vmul.f32 %v6791_v30, %v10370_v28  ;;  %6802 = vpow2.f32 %v3801_v63  ;;  %v9315_v13 = vpop.eup %6792  ;;  %v10377_v30 = vld [vmem:[#allocation152_spill] sm:$0xff] }
 0xd47   : > { %v3773_v35 = vsub.f32 %v9107_v5, %v3752_v38  ;;  %v2476_v0 = vpop.permute.xlu1 %2475  ;;  %2831 = vadd.xlane.f32.xlu0 %v10371_v52  ;;  %v9319_v44 = vpop.eup %6794  ;;  %v4162_v28 = vsel %vm482_vm0, %v10377_v30, 0 }
 0xd48   : > { %2521 = vst.msk [vmem:[#allocation2 + $0x30] sm:$0xff] %vm2517_vm3, %v2476_v0 }
 0xd49   : > { %3016 = vst.msk [vmem:[#allocation2 + $0x88] sm:$0xff] %vm482_vm0, %v3000_v32  ;;  %v3799_v53 = vmul.f32 1.442695, %v3773_v35  ;;  %1421 = vrot.lane.b32.xlu1 %v1382_v6, %s7112_s27 }
 0xd4a   : > { %v3756_v56 = vpop.xlane.xlu0 %3755 }
 0xd4b   : > { %6804 = vpow2.f32 %v3799_v53  ;;  %6197 = vmatpush3.bf16.xpose.msra.mxu1 %v4156_v25  ;;  %v3775_v5 = vsub.f32 %v9120_v20, %v3756_v56  ;;  %732 = vadd.xlane.f32.xlu0 %v10373_v4  ;;  %v10376_v20 = vld [vmem:[#allocation32_spill] sm:$0xff]  ;;  %v10379_v56 = vld [vmem:[#allocation154_spill] sm:$0xff]  ;;  %v10380_v4 = vld [vmem:[#allocation157_spill] sm:$0xff] }
 0xd4c   : > { %6312 = vmatprep.subr.msk.bf16.mxu1 %vm482_vm0, %v10374_v58 }
 0xd4d   : > { %v6797_v45 = vpop.eup %6796  ;;  %v3803_v8 = vmul.f32 1.442695, %v3775_v5 }
 0xd4e   : > { %v6799_v29 = vpop.eup %6798  ;;  %v3758_v36 = vpop.xlane.xlu0 %3757  ;;  %v3845_v34 = vpack.c.bf16 %v6797_v45, %v9315_v13 }
 0xd4f   : > { %v9324_v7 = vpop.eup %6800  ;;  %v3776_v39 = vsub.f32 %v9124_v48, %v3758_v36  ;;  %734 = vadd.xlane.f32.xlu0 %v10375_v57  ;;  %v917_v24 = vmul.f32 %v6799_v29, %v10376_v20  ;;  %6806 = vpow2.f32 %v3803_v8  ;;  %v4159_v48 = vsel %vm482_vm0, %v10374_v58, 0  ;;  %v10381_v58 = vld [vmem:[#allocation156_spill] sm:$0xff]  ;;  %v10383_v29 = vld [vmem:[#allocation158_spill] sm:$0xff]  ;;  %v10384_v8 = vld [vmem:[#allocation161_spill] sm:$0xff] }
 0xd50   : > { %6174 = vmatprep.mubr.bf16.mxu1 %v3845_v34  ;;  %v3847_v61 = vpack.c.bf16 %v9319_v44, %v9324_v7  ;;  %v6803_v19 = vpop.eup %6802  ;;  %v10385_v36 = vld [vmem:[#allocation160_spill] sm:$0xff]  ;;  %v10386_v34 = vld [vmem:[#allocation162_spill] sm:$0xff] }
 0xd51   : > { %v3805_v1 = vmul.f32 1.442695, %v3776_v39  ;;  %6175 = vmatmul.mubr.bf16.gmra.mrb[116].mxu1 %v3846_v18  ;;  %933 = vst.msk [vmem:[#allocation2 + $0x80] sm:$0xff] %vm482_vm0, %v917_v24  ;;  %v10387_v39 = vld [vmem:[#allocation142_spill] sm:$0xff] }
 0xd52   : > { %6178 = vmatprep.mubr.bf16.mxu1 %v3847_v61  ;;  %v727_v23 = vpop.xlane.xlu0 %726 }
 0xd53   : > { %6808 = vpow2.f32 %v3805_v1  ;;  %6199 = vmatpush3.bf16.xpose.msra.mxu1 %v4159_v48  ;;  %v10388_v1 = vld [vmem:[#allocation140_spill] sm:$0xff] }
 0xd54   : > { %6810 = vrcp.f32 %v727_v23  ;;  %6313 = vmatprep.subr.msk.bf16.mxu1 %vm482_vm0, %v10377_v30 }
 0xd55   : > { %v6805_v63 = vpop.eup %6804  ;;  %6812 = vrcp.f32 %v9144_v60  ;;  %v10378_v60 = vld [vmem:[#allocation34_spill] sm:$0xff] }
 0xd56   : > { %v3495_v38 = vpop.permute.xlu0 %3494  ;;  %v3848_v18 = vpack.c.bf16 %v6803_v19, %v6805_v63 }
 0xd57   : > { %3540 = vst.msk [vmem:[#allocation2 + $0x28] sm:$0xff] %vm1455_vm1, %v3495_v38 }
 0xd59   : > { %6179 = vmatmul.mubr.bf16.gmra.mrb[120].mxu1 %v3848_v18  ;;  %v9344_v35 = vpop.eup %6806 }
 0xd5a   : > { %v1943_v32 = vpop.permute.xlu0 %1942 }
 0xd5b   : > { %6201 = vmatpush3.bf16.xpose.msra.mxu1 %v4162_v28  ;;  %1989 = vst.msk [vmem:[#allocation2 + $0x20] sm:$0xff] %vm1986_vm2, %v1943_v32 }
 0xd5d   : > { %v6809_v0 = vpop.eup %6808 }
 0xd5e   : > { %v6811_v52 = vpop.eup %6810  ;;  %v2474_v47 = vpop.permute.xlu0 %2473  ;;  %v3849_v6 = vpack.c.bf16 %v6809_v0, %v9344_v35 }
 0xd5f   : > { %2520 = vst.msk [vmem:[#allocation2 + $0x20] sm:$0xff] %vm2517_vm3, %v2474_v47  ;;  %v918_v53 = vmul.f32 %v6811_v52, %v10378_v60  ;;  %v6813_v25 = vpop.eup %6812 }
 0xd60   : > { %6182 = vmatprep.mubr.bf16.mxu1 %v3849_v6  ;;  %v3464_v5 = vmul.f32 %v6813_v25, %v9049_v37 }
 0xd61   : > { %6183 = vmatmul.mubr.bf16.gmra.mrb[124].mxu1 %v3850_v33  ;;  %934 = vst.msk [vmem:[#allocation2 + $0x90] sm:$0xff] %vm482_vm0, %v918_v53  ;;  %v10382_v33 = vld [vmem:[#allocation159_spill] sm:$0xff] }
 0xd62   : > { %6202 = vmatprep.mubr.msk.bf16.mxu1 %vm482_vm0, %v10379_v56  ;;  %v10392_v56 = vld [vmem:[#allocation145_spill] sm:$0xff] }
 0xd65   : > { %3502 = vrot.lane.b32.xlu0 %v3464_v5, %s7112_s27 }
 0xd69   : > { %6203 = vmatmul.mubr.msk.bf16.vlgmr.msra.gmra.mrb[128].mxu1 %vm482_vm0, %v10380_v4 }
 0xd6a   : > { %6206 = vmatprep.mubr.msk.bf16.mxu1 %vm482_vm0, %v10381_v58  ;;  %v10393_v58 = vld [vmem:[#allocation36_spill] sm:$0xff] }
 0xd6d   : > { %3817 = vadd.xlane.f32.xlu1 %v9234_v11 }
 0xd71   : > { %3813 = vadd.xlane.f32.xlu1 %v9236_v3  ;;  %6207 = vmatmul.mubr.msk.bf16.gmra.mrb[132].mxu1 %vm482_vm0, %v10382_v33 }
 0xd72   : > { %6210 = vmatprep.mubr.msk.bf16.mxu1 %vm482_vm0, %v10383_v29 }
 0xd75   : > { %3825 = vadd.xlane.f32.xlu1 %v9263_v2 }
 0xd78   : > { %v2830_v37 = vpop.xlane.xlu1 %2829 }
 0xd79   : > { %6814 = vrcp.f32 %v2830_v37  ;;  %3821 = vadd.xlane.f32.xlu1 %v6797_v45  ;;  %6211 = vmatmul.mubr.msk.bf16.gmra.mrb[136].mxu1 %vm482_vm0, %v10384_v8  ;;  %v10394_v37 = vld [vmem:[#allocation38_spill] sm:$0xff] }
 0xd7a   : > { %6214 = vmatprep.mubr.msk.bf16.mxu1 %vm482_vm0, %v10385_v36 }
 0xd7c   : > { %v3501_v11 = vpop.permute.xlu1 %3500 }
 0xd7d   : > { %3543 = vst.msk [vmem:[#allocation2 + $0x58] sm:$0xff] %vm1455_vm1, %v3501_v11  ;;  %3833 = vadd.xlane.f32.xlu1 %v6803_v19 }
 0xd80   : > { %v1416_v3 = vpop.permute.xlu1 %1415 }
 0xd81   : > { %1460 = vst.msk [vmem:[#allocation2 + $0x40] sm:$0xff] %vm1455_vm1, %v1416_v3  ;;  %3829 = vadd.xlane.f32.xlu1 %v9319_v44  ;;  %6215 = vmatmul.mubr.msk.bf16.gmra.mrb[140].mxu1 %vm482_vm0, %v10386_v34 }
 0xd83   : > { %v6815_v2 = vpop.eup %6814 }
 0xd84   : > { %v1418_v45 = vpop.permute.xlu1 %1417  ;;  %3815 = vadd.xlane.f32.xlu0 %v9227_v50  ;;  %v3003_v57 = vmul.f32 %v6815_v2, %v10387_v39 }
 0xd85   : > { %1461 = vst.msk [vmem:[#allocation2 + $0x50] sm:$0xff] %vm1455_vm1, %v1418_v45  ;;  %3841 = vadd.xlane.f32.xlu1 %v9293_v41 }
 0xd86   : > { %3019 = vst.msk [vmem:[#allocation2 + $0xb8] sm:$0xff] %vm482_vm0, %v3003_v57 }
 0xd88   : > { %v1949_v20 = vpop.permute.xlu1 %1948  ;;  %3811 = vadd.xlane.f32.xlu0 %v9232_v22 }
 0xd89   : > { %1992 = vst.msk [vmem:[#allocation2 + $0x50] sm:$0xff] %vm1986_vm2, %v1949_v20  ;;  %3837 = vadd.xlane.f32.xlu1 %v6809_v0  ;;  %v10391_v0 = vld [vmem:[#allocation147_spill] sm:$0xff] }
 0xd8c   : > { %v2480_v44 = vpop.permute.xlu1 %2479  ;;  %3823 = vadd.xlane.f32.xlu0 %v9261_v51 }
 0xd8d   : > { %2523 = vst.msk [vmem:[#allocation2 + $0x50] sm:$0xff] %vm2517_vm3, %v2480_v44 }
 0xd8f   : > { %v2828_v50 = vpop.xlane.xlu0 %2827 }
 0xd90   : > { %6816 = vrcp.f32 %v2828_v50  ;;  %3819 = vadd.xlane.f32.xlu0 %v9315_v13  ;;  %v10389_v13 = vld [vmem:[#allocation31_spill] sm:$0xff] }
 0xd93   : > { %v729_v24 = vpop.xlane.xlu0 %728 }
 0xd94   : > { %6818 = vrcp.f32 %v729_v24  ;;  %3831 = vadd.xlane.f32.xlu0 %v6805_v63  ;;  %v10390_v63 = vld [vmem:[#allocation33_spill] sm:$0xff] }
 0xd97   : > { %v731_v41 = vpop.xlane.xlu0 %730 }
 0xd98   : > { %6820 = vrcp.f32 %v731_v41  ;;  %3827 = vadd.xlane.f32.xlu0 %v9324_v7 }
 0xd9a   : > { %v6817_v22 = vpop.eup %6816 }
 0xd9b   : > { %v3499_v61 = vpop.permute.xlu0 %3498  ;;  %v3002_v48 = vmul.f32 %v6817_v22, %v10388_v1 }
 0xd9c   : > { %3542 = vst.msk [vmem:[#allocation2 + $0x48] sm:$0xff] %vm1455_vm1, %v3499_v61  ;;  %3839 = vadd.xlane.f32.xlu0 %v9290_v59 }
 0xd9d   : > { %3018 = vst.msk [vmem:[#allocation2 + $0xa8] sm:$0xff] %vm482_vm0, %v3002_v48 }
 0xd9e   : > { %v6819_v51 = vpop.eup %6818 }
 0xd9f   : > { %v1947_v23 = vpop.permute.xlu0 %1946  ;;  %v919_v19 = vmul.f32 %v6819_v51, %v10389_v13 }
 0xda0   : > { %1991 = vst.msk [vmem:[#allocation2 + $0x40] sm:$0xff] %vm1986_vm2, %v1947_v23  ;;  %3835 = vadd.xlane.f32.xlu0 %v9344_v35 }
 0xda1   : > { %935 = vst.msk [vmem:[#allocation2 + $0xa0] sm:$0xff] %vm482_vm0, %v919_v19 }
 0xda2   : > { %v6821_v7 = vpop.eup %6820 }
 0xda3   : > { %v2478_v30 = vpop.permute.xlu0 %2477  ;;  %v920_v38 = vmul.f32 %v6821_v7, %v10390_v63 }
 0xda4   : > { %2522 = vst.msk [vmem:[#allocation2 + $0x40] sm:$0xff] %vm2517_vm3, %v2478_v30 }
 0xda5   : > { %936 = vst.msk [vmem:[#allocation2 + $0xb0] sm:$0xff] %vm482_vm0, %v920_v38 }
 0xdbd   : > { %v2834_v59 = vpop.xlane.xlu1 %2833 }
 0xdbe   : > { %6822 = vrcp.f32 %v2834_v59 }
 0xdc1   : > { %v3505_v18 = vpop.permute.xlu1 %3504 }
 0xdc2   : > { %3545 = vst.msk [vmem:[#allocation2 + $0x78] sm:$0xff] %vm1455_vm1, %v3505_v18 }
 0xdc5   : > { %v1420_v28 = vpop.permute.xlu1 %1419 }
 0xdc6   : > { %1462 = vst.msk [vmem:[#allocation2 + $0x60] sm:$0xff] %vm1455_vm1, %v1420_v28 }
 0xdc8   : > { %v6823_v32 = vpop.eup %6822 }
 0xdc9   : > { %v1422_v35 = vpop.permute.xlu1 %1421  ;;  %v3005_v52 = vmul.f32 %v6823_v32, %v10391_v0 }
 0xdca   : > { %1463 = vst.msk [vmem:[#allocation2 + $0x70] sm:$0xff] %vm1455_vm1, %v1422_v35 }
 0xdcb   : > { %3021 = vst.msk [vmem:[#allocation2 + $0xd8] sm:$0xff] %vm482_vm0, %v3005_v52 }
 0xdd4   : > { %v2832_v47 = vpop.xlane.xlu0 %2831 }
 0xdd5   : > { %6824 = vrcp.f32 %v2832_v47 }
 0xdd8   : > { %v733_v6 = vpop.xlane.xlu0 %732 }
 0xdd9   : > { %6826 = vrcp.f32 %v733_v6 }
 0xddc   : > { %v735_v60 = vpop.xlane.xlu0 %734 }
 0xddd   : > { %6828 = vrcp.f32 %v735_v60 }
 0xddf   : > { %v6825_v53 = vpop.eup %6824 }
 0xde0   : > { %v3503_v25 = vpop.permute.xlu0 %3502  ;;  %v3004_v5 = vmul.f32 %v6825_v53, %v10392_v56 }
 0xde1   : > { %3544 = vst.msk [vmem:[#allocation2 + $0x68] sm:$0xff] %vm1455_vm1, %v3503_v25 }
 0xde2   : > { %3020 = vst.msk [vmem:[#allocation2 + $0xc8] sm:$0xff] %vm482_vm0, %v3004_v5 }
 0xde3   : > { %v6827_v4 = vpop.eup %6826 }
 0xde4   : > { %v921_v33 = vmul.f32 %v6827_v4, %v10393_v58 }
 0xde6   : > { %937 = vst.msk [vmem:[#allocation2 + $0xc0] sm:$0xff] %vm482_vm0, %v921_v33 }
 0xde7   : > { %v6829_v29 = vpop.eup %6828 }
 0xde8   : > { %v922_v8 = vmul.f32 %v6829_v29, %v10394_v37 }
 0xdea   : > { %938 = vst.msk [vmem:[#allocation2 + $0xd0] sm:$0xff] %vm482_vm0, %v922_v8 }
 0xdf5   : > { %v6172_v36 = vpop.f32.mrb[112].mxu1 }
 0xdf6   : > { %v3909_v11 = vpop.f32.mrb[113].mxu1 }
 0xdf7   : > { %v6173_v3 = vpop.f32.mrb[114].mxu1 }
 0xdf8   : > { %v3912_v34 = vpop.f32.mrb[115].mxu1 }
 0xdfa   : > { %v3818_v2 = vpop.xlane.xlu1 %3817 }
 0xdfb   : > { %6830 = vrcp.f32 %v3818_v2 }
 0xdfe   : > { %v3814_v45 = vpop.xlane.xlu1 %3813 }
 0xdff   : > { %6832 = vrcp.f32 %v3814_v45 }
 0xe02   : > { %v3826_v41 = vpop.xlane.xlu1 %3825 }
 0xe05   : > { %v6831_v39 = vpop.eup %6830 }
 0xe06   : > { %v3991_v57 = vmul.f32 %v6831_v39, %v6173_v3  ;;  %v3822_v1 = vpop.xlane.xlu1 %3821 }
 0xe08   : > { %4026 = vrot.lane.b32.xlu1 %v3991_v57, %s7111_s25 }
 0xe09   : > { %v6833_v20 = vpop.eup %6832 }
 0xe0a   : > { %v3989_v44 = vmul.f32 %v6833_v20, %v3912_v34 }
 0xe0c   : > { %4022 = vrot.lane.b32.xlu1 %v3989_v44, %s7111_s25 }
 0xe11   : > { %v3816_v50 = vpop.xlane.xlu0 %3815 }
 0xe12   : > { %6834 = vrcp.f32 %v3816_v50 }
 0xe15   : > { %v3812_v24 = vpop.xlane.xlu0 %3811 }
 0xe16   : > { %6836 = vrcp.f32 %v3812_v24  ;;  %v9478_v24 = vpop.xlane.xlu1 %3833 }
 0xe19   : > { %v3824_v22 = vpop.xlane.xlu0 %3823 }
 0xe1a   : > { %6838 = vrcp.f32 %v3824_v22 }
 0xe1b   : > { %6840 = vrcp.f32 %v3826_v41  ;;  %v9482_v41 = vpop.xlane.xlu1 %3829 }
 0xe1c   : > { %v6835_v61 = vpop.eup %6834 }
 0xe1d   : > { %v3820_v48 = vpop.xlane.xlu0 %3819  ;;  %v3990_v51 = vmul.f32 %v6835_v61, %v6172_v36  ;;  %v10395_v61 = vld [vmem:[#allocation83_spill] sm:$0xff] }
 0xe1e   : > { %6842 = vrcp.f32 %v3820_v48 }
 0xe1f   : > { %4024 = vrot.lane.b32.xlu0 %v3990_v51, %s7111_s25  ;;  %6844 = vrcp.f32 %v3822_v1  ;;  %v9486_v48 = vpop.xlane.xlu1 %3841 }
 0xe20   : > { %v6837_v23 = vpop.eup %6836  ;;  %6846 = vrcp.f32 %v8973_v17 }
 0xe21   : > { %v3988_v13 = vmul.f32 %v6837_v23, %v3909_v11  ;;  %6848 = vrcp.f32 %v8921_v31  ;;  %v10396_v23 = vld [vmem:[#allocation85_spill] sm:$0xff] }
 0xe22   : > { %6850 = vrcp.f32 %v8975_v43 }
 0xe23   : > { %4020 = vrot.lane.b32.xlu0 %v3988_v13, %s7111_s25  ;;  %v9489_v51 = vpop.xlane.xlu1 %3837  ;;  %6852 = vrcp.f32 %v8924_v42 }
 0xe24   : > { %v6839_v19 = vpop.eup %6838  ;;  %v6176_v7 = vpop.f32.mrb[116].mxu1  ;;  %6854 = vrcp.f32 %v9158_v14 }
 0xe25   : > { %v3994_v30 = vmul.f32 %v6839_v19, %v6176_v7  ;;  %v3925_v63 = vpop.f32.mrb[117].mxu1  ;;  %v6841_v38 = vpop.eup %6840  ;;  %6856 = vrcp.f32 %v9172_v54 }
 0xe26   : > { %v6177_v59 = vpop.f32.mrb[118].mxu1  ;;  %v9493_v7 = vpop.xlane.xlu0 %3831 }
 0xe27   : > { %v3995_v18 = vmul.f32 %v6841_v38, %v6177_v59  ;;  %v3928_v28 = vpop.f32.mrb[119].mxu1  ;;  %4032 = vrot.lane.b32.xlu0 %v3994_v30, %s7111_s25 }
 0xe28   : > { %v6843_v32 = vpop.eup %6842 }
 0xe29   : > { %v3992_v35 = vmul.f32 %v6843_v32, %v3925_v63  ;;  %4034 = vrot.lane.b32.xlu1 %v3995_v18, %s7111_s25  ;;  %v6845_v0 = vpop.eup %6844 }
 0xe2a   : > { %v3993_v52 = vmul.f32 %v6845_v0, %v3928_v28  ;;  %v6847_v22 = vpop.eup %6846  ;;  %v3828_v31 = vpop.xlane.xlu0 %3827 }
 0xe2b   : > { %4028 = vrot.lane.b32.xlu0 %v3992_v35, %s7111_s25  ;;  %v1912_v1 = vmul.f32 %v6847_v22, %v10395_v61  ;;  %v6849_v17 = vpop.eup %6848  ;;  %v10397_v22 = vld [vmem:[#allocation112_spill] sm:$0xff]  ;;  %6858 = vrcp.f32 %v3828_v31 }
 0xe2c   : > { %v9418_v47 = vpop.f32.mrb[120].mxu1  ;;  %v1913_v13 = vmul.f32 %v6849_v17, %v10396_v23  ;;  %v10399_v23 = vld [vmem:[#allocation131_spill] sm:$0xff]  ;;  %6860 = vrcp.f32 %v8977_v9 }
 0xe2d   : > { %v9420_v6 = vpop.f32.mrb[121].mxu1  ;;  %4030 = vrot.lane.b32.xlu1 %v3993_v52, %s7111_s25  ;;  %v6851_v52 = vpop.eup %6850  ;;  %6862 = vrcp.f32 %v8982_v10 }
 0xe2e   : > { %v9423_v60 = vpop.f32.mrb[122].mxu1  ;;  %v9497_v63 = vpop.xlane.xlu0 %3839  ;;  %v2443_v43 = vmul.f32 %v6851_v52, %v10397_v22  ;;  %6864 = vrcp.f32 %v8929_v15 }
 0xe2f   : > { %v9425_v53 = vpop.f32.mrb[123].mxu1  ;;  %v6853_v61 = vpop.eup %6852  ;;  %6866 = vrcp.f32 %v8931_v21 }
 0xe30   : > { %6868 = vrcp.f32 %v8994_v55 }
 0xe31   : > { %6870 = vrcp.f32 %v9153_v40 }
 0xe32   : > { %v9499_v38 = vpop.xlane.xlu0 %3835  ;;  %6872 = vrcp.f32 %v9482_v41 }
 0xe34   : > { %v9427_v25 = vpop.f32.mrb[124].mxu1 }
 0xe35   : > { %v9429_v56 = vpop.f32.mrb[125].mxu1 }
 0xe36   : > { %v9431_v5 = vpop.f32.mrb[126].mxu1 }
 0xe37   : > { %v9433_v4 = vpop.f32.mrb[127].mxu1 }
 0xe3c   : > { %v9435_v58 = vpop.f32.mrb[128].mxu1 }
 0xe3d   : > { %v9437_v33 = vpop.f32.mrb[129].mxu1 }
 0xe3e   : > { %v9439_v29 = vpop.f32.mrb[130].mxu1 }
 0xe3f   : > { %v9441_v37 = vpop.f32.mrb[131].mxu1 }
 0xe44   : > { %v9443_v8 = vpop.f32.mrb[132].mxu1 }
 0xe45   : > { %v9445_v36 = vpop.f32.mrb[133].mxu1 }
 0xe46   : > { %v9447_v11 = vpop.f32.mrb[134].mxu1 }
 0xe47   : > { %v9449_v3 = vpop.f32.mrb[135].mxu1 }
 0xe4a   : > { %4261 = vmax.xlane.f32.xlu0 %v9437_v33 }
 0xe4c   : > { %v9452_v34 = vpop.f32.mrb[136].mxu1 }
 0xe4d   : > { %v9454_v2 = vpop.f32.mrb[137].mxu1 }
 0xe4e   : > { %v9456_v45 = vpop.f32.mrb[138].mxu1  ;;  %4269 = vmax.xlane.f32.xlu0 %v9445_v36 }
 0xe4f   : > { %v9459_v39 = vpop.f32.mrb[139].mxu1 }
 0xe51   : > { %4265 = vmax.xlane.f32.xlu1 %v9435_v58 }
 0xe52   : > { %4281 = vmax.xlane.f32.xlu0 %v9452_v34 }
 0xe54   : > { %v9463_v57 = vpop.f32.mrb[140].mxu1 }
 0xe55   : > { %4267 = vmax.xlane.f32.xlu1 %v9439_v29  ;;  %v9466_v20 = vpop.f32.mrb[141].mxu1 }
 0xe56   : > { %v9468_v44 = vpop.f32.mrb[142].mxu1  ;;  %4277 = vmax.xlane.f32.xlu0 %v9454_v2 }
 0xe57   : > { %v9471_v50 = vpop.f32.mrb[143].mxu1 }
 0xe59   : > { %4263 = vmax.xlane.f32.xlu1 %v9441_v37 }
 0xe5a   : > { %4283 = vmax.xlane.f32.xlu0 %v9456_v45 }
 0xe5d   : > { %4273 = vmax.xlane.f32.xlu1 %v9443_v8 }
 0xe61   : > { %4275 = vmax.xlane.f32.xlu1 %v9447_v11 }
 0xe65   : > { %4271 = vmax.xlane.f32.xlu1 %v9449_v3 }
 0xe69   : > { %4279 = vmax.xlane.f32.xlu1 %v9459_v39 }
 0xe70   : > { %1950 = vrot.lane.b32.xlu0 %v1912_v1, %s7111_s25  ;;  %v10398_v1 = vld [vmem:[#allocation114_spill] sm:$0xff] }
 0xe71   : > { %v2444_v17 = vmul.f32 %v6853_v61, %v10398_v1 }
 0xe7a   : > { %v4027_v19 = vpop.permute.xlu1 %4026  ;;  %1952 = vrot.lane.b32.xlu1 %v1913_v13, %s7111_s25  ;;  %v10400_v13 = vld [vmem:[#allocation22_spill] sm:$0xff] }
 0xe7b   : > { %4071 = vst.msk [vmem:[#allocation2 + $0x38] sm:$0xff] %vm1986_vm2, %v4027_v19  ;;  %v10401_v19 = vld [vmem:[#allocation20_spill] sm:$0xff] }
 0xe7e   : > { %v4023_v30 = vpop.permute.xlu1 %4022 }
 0xe7f   : > { %4069 = vst.msk [vmem:[#allocation2 + $0x18] sm:$0xff] %vm1986_vm2, %v4023_v30  ;;  %v10402_v30 = vld [vmem:[#allocation129_spill] sm:$0xff] }
 0xe8f   : > { %4289 = vmax.xlane.f32.xlu0 %v9463_v57 }
 0xe91   : > { %v4025_v59 = vpop.permute.xlu0 %4024 }
 0xe92   : > { %4070 = vst.msk [vmem:[#allocation2 + $0x28] sm:$0xff] %vm1986_vm2, %v4025_v59 }
 0xe93   : > { %4285 = vmax.xlane.f32.xlu0 %v9466_v20 }
 0xe95   : > { %v4021_v18 = vpop.permute.xlu0 %4020 }
 0xe96   : > { %4068 = vst.msk [vmem:[#allocation2 + $0x8] sm:$0xff] %vm1986_vm2, %v4021_v18 }
 0xe99   : > { %v4033_v28 = vpop.permute.xlu0 %4032 }
 0xe9a   : > { %4074 = vst.msk [vmem:[#allocation2 + $0x68] sm:$0xff] %vm1986_vm2, %v4033_v28 }
 0xe9b   : > { %v4035_v32 = vpop.permute.xlu1 %4034 }
 0xe9c   : > { %4075 = vst.msk [vmem:[#allocation2 + $0x78] sm:$0xff] %vm1986_vm2, %v4035_v32 }
 0xe9d   : > { %v4029_v35 = vpop.permute.xlu0 %4028 }
 0xe9e   : > { %4072 = vst.msk [vmem:[#allocation2 + $0x48] sm:$0xff] %vm1986_vm2, %v4029_v35  ;;  %4291 = vmax.xlane.f32.xlu1 %v9468_v44  ;;  %v6855_v35 = vpop.eup %6854 }
 0xe9f   : > { %v4031_v0 = vpop.permute.xlu1 %4030  ;;  %v6857_v52 = vpop.eup %6856 }
 0xea0   : > { %4073 = vst.msk [vmem:[#allocation2 + $0x58] sm:$0xff] %vm1986_vm2, %v4031_v0  ;;  %v6859_v15 = vpop.eup %6858  ;;  %v3467_v55 = vmul.f32 %v6857_v52, %v9069_v62  ;;  %v10403_v62 = vld [vmem:[#allocation60_spill] sm:$0xff] }
 0xea2   : > { %4287 = vmax.xlane.f32.xlu1 %v9471_v50 }
 0xea9   : > { %2481 = vrot.lane.b32.xlu0 %v2443_v43, %s7110_s12  ;;  %v6861_v43 = vpop.eup %6860 }
 0xeaa   : > { %v6863_v41 = vpop.eup %6862 }
 0xeb3   : > { %2483 = vrot.lane.b32.xlu1 %v2444_v17, %s7110_s12 }
 0xec8   : > { %2835 = vadd.xlane.f32.xlu0 %v10399_v23 }
 0xecc   : > { %736 = vadd.xlane.f32.xlu0 %v10400_v13  ;;  %v1383_v13 = vmul.f32 %v6861_v43, %v10403_v62  ;;  %v10410_v43 = vld [vmem:[#allocation68_spill] sm:$0xff] }
 0xed0   : > { %738 = vadd.xlane.f32.xlu0 %v10401_v19 }
 0xed7   : > { %2837 = vadd.xlane.f32.xlu1 %v10402_v30  ;;  %v4262_v42 = vpop.xlane.xlu0 %4261 }
 0xed8   : > { %v4293_v14 = vsub.f32 %v9437_v33, %v4262_v42 }
 0xeda   : > { %v4309_v33 = vmul.f32 1.442695, %v4293_v14 }
 0xedb   : > { %v9523_v59 = vpop.xlane.xlu0 %4269 }
 0xede   : > { %v4266_v18 = vpop.xlane.xlu1 %4265 }
 0xedf   : > { %v4295_v28 = vsub.f32 %v9435_v58, %v4266_v18  ;;  %v4282_v32 = vpop.xlane.xlu0 %4281  ;;  %v3466_v58 = vmul.f32 %v6855_v35, %v9064_v27  ;;  %v3996_v27 = vmul.f32 %v6859_v15, %v9420_v6 }
 0xee0   : > { %v4303_v54 = vsub.f32 %v9452_v34, %v4282_v32 }
 0xee1   : > { %v4313_v0 = vmul.f32 1.442695, %v4295_v28  ;;  %v4297_v28 = vsub.f32 %v9445_v36, %v9523_v59  ;;  %v10407_v59 = vld [vmem:[#allocation98_spill] sm:$0xff] }
 0xee2   : > { %v4268_v31 = vpop.xlane.xlu1 %4267  ;;  %v4329_v22 = vmul.f32 1.442695, %v4303_v54 }
 0xee3   : > { %v4296_v9 = vsub.f32 %v9439_v29, %v4268_v31  ;;  %v9534_v10 = vpop.xlane.xlu0 %4277  ;;  %6874 = vpow2.f32 %v4313_v0 }
 0xee5   : > { %v4315_v21 = vmul.f32 1.442695, %v4296_v9 }
 0xee6   : > { %v4264_v34 = vpop.xlane.xlu1 %4263  ;;  %3506 = vrot.lane.b32.xlu0 %v3466_v58, %s7112_s27 }
 0xee7   : > { %6876 = vpow2.f32 %v4315_v21  ;;  %v4294_v29 = vsub.f32 %v9441_v37, %v4264_v34  ;;  %v4284_v61 = vpop.xlane.xlu0 %4283  ;;  %v6865_v37 = vpop.eup %6864 }
 0xee8   : > { %6878 = vrcp.f32 %v9002_v49  ;;  %v4304_v40 = vsub.f32 %v9456_v45, %v4284_v61  ;;  %3508 = vrot.lane.b32.xlu1 %v3467_v55, %s7112_s27  ;;  %v6867_v6 = vpop.eup %6866  ;;  %v10404_v45 = vld [vmem:[#allocation88_spill] sm:$0xff]  ;;  %v10409_v55 = vld [vmem:[#allocation77_spill] sm:$0xff] }
 0xee9   : > { %6880 = vpow2.f32 %v4309_v33  ;;  %v4311_v1 = vmul.f32 1.442695, %v4294_v29  ;;  %v1914_v30 = vmul.f32 %v6863_v41, %v10404_v45  ;;  %v6869_v42 = vpop.eup %6868  ;;  %v4317_v33 = vmul.f32 1.442695, %v4297_v28 }
 0xeea   : > { %6882 = vpow2.f32 %v4329_v22  ;;  %v4331_v17 = vmul.f32 1.442695, %v4304_v40  ;;  %v4274_v23 = vpop.xlane.xlu1 %4273  ;;  %4036 = vrot.lane.b32.xlu0 %v3996_v27, %s7111_s25  ;;  %v6871_v18 = vpop.eup %6870 }
 0xeeb   : > { %6884 = vpow2.f32 %v4311_v1  ;;  %v4299_v49 = vsub.f32 %v9443_v8, %v4274_v23  ;;  %v1951_v19 = vpop.permute.xlu0 %1950  ;;  %v10405_v8 = vld [vmem:[#allocation62_spill] sm:$0xff]  ;;  %v6873_v0 = vpop.eup %6872 }
 0xeec   : > { %6886 = vpow2.f32 %v4331_v17  ;;  %1993 = vst.msk [vmem:[#allocation2 + $0x60] sm:$0xff] %vm1986_vm2, %v1951_v19  ;;  %1423 = vrot.lane.b32.xlu1 %v1383_v13, %s7112_s27  ;;  %v1384_v14 = vmul.f32 %v6865_v37, %v10405_v8  ;;  %v3997_v9 = vmul.f32 %v6873_v0, %v9425_v53  ;;  %v10408_v53 = vld [vmem:[#allocation99_spill] sm:$0xff]  ;;  %v10415_v8 = vld [vmem:[#allocation97_spill] sm:$0xff] }
 0xeed   : > { %6888 = vrcp.f32 %v8935_v12  ;;  %v4321_v32 = vmul.f32 1.442695, %v4299_v49  ;;  %v9559_v31 = vpop.eup %6874  ;;  %v10406_v12 = vld [vmem:[#allocation117_spill] sm:$0xff]  ;;  %v10412_v13 = vld [vmem:[#allocation59_spill] sm:$0xff] }
 0xeee   : > { %v4276_v35 = vpop.xlane.xlu1 %4275  ;;  %1954 = vrot.lane.b32.xlu0 %v1914_v30, %s7111_s25  ;;  %6890 = vrcp.f32 %v9493_v7  ;;  %v2445_v52 = vmul.f32 %v6869_v42, %v10406_v12  ;;  %v10413_v30 = vld [vmem:[#allocation119_spill] sm:$0xff] }
 0xeef   : > { %v4300_v54 = vsub.f32 %v9447_v11, %v4276_v35  ;;  %6892 = vrcp.f32 %v9007_v16  ;;  %v4301_v11 = vsub.f32 %v9454_v2, %v9534_v10  ;;  %v3468_v2 = vmul.f32 %v6871_v18, %v10409_v55 }
 0xef0   : > { %1425 = vrot.lane.b32.xlu1 %v1384_v14, %s7112_s27  ;;  %6894 = vrcp.f32 %v10407_v59 }
 0xef1   : > { %v9564_v36 = vpop.eup %6876  ;;  %v4323_v58 = vmul.f32 1.442695, %v4300_v54  ;;  %6896 = vpow2.f32 %v4321_v32  ;;  %v4325_v27 = vmul.f32 1.442695, %v4301_v11 }
 0xef2   : > { %v6879_v15 = vpop.eup %6878  ;;  %v4272_v7 = vpop.xlane.xlu1 %4271  ;;  %2485 = vrot.lane.b32.xlu0 %v2445_v52, %s7110_s12  ;;  %v4374_v16 = vpack.c.bf16 %v9564_v36, %v9559_v31  ;;  %v10416_v52 = vld [vmem:[#allocation87_spill] sm:$0xff] }
 0xef3   : > { %v9573_v21 = vpop.eup %6880  ;;  %6898 = vpow2.f32 %v4323_v58  ;;  %v4298_v22 = vsub.f32 %v9449_v3, %v4272_v7  ;;  %v10411_v3 = vld [vmem:[#allocation90_spill] sm:$0xff]  ;;  %v1385_v37 = vmul.f32 %v6879_v15, %v10412_v13  ;;  %v10418_v58 = vld [vmem:[#allocation61_spill] sm:$0xff] }
 0xef4   : > { %v9576_v34 = vpop.eup %6882  ;;  %6900 = vrcp.f32 %v10408_v53  ;;  %4038 = vrot.lane.b32.xlu1 %v3997_v9, %s7111_s25  ;;  %v1915_v41 = vmul.f32 %v6867_v6, %v10411_v3  ;;  %v10417_v9 = vld [vmem:[#allocation45_spill] sm:$0xff]  ;;  %v10421_v3 = vld [vmem:[#allocation118_spill] sm:$0xff] }
 0xef5   : > { %v9581_v10 = vpop.eup %6884  ;;  %6902 = vrcp.f32 %v10410_v43  ;;  %v4319_v29 = vmul.f32 1.442695, %v4298_v22 }
 0xef6   : > { %v9584_v61 = vpop.eup %6886  ;;  %6904 = vpow2.f32 %v4317_v33  ;;  %v4280_v40 = vpop.xlane.xlu1 %4279  ;;  %3510 = vrot.lane.b32.xlu0 %v3468_v2, %s7112_s27  ;;  %v4373_v1 = vpack.c.bf16 %v9581_v10, %v9573_v21 }
 0xef7   : > { %v6889_v17 = vpop.eup %6888  ;;  %6906 = vpow2.f32 %v4319_v29  ;;  %v4302_v23 = vsub.f32 %v9459_v39, %v4280_v40  ;;  %v4378_v62 = vpack.c.bf16 %v9584_v61, %v9576_v34  ;;  %v10420_v29 = vld [vmem:[#allocation89_spill] sm:$0xff] }
 0xef8   : > { %1956 = vrot.lane.b32.xlu1 %v1915_v41, %s7111_s25  ;;  %6234 = vmatprep.mubr.bf16.mxu0 %v4373_v1  ;;  %v6891_v49 = vpop.eup %6890  ;;  %6908 = vrcp.f32 %v9478_v24  ;;  %v2446_v39 = vmul.f32 %v6889_v17, %v10413_v30  ;;  %v10414_v24 = vld [vmem:[#allocation39_spill] sm:$0xff] }
 0xef9   : > { %v4327_v19 = vmul.f32 1.442695, %v4302_v23  ;;  %6235 = vmatmul.mubr.bf16.vlgmr.msra.gmra.mrb[96].mxu0 %v4374_v16  ;;  %v6893_v6 = vpop.eup %6892  ;;  %6910 = vpow2.f32 %v4325_v27  ;;  %v3998_v28 = vmul.f32 %v6891_v49, %v9418_v47  ;;  %v10419_v16 = vld [vmem:[#allocation116_spill] sm:$0xff] }
 0xefa   : > { %v1953_v45 = vpop.permute.xlu1 %1952  ;;  %1427 = vrot.lane.b32.xlu0 %v1385_v37, %s7112_s27  ;;  %v6895_v42 = vpop.eup %6894  ;;  %v1916_v59 = vmul.f32 %v6893_v6, %v10416_v52 }
 0xefb   : > { %6912 = vpow2.f32 %v4327_v19  ;;  %1994 = vst.msk [vmem:[#allocation2 + $0x70] sm:$0xff] %vm1986_vm2, %v1953_v45  ;;  %v6897_v18 = vpop.eup %6896  ;;  %v3469_v14 = vmul.f32 %v6895_v42, %v10415_v8 }
 0xefc   : > { %2487 = vrot.lane.b32.xlu1 %v2446_v39, %s7110_s12  ;;  %6914 = vrcp.f32 %v10414_v24  ;;  %v10424_v24 = vld [vmem:[#allocation70_spill] sm:$0xff] }
 0xefd   : > { %v9601_v32 = vpop.eup %6898  ;;  %6916 = vrcp.f32 %v10417_v9 }
 0xefe   : > { %v6901_v35 = vpop.eup %6900  ;;  %4040 = vrot.lane.b32.xlu0 %v3998_v28, %s7111_s25  ;;  %v4376_v0 = vpack.c.bf16 %v9601_v32, %v6897_v18 }
 0xeff   : > { %v6903_v54 = vpop.eup %6902  ;;  %v1386_v15 = vmul.f32 %v6901_v35, %v10418_v58 }
 0xf00   : > { %v6905_v12 = vpop.eup %6904  ;;  %3512 = vrot.lane.b32.xlu1 %v3469_v14, %s7112_s27  ;;  %v2447_v22 = vmul.f32 %v6903_v54, %v10419_v16  ;;  %v10425_v54 = vld [vmem:[#allocation144_spill] sm:$0xff] }
 0xf01   : > { %v6907_v47 = vpop.eup %6906 }
 0xf02   : > { %1958 = vrot.lane.b32.xlu0 %v1916_v59, %s7111_s25  ;;  %v4375_v33 = vpack.c.bf16 %v6907_v47, %v6905_v12  ;;  %v6909_v11 = vpop.eup %6908 }
 0xf03   : > { %v6911_v7 = vpop.eup %6910  ;;  %v3999_v55 = vmul.f32 %v6909_v11, %v9423_v60  ;;  %v10427_v11 = vld [vmem:[#allocation37_spill] sm:$0xff] }
 0xf04   : > { %1429 = vrot.lane.b32.xlu1 %v1386_v15, %s7112_s27  ;;  %6238 = vmatprep.mubr.bf16.mxu0 %v4375_v33 }
 0xf05   : > { %v6913_v53 = vpop.eup %6912  ;;  %6239 = vmatmul.mubr.bf16.gmra.mrb[100].mxu0 %v4376_v0 }
 0xf06   : > { %2489 = vrot.lane.b32.xlu0 %v2447_v22, %s7110_s12  ;;  %v4377_v2 = vpack.c.bf16 %v6913_v53, %v6911_v7  ;;  %v6915_v43 = vpop.eup %6914 }
 0xf07   : > { %v1917_v27 = vmul.f32 %v6915_v43, %v10420_v29  ;;  %v6917_v40 = vpop.eup %6916 }
 0xf08   : > { %4042 = vrot.lane.b32.xlu1 %v3999_v55, %s7111_s25  ;;  %6242 = vmatprep.mubr.bf16.mxu0 %v4377_v2  ;;  %v2448_v41 = vmul.f32 %v6917_v40, %v10421_v3  ;;  %v10428_v2 = vld [vmem:[#allocation146_spill] sm:$0xff] }
 0xf0c   : > { %1960 = vrot.lane.b32.xlu1 %v1917_v27, %s7111_s25 }
 0xf0d   : > { %6243 = vmatmul.mubr.bf16.gmra.mrb[104].mxu0 %v4378_v62 }
 0xf10   : > { %2491 = vrot.lane.b32.xlu1 %v2448_v41, %s7110_s12 }
 0xf1c   : > { %v4290_v1 = vpop.xlane.xlu0 %4289 }
 0xf1d   : > { %v4307_v23 = vsub.f32 %v9463_v57, %v4290_v1 }
 0xf1f   : > { %v4337_v13 = vmul.f32 1.442695, %v4307_v23 }
 0xf20   : > { %v4286_v17 = vpop.xlane.xlu0 %4285 }
 0xf21   : > { %v4305_v37 = vsub.f32 %v9466_v20, %v4286_v17  ;;  %6918 = vpow2.f32 %v4337_v13 }
 0xf23   : > { %v4333_v6 = vmul.f32 1.442695, %v4305_v37 }
 0xf24   : > { %v2482_v60 = vpop.permute.xlu0 %2481 }
 0xf25   : > { %2524 = vst.msk [vmem:[#allocation2 + $0x60] sm:$0xff] %vm2517_vm3, %v2482_v60  ;;  %4345 = vadd.xlane.f32.xlu0 %v9559_v31 }
 0xf29   : > { %4341 = vadd.xlane.f32.xlu0 %v9573_v21 }
 0xf2b   : > { %v4292_v49 = vpop.xlane.xlu1 %4291  ;;  %v6919_v20 = vpop.eup %6918 }
 0xf2c   : > { %v4308_v62 = vsub.f32 %v9468_v44, %v4292_v49 }
 0xf2d   : > { %4353 = vadd.xlane.f32.xlu0 %v6897_v18  ;;  %v10422_v18 = vld [vmem:[#allocation43_spill] sm:$0xff] }
 0xf2e   : > { %v4339_v19 = vmul.f32 1.442695, %v4308_v62  ;;  %v6446_v62 = vld [vmem:[%s10020_s3] ss:$8 sps:$4 sm:$0xff]  }
 0xf2f   : > { %v4288_v45 = vpop.xlane.xlu1 %4287 }
 0xf30   : > { %6920 = vpow2.f32 %v4339_v19  ;;  %v4306_v30 = vsub.f32 %v9471_v50, %v4288_v45  ;;  %v6448_v19 = vld [vmem:[%s10020_s3 + $0x4] ss:$8 sps:$4 sm:$0xff]   ;;  %v6451_v45 = vld [vmem:[%s10020_s3 + $0x14] ss:$8 sps:$4 sm:$0xff]  }
 0xf31   : > { %4349 = vadd.xlane.f32.xlu0 %v6905_v12  ;;  %6922 = vpow2.f32 %v4333_v6  ;;  %4892 = vmatprep.subr.bf16.mxu0 %v6448_v19 }
 0xf32   : > { %v4335_v31 = vmul.f32 1.442695, %v4306_v30  ;;  %4893 = vmatpush1.bf16.msra.mxu0 %v6446_v62  ;;  %v6449_v30 = vld [vmem:[%s10020_s3 + $0x10] ss:$8 sps:$4 sm:$0xff]  }
 0xf33   : > { %v2484_v57 = vpop.permute.xlu1 %2483  ;;  %4894 = vmatprep.subr.bf16.mxu0 %v6451_v45 }
 0xf34   : > { %6924 = vpow2.f32 %v4335_v31  ;;  %2525 = vst.msk [vmem:[#allocation2 + $0x70] sm:$0xff] %vm2517_vm3, %v2484_v57  ;;  %4347 = vadd.xlane.f32.xlu1 %v9564_v36  ;;  %v6452_v31 = vld [vmem:[%s10020_s3 + $0x20] ss:$8 sps:$4 sm:$0xff]   ;;  %v6454_v57 = vld [vmem:[%s10020_s3 + $0x24] ss:$8 sps:$4 sm:$0xff]  }
 0xf35   : > { %4361 = vadd.xlane.f32.xlu0 %v9576_v34  ;;  %6926 = vrcp.f32 %v10422_v18  ;;  %v10423_v34 = vld [vmem:[#allocation42_spill] sm:$0xff]  ;;  %v6466_v18 = vld [vmem:[%s10020_s3 + $0x64] ss:$8 sps:$4 sm:$0xff]  }
 0xf36   : > { %6928 = vrcp.f32 %v9188_v26  ;;  %4895 = vmatpush1.bf16.msra.mxu0 %v6449_v30 }
 0xf37   : > { %4896 = vmatprep.subr.bf16.mxu0 %v6454_v57  ;;  %v10431_v57 = vld [vmem:[#allocation64_spill] sm:$0xff] }
 0xf38   : > { %4343 = vadd.xlane.f32.xlu1 %v9581_v10 }
 0xf39   : > { %4357 = vadd.xlane.f32.xlu0 %v6911_v7 }
 0xf3a   : > { %v9632_v44 = vpop.eup %6920  ;;  %4897 = vmatpush1.bf16.msra.mxu0 %v6452_v31 }
 0xf3b   : > { %v4380_v21 = vpack.c.bf16 %v9632_v44, %v6919_v20  ;;  %v6923_v50 = vpop.eup %6922 }
 0xf3c   : > { %4355 = vadd.xlane.f32.xlu1 %v9601_v32 }
 0xf3e   : > { %v9636_v39 = vpop.eup %6924 }
 0xf3f   : > { %v4379_v42 = vpack.c.bf16 %v9636_v39, %v6923_v50  ;;  %v6927_v36 = vpop.eup %6926 }
 0xf40   : > { %4351 = vadd.xlane.f32.xlu1 %v6907_v47  ;;  %v3470_v10 = vmul.f32 %v6927_v36, %v10423_v34  ;;  %v6929_v28 = vpop.eup %6928  ;;  %v10426_v47 = vld [vmem:[#allocation35_spill] sm:$0xff]  ;;  %v6469_v34 = vld [vmem:[%s10020_s3 + $0x74] ss:$8 sps:$4 sm:$0xff]  }
 0xf41   : > { %6246 = vmatprep.mubr.bf16.mxu0 %v4379_v42  ;;  %v3471_v35 = vmul.f32 %v6929_v28, %v10424_v24  ;;  %v6461_v42 = vld [vmem:[%s10020_s3 + $0x50] ss:$8 sps:$4 sm:$0xff]   ;;  %v6464_v36 = vld [vmem:[%s10020_s3 + $0x60] ss:$8 sps:$4 sm:$0xff]   ;;  %v6472_v28 = vld [vmem:[%s10020_s3 + $0x84] ss:$8 sps:$4 sm:$0xff]  }
 0xf42   : > { %6247 = vmatmul.mubr.bf16.gmra.mrb[108].mxu0 %v4380_v21  ;;  %v6460_v21 = vld [vmem:[%s10020_s3 + $0x44] ss:$8 sps:$4 sm:$0xff]   ;;  %v6470_v24 = vld [vmem:[%s10020_s3 + $0x80] ss:$8 sps:$4 sm:$0xff]  }
 0xf44   : > { %4363 = vadd.xlane.f32.xlu1 %v9584_v61 }
 0xf48   : > { %4359 = vadd.xlane.f32.xlu1 %v6913_v53 }
 0xf4f   : > { %3514 = vrot.lane.b32.xlu0 %v3470_v10, %s7112_s27  ;;  %v6467_v10 = vld [vmem:[%s10020_s3 + $0x70] ss:$8 sps:$4 sm:$0xff]  }
 0xf55   : > { %v2836_v32 = vpop.xlane.xlu0 %2835 }
 0xf56   : > { %6930 = vrcp.f32 %v2836_v32 }
 0xf59   : > { %3516 = vrot.lane.b32.xlu1 %v3471_v35, %s7112_s27  ;;  %v737_v8 = vpop.xlane.xlu0 %736  ;;  %v6475_v35 = vld [vmem:[%s10020_s3 + $0x94] ss:$8 sps:$4 sm:$0xff]  }
 0xf5a   : > { %6932 = vrcp.f32 %v737_v8 }
 0xf5d   : > { %v739_v14 = vpop.xlane.xlu0 %738 }
 0xf5e   : > { %6934 = vrcp.f32 %v739_v14  ;;  %v6473_v14 = vld [vmem:[%s10020_s3 + $0x90] ss:$8 sps:$4 sm:$0xff]  }
 0xf60   : > { %v6931_v61 = vpop.eup %6930 }
 0xf61   : > { %v3507_v0 = vpop.permute.xlu0 %3506  ;;  %v3006_v12 = vmul.f32 %v6931_v61, %v10425_v54  ;;  %v6478_v61 = vld [vmem:[%s10020_s3 + $0xa4] ss:$8 sps:$4 sm:$0xff]   ;;  %v6476_v54 = vld [vmem:[%s10020_s3 + $0xa0] ss:$8 sps:$4 sm:$0xff]  }
 0xf62   : > { %3546 = vst.msk [vmem:[#allocation2 + $0x88] sm:$0xff] %vm1455_vm1, %v3507_v0 }
 0xf63   : > { %3022 = vst.msk [vmem:[#allocation2 + $0xe8] sm:$0xff] %vm482_vm0, %v3006_v12  ;;  %v6481_v12 = vld [vmem:[%s10020_s3 + $0xb4] ss:$8 sps:$4 sm:$0xff]  }
 0xf64   : > { %v6933_v26 = vpop.eup %6932  ;;  %v2838_v52 = vpop.xlane.xlu1 %2837 }
 0xf65   : > { %6936 = vrcp.f32 %v2838_v52  ;;  %v4037_v59 = vpop.permute.xlu0 %4036  ;;  %v923_v9 = vmul.f32 %v6933_v26, %v10426_v47  ;;  %v6479_v52 = vld [vmem:[%s10020_s3 + $0xb0] ss:$8 sps:$4 sm:$0xff]  }
 0xf66   : > { %4076 = vst.msk [vmem:[#allocation2 + $0x88] sm:$0xff] %vm1986_vm2, %v4037_v59 }
 0xf67   : > { %939 = vst.msk [vmem:[#allocation2 + $0xe0] sm:$0xff] %vm482_vm0, %v923_v9  ;;  %v6482_v9 = vld [vmem:[%s10020_s3 + $0xc0] ss:$8 sps:$4 sm:$0xff]  }
 0xf68   : > { %v6935_v58 = vpop.eup %6934  ;;  %v3509_v15 = vpop.permute.xlu1 %3508 }
 0xf69   : > { %3547 = vst.msk [vmem:[#allocation2 + $0x98] sm:$0xff] %vm1455_vm1, %v3509_v15  ;;  %v1955_v33 = vpop.permute.xlu0 %1954  ;;  %v924_v7 = vmul.f32 %v6935_v58, %v10427_v11  ;;  %v6484_v58 = vld [vmem:[%s10020_s3 + $0xc4] ss:$8 sps:$4 sm:$0xff]   ;;  %v6485_v11 = vld [vmem:[%s10020_s3 + $0xd0] ss:$8 sps:$4 sm:$0xff]  }
 0xf6b   : > { %940 = vst.msk [vmem:[#allocation2 + $0xf0] sm:$0xff] %vm482_vm0, %v924_v7  ;;  %v6487_v7 = vld [vmem:[%s10020_s3 + $0xd4] ss:$8 sps:$4 sm:$0xff]  }
 0xf6c   : > { %v1424_v16 = vpop.permute.xlu1 %1423 }
 0xf6d   : > { %1464 = vst.msk [vmem:[#allocation2 + $0x80] sm:$0xff] %vm1455_vm1, %v1424_v16  ;;  %v2486_v22 = vpop.permute.xlu0 %2485  ;;  %v10429_v16 = vld [vmem:[#allocation72_spill] sm:$0xff] }
 0xf6e   : > { %1995 = vst.msk [vmem:[#allocation2 + $0x80] sm:$0xff] %vm1986_vm2, %v1955_v33  ;;  %4369 = vadd.xlane.f32.xlu0 %v6919_v20  ;;  %v6457_v20 = vld [vmem:[%s10020_s3 + $0x34] ss:$8 sps:$4 sm:$0xff]  }
 0xf6f   : > { %v6937_v53 = vpop.eup %6936  ;;  %2526 = vst.msk [vmem:[#allocation2 + $0x80] sm:$0xff] %vm2517_vm3, %v2486_v22  ;;  %4898 = vmatprep.subr.bf16.mxu0 %v6457_v20 }
 0xf70   : > { %v1426_v55 = vpop.permute.xlu1 %1425  ;;  %v3007_v43 = vmul.f32 %v6937_v53, %v10428_v2  ;;  %v10430_v53 = vld [vmem:[#allocation67_spill] sm:$0xff] }
 0xf71   : > { %1465 = vst.msk [vmem:[#allocation2 + $0x90] sm:$0xff] %vm1455_vm1, %v1426_v55  ;;  %v3511_v29 = vpop.permute.xlu0 %3510  ;;  %v6488_v2 = vld [vmem:[%s10020_s3 + $0xe0] ss:$8 sps:$4 sm:$0xff]  }
 0xf72   : > { %3548 = vst.msk [vmem:[#allocation2 + $0xa8] sm:$0xff] %vm1455_vm1, %v3511_v29  ;;  %4365 = vadd.xlane.f32.xlu0 %v6923_v50  ;;  %v6458_v50 = vld [vmem:[%s10020_s3 + $0x40] ss:$8 sps:$4 sm:$0xff]  }
 0xf73   : > { %3023 = vst.msk [vmem:[#allocation2 + $0xf8] sm:$0xff] %vm482_vm0, %v3007_v43  ;;  %v6490_v43 = vld [vmem:[%s10020_s3 + $0xe4] ss:$8 sps:$4 sm:$0xff]  }
 0xf74   : > { %v4039_v27 = vpop.permute.xlu1 %4038 }
 0xf75   : > { %4077 = vst.msk [vmem:[#allocation2 + $0x98] sm:$0xff] %vm1986_vm2, %v4039_v27  ;;  %v1428_v40 = vpop.permute.xlu0 %1427 }
 0xf76   : > { %1466 = vst.msk [vmem:[#allocation2 + $0xa0] sm:$0xff] %vm1455_vm1, %v1428_v40 }
 0xf78   : > { %v1957_v3 = vpop.permute.xlu1 %1956 }
 0xf79   : > { %1996 = vst.msk [vmem:[#allocation2 + $0x90] sm:$0xff] %vm1986_vm2, %v1957_v3  ;;  %v4041_v41 = vpop.permute.xlu0 %4040 }
 0xf7a   : > { %4078 = vst.msk [vmem:[#allocation2 + $0xa8] sm:$0xff] %vm1986_vm2, %v4041_v41 }
 0xf7c   : > { %v2488_v1 = vpop.permute.xlu1 %2487 }
 0xf7d   : > { %2527 = vst.msk [vmem:[#allocation2 + $0x90] sm:$0xff] %vm2517_vm3, %v2488_v1  ;;  %4371 = vadd.xlane.f32.xlu1 %v9632_v44  ;;  %v1959_v17 = vpop.permute.xlu0 %1958  ;;  %v6455_v44 = vld [vmem:[%s10020_s3 + $0x30] ss:$8 sps:$4 sm:$0xff]  }
 0xf7e   : > { %1997 = vst.msk [vmem:[#allocation2 + $0xa0] sm:$0xff] %vm1986_vm2, %v1959_v17  ;;  %4899 = vmatpush1.bf16.msra.mxu0 %v6455_v44 }
 0xf7f   : > { %4900 = vmatprep.subr.bf16.mxu0 %v6460_v21  ;;  %v10433_v21 = vld [vmem:[#allocation66_spill] sm:$0xff] }
 0xf80   : > { %v3513_v60 = vpop.permute.xlu1 %3512 }
 0xf81   : > { %3549 = vst.msk [vmem:[#allocation2 + $0xb8] sm:$0xff] %vm1455_vm1, %v3513_v60  ;;  %4367 = vadd.xlane.f32.xlu1 %v9636_v39  ;;  %v2490_v23 = vpop.permute.xlu0 %2489  ;;  %v6463_v39 = vld [vmem:[%s10020_s3 + $0x54] ss:$8 sps:$4 sm:$0xff]   ;;  %v6491_v60 = vld [vmem:[%s10020_s3 + $0xf0] ss:$8 sps:$4 sm:$0xff]  }
 0xf82   : > { %2528 = vst.msk [vmem:[#allocation2 + $0xa0] sm:$0xff] %vm2517_vm3, %v2490_v23  ;;  %4901 = vmatpush1.bf16.msra.mxu0 %v6458_v50  ;;  %v6493_v23 = vld [vmem:[%s10020_s3 + $0xf4] ss:$8 sps:$4 sm:$0xff]  }
 0xf83   : > { %4902 = vmatprep.subr.bf16.mxu0 %v6463_v39 }
 0xf84   : > { %v1430_v13 = vpop.permute.xlu1 %1429 }
 0xf85   : > { %1467 = vst.msk [vmem:[#allocation2 + $0xb0] sm:$0xff] %vm1455_vm1, %v1430_v13 }
 0xf86   : > { %4903 = vmatpush1.bf16.msra.mxu0 %v6461_v42 }
 0xf87   : > { %4904 = vmatprep.subr.bf16.mxu0 %v6466_v18 }
 0xf88   : > { %v4043_v37 = vpop.permute.xlu1 %4042 }
 0xf89   : > { %4079 = vst.msk [vmem:[#allocation2 + $0xb8] sm:$0xff] %vm1986_vm2, %v4043_v37 }
 0xf8a   : > { %4905 = vmatpush1.bf16.msra.mxu0 %v6464_v36 }
 0xf8b   : > { %4906 = vmatprep.subr.bf16.mxu0 %v6469_v34 }
 0xf8c   : > { %v1961_v49 = vpop.permute.xlu1 %1960 }
 0xf8d   : > { %1998 = vst.msk [vmem:[#allocation2 + $0xb0] sm:$0xff] %vm1986_vm2, %v1961_v49 }
 0xf8e   : > { %4907 = vmatpush1.bf16.msra.mxu0 %v6467_v10  ;;  %v10434_v10 = vld [vmem:[#allocation73_spill] sm:$0xff] }
 0xf8f   : > { %4908 = vmatprep.subr.bf16.mxu0 %v6472_v28 }
 0xf90   : > { %v2492_v6 = vpop.permute.xlu1 %2491 }
 0xf91   : > { %2529 = vst.msk [vmem:[#allocation2 + $0xb0] sm:$0xff] %vm2517_vm3, %v2492_v6 }
 0xf92   : > { %4909 = vmatpush1.bf16.msra.mxu0 %v6470_v24 }
 0xf93   : > { %4910 = vmatprep.subr.bf16.mxu0 %v6475_v35 }
 0xf96   : > { %4911 = vmatpush1.bf16.msra.mxu0 %v6473_v14 }
 0xf97   : > { %4912 = vmatprep.subr.bf16.mxu0 %v6478_v61  ;;  %v10436_v61 = vld [vmem:[#allocation95_spill] sm:$0xff] }
 0xf9a   : > { %4913 = vmatpush1.bf16.msra.mxu0 %v6476_v54 }
 0xf9b   : > { %4914 = vmatprep.subr.bf16.mxu0 %v6481_v12 }
 0xf9e   : > { %4915 = vmatpush1.bf16.msra.mxu0 %v6479_v52 }
 0xf9f   : > { %4916 = vmatprep.subr.bf16.mxu0 %v6484_v58 }
 0xfa2   : > { %4917 = vmatpush1.bf16.msra.mxu0 %v6482_v9 }
 0xfa3   : > { %4918 = vmatprep.subr.bf16.mxu0 %v6487_v7  ;;  %v10437_v7 = vld [vmem:[#allocation92_spill] sm:$0xff] }
 0xfa6   : > { %4919 = vmatpush1.bf16.msra.mxu0 %v6485_v11 }
 0xfa7   : > { %4920 = vmatprep.subr.bf16.mxu0 %v6490_v43  ;;  %v10440_v43 = vld [vmem:[#allocation121_spill] sm:$0xff] }
 0xfaa   : > { %4921 = vmatpush1.bf16.msra.mxu0 %v6488_v2 }
 0xfab   : > { %4922 = vmatprep.subr.bf16.mxu0 %v6493_v23 }
 0xfae   : > { %4923 = vmatpush1.bf16.msra.mxu0 %v6491_v60 }
 0xfb2   : > { %v4346_v32 = vpop.xlane.xlu0 %4345 }
 0xfb3   : > { %6938 = vrcp.f32 %v4346_v32 }
 0xfb6   : > { %v4342_v8 = vpop.xlane.xlu0 %4341 }
 0xfba   : > { %v4354_v0 = vpop.xlane.xlu0 %4353 }
 0xfbd   : > { %v6939_v29 = vpop.eup %6938 }
 0xfbe   : > { %v4350_v26 = vpop.xlane.xlu0 %4349 }
 0xfc1   : > { %v4348_v59 = vpop.xlane.xlu1 %4347 }
 0xfc2   : > { %v9748_v47 = vpop.xlane.xlu0 %4361  ;;  %6940 = vrcp.f32 %v4348_v59 }
 0xfc3   : > { %6942 = vrcp.f32 %v4342_v8  ;;  %v10435_v8 = vld [vmem:[#allocation102_spill] sm:$0xff] }
 0xfc5   : > { %v4344_v15 = vpop.xlane.xlu1 %4343 }
 0xfc6   : > { %6944 = vrcp.f32 %v4344_v15  ;;  %v9756_v33 = vpop.xlane.xlu0 %4357 }
 0xfc7   : > { %6946 = vrcp.f32 %v10429_v16 }
 0xfc8   : > { %6948 = vrcp.f32 %v10430_v53  ;;  %v10438_v53 = vld [vmem:[#allocation9_spill] sm:$0xff] }
 0xfc9   : > { %v4356_v22 = vpop.xlane.xlu1 %4355  ;;  %6950 = vrcp.f32 %v9499_v38 }
 0xfca   : > { %v3515_v55 = vpop.permute.xlu0 %3514  ;;  %6952 = vrcp.f32 %v9489_v51  ;;  %v10432_v51 = vld [vmem:[#allocation96_spill] sm:$0xff] }
 0xfcb   : > { %3550 = vst.msk [vmem:[#allocation2 + $0xc8] sm:$0xff] %vm1455_vm1, %v3515_v55  ;;  %6954 = vrcp.f32 %v4354_v0  ;;  %v10439_v55 = vld [vmem:[#allocation94_spill] sm:$0xff] }
 0xfcc   : > { %v6236_v27 = vpop.f32.mrb[96].mxu0  ;;  %v6941_v1 = vpop.eup %6940  ;;  %6956 = vrcp.f32 %v4356_v22 }
 0xfcd   : > { %v4520_v40 = vmul.f32 %v6939_v29, %v6236_v27  ;;  %v4352_v3 = vpop.xlane.xlu1 %4351  ;;  %v4439_v41 = vpop.f32.mrb[97].mxu0  ;;  %6958 = vrcp.f32 %v4350_v26  ;;  %v10441_v27 = vld [vmem:[#allocation123_spill] sm:$0xff] }
 0xfce   : > { %v6237_v17 = vpop.f32.mrb[98].mxu0  ;;  %v6943_v13 = vpop.eup %6942  ;;  %6960 = vrcp.f32 %v10432_v51 }
 0xfcf   : > { %v4521_v37 = vmul.f32 %v6941_v1, %v6237_v17  ;;  %v4442_v49 = vpop.f32.mrb[99].mxu0  ;;  %4554 = vrot.lane.b32.xlu0 %v4520_v40, %s7110_s12  ;;  %v4518_v62 = vmul.f32 %v6943_v13, %v4439_v41  ;;  %6962 = vrcp.f32 %v4352_v3  ;;  %v10443_v17 = vld [vmem:[#allocation100_spill] sm:$0xff] }
 0xfd0   : > { %v6945_v38 = vpop.eup %6944  ;;  %6964 = vrcp.f32 %v10434_v10  ;;  %v10449_v10 = vld [vmem:[#allocation40_spill] sm:$0xff] }
 0xfd1   : > { %4556 = vrot.lane.b32.xlu1 %v4521_v37, %s7110_s12  ;;  %v4364_v19 = vpop.xlane.xlu1 %4363  ;;  %v6947_v6 = vpop.eup %6946  ;;  %v4519_v45 = vmul.f32 %v6945_v38, %v4442_v49  ;;  %6966 = vrcp.f32 %v10435_v8 }
 0xfd2   : > { %v6949_v30 = vpop.eup %6948  ;;  %v1387_v20 = vmul.f32 %v6947_v6, %v10431_v57  ;;  %6968 = vrcp.f32 %v10436_v61  ;;  %v10451_v61 = vld [vmem:[#allocation44_spill] sm:$0xff] }
 0xfd3   : > { %4550 = vrot.lane.b32.xlu0 %v4518_v62, %s7110_s12  ;;  %v6951_v44 = vpop.eup %6950  ;;  %v1388_v50 = vmul.f32 %v6949_v30, %v10433_v21  ;;  %6970 = vrcp.f32 %v9748_v47  ;;  %v10444_v62 = vld [vmem:[#allocation104_spill] sm:$0xff] }
 0xfd4   : > { %v4000_v42 = vmul.f32 %v6951_v44, %v9429_v56  ;;  %v6953_v34 = vpop.eup %6952  ;;  %6972 = vrcp.f32 %v4364_v19  ;;  %v10447_v44 = vld [vmem:[#allocation65_spill] sm:$0xff] }
 0xfd5   : > { %4552 = vrot.lane.b32.xlu1 %v4519_v45, %s7110_s12  ;;  %v4360_v31 = vpop.xlane.xlu1 %4359  ;;  %v4001_v32 = vmul.f32 %v6953_v34, %v9433_v4  ;;  %v6955_v35 = vpop.eup %6954  ;;  %6974 = vrcp.f32 %v9756_v33  ;;  %v10442_v33 = vld [vmem:[#allocation41_spill] sm:$0xff]  ;;  %v10445_v45 = vld [vmem:[#allocation48_spill] sm:$0xff] }
 0xfd6   : > { %v6957_v56 = vpop.eup %6956  ;;  %6976 = vrcp.f32 %v10438_v53  ;;  %v10455_v53 = vld [vmem:[#allocation122_spill] sm:$0xff] }
 0xfd7   : > { %1431 = vrot.lane.b32.xlu0 %v1387_v20, %s7112_s27  ;;  %v6959_v54 = vpop.eup %6958  ;;  %6978 = vrcp.f32 %v4360_v31  ;;  %v10446_v31 = vld [vmem:[#allocation63_spill] sm:$0xff] }
 0xfd8   : > { %v6240_v39 = vpop.f32.mrb[100].mxu0  ;;  %v6961_v26 = vpop.eup %6960  ;;  %6980 = vrcp.f32 %v9181_v46 }
 0xfd9   : > { %v4455_v18 = vpop.f32.mrb[101].mxu0  ;;  %1433 = vrot.lane.b32.xlu1 %v1388_v50, %s7112_s27  ;;  %v3517_v36 = vpop.permute.xlu1 %3516  ;;  %v4524_v14 = vmul.f32 %v6955_v35, %v6240_v39  ;;  %v1918_v16 = vmul.f32 %v6961_v26, %v10437_v7  ;;  %6982 = vrcp.f32 %v10442_v33  ;;  %v4684_v33 = vld [vmem:[#allocation2] sm:$0xff] }
 0xfda   : > { %3551 = vst.msk [vmem:[#allocation2 + $0xd8] sm:$0xff] %vm1455_vm1, %v3517_v36  ;;  %v6241_v28 = vpop.f32.mrb[102].mxu0  ;;  %v4522_v52 = vmul.f32 %v6959_v54, %v4455_v18  ;;  %v6963_v59 = vpop.eup %6962  ;;  %6984 = vrcp.f32 %v10443_v17  ;;  %v10448_v36 = vld [vmem:[#allocation49_spill] sm:$0xff] }
 0xfdb   : > { %v4458_v24 = vpop.f32.mrb[103].mxu0  ;;  %4044 = vrot.lane.b32.xlu0 %v4000_v42, %s7111_s25  ;;  %v4525_v0 = vmul.f32 %v6957_v56, %v6241_v28  ;;  %v6965_v11 = vpop.eup %6964  ;;  %6986 = vrcp.f32 %v9497_v63 }
 0xfdc   : > { %v4523_v58 = vmul.f32 %v6963_v59, %v4458_v24  ;;  %v6967_v22 = vpop.eup %6966  ;;  %v1919_v47 = vmul.f32 %v6965_v11, %v10439_v55  ;;  %6988 = vrcp.f32 %v9486_v48 }
 0xfdd   : > { %4046 = vrot.lane.b32.xlu1 %v4001_v32, %s7111_s25  ;;  %v6969_v2 = vpop.eup %6968  ;;  %v2449_v29 = vmul.f32 %v6967_v22, %v10440_v43  ;;  %v10450_v32 = vld [vmem:[#allocation69_spill] sm:$0xff] }
 0xfde   : > { %v2450_v40 = vmul.f32 %v6969_v2, %v10441_v27  ;;  %v6971_v3 = vpop.eup %6970 }
 0xfdf   : > { %4562 = vrot.lane.b32.xlu0 %v4524_v14, %s7110_s12  ;;  %v6973_v1 = vpop.eup %6972 }
 0xfe0   : > { %v6244_v12 = vpop.f32.mrb[104].mxu0  ;;  %v6975_v23 = vpop.eup %6974 }
 0xfe1   : > { %4564 = vrot.lane.b32.xlu1 %v4525_v0, %s7110_s12  ;;  %v4471_v4 = vpop.f32.mrb[105].mxu0  ;;  %v4528_v41 = vmul.f32 %v6971_v3, %v6244_v12  ;;  %v6977_v46 = vpop.eup %6976  ;;  %v10452_v12 = vld [vmem:[#allocation91_spill] sm:$0xff] }
 0xfe2   : > { %v6245_v9 = vpop.f32.mrb[106].mxu0  ;;  %v4526_v13 = vmul.f32 %v6975_v23, %v4471_v4  ;;  %v6979_v37 = vpop.eup %6978  ;;  %v3472_v19 = vmul.f32 %v6977_v46, %v10444_v62  ;;  %v10453_v4 = vld [vmem:[#allocation93_spill] sm:$0xff] }
 0xfe3   : > { %v4474_v15 = vpop.f32.mrb[107].mxu0  ;;  %4558 = vrot.lane.b32.xlu0 %v4522_v52, %s7110_s12  ;;  %v4529_v60 = vmul.f32 %v6973_v1, %v6245_v9  ;;  %v6981_v38 = vpop.eup %6980  ;;  %v4686_v46 = vld [vmem:[#allocation2 + $0x10] sm:$0xff] }
 0xfe4   : > { %v4527_v49 = vmul.f32 %v6979_v37, %v4474_v15  ;;  %v6983_v6 = vpop.eup %6982  ;;  %v3473_v63 = vmul.f32 %v6981_v38, %v10445_v45  ;;  %v4716_v37 = vpack.c.bf16 %v4686_v46, %v4684_v33 }
 0xfe5   : > { %4560 = vrot.lane.b32.xlu1 %v4523_v58, %s7110_s12  ;;  %v6985_v30 = vpop.eup %6984  ;;  %v1389_v57 = vmul.f32 %v6983_v6, %v10446_v31  ;;  %v4688_v6 = vld [vmem:[#allocation2 + $0x20] sm:$0xff] }
 0xfe6   : > { %v6987_v20 = vpop.eup %6986  ;;  %v1390_v51 = vmul.f32 %v6985_v30, %v10447_v44  ;;  %v4692_v44 = vld [vmem:[#allocation2 + $0x40] sm:$0xff] }
 0xfe7   : > { %1962 = vrot.lane.b32.xlu0 %v1918_v16, %s7111_s25  ;;  %v4002_v48 = vmul.f32 %v6987_v20, %v9427_v25  ;;  %v6989_v21 = vpop.eup %6988  ;;  %v10454_v16 = vld [vmem:[#allocation120_spill] sm:$0xff] }
 0xfe8   : > { %v4003_v50 = vmul.f32 %v6989_v21, %v9431_v5 }
 0xfe9   : > { %1964 = vrot.lane.b32.xlu1 %v1919_v47, %s7111_s25 }
 0xfeb   : > { %2493 = vrot.lane.b32.xlu0 %v2449_v29, %s7110_s12 }
 0xfed   : > { %2495 = vrot.lane.b32.xlu1 %v2450_v40, %s7110_s12 }
 0xfef   : > { %4570 = vrot.lane.b32.xlu0 %v4528_v41, %s7110_s12 }
 0xff1   : > { %4572 = vrot.lane.b32.xlu1 %v4529_v60, %s7110_s12 }
 0xff3   : > { %4566 = vrot.lane.b32.xlu0 %v4526_v13, %s7110_s12 }
 0xff5   : > { %4568 = vrot.lane.b32.xlu1 %v4527_v49, %s7110_s12 }
 0xff7   : > { %3518 = vrot.lane.b32.xlu0 %v3472_v19, %s7112_s27 }
 0xff9   : > { %3520 = vrot.lane.b32.xlu1 %v3473_v63, %s7112_s27  ;;  %v4690_v63 = vld [vmem:[#allocation2 + $0x30] sm:$0xff] }
 0xffa   : > { %v4718_v31 = vpack.c.bf16 %v4690_v63, %v4688_v6 }
 0xffb   : > { %1435 = vrot.lane.b32.xlu0 %v1389_v57, %s7112_s27  ;;  %v4370_v39 = vpop.xlane.xlu0 %4369 }
 0xffd   : > { %1437 = vrot.lane.b32.xlu1 %v1390_v51, %s7112_s27 }
 0xfff   : > { %4048 = vrot.lane.b32.xlu0 %v4002_v48, %s7111_s25  ;;  %v4366_v42 = vpop.xlane.xlu0 %4365 }
0x1000   : > { %6990 = vrcp.f32 %v4366_v42  ;;  %v4694_v42 = vld [vmem:[#allocation2 + $0x50] sm:$0xff] }
0x1001   : > { %4050 = vrot.lane.b32.xlu1 %v4003_v50, %s7111_s25  ;;  %6992 = vrcp.f32 %v10448_v36  ;;  %v4720_v36 = vpack.c.bf16 %v4694_v42, %v4692_v44 }
0x100a   : > { %v4372_v18 = vpop.xlane.xlu1 %4371  ;;  %v6991_v28 = vpop.eup %6990 }
0x100b   : > { %v6993_v8 = vpop.eup %6992 }
0x100c   : > { %v1920_v26 = vmul.f32 %v6993_v8, %v10452_v12 }
0x100e   : > { %v4368_v34 = vpop.xlane.xlu1 %4367 }
0x100f   : > { %6994 = vrcp.f32 %v4368_v34 }
0x1010   : > { %6996 = vrcp.f32 %v10449_v10 }
0x1011   : > { %6998 = vrcp.f32 %v4370_v39 }
0x1012   : > { %7000 = vrcp.f32 %v10450_v32  ;;  %v4698_v32 = vld [vmem:[#allocation2 + $0x70] sm:$0xff] }
0x1013   : > { %7002 = vrcp.f32 %v4372_v18 }
0x1014   : > { %7004 = vrcp.f32 %v10451_v61  ;;  %v4702_v61 = vld [vmem:[#allocation2 + $0x90] sm:$0xff] }
0x1015   : > { %v6248_v25 = vpop.f32.mrb[108].mxu0 }
0x1016   : > { %v4487_v5 = vpop.f32.mrb[109].mxu0 }
0x1017   : > { %v4530_v24 = vmul.f32 %v6991_v28, %v4487_v5  ;;  %v6249_v35 = vpop.f32.mrb[110].mxu0 }
0x1018   : > { %v4490_v14 = vpop.f32.mrb[111].mxu0 }
0x1019   : > { %v6995_v56 = vpop.eup %6994  ;;  %4574 = vrot.lane.b32.xlu0 %v4530_v24, %s7110_s12  ;;  %v4696_v24 = vld [vmem:[#allocation2 + $0x60] sm:$0xff] }
0x101a   : > { %v4531_v0 = vmul.f32 %v6995_v56, %v4490_v14  ;;  %v6997_v54 = vpop.eup %6996  ;;  %v4722_v8 = vpack.c.bf16 %v4698_v32, %v4696_v24 }
0x101b   : > { %v6999_v52 = vpop.eup %6998  ;;  %v1921_v59 = vmul.f32 %v6997_v54, %v10453_v4  ;;  %v4700_v4 = vld [vmem:[#allocation2 + $0x80] sm:$0xff] }
0x101c   : > { %4576 = vrot.lane.b32.xlu1 %v4531_v0, %s7110_s12  ;;  %v4532_v9 = vmul.f32 %v6999_v52, %v6248_v25  ;;  %v7001_v58 = vpop.eup %7000 }
0x101d   : > { %1966 = vrot.lane.b32.xlu0 %v1920_v26, %s7111_s25  ;;  %v7003_v15 = vpop.eup %7002  ;;  %v2451_v22 = vmul.f32 %v7001_v58, %v10454_v16  ;;  %v4704_v16 = vld [vmem:[#allocation2 + $0xa0] sm:$0xff] }
0x101e   : > { %v4533_v11 = vmul.f32 %v7003_v15, %v6249_v35  ;;  %v7005_v7 = vpop.eup %7004 }
0x101f   : > { %v2452_v55 = vmul.f32 %v7005_v7, %v10455_v53  ;;  %v4706_v7 = vld [vmem:[#allocation2 + $0xb0] sm:$0xff] }
0x1020   : > { %1968 = vrot.lane.b32.xlu1 %v1921_v59, %s7111_s25 }
0x1021   : > { %4578 = vrot.lane.b32.xlu0 %v4532_v9, %s7110_s12  ;;  %v4724_v9 = vpack.c.bf16 %v4702_v61, %v4700_v4 }
0x1024   : > { %4580 = vrot.lane.b32.xlu1 %v4533_v11, %s7110_s12 }
0x1025   : > { %2497 = vrot.lane.b32.xlu0 %v2451_v22, %s7110_s12  ;;  %v4726_v22 = vpack.c.bf16 %v4706_v7, %v4704_v16 }
0x1028   : > { %2499 = vrot.lane.b32.xlu1 %v2452_v55, %s7110_s12  ;;  %s287_s12 = sand.u32 1, %s7092_s19  }
0x1029   : > { %s5322_s10 = sshll.u32 %s287_s12, 8  ;;  %s9971_s21 = scalar_lea.sflag [#allocation5], %s287_s12 }
0x102a   : > { %s9896_s11 = scalar_lea.vmem [#allocation4], %s5322_s10 }
0x102b   : > { %s5194_s14 = sshll.u32 %s9896_s11, 4  ;;  %s9963_s14 = int_to_ptr.vmem [resolvable:$true] %s5194_s14 }
0x102c   : > { %s7030_s24 = scalar_lea.vmem %s9963_s14, 4096  ;;  %p7037_p1 = scmp.lt.s32.totalorder %s9963_s14, %s7035_s7 }
0x102d   : > { %p7031_p12 = scmp.ne.s32.totalorder %s9963_s14, %s7030_s24  ;;  %p7038_p2 = scmp.lt.s32.totalorder %s7036_s8, %s7030_s24 }
0x102f   : > { %p7032_p13 = pnand %p7031_p12, %p7186_p4  ;;  %p7039_p3 = por %p7038_p2, %p7037_p1 }
0x1031   : > { %p7033_p0 = pneg %p7032_p13 }
0x1033   : > { %p7040_p5 = pnand %p7039_p3, %p7033_p0 }
0x1041   : > { %v4555_v47 = vpop.permute.xlu0 %4554 }
0x1042   : > { %4600 = vst.msk [vmem:[#allocation2 + $0x28] sm:$0xff] %vm2517_vm3, %v4555_v47 }
0x1043   : > { %v4557_v2 = vpop.permute.xlu1 %4556 }
0x1044   : > { %4601 = vst.msk [vmem:[#allocation2 + $0x38] sm:$0xff] %vm2517_vm3, %v4557_v2 }
0x1045   : > { %v4551_v43 = vpop.permute.xlu0 %4550 }
0x1046   : > { %4598 = vst.msk [vmem:[#allocation2 + $0x8] sm:$0xff] %vm2517_vm3, %v4551_v43 }
0x1047   : > { %v4553_v29 = vpop.permute.xlu1 %4552 }
0x1048   : > { %4599 = vst.msk [vmem:[#allocation2 + $0x18] sm:$0xff] %vm2517_vm3, %v4553_v29 }
0x1049   : > { %v1432_v27 = vpop.permute.xlu0 %1431  ;;  %v4689_v49 = vld [vmem:[#allocation2 + $0x28] sm:$0xff] }
0x104a   : > { %1468 = vst.msk [vmem:[#allocation2 + $0xc0] sm:$0xff] %vm1455_vm1, %v1432_v27 }
0x104b   : > { %v1434_v40 = vpop.permute.xlu1 %1433  ;;  %v4691_v60 = vld [vmem:[#allocation2 + $0x38] sm:$0xff] }
0x104c   : > { %1469 = vst.msk [vmem:[#allocation2 + $0xd0] sm:$0xff] %vm1455_vm1, %v1434_v40  ;;  %v4719_v38 = vpack.c.bf16 %v4691_v60, %v4689_v49 }
0x104d   : > { %v4045_v3 = vpop.permute.xlu0 %4044  ;;  %v4685_v1 = vld [vmem:[#allocation2 + $0x8] sm:$0xff] }
0x104e   : > { %4080 = vst.msk [vmem:[#allocation2 + $0xc8] sm:$0xff] %vm1986_vm2, %v4045_v3 }
0x104f   : > { %v4047_v41 = vpop.permute.xlu1 %4046  ;;  %v4687_v17 = vld [vmem:[#allocation2 + $0x18] sm:$0xff] }
0x1050   : > { %4081 = vst.msk [vmem:[#allocation2 + $0xd8] sm:$0xff] %vm1986_vm2, %v4047_v41  ;;  %v4717_v23 = vpack.c.bf16 %v4687_v17, %v4685_v1 }
0x1051   : > { %v4563_v13 = vpop.permute.xlu0 %4562 }
0x1052   : > { %4604 = vst.msk [vmem:[#allocation2 + $0x68] sm:$0xff] %vm2517_vm3, %v4563_v13  ;;  %4924 = vmatprep.mubr.bf16.mxu0 %v4717_v23 }
0x1053   : > { %v4565_v62 = vpop.permute.xlu1 %4564  ;;  %4925 = vmatmul.mubr.bf16.vlgmr.msra.gmra.mrb[112].mxu0 %v4716_v37 }
0x1054   : > { %4605 = vst.msk [vmem:[#allocation2 + $0x78] sm:$0xff] %vm2517_vm3, %v4565_v62  ;;  %4934 = vmatprep.mubr.bf16.mxu0 %v4719_v38  ;;  %v5106_v62 = vlaneseq }
0x1055   : > { %v4559_v19 = vpop.permute.xlu0 %4558 }
0x1056   : > { %4602 = vst.msk [vmem:[#allocation2 + $0x48] sm:$0xff] %vm2517_vm3, %v4559_v19  ;;  %v5107_v19 = vshrl.u32 %v5106_v62, 7 }
0x1057   : > { %v4561_v45 = vpop.permute.xlu1 %4560 }
0x1058   : > { %4603 = vst.msk [vmem:[#allocation2 + $0x58] sm:$0xff] %vm2517_vm3, %v4561_v45  ;;  %v5108_v6 = vsub.s32 0, %v5107_v19  ;;  %v5104_v45 = vld [vmem:[%s10021_s4] sm:$0x3]  ;;  %v5112_v63 = vsub.s32 1, %v5107_v19 }
0x1059   : > { %v1963_v30 = vpop.permute.xlu0 %1962  ;;  %v4697_v34 = vld [vmem:[#allocation2 + $0x68] sm:$0xff] }
0x105a   : > { %1999 = vst.msk [vmem:[#allocation2 + $0xc0] sm:$0xff] %vm1986_vm2, %v1963_v30  ;;  %v9890_v30 = vrot.slane %v5104_v45, %v5108_v6 }
0x105b   : > { %v1965_v57 = vpop.permute.xlu1 %1964  ;;  %4935 = vmatmul.mubr.bf16.gmra.mrb[116].mxu0 %v4718_v31  ;;  %v4699_v50 = vld [vmem:[#allocation2 + $0x78] sm:$0xff]  ;;  %v9892_v31 = vrot.slane %v5104_v45, %v5112_v63 }
0x105c   : > { %2000 = vst.msk [vmem:[#allocation2 + $0xd0] sm:$0xff] %vm1986_vm2, %v1965_v57  ;;  %v4723_v10 = vpack.c.bf16 %v4699_v50, %v4697_v34 }
0x105d   : > { %v2494_v20 = vpop.permute.xlu0 %2493  ;;  %v4693_v48 = vld [vmem:[#allocation2 + $0x48] sm:$0xff] }
0x105e   : > { %2530 = vst.msk [vmem:[#allocation2 + $0xc0] sm:$0xff] %vm2517_vm3, %v2494_v20 }
0x105f   : > { %v2496_v51 = vpop.permute.xlu1 %2495  ;;  %v4695_v21 = vld [vmem:[#allocation2 + $0x58] sm:$0xff] }
0x1060   : > { %2531 = vst.msk [vmem:[#allocation2 + $0xd0] sm:$0xff] %vm2517_vm3, %v2496_v51  ;;  %v4721_v39 = vpack.c.bf16 %v4695_v21, %v4693_v48 }
0x1061   : > { %v4571_v18 = vpop.permute.xlu0 %4570 }
0x1062   : > { %4608 = vst.msk [vmem:[#allocation2 + $0xa8] sm:$0xff] %vm2517_vm3, %v4571_v18  ;;  %4944 = vmatprep.mubr.bf16.mxu0 %v4721_v39 }
0x1063   : > { %v4573_v25 = vpop.permute.xlu1 %4572  ;;  %4945 = vmatmul.mubr.bf16.gmra.mrb[120].mxu0 %v4720_v36 }
0x1064   : > { %4609 = vst.msk [vmem:[#allocation2 + $0xb8] sm:$0xff] %vm2517_vm3, %v4573_v25  ;;  %4954 = vmatprep.mubr.bf16.mxu0 %v4723_v10 }
0x1065   : > { %v4567_v28 = vpop.permute.xlu0 %4566  ;;  %v4708_v1 = vld [vmem:[#allocation2 + $0xc0] sm:$0xff] }
0x1066   : > { %4606 = vst.msk [vmem:[#allocation2 + $0x88] sm:$0xff] %vm2517_vm3, %v4567_v28 }
0x1067   : > { %v4569_v5 = vpop.permute.xlu1 %4568  ;;  %v4710_v29 = vld [vmem:[#allocation2 + $0xd0] sm:$0xff] }
0x1068   : > { %4607 = vst.msk [vmem:[#allocation2 + $0x98] sm:$0xff] %vm2517_vm3, %v4569_v5  ;;  %v4728_v17 = vpack.c.bf16 %v4710_v29, %v4708_v1 }
0x1069   : > { %v3519_v35 = vpop.permute.xlu0 %3518  ;;  %v4705_v58 = vld [vmem:[#allocation2 + $0xa8] sm:$0xff] }
0x106a   : > { %3552 = vst.msk [vmem:[#allocation2 + $0xe8] sm:$0xff] %vm1455_vm1, %v3519_v35 }
0x106b   : > { %v3521_v14 = vpop.permute.xlu1 %3520  ;;  %4955 = vmatmul.mubr.bf16.gmra.mrb[124].mxu0 %v4722_v8  ;;  %v4707_v26 = vld [vmem:[#allocation2 + $0xb8] sm:$0xff] }
0x106c   : > { %3553 = vst.msk [vmem:[#allocation2 + $0xf8] sm:$0xff] %vm1455_vm1, %v3521_v14  ;;  %v4727_v15 = vpack.c.bf16 %v4707_v26, %v4705_v58 }
0x106d   : > { %v1436_v56 = vpop.permute.xlu0 %1435  ;;  %v4701_v54 = vld [vmem:[#allocation2 + $0x88] sm:$0xff] }
0x106e   : > { %1470 = vst.msk [vmem:[#allocation2 + $0xe0] sm:$0xff] %vm1455_vm1, %v1436_v56 }
0x106f   : > { %v1438_v0 = vpop.permute.xlu1 %1437  ;;  %v4703_v12 = vld [vmem:[#allocation2 + $0x98] sm:$0xff] }
0x1070   : > { %1471 = vst.msk [vmem:[#allocation2 + $0xf0] sm:$0xff] %vm1455_vm1, %v1438_v0  ;;  %v4725_v52 = vpack.c.bf16 %v4703_v12, %v4701_v54 }
0x1071   : > { %v4049_v59 = vpop.permute.xlu0 %4048 }
0x1072   : > { %4082 = vst.msk [vmem:[#allocation2 + $0xe8] sm:$0xff] %vm1986_vm2, %v4049_v59  ;;  %4964 = vmatprep.mubr.bf16.mxu0 %v4725_v52 }
0x1073   : > { %v4051_v11 = vpop.permute.xlu1 %4050  ;;  %4965 = vmatmul.mubr.bf16.gmra.mrb[128].mxu0 %v4724_v9 }
0x1074   : > { %4083 = vst.msk [vmem:[#allocation2 + $0xf8] sm:$0xff] %vm1986_vm2, %v4051_v11  ;;  %4974 = vmatprep.mubr.bf16.mxu0 %v4727_v15 }
0x107b   : > { %4975 = vmatmul.mubr.bf16.gmra.mrb[132].mxu0 %v4726_v22 }
0x108b   : > { %v4575_v53 = vpop.permute.xlu0 %4574 }
0x108c   : > { %4610 = vst.msk [vmem:[#allocation2 + $0xc8] sm:$0xff] %vm2517_vm3, %v4575_v53 }
0x108e   : > { %v4577_v55 = vpop.permute.xlu1 %4576 }
0x108f   : > { %4611 = vst.msk [vmem:[#allocation2 + $0xd8] sm:$0xff] %vm2517_vm3, %v4577_v55  ;;  %v1967_v47 = vpop.permute.xlu0 %1966 }
0x1090   : > { %2001 = vst.msk [vmem:[#allocation2 + $0xe0] sm:$0xff] %vm1986_vm2, %v1967_v47 }
0x1092   : > { %v1969_v2 = vpop.permute.xlu1 %1968 }
0x1093   : > { %2002 = vst.msk [vmem:[#allocation2 + $0xf0] sm:$0xff] %vm1986_vm2, %v1969_v2  ;;  %v4579_v43 = vpop.permute.xlu0 %4578  ;;  %v4709_v40 = vld [vmem:[#allocation2 + $0xc8] sm:$0xff] }
0x1094   : > { %4612 = vst.msk [vmem:[#allocation2 + $0xe8] sm:$0xff] %vm2517_vm3, %v4579_v43 }
0x1096   : > { %v4581_v27 = vpop.permute.xlu1 %4580  ;;  %v4711_v3 = vld [vmem:[#allocation2 + $0xd8] sm:$0xff] }
0x1097   : > { %4613 = vst.msk [vmem:[#allocation2 + $0xf8] sm:$0xff] %vm2517_vm3, %v4581_v27  ;;  %v2498_v33 = vpop.permute.xlu0 %2497  ;;  %v4729_v41 = vpack.c.bf16 %v4711_v3, %v4709_v40 }
0x1098   : > { %2532 = vst.msk [vmem:[#allocation2 + $0xe0] sm:$0xff] %vm2517_vm3, %v2498_v33 }
0x1099   : > { %4984 = vmatprep.mubr.bf16.mxu0 %v4729_v41 }
0x109a   : > { %v2500_v60 = vpop.permute.xlu1 %2499  ;;  %4985 = vmatmul.mubr.bf16.gmra.mrb[136].mxu0 %v4728_v17 }
0x109b   : > { %2533 = vst.msk [vmem:[#allocation2 + $0xf0] sm:$0xff] %vm2517_vm3, %v2500_v60  ;;  %v4713_v23 = vld [vmem:[#allocation2 + $0xe8] sm:$0xff] }
0x109e   : > { %v4715_v46 = vld [vmem:[#allocation2 + $0xf8] sm:$0xff] }
0x109f   : > { %v4731_v13 = vpack.c.bf16 %v4715_v46, %v4713_v23  ;;  %v4712_v37 = vld [vmem:[#allocation2 + $0xe0] sm:$0xff] }
0x10a1   : > { %4994 = vmatprep.mubr.bf16.mxu0 %v4731_v13 }
0x10a2   : > { %v4714_v49 = vld [vmem:[#allocation2 + $0xf0] sm:$0xff] }
0x10a3   : > { %v4730_v38 = vpack.c.bf16 %v4714_v49, %v4712_v37 }
0x10a5   : > { %4995 = vmatmul.mubr.bf16.gmra.mrb[140].mxu0 %v4730_v38 }
0x1126   : > { %v4926_v57 = vpop.f32.mrb[112].mxu0 }
0x1127   : > { %v5116_v20 = vadd.f32 %v9890_v30, %v4926_v57  ;;  %v4928_v44 = vpop.f32.mrb[113].mxu0 }
0x1128   : > { %v5117_v51 = vadd.f32 %v9892_v31, %v4928_v44  ;;  %v4930_v48 = vpop.f32.mrb[114].mxu0 }
0x1129   : > { %5148 = vst [vmem:[%s9896_s11] sm:$0xff] %v5116_v20  ;;  %v5118_v21 = vadd.f32 %v9890_v30, %v4930_v48  ;;  %v4932_v50 = vpop.f32.mrb[115].mxu0 }
0x112a   : > { %5149 = vst [vmem:[%s9896_s11 + $0x8] sm:$0xff] %v5117_v51  ;;  %v5119_v39 = vadd.f32 %v9892_v31, %v4932_v50 }
0x112b   : > { %5150 = vst [vmem:[%s9896_s11 + $0x10] sm:$0xff] %v5118_v21 }
0x112c   : > { %5151 = vst [vmem:[%s9896_s11 + $0x18] sm:$0xff] %v5119_v39 }
0x112e   : > { %v4936_v42 = vpop.f32.mrb[116].mxu0 }
0x112f   : > { %v5120_v18 = vadd.f32 %v9890_v30, %v4936_v42  ;;  %v4938_v36 = vpop.f32.mrb[117].mxu0 }
0x1130   : > { %v5121_v34 = vadd.f32 %v9892_v31, %v4938_v36  ;;  %v4940_v10 = vpop.f32.mrb[118].mxu0 }
0x1131   : > { %5152 = vst [vmem:[%s9896_s11 + $0x20] sm:$0xff] %v5120_v18  ;;  %v5122_v25 = vadd.f32 %v9890_v30, %v4940_v10  ;;  %v4942_v28 = vpop.f32.mrb[119].mxu0 }
0x1132   : > { %5153 = vst [vmem:[%s9896_s11 + $0x28] sm:$0xff] %v5121_v34  ;;  %v5123_v32 = vadd.f32 %v9892_v31, %v4942_v28 }
0x1133   : > { %5154 = vst [vmem:[%s9896_s11 + $0x30] sm:$0xff] %v5122_v25 }
0x1134   : > { %5155 = vst [vmem:[%s9896_s11 + $0x38] sm:$0xff] %v5123_v32 }
0x1136   : > { %v4946_v5 = vpop.f32.mrb[120].mxu0 }
0x1137   : > { %v5124_v24 = vadd.f32 %v9890_v30, %v4946_v5  ;;  %v4948_v35 = vpop.f32.mrb[121].mxu0 }
0x1138   : > { %v5125_v8 = vadd.f32 %v9892_v31, %v4948_v35  ;;  %v4950_v14 = vpop.f32.mrb[122].mxu0 }
0x1139   : > { %5156 = vst [vmem:[%s9896_s11 + $0x40] sm:$0xff] %v5124_v24  ;;  %v5126_v56 = vadd.f32 %v9890_v30, %v4950_v14  ;;  %v4952_v61 = vpop.f32.mrb[123].mxu0 }
0x113a   : > { %5157 = vst [vmem:[%s9896_s11 + $0x48] sm:$0xff] %v5125_v8  ;;  %v5127_v0 = vadd.f32 %v9892_v31, %v4952_v61 }
0x113b   : > { %5158 = vst [vmem:[%s9896_s11 + $0x50] sm:$0xff] %v5126_v56 }
0x113c   : > { %5159 = vst [vmem:[%s9896_s11 + $0x58] sm:$0xff] %v5127_v0 }
0x113e   : > { %v4956_v54 = vpop.f32.mrb[124].mxu0 }
0x113f   : > { %v5128_v12 = vadd.f32 %v9890_v30, %v4956_v54  ;;  %v4958_v26 = vpop.f32.mrb[125].mxu0 }
0x1140   : > { %v5129_v52 = vadd.f32 %v9892_v31, %v4958_v26  ;;  %v4960_v4 = vpop.f32.mrb[126].mxu0 }
0x1141   : > { %5160 = vst [vmem:[%s9896_s11 + $0x60] sm:$0xff] %v5128_v12  ;;  %v5130_v59 = vadd.f32 %v9890_v30, %v4960_v4  ;;  %v4962_v9 = vpop.f32.mrb[127].mxu0 }
0x1142   : > { %5161 = vst [vmem:[%s9896_s11 + $0x68] sm:$0xff] %v5129_v52  ;;  %v5131_v58 = vadd.f32 %v9892_v31, %v4962_v9 }
0x1143   : > { %5162 = vst [vmem:[%s9896_s11 + $0x70] sm:$0xff] %v5130_v59 }
0x1144   : > { %5163 = vst [vmem:[%s9896_s11 + $0x78] sm:$0xff] %v5131_v58 }
0x1146   : > { %v4966_v15 = vpop.f32.mrb[128].mxu0 }
0x1147   : > { %v5132_v11 = vadd.f32 %v9890_v30, %v4966_v15  ;;  %v4968_v7 = vpop.f32.mrb[129].mxu0 }
0x1148   : > { %v5133_v16 = vadd.f32 %v9892_v31, %v4968_v7  ;;  %v4970_v22 = vpop.f32.mrb[130].mxu0 }
0x1149   : > { %5164 = vst [vmem:[%s9896_s11 + $0x80] sm:$0xff] %v5132_v11  ;;  %v5134_v53 = vadd.f32 %v9890_v30, %v4970_v22  ;;  %v4972_v55 = vpop.f32.mrb[131].mxu0 }
0x114a   : > { %5165 = vst [vmem:[%s9896_s11 + $0x88] sm:$0xff] %v5133_v16  ;;  %v5135_v47 = vadd.f32 %v9892_v31, %v4972_v55 }
0x114b   : > { %5166 = vst [vmem:[%s9896_s11 + $0x90] sm:$0xff] %v5134_v53 }
0x114c   : > { %5167 = vst [vmem:[%s9896_s11 + $0x98] sm:$0xff] %v5135_v47 }
0x114e   : > { %v4976_v2 = vpop.f32.mrb[132].mxu0 }
0x114f   : > { %v5136_v43 = vadd.f32 %v9890_v30, %v4976_v2  ;;  %v4978_v29 = vpop.f32.mrb[133].mxu0 }
0x1150   : > { %v5137_v27 = vadd.f32 %v9892_v31, %v4978_v29  ;;  %v4980_v40 = vpop.f32.mrb[134].mxu0 }
0x1151   : > { %5168 = vst [vmem:[%s9896_s11 + $0xa0] sm:$0xff] %v5136_v43  ;;  %v5138_v3 = vadd.f32 %v9890_v30, %v4980_v40  ;;  %v4982_v33 = vpop.f32.mrb[135].mxu0 }
0x1152   : > { %5169 = vst [vmem:[%s9896_s11 + $0xa8] sm:$0xff] %v5137_v27  ;;  %v5139_v41 = vadd.f32 %v9892_v31, %v4982_v33 }
0x1153   : > { %5170 = vst [vmem:[%s9896_s11 + $0xb0] sm:$0xff] %v5138_v3 }
0x1154   : > { %5171 = vst [vmem:[%s9896_s11 + $0xb8] sm:$0xff] %v5139_v41 }
0x116d   : > { %v4986_v1 = vpop.f32.mrb[136].mxu0 }
0x116e   : > { %v5140_v17 = vadd.f32 %v9890_v30, %v4986_v1  ;;  %v4988_v60 = vpop.f32.mrb[137].mxu0 }
0x116f   : > { %v5141_v23 = vadd.f32 %v9892_v31, %v4988_v60  ;;  %v4990_v46 = vpop.f32.mrb[138].mxu0 }
0x1170   : > { %5172 = vst [vmem:[%s9896_s11 + $0xc0] sm:$0xff] %v5140_v17  ;;  %v5142_v13 = vadd.f32 %v9890_v30, %v4990_v46  ;;  %v4992_v37 = vpop.f32.mrb[139].mxu0 }
0x1171   : > { %5173 = vst [vmem:[%s9896_s11 + $0xc8] sm:$0xff] %v5141_v23  ;;  %v5143_v49 = vadd.f32 %v9892_v31, %v4992_v37 }
0x1172   : > { %5174 = vst [vmem:[%s9896_s11 + $0xd0] sm:$0xff] %v5142_v13 }
0x1173   : > { %5175 = vst [vmem:[%s9896_s11 + $0xd8] sm:$0xff] %v5143_v49 }
0x1178   : > { %v4996_v38 = vpop.f32.mrb[140].mxu0 }
0x1179   : > { %v5144_v62 = vadd.f32 %v9890_v30, %v4996_v38  ;;  %v4998_v19 = vpop.f32.mrb[141].mxu0 }
0x117a   : > { %v5145_v6 = vadd.f32 %v9892_v31, %v4998_v19  ;;  %v5000_v45 = vpop.f32.mrb[142].mxu0 }
0x117b   : > { %5176 = vst [vmem:[%s9896_s11 + $0xe0] sm:$0xff] %v5144_v62  ;;  %v5146_v63 = vadd.f32 %v9890_v30, %v5000_v45  ;;  %v5002_v57 = vpop.f32.mrb[143].mxu0 }
0x117c   : > { %5177 = vst [vmem:[%s9896_s11 + $0xe8] sm:$0xff] %v5145_v6  ;;  %v5147_v20 = vadd.f32 %v9892_v31, %v5002_v57 }
0x117d   : > { %5178 = vst [vmem:[%s9896_s11 + $0xf0] sm:$0xff] %v5146_v63 }
0x117e   : > { %5179 = vst [vmem:[%s9896_s11 + $0xf8] sm:$0xff] %v5147_v20 }
0x117f   : > { %7043 = shalt.err (!%p7040_p5)
}
0x1180   : > { %s7044_s9 = scalar_lea.hbm %s9961_s17, 4096  ;;  %s7048_s27 = scalar_lea.hbm %s10022_s5, 8192 }
0x1181   : > { %p7045_p6 = scmp.ne.s32.totalorder %s9961_s17, %s7044_s9  ;;  %p7049_p10 = scmp.lt.u32.totalorder %s9961_s17, %s10022_s5 }
0x1182   : > { %p7050_p11 = scmp.lt.u32.totalorder %s7048_s27, %s7044_s9  ;;  %p7052_p13 = scmp.lt.u32.totalorder %s7044_s9, %s9961_s17 }
0x1183   : > { %p7046_p7 = pnand %p7045_p6, %p7186_p4 }
0x1184   : > { %p7051_p12 = por %p7050_p11, %p7049_p10 }
0x1185   : > { %p7047_p9 = pneg %p7046_p7 }
0x1186   : > { %p7053_p0 = por %p7052_p13, %p7051_p12 }
0x1188   : > { %p7054_p1 = pnand %p7053_p0, %p7047_p9 }
0x118a   : > { %7057 = shalt.err (!%p7054_p1)
}
0x118b   : > { %s7114_s13 = smov 256   ;;  %s7115_s15 = smov 16  }
0x118c   : > { %6314 = dma.vmem_to_hbm [thread:$0]  (%p7186_p4), %s9963_s14, 4096, %s9961_s17, %s9971_s21, %s7114_s13, %s7114_s13, %s7115_s15  }
0x118d PF: > { %p6320_p2 = scmp.ge.s32.totalorder %s7108_s23, 2  ;;  %s5209_s16 = sand.u32 1, %s7088_s18  }
0x118e   : > { %s5210_s24 = scalar_lea.sflag [#allocation5], %s5209_s16 }
0x118f   : > { %p6317_p3 = pnand %p6320_p2, %p7193_p8 }
0x1191   : > { %7083 = dma.done.wait (!%p6317_p3), %s5210_s24, 4096  }
0x1192   : > { %7085 = vsyncadd (!%p6317_p3), %s5210_s24, 4294963200  ;;  %s18_s23 = sadd.s32 1, %s7108_s23   ;;  %s10456_s18 = smov %s7092_s19 }
0x1193   : > { %p15_p5 = scmp.ge.s32.totalorder %s18_s23, 4   ;;  %s10457_s19 = smov %s7096_s20 }
0x1194   : > { %s10458_s20 = smov %s7199_s6  ;;  %s10459_s21 = smov %s7104_s22 }
0x1195   : > { %s10460_s22 = smov %s10462_s26  ;;  %17 = sbr.rel (!%p15_p5) target bundleno = 4 (0x4), region = 90 }
0x119c   :  { %5215 = vsyncpa [#allocation5], 1 }
0x119d   :  { %5217 = vsyncpa [#allocation5 + $0x1], 1 }

</bundles_post_ra>
